<compile_context>
chip_gen: v5e
topology: v5e:2x2
jax: 0.10.0
libtpu: 0.0.40
codegen_flags: <defaults>
</compile_context>

<pallas_src>
import jax
import jax.numpy as jnp
from jax import lax
from jax.experimental import pallas as pl
from jax.experimental.pallas import tpu as pltpu

HIDDEN = 256          # hidden_size in the PyTorch module
VOCAB = 2             # input_size = len({'SOS': 0, 'EOS': 1})


def _pack_gx_table(emb, w_ih, b_ih, b_hh):
    """(VOCAB, 3H) table: embedding @ W_ih^T with r/z biases of BOTH matrices and b_in folded in.

    Gate order is PyTorch's [r | z | n].  b_hn is NOT folded (it must stay inside
    r * (gh_n + b_hn)).
    """
    H = HIDDEN
    gx = jnp.dot(emb, w_ih.T, precision=lax.Precision.HIGHEST)           # (VOCAB, 3H)
    bias = jnp.concatenate([b_ih[:2 * H] + b_hh[:2 * H], b_ih[2 * H:]]).reshape(1, 3 * H)
    return (gx + bias).astype(jnp.float32)


def gru_encoder_kernel(tok_ref, gx_tab_ref, h0_ref, whh_t_ref, b_hn_ref, out_ref):
    """Whole-sequence GRU encoder in a single kernel invocation.

    tok_ref    : SMEM (T,) int32        -- token ids
    gx_tab_ref : VMEM (VOCAB, 3H) f32   -- precomputed input-gate contributions (see above)
    h0_ref     : VMEM (1, H) f32        -- initial hidden state
    whh_t_ref  : VMEM (H, 3H) bf16      -- W_hh^T, gate order [r|z|n], resident
    b_hn_ref   : VMEM (1, H) f32        -- b_hh for the n gate
    out_ref    : VMEM (T, H) f32        -- per-step hidden states (dense slab, flushed once)
    """
    H = HIDDEN
    T = out_ref.shape[0]

    # Loaded once, hoisted out of the recurrence.
    gx_rows = [gx_tab_ref[v:v + 1, :] for v in range(VOCAB)]             # each (1, 3H) f32
    b_hn = b_hn_ref[...]                                                 # (1, H) f32

    def step(t, h):
        tok = tok_ref[t]

        # VOCAB == 2: scalar-predicated row select replaces gather + W_ih matmul + bias adds.
        gx = gx_rows[0]
        for v in range(1, VOCAB):
            gx = jnp.where(tok == v, gx_rows[v], gx)                     # (1, 3H)

        # Recurrent matvec on the MXU (bf16 in, f32 accumulate).
        gh = jnp.dot(h.astype(jnp.bfloat16), whh_t_ref[...],
                     preferred_element_type=jnp.float32)                 # (1, 3H)

        # PyTorch GRU equations (gate order r, z, n).
        rz = jax.nn.sigmoid(gx[:, :2 * H] + gh[:, :2 * H])
        r = rz[:, :H]
        z = rz[:, H:]
        n = jnp.tanh(gx[:, 2 * H:] + r * (gh[:, 2 * H:] + b_hn))
        h_new = (1.0 - z) * n + z * h

        out_ref[pl.ds(t, 1), :] = h_new
        return h_new

    # Short fixed trip-count: fully unroll for scheduler visibility; cap for long T.
    unroll = True if T <= 32 else 8
    lax.fori_loop(0, T, step, h0_ref[...], unroll=unroll)


def encode_sequence(tokens, hidden0, params):
    """Run the encoder over a whole token sequence in one pallas_call.

    Returns (outputs, hidden): outputs is (T, 1, H) -- one GRU output per step,
    hidden is (1, 1, H) -- the final hidden state (== last output row).
    """
    H = HIDDEN
    tokens = jnp.asarray(tokens, jnp.int32).reshape((-1,))
    T = int(tokens.shape[0])
    h0 = jnp.asarray(hidden0, jnp.float32).reshape(1, H)

    out = pl.pallas_call(
        gru_encoder_kernel,
        out_shape=jax.ShapeDtypeStruct((T, H), jnp.float32),
        in_specs=[
            pl.BlockSpec(memory_space=pltpu.MemorySpace.SMEM),   # token ids
            pl.BlockSpec(memory_space=pltpu.MemorySpace.VMEM),   # gx table
            pl.BlockSpec(memory_space=pltpu.MemorySpace.VMEM),   # h0
            pl.BlockSpec(memory_space=pltpu.MemorySpace.VMEM),   # W_hh^T (bf16, resident)
            pl.BlockSpec(memory_space=pltpu.MemorySpace.VMEM),   # b_hn
        ],
        out_specs=pl.BlockSpec(memory_space=pltpu.MemorySpace.VMEM),
    )(tokens, params["gx_table"], h0, params["w_hh_t"], params["b_hn"])

    outputs = out.reshape(T, 1, H)
    hidden_final = out[T - 1].reshape(1, 1, H)
    return outputs, hidden_final


def encoder_forward(token, hidden, params):
    """Mirrors Encoder.forward(input, hidden) -> (output, hidden), both (1, 1, H)."""
    outs, h_new = encode_sequence(jnp.asarray(token, jnp.int32).reshape((1,)),
                                  hidden, params)
    return outs.reshape(1, 1, HIDDEN), h_new


def init_params(key):
    """Deterministic synthetic parameters matching nn.Embedding + nn.GRU shapes.

    The gx table, the W_hh transpose/bf16 cast and the b_hn split are done ONCE here.
    """
    H = HIDDEN
    k = 1.0 / jnp.sqrt(jnp.float32(H))
    k0, k1, k2, k3, k4 = jax.random.split(key, 5)
    emb = jax.random.normal(k0, (VOCAB, H), jnp.float32)              # nn.Embedding: N(0,1)
    w_ih = jax.random.uniform(k1, (3 * H, H), jnp.float32, -k, k)     # nn.GRU: U(-1/sqrt(H), 1/sqrt(H))
    w_hh = jax.random.uniform(k2, (3 * H, H), jnp.float32, -k, k)
    b_ih = jax.random.uniform(k3, (3 * H,), jnp.float32, -k, k)
    b_hh = jax.random.uniform(k4, (3 * H,), jnp.float32, -k, k)
    return {
        # kernel-side (packed) parameters
        "gx_table": _pack_gx_table(emb, w_ih, b_ih, b_hh),            # (VOCAB, 3H) f32
        "w_hh_t": w_hh.T.astype(jnp.bfloat16),                        # (H, 3H) bf16
        "b_hn": b_hh[2 * H:].reshape(1, H),                           # (1, H) f32
        # f32 originals for the pure-JAX reference
        "ref": {"embedding": emb, "w_ih": w_ih, "w_hh": w_hh,
                "b_ih": b_ih, "b_hh": b_hh},
    }


def reference_encode(tokens, hidden0, params):
    """Plain-JAX reference of the PyTorch Encoder unrolled over `tokens`.

    W_hh is round-tripped through bf16 to mirror what the kernel feeds the MXU;
    the input-gate path uses the same f32 gx table construction as the kernel.
    """
    H = HIDDEN
    p = params["ref"]
    gx_tab = _pack_gx_table(p["embedding"], p["w_ih"], p["b_ih"], p["b_hh"])
    whh_t = p["w_hh"].T.astype(jnp.bfloat16).astype(jnp.float32)
    b_hn = p["b_hh"][2 * H:].reshape(1, H)

    tokens = jnp.asarray(tokens, jnp.int32).reshape((-1,))
    h = jnp.asarray(hidden0, jnp.float32).reshape(1, H)
    outs = []
    for t in range(int(tokens.shape[0])):
        gx = gx_tab[tokens[t]].reshape(1, 3 * H)
        hb = h.astype(jnp.bfloat16).astype(jnp.float32)
        gh = jnp.dot(hb, whh_t, precision=lax.Precision.HIGHEST)
        rz = jax.nn.sigmoid(gx[:, :2 * H] + gh[:, :2 * H])
        r, z = rz[:, :H], rz[:, H:]
        n = jnp.tanh(gx[:, 2 * H:] + r * (gh[:, 2 * H:] + b_hn))
        h = (1.0 - z) * n + z * h
        outs.append(h)
    return jnp.stack(outs).reshape(-1, 1, H), h.reshape(1, 1, H)


if __name__ == "__main__":
    key = jax.random.PRNGKey(0)
    params = init_params(key)

    # Encoder.initHidden() -> zeros(1, 1, hidden_size); encode an 8-token sequence
    # (SOS/EOS ids only, since input_size == 2) in a single pallas_call.
    tokens = jnp.array([0, 1, 1, 0, 1, 0, 0, 1], dtype=jnp.int32)
    hidden0 = jnp.zeros((1, 1, HIDDEN), dtype=jnp.float32)

    outs, h_final = encode_sequence(tokens, hidden0, params)
    outs = jax.block_until_ready(outs)
    h_final = jax.block_until_ready(h_final)

    ref_outs, ref_h = reference_encode(tokens, hidden0, params)

    assert outs.shape == (tokens.shape[0], 1, HIDDEN)
    assert h_final.shape == (1, 1, HIDDEN)
    assert jnp.allclose(outs, ref_outs, rtol=5e-3, atol=5e-3)
    assert jnp.allclose(h_final, ref_h, rtol=5e-3, atol=5e-3)

    # Single-step call with the original Encoder.forward(input, hidden) signature.
    out1, h1 = encoder_forward(jnp.array(1, dtype=jnp.int32), hidden0, params)
    out1 = jax.block_until_ready(out1)
    h1 = jax.block_until_ready(h1)
    ref_o1, ref_h1 = reference_encode(jnp.array([1], dtype=jnp.int32), hidden0, params)
    assert out1.shape == (1, 1, HIDDEN) and h1.shape == (1, 1, HIDDEN)
    assert jnp.allclose(out1, ref_o1, rtol=5e-3, atol=5e-3)
    assert jnp.allclose(h1, ref_h1, rtol=5e-3, atol=5e-3)

    print("KERNEL_OK")
</pallas_src>

<mosaic_0001>
module attributes {stable_mosaic.version = 11 : i64} {
  func.func @gru_encoder_kernel(%arg0: memref<8xi32, #tpu.memory_space<smem>>, %arg1: memref<2x768xf32, #tpu.memory_space<vmem>>, %arg2: memref<1x256xf32, #tpu.memory_space<vmem>>, %arg3: memref<256x768xbf16, #tpu.memory_space<vmem>>, %arg4: memref<1x256xf32, #tpu.memory_space<vmem>>, %arg5: memref<8x256xf32, #tpu.memory_space<vmem>>) attributes {dimension_semantics = [], scalar_prefetch = 0 : i64, scratch_operands = 0 : i64, tpu.core_type = #tpu.core_type<tc>} {
    %c0 = arith.constant 0 : index
    %c0_0 = arith.constant 0 : index
    %0 = vector.load %arg1[%c0, %c0_0] : memref<2x768xf32, #tpu.memory_space<vmem>>, vector<1x768xf32>
    %c1 = arith.constant 1 : index
    %c0_1 = arith.constant 0 : index
    %1 = vector.load %arg1[%c1, %c0_1] : memref<2x768xf32, #tpu.memory_space<vmem>>, vector<1x768xf32>
    %c0_2 = arith.constant 0 : index
    %c0_3 = arith.constant 0 : index
    %2 = vector.load %arg4[%c0_2, %c0_3] : memref<1x256xf32, #tpu.memory_space<vmem>>, vector<1x256xf32>
    %c0_4 = arith.constant 0 : index
    %c0_5 = arith.constant 0 : index
    %3 = vector.load %arg2[%c0_4, %c0_5] : memref<1x256xf32, #tpu.memory_space<vmem>>, vector<1x256xf32>
    %c0_i32 = arith.constant 0 : i32
    %4 = arith.index_cast %c0_i32 : i32 to index
    %5 = memref.load %arg0[%4] : memref<8xi32, #tpu.memory_space<smem>>
    %c1_i32 = arith.constant 1 : i32
    %6 = arith.cmpi eq, %5, %c1_i32 : i32
    %7 = arith.select %6, %1, %0 : vector<1x768xf32>
    %8 = arith.truncf %3 : vector<1x256xf32> to vector<1x256xbf16>
    %c0_6 = arith.constant 0 : index
    %c0_7 = arith.constant 0 : index
    %9 = vector.load %arg3[%c0_6, %c0_7] : memref<256x768xbf16, #tpu.memory_space<vmem>>, vector<256x768xbf16>
    %cst = arith.constant dense<0.000000e+00> : vector<1x768xf32>
    %10 = tpu.matmul %8, %9, %cst {dimension_numbers = #tpu.dot_dimension_numbers<[1], [0], [0], [1], [0, 0, 1, 1], [], []>} : vector<1x256xbf16>, vector<256x768xbf16>, vector<1x768xf32> -> vector<1x768xf32>
    %11 = vector.extract_strided_slice %7 {offsets = [0, 0], sizes = [1, 512], strides = [1, 1]} : vector<1x768xf32> to vector<1x512xf32>
    %12 = vector.extract_strided_slice %10 {offsets = [0, 0], sizes = [1, 512], strides = [1, 1]} : vector<1x768xf32> to vector<1x512xf32>
    %13 = arith.addf %11, %12 : vector<1x512xf32>
    %14 = arith.negf %13 : vector<1x512xf32>
    %15 = math.exp %14 : vector<1x512xf32>
    %cst_8 = arith.constant 1.000000e+00 : f32
    %16 = vector.broadcast %cst_8 : f32 to vector<1x512xf32>
    %17 = arith.addf %16, %15 : vector<1x512xf32>
    %18 = arith.divf %16, %17 : vector<1x512xf32>
    %19 = vector.extract_strided_slice %18 {offsets = [0, 0], sizes = [1, 256], strides = [1, 1]} : vector<1x512xf32> to vector<1x256xf32>
    %20 = vector.extract_strided_slice %18 {offsets = [0, 256], sizes = [1, 256], strides = [1, 1]} : vector<1x512xf32> to vector<1x256xf32>
    %21 = vector.extract_strided_slice %7 {offsets = [0, 512], sizes = [1, 256], strides = [1, 1]} : vector<1x768xf32> to vector<1x256xf32>
    %22 = vector.extract_strided_slice %10 {offsets = [0, 512], sizes = [1, 256], strides = [1, 1]} : vector<1x768xf32> to vector<1x256xf32>
    %23 = arith.addf %22, %2 : vector<1x256xf32>
    %24 = arith.mulf %19, %23 : vector<1x256xf32>
    %25 = arith.addf %21, %24 : vector<1x256xf32>
    %26 = math.tanh %25 : vector<1x256xf32>
    %cst_9 = arith.constant 1.000000e+00 : f32
    %27 = vector.broadcast %cst_9 : f32 to vector<1x256xf32>
    %28 = arith.subf %27, %20 : vector<1x256xf32>
    %29 = arith.mulf %28, %26 : vector<1x256xf32>
    %30 = arith.mulf %20, %3 : vector<1x256xf32>
    %31 = arith.addf %29, %30 : vector<1x256xf32>
    %32 = arith.index_cast %c0_i32 : i32 to index
    %c0_10 = arith.constant 0 : index
    %33 = vector.load %arg5[%32, %c0_10] : memref<8x256xf32, #tpu.memory_space<vmem>>, vector<1x256xf32>
    tpu.vector_store %arg5[%32, %c0_10], %31 {strides = array<i32>} : memref<8x256xf32, #tpu.memory_space<vmem>>, vector<1x256xf32>,
    %c1_i32_11 = arith.constant 1 : i32
    %34 = arith.index_cast %c1_i32_11 : i32 to index
    %35 = memref.load %arg0[%34] : memref<8xi32, #tpu.memory_space<smem>>
    %c1_i32_12 = arith.constant 1 : i32
    %36 = arith.cmpi eq, %35, %c1_i32_12 : i32
    %37 = arith.select %36, %1, %0 : vector<1x768xf32>
    %38 = arith.truncf %31 : vector<1x256xf32> to vector<1x256xbf16>
    %c0_13 = arith.constant 0 : index
    %c0_14 = arith.constant 0 : index
    %39 = vector.load %arg3[%c0_13, %c0_14] : memref<256x768xbf16, #tpu.memory_space<vmem>>, vector<256x768xbf16>
    %cst_15 = arith.constant dense<0.000000e+00> : vector<1x768xf32>
    %40 = tpu.matmul %38, %39, %cst_15 {dimension_numbers = #tpu.dot_dimension_numbers<[1], [0], [0], [1], [0, 0, 1, 1], [], []>} : vector<1x256xbf16>, vector<256x768xbf16>, vector<1x768xf32> -> vector<1x768xf32>
    %41 = vector.extract_strided_slice %37 {offsets = [0, 0], sizes = [1, 512], strides = [1, 1]} : vector<1x768xf32> to vector<1x512xf32>
    %42 = vector.extract_strided_slice %40 {offsets = [0, 0], sizes = [1, 512], strides = [1, 1]} : vector<1x768xf32> to vector<1x512xf32>
    %43 = arith.addf %41, %42 : vector<1x512xf32>
    %44 = arith.negf %43 : vector<1x512xf32>
    %45 = math.exp %44 : vector<1x512xf32>
    %cst_16 = arith.constant 1.000000e+00 : f32
    %46 = vector.broadcast %cst_16 : f32 to vector<1x512xf32>
    %47 = arith.addf %46, %45 : vector<1x512xf32>
    %48 = arith.divf %46, %47 : vector<1x512xf32>
    %49 = vector.extract_strided_slice %48 {offsets = [0, 0], sizes = [1, 256], strides = [1, 1]} : vector<1x512xf32> to vector<1x256xf32>
    %50 = vector.extract_strided_slice %48 {offsets = [0, 256], sizes = [1, 256], strides = [1, 1]} : vector<1x512xf32> to vector<1x256xf32>
    %51 = vector.extract_strided_slice %37 {offsets = [0, 512], sizes = [1, 256], strides = [1, 1]} : vector<1x768xf32> to vector<1x256xf32>
    %52 = vector.extract_strided_slice %40 {offsets = [0, 512], sizes = [1, 256], strides = [1, 1]} : vector<1x768xf32> to vector<1x256xf32>
    %53 = arith.addf %52, %2 : vector<1x256xf32>
    %54 = arith.mulf %49, %53 : vector<1x256xf32>
    %55 = arith.addf %51, %54 : vector<1x256xf32>
    %56 = math.tanh %55 : vector<1x256xf32>
    %cst_17 = arith.constant 1.000000e+00 : f32
    %57 = vector.broadcast %cst_17 : f32 to vector<1x256xf32>
    %58 = arith.subf %57, %50 : vector<1x256xf32>
    %59 = arith.mulf %58, %56 : vector<1x256xf32>
    %60 = arith.mulf %50, %31 : vector<1x256xf32>
    %61 = arith.addf %59, %60 : vector<1x256xf32>
    %62 = arith.index_cast %c1_i32_11 : i32 to index
    %c0_18 = arith.constant 0 : index
    %63 = vector.load %arg5[%62, %c0_18] : memref<8x256xf32, #tpu.memory_space<vmem>>, vector<1x256xf32>
    tpu.vector_store %arg5[%62, %c0_18], %61 {strides = array<i32>} : memref<8x256xf32, #tpu.memory_space<vmem>>, vector<1x256xf32>,
    %c2_i32 = arith.constant 2 : i32
    %64 = arith.index_cast %c2_i32 : i32 to index
    %65 = memref.load %arg0[%64] : memref<8xi32, #tpu.memory_space<smem>>
    %c1_i32_19 = arith.constant 1 : i32
    %66 = arith.cmpi eq, %65, %c1_i32_19 : i32
    %67 = arith.select %66, %1, %0 : vector<1x768xf32>
    %68 = arith.truncf %61 : vector<1x256xf32> to vector<1x256xbf16>
    %c0_20 = arith.constant 0 : index
    %c0_21 = arith.constant 0 : index
    %69 = vector.load %arg3[%c0_20, %c0_21] : memref<256x768xbf16, #tpu.memory_space<vmem>>, vector<256x768xbf16>
    %cst_22 = arith.constant dense<0.000000e+00> : vector<1x768xf32>
    %70 = tpu.matmul %68, %69, %cst_22 {dimension_numbers = #tpu.dot_dimension_numbers<[1], [0], [0], [1], [0, 0, 1, 1], [], []>} : vector<1x256xbf16>, vector<256x768xbf16>, vector<1x768xf32> -> vector<1x768xf32>
    %71 = vector.extract_strided_slice %67 {offsets = [0, 0], sizes = [1, 512], strides = [1, 1]} : vector<1x768xf32> to vector<1x512xf32>
    %72 = vector.extract_strided_slice %70 {offsets = [0, 0], sizes = [1, 512], strides = [1, 1]} : vector<1x768xf32> to vector<1x512xf32>
    %73 = arith.addf %71, %72 : vector<1x512xf32>
    %74 = arith.negf %73 : vector<1x512xf32>
    %75 = math.exp %74 : vector<1x512xf32>
    %cst_23 = arith.constant 1.000000e+00 : f32
    %76 = vector.broadcast %cst_23 : f32 to vector<1x512xf32>
    %77 = arith.addf %76, %75 : vector<1x512xf32>
    %78 = arith.divf %76, %77 : vector<1x512xf32>
    %79 = vector.extract_strided_slice %78 {offsets = [0, 0], sizes = [1, 256], strides = [1, 1]} : vector<1x512xf32> to vector<1x256xf32>
    %80 = vector.extract_strided_slice %78 {offsets = [0, 256], sizes = [1, 256], strides = [1, 1]} : vector<1x512xf32> to vector<1x256xf32>
    %81 = vector.extract_strided_slice %67 {offsets = [0, 512], sizes = [1, 256], strides = [1, 1]} : vector<1x768xf32> to vector<1x256xf32>
    %82 = vector.extract_strided_slice %70 {offsets = [0, 512], sizes = [1, 256], strides = [1, 1]} : vector<1x768xf32> to vector<1x256xf32>
    %83 = arith.addf %82, %2 : vector<1x256xf32>
    %84 = arith.mulf %79, %83 : vector<1x256xf32>
    %85 = arith.addf %81, %84 : vector<1x256xf32>
    %86 = math.tanh %85 : vector<1x256xf32>
    %cst_24 = arith.constant 1.000000e+00 : f32
    %87 = vector.broadcast %cst_24 : f32 to vector<1x256xf32>
    %88 = arith.subf %87, %80 : vector<1x256xf32>
    %89 = arith.mulf %88, %86 : vector<1x256xf32>
    %90 = arith.mulf %80, %61 : vector<1x256xf32>
    %91 = arith.addf %89, %90 : vector<1x256xf32>
    %92 = arith.index_cast %c2_i32 : i32 to index
    %c0_25 = arith.constant 0 : index
    %93 = vector.load %arg5[%92, %c0_25] : memref<8x256xf32, #tpu.memory_space<vmem>>, vector<1x256xf32>
    tpu.vector_store %arg5[%92, %c0_25], %91 {strides = array<i32>} : memref<8x256xf32, #tpu.memory_space<vmem>>, vector<1x256xf32>,
    %c3_i32 = arith.constant 3 : i32
    %94 = arith.index_cast %c3_i32 : i32 to index
    %95 = memref.load %arg0[%94] : memref<8xi32, #tpu.memory_space<smem>>
    %c1_i32_26 = arith.constant 1 : i32
    %96 = arith.cmpi eq, %95, %c1_i32_26 : i32
    %97 = arith.select %96, %1, %0 : vector<1x768xf32>
    %98 = arith.truncf %91 : vector<1x256xf32> to vector<1x256xbf16>
    %c0_27 = arith.constant 0 : index
    %c0_28 = arith.constant 0 : index
    %99 = vector.load %arg3[%c0_27, %c0_28] : memref<256x768xbf16, #tpu.memory_space<vmem>>, vector<256x768xbf16>
    %cst_29 = arith.constant dense<0.000000e+00> : vector<1x768xf32>
    %100 = tpu.matmul %98, %99, %cst_29 {dimension_numbers = #tpu.dot_dimension_numbers<[1], [0], [0], [1], [0, 0, 1, 1], [], []>} : vector<1x256xbf16>, vector<256x768xbf16>, vector<1x768xf32> -> vector<1x768xf32>
    %101 = vector.extract_strided_slice %97 {offsets = [0, 0], sizes = [1, 512], strides = [1, 1]} : vector<1x768xf32> to vector<1x512xf32>
    %102 = vector.extract_strided_slice %100 {offsets = [0, 0], sizes = [1, 512], strides = [1, 1]} : vector<1x768xf32> to vector<1x512xf32>
    %103 = arith.addf %101, %102 : vector<1x512xf32>
    %104 = arith.negf %103 : vector<1x512xf32>
    %105 = math.exp %104 : vector<1x512xf32>
    %cst_30 = arith.constant 1.000000e+00 : f32
    %106 = vector.broadcast %cst_30 : f32 to vector<1x512xf32>
    %107 = arith.addf %106, %105 : vector<1x512xf32>
    %108 = arith.divf %106, %107 : vector<1x512xf32>
    %109 = vector.extract_strided_slice %108 {offsets = [0, 0], sizes = [1, 256], strides = [1, 1]} : vector<1x512xf32> to vector<1x256xf32>
    %110 = vector.extract_strided_slice %108 {offsets = [0, 256], sizes = [1, 256], strides = [1, 1]} : vector<1x512xf32> to vector<1x256xf32>
    %111 = vector.extract_strided_slice %97 {offsets = [0, 512], sizes = [1, 256], strides = [1, 1]} : vector<1x768xf32> to vector<1x256xf32>
    %112 = vector.extract_strided_slice %100 {offsets = [0, 512], sizes = [1, 256], strides = [1, 1]} : vector<1x768xf32> to vector<1x256xf32>
    %113 = arith.addf %112, %2 : vector<1x256xf32>
    %114 = arith.mulf %109, %113 : vector<1x256xf32>
    %115 = arith.addf %111, %114 : vector<1x256xf32>
    %116 = math.tanh %115 : vector<1x256xf32>
    %cst_31 = arith.constant 1.000000e+00 : f32
    %117 = vector.broadcast %cst_31 : f32 to vector<1x256xf32>
    %118 = arith.subf %117, %110 : vector<1x256xf32>
    %119 = arith.mulf %118, %116 : vector<1x256xf32>
    %120 = arith.mulf %110, %91 : vector<1x256xf32>
    %121 = arith.addf %119, %120 : vector<1x256xf32>
    %122 = arith.index_cast %c3_i32 : i32 to index
    %c0_32 = arith.constant 0 : index
    %123 = vector.load %arg5[%122, %c0_32] : memref<8x256xf32, #tpu.memory_space<vmem>>, vector<1x256xf32>
    tpu.vector_store %arg5[%122, %c0_32], %121 {strides = array<i32>} : memref<8x256xf32, #tpu.memory_space<vmem>>, vector<1x256xf32>,
    %c4_i32 = arith.constant 4 : i32
    %124 = arith.index_cast %c4_i32 : i32 to index
    %125 = memref.load %arg0[%124] : memref<8xi32, #tpu.memory_space<smem>>
    %c1_i32_33 = arith.constant 1 : i32
    %126 = arith.cmpi eq, %125, %c1_i32_33 : i32
    %127 = arith.select %126, %1, %0 : vector<1x768xf32>
    %128 = arith.truncf %121 : vector<1x256xf32> to vector<1x256xbf16>
    %c0_34 = arith.constant 0 : index
    %c0_35 = arith.constant 0 : index
    %129 = vector.load %arg3[%c0_34, %c0_35] : memref<256x768xbf16, #tpu.memory_space<vmem>>, vector<256x768xbf16>
    %cst_36 = arith.constant dense<0.000000e+00> : vector<1x768xf32>
    %130 = tpu.matmul %128, %129, %cst_36 {dimension_numbers = #tpu.dot_dimension_numbers<[1], [0], [0], [1], [0, 0, 1, 1], [], []>} : vector<1x256xbf16>, vector<256x768xbf16>, vector<1x768xf32> -> vector<1x768xf32>
    %131 = vector.extract_strided_slice %127 {offsets = [0, 0], sizes = [1, 512], strides = [1, 1]} : vector<1x768xf32> to vector<1x512xf32>
    %132 = vector.extract_strided_slice %130 {offsets = [0, 0], sizes = [1, 512], strides = [1, 1]} : vector<1x768xf32> to vector<1x512xf32>
    %133 = arith.addf %131, %132 : vector<1x512xf32>
    %134 = arith.negf %133 : vector<1x512xf32>
    %135 = math.exp %134 : vector<1x512xf32>
    %cst_37 = arith.constant 1.000000e+00 : f32
    %136 = vector.broadcast %cst_37 : f32 to vector<1x512xf32>
    %137 = arith.addf %136, %135 : vector<1x512xf32>
    %138 = arith.divf %136, %137 : vector<1x512xf32>
    %139 = vector.extract_strided_slice %138 {offsets = [0, 0], sizes = [1, 256], strides = [1, 1]} : vector<1x512xf32> to vector<1x256xf32>
    %140 = vector.extract_strided_slice %138 {offsets = [0, 256], sizes = [1, 256], strides = [1, 1]} : vector<1x512xf32> to vector<1x256xf32>
    %141 = vector.extract_strided_slice %127 {offsets = [0, 512], sizes = [1, 256], strides = [1, 1]} : vector<1x768xf32> to vector<1x256xf32>
    %142 = vector.extract_strided_slice %130 {offsets = [0, 512], sizes = [1, 256], strides = [1, 1]} : vector<1x768xf32> to vector<1x256xf32>
    %143 = arith.addf %142, %2 : vector<1x256xf32>
    %144 = arith.mulf %139, %143 : vector<1x256xf32>
    %145 = arith.addf %141, %144 : vector<1x256xf32>
    %146 = math.tanh %145 : vector<1x256xf32>
    %cst_38 = arith.constant 1.000000e+00 : f32
    %147 = vector.broadcast %cst_38 : f32 to vector<1x256xf32>
    %148 = arith.subf %147, %140 : vector<1x256xf32>
    %149 = arith.mulf %148, %146 : vector<1x256xf32>
    %150 = arith.mulf %140, %121 : vector<1x256xf32>
    %151 = arith.addf %149, %150 : vector<1x256xf32>
    %152 = arith.index_cast %c4_i32 : i32 to index
    %c0_39 = arith.constant 0 : index
    %153 = vector.load %arg5[%152, %c0_39] : memref<8x256xf32, #tpu.memory_space<vmem>>, vector<1x256xf32>
    tpu.vector_store %arg5[%152, %c0_39], %151 {strides = array<i32>} : memref<8x256xf32, #tpu.memory_space<vmem>>, vector<1x256xf32>,
    %c5_i32 = arith.constant 5 : i32
    %154 = arith.index_cast %c5_i32 : i32 to index
    %155 = memref.load %arg0[%154] : memref<8xi32, #tpu.memory_space<smem>>
    %c1_i32_40 = arith.constant 1 : i32
    %156 = arith.cmpi eq, %155, %c1_i32_40 : i32
    %157 = arith.select %156, %1, %0 : vector<1x768xf32>
    %158 = arith.truncf %151 : vector<1x256xf32> to vector<1x256xbf16>
    %c0_41 = arith.constant 0 : index
    %c0_42 = arith.constant 0 : index
    %159 = vector.load %arg3[%c0_41, %c0_42] : memref<256x768xbf16, #tpu.memory_space<vmem>>, vector<256x768xbf16>
    %cst_43 = arith.constant dense<0.000000e+00> : vector<1x768xf32>
    %160 = tpu.matmul %158, %159, %cst_43 {dimension_numbers = #tpu.dot_dimension_numbers<[1], [0], [0], [1], [0, 0, 1, 1], [], []>} : vector<1x256xbf16>, vector<256x768xbf16>, vector<1x768xf32> -> vector<1x768xf32>
    %161 = vector.extract_strided_slice %157 {offsets = [0, 0], sizes = [1, 512], strides = [1, 1]} : vector<1x768xf32> to vector<1x512xf32>
    %162 = vector.extract_strided_slice %160 {offsets = [0, 0], sizes = [1, 512], strides = [1, 1]} : vector<1x768xf32> to vector<1x512xf32>
    %163 = arith.addf %161, %162 : vector<1x512xf32>
    %164 = arith.negf %163 : vector<1x512xf32>
    %165 = math.exp %164 : vector<1x512xf32>
    %cst_44 = arith.constant 1.000000e+00 : f32
    %166 = vector.broadcast %cst_44 : f32 to vector<1x512xf32>
    %167 = arith.addf %166, %165 : vector<1x512xf32>
    %168 = arith.divf %166, %167 : vector<1x512xf32>
    %169 = vector.extract_strided_slice %168 {offsets = [0, 0], sizes = [1, 256], strides = [1, 1]} : vector<1x512xf32> to vector<1x256xf32>
    %170 = vector.extract_strided_slice %168 {offsets = [0, 256], sizes = [1, 256], strides = [1, 1]} : vector<1x512xf32> to vector<1x256xf32>
    %171 = vector.extract_strided_slice %157 {offsets = [0, 512], sizes = [1, 256], strides = [1, 1]} : vector<1x768xf32> to vector<1x256xf32>
    %172 = vector.extract_strided_slice %160 {offsets = [0, 512], sizes = [1, 256], strides = [1, 1]} : vector<1x768xf32> to vector<1x256xf32>
    %173 = arith.addf %172, %2 : vector<1x256xf32>
    %174 = arith.mulf %169, %173 : vector<1x256xf32>
    %175 = arith.addf %171, %174 : vector<1x256xf32>
    %176 = math.tanh %175 : vector<1x256xf32>
    %cst_45 = arith.constant 1.000000e+00 : f32
    %177 = vector.broadcast %cst_45 : f32 to vector<1x256xf32>
    %178 = arith.subf %177, %170 : vector<1x256xf32>
    %179 = arith.mulf %178, %176 : vector<1x256xf32>
    %180 = arith.mulf %170, %151 : vector<1x256xf32>
    %181 = arith.addf %179, %180 : vector<1x256xf32>
    %182 = arith.index_cast %c5_i32 : i32 to index
    %c0_46 = arith.constant 0 : index
    %183 = vector.load %arg5[%182, %c0_46] : memref<8x256xf32, #tpu.memory_space<vmem>>, vector<1x256xf32>
    tpu.vector_store %arg5[%182, %c0_46], %181 {strides = array<i32>} : memref<8x256xf32, #tpu.memory_space<vmem>>, vector<1x256xf32>,
    %c6_i32 = arith.constant 6 : i32
    %184 = arith.index_cast %c6_i32 : i32 to index
    %185 = memref.load %arg0[%184] : memref<8xi32, #tpu.memory_space<smem>>
    %c1_i32_47 = arith.constant 1 : i32
    %186 = arith.cmpi eq, %185, %c1_i32_47 : i32
    %187 = arith.select %186, %1, %0 : vector<1x768xf32>
    %188 = arith.truncf %181 : vector<1x256xf32> to vector<1x256xbf16>
    %c0_48 = arith.constant 0 : index
    %c0_49 = arith.constant 0 : index
    %189 = vector.load %arg3[%c0_48, %c0_49] : memref<256x768xbf16, #tpu.memory_space<vmem>>, vector<256x768xbf16>
    %cst_50 = arith.constant dense<0.000000e+00> : vector<1x768xf32>
    %190 = tpu.matmul %188, %189, %cst_50 {dimension_numbers = #tpu.dot_dimension_numbers<[1], [0], [0], [1], [0, 0, 1, 1], [], []>} : vector<1x256xbf16>, vector<256x768xbf16>, vector<1x768xf32> -> vector<1x768xf32>
    %191 = vector.extract_strided_slice %187 {offsets = [0, 0], sizes = [1, 512], strides = [1, 1]} : vector<1x768xf32> to vector<1x512xf32>
    %192 = vector.extract_strided_slice %190 {offsets = [0, 0], sizes = [1, 512], strides = [1, 1]} : vector<1x768xf32> to vector<1x512xf32>
    %193 = arith.addf %191, %192 : vector<1x512xf32>
    %194 = arith.negf %193 : vector<1x512xf32>
    %195 = math.exp %194 : vector<1x512xf32>
    %cst_51 = arith.constant 1.000000e+00 : f32
    %196 = vector.broadcast %cst_51 : f32 to vector<1x512xf32>
    %197 = arith.addf %196, %195 : vector<1x512xf32>
    %198 = arith.divf %196, %197 : vector<1x512xf32>
    %199 = vector.extract_strided_slice %198 {offsets = [0, 0], sizes = [1, 256], strides = [1, 1]} : vector<1x512xf32> to vector<1x256xf32>
    %200 = vector.extract_strided_slice %198 {offsets = [0, 256], sizes = [1, 256], strides = [1, 1]} : vector<1x512xf32> to vector<1x256xf32>
    %201 = vector.extract_strided_slice %187 {offsets = [0, 512], sizes = [1, 256], strides = [1, 1]} : vector<1x768xf32> to vector<1x256xf32>
    %202 = vector.extract_strided_slice %190 {offsets = [0, 512], sizes = [1, 256], strides = [1, 1]} : vector<1x768xf32> to vector<1x256xf32>
    %203 = arith.addf %202, %2 : vector<1x256xf32>
    %204 = arith.mulf %199, %203 : vector<1x256xf32>
    %205 = arith.addf %201, %204 : vector<1x256xf32>
    %206 = math.tanh %205 : vector<1x256xf32>
    %cst_52 = arith.constant 1.000000e+00 : f32
    %207 = vector.broadcast %cst_52 : f32 to vector<1x256xf32>
    %208 = arith.subf %207, %200 : vector<1x256xf32>
    %209 = arith.mulf %208, %206 : vector<1x256xf32>
    %210 = arith.mulf %200, %181 : vector<1x256xf32>
    %211 = arith.addf %209, %210 : vector<1x256xf32>
    %212 = arith.index_cast %c6_i32 : i32 to index
    %c0_53 = arith.constant 0 : index
    %213 = vector.load %arg5[%212, %c0_53] : memref<8x256xf32, #tpu.memory_space<vmem>>, vector<1x256xf32>
    tpu.vector_store %arg5[%212, %c0_53], %211 {strides = array<i32>} : memref<8x256xf32, #tpu.memory_space<vmem>>, vector<1x256xf32>,
    %c7_i32 = arith.constant 7 : i32
    %214 = arith.index_cast %c7_i32 : i32 to index
    %215 = memref.load %arg0[%214] : memref<8xi32, #tpu.memory_space<smem>>
    %c1_i32_54 = arith.constant 1 : i32
    %216 = arith.cmpi eq, %215, %c1_i32_54 : i32
    %217 = arith.select %216, %1, %0 : vector<1x768xf32>
    %218 = arith.truncf %211 : vector<1x256xf32> to vector<1x256xbf16>
    %c0_55 = arith.constant 0 : index
    %c0_56 = arith.constant 0 : index
    %219 = vector.load %arg3[%c0_55, %c0_56] : memref<256x768xbf16, #tpu.memory_space<vmem>>, vector<256x768xbf16>
    %cst_57 = arith.constant dense<0.000000e+00> : vector<1x768xf32>
    %220 = tpu.matmul %218, %219, %cst_57 {dimension_numbers = #tpu.dot_dimension_numbers<[1], [0], [0], [1], [0, 0, 1, 1], [], []>} : vector<1x256xbf16>, vector<256x768xbf16>, vector<1x768xf32> -> vector<1x768xf32>
    %221 = vector.extract_strided_slice %217 {offsets = [0, 0], sizes = [1, 512], strides = [1, 1]} : vector<1x768xf32> to vector<1x512xf32>
    %222 = vector.extract_strided_slice %220 {offsets = [0, 0], sizes = [1, 512], strides = [1, 1]} : vector<1x768xf32> to vector<1x512xf32>
    %223 = arith.addf %221, %222 : vector<1x512xf32>
    %224 = arith.negf %223 : vector<1x512xf32>
    %225 = math.exp %224 : vector<1x512xf32>
    %cst_58 = arith.constant 1.000000e+00 : f32
    %226 = vector.broadcast %cst_58 : f32 to vector<1x512xf32>
    %227 = arith.addf %226, %225 : vector<1x512xf32>
    %228 = arith.divf %226, %227 : vector<1x512xf32>
    %229 = vector.extract_strided_slice %228 {offsets = [0, 0], sizes = [1, 256], strides = [1, 1]} : vector<1x512xf32> to vector<1x256xf32>
    %230 = vector.extract_strided_slice %228 {offsets = [0, 256], sizes = [1, 256], strides = [1, 1]} : vector<1x512xf32> to vector<1x256xf32>
    %231 = vector.extract_strided_slice %217 {offsets = [0, 512], sizes = [1, 256], strides = [1, 1]} : vector<1x768xf32> to vector<1x256xf32>
    %232 = vector.extract_strided_slice %220 {offsets = [0, 512], sizes = [1, 256], strides = [1, 1]} : vector<1x768xf32> to vector<1x256xf32>
    %233 = arith.addf %232, %2 : vector<1x256xf32>
    %234 = arith.mulf %229, %233 : vector<1x256xf32>
    %235 = arith.addf %231, %234 : vector<1x256xf32>
    %236 = math.tanh %235 : vector<1x256xf32>
    %cst_59 = arith.constant 1.000000e+00 : f32
    %237 = vector.broadcast %cst_59 : f32 to vector<1x256xf32>
    %238 = arith.subf %237, %230 : vector<1x256xf32>
    %239 = arith.mulf %238, %236 : vector<1x256xf32>
    %240 = arith.mulf %230, %211 : vector<1x256xf32>
    %241 = arith.addf %239, %240 : vector<1x256xf32>
    %242 = arith.index_cast %c7_i32 : i32 to index
    %c0_60 = arith.constant 0 : index
    %243 = vector.load %arg5[%242, %c0_60] : memref<8x256xf32, #tpu.memory_space<vmem>>, vector<1x256xf32>
    tpu.vector_store %arg5[%242, %c0_60], %241 {strides = array<i32>} : memref<8x256xf32, #tpu.memory_space<vmem>>, vector<1x256xf32>,
    %c8_i32 = arith.constant 8 : i32
    return
  }
}

</mosaic_0001>

<bundles_post_ra>
// kernel: tpu_custom_call.1
= control target key start
LH: loop header
LB: loop body
LE: loop exit
PB: predicated region body
PF: predicated region fallthrough
CT: control target
= control target key end

     0   :  { %10 = vsyncpa [#allocation5], 0  ;;  %s11131_s0 = inlined_call_operand.hbm [shape: s32[8], index: 0, kind: input, shape index: {}]   ;;  %s11132_s1 = inlined_call_operand.hbm [shape: f32[2,768], index: 1, kind: input, shape index: {}]   ;;  %s11133_s2 = inlined_call_operand.hbm [shape: f32[1,256], index: 2, kind: input, shape index: {}]   ;;  %s11134_s3 = inlined_call_operand.hbm [shape: bf16[256,768], index: 3, kind: input, shape index: {}]   ;;  %s11135_s4 = inlined_call_operand.vmem [shape: f32[1,256], index: 4, kind: input, shape index: {}]   ;;  %s11136_s5 = inlined_call_operand.hbm [shape: f32[8,256], index: 5, kind: output, shape index: {}]  }
   0x1   :  { %11 = vsyncpa [#allocation3], 0 }
   0x2   :  { %12 = vsyncpa [#allocation8], 0  ;;  %s39_s20 = sshll.u32 %s11133_s2, 4  ;;  %s40_s20 = int_to_ptr.hbm [resolvable:$true] %s39_s20 }
   0x3   :  { %13 = vsyncpa [#allocation4], 0  ;;  %s10537_s21 = smov [#allocation7]   ;;  %s19_s25 = sshll.u32 %s11131_s0, 4  ;;  %s20_s25 = int_to_ptr.hbm [resolvable:$true] %s19_s25 }
   0x4   :  { %s41_s22 = sshll.u32 %s10537_s21, 4  ;;  %s10538_s26 = smov [#allocation2]   ;;  %s42_s22 = int_to_ptr.vmem [resolvable:$true] %s41_s22 }
   0x5   :  { %44 = dma.hbm_to_vmem [thread:$0]  %s40_s20, 32, %s42_s22, [#allocation8]  }
   0x6   :  { %22 = dma.hbm_to_smem %s20_s25, 16, %s10538_s26, [#allocation5]  }
   0x7   :  { %s28_s29 = sshll.u32 %s11132_s1, 4  ;;  %s10539_s30 = smov [#allocation6]   ;;  %s29_s29 = int_to_ptr.hbm [resolvable:$true] %s28_s29 }
   0x8   :  { %s30_s2 = sshll.u32 %s10539_s30, 4  ;;  %s49_s8 = sshll.u32 %s11134_s3, 4  ;;  %s31_s2 = int_to_ptr.vmem [resolvable:$true] %s30_s2  ;;  %s50_s8 = int_to_ptr.hbm [resolvable:$true] %s49_s8 }
   0x9   :  { %33 = dma.hbm_to_vmem [thread:$0]  %s29_s29, 192, %s31_s2, [#allocation3]  }
   0xa   :  { %s10540_s9 = smov [#allocation9]   ;;  %s10541_s10 = smov 384  }
   0xb   :  { %s51_s0 = sshll.u32 %s10540_s9, 4  ;;  %s10542_s11 = smov 24   ;;  %s52_s0 = int_to_ptr.vmem [resolvable:$true] %s51_s0 }
   0xc   :  { %57 = dma.hbm_to_vmem [thread:$0]  %s50_s8, 12288, %s52_s0, [#allocation8], %s10541_s10, %s10541_s10, %s10542_s11  }
   0xd   :  { %10529 = dma.done.wait [#allocation5], 16  }
   0xe   :  { %10530 = vsyncadd [#allocation5], 4294967280 }
   0xf   :  { %10531 = dma.done.wait [#allocation3], 192  }
  0x10   :  { %10532 = vsyncadd [#allocation3], 4294967104 }
  0x11   :  { %10533 = dma.done.wait [#allocation8], 12320  }
  0x12   :  { %10534 = vsyncadd [#allocation8], 4294954976 }
  0x13   :  { %76 = sfence }
  0x14   :  { %v6674_v0 = vld [vmem:[#allocation9 + $0x150] sm:$0xf]  ;;  %v9636_v1 = vld [vmem:[#allocation9 + $0x164] sm:$0xf0]  ;;  %v9633_v5 = vld [vmem:[#allocation9 + $0x154] sm:$0xf] }
  0x15   :  { %v6866_v2 = vld [vmem:[#allocation9 + $0x2d0] sm:$0xf]  ;;  %v6675_v3 = vor.u32 %v9636_v1, %v6674_v0  ;;  %v9684_v4 = vld [vmem:[#allocation9 + $0x2e4] sm:$0xf0]  ;;  %v6676_v6 = vld [vmem:[#allocation9 + $0x168] sm:$0xf0] }
  0x16   :  { %v6867_v7 = vor.u32 %v9684_v4, %v6866_v2  ;;  %v6679_v8 = vor.u32 %v9633_v5, %v6676_v6  ;;  %v9681_v9 = vld [vmem:[#allocation9 + $0x2d4] sm:$0xf]  ;;  %v6868_v10 = vld [vmem:[#allocation9 + $0x2e8] sm:$0xf0]  ;;  %v6650_v11 = vld [vmem:[#allocation9 + $0x120] sm:$0xf] }
  0x17   :  { %671 = vmatpush.bf16.msra.mxu0 %v6675_v3  ;;  %v6871_v12 = vor.u32 %v9681_v9, %v6868_v10  ;;  %v9630_v13 = vld [vmem:[#allocation9 + $0x134] sm:$0xf0]  ;;  %v6842_v14 = vld [vmem:[#allocation9 + $0x2a0] sm:$0xf]  ;;  %v9627_v18 = vld [vmem:[#allocation9 + $0x124] sm:$0xf] }
  0x18   :  { %v9678_v15 = vld [vmem:[#allocation9 + $0x2b4] sm:$0xf0]  ;;  %684 = vmatpush.bf16.msra.mxu1 %v6867_v7  ;;  %697 = vmatpush.bf16.msra.mxu2 %v6679_v8  ;;  %v6651_v16 = vor.u32 %v9630_v13, %v6650_v11  ;;  %v6652_v19 = vld [vmem:[#allocation9 + $0x138] sm:$0xf0]  ;;  %v9675_v20 = vld [vmem:[#allocation9 + $0x2a4] sm:$0xf] }
  0x19   :  { %v6843_v17 = vor.u32 %v9678_v15, %v6842_v14  ;;  %710 = vmatpush.bf16.msra.mxu3 %v6871_v12  ;;  %v6655_v21 = vor.u32 %v9627_v18, %v6652_v19  ;;  %v6844_v22 = vld [vmem:[#allocation9 + $0x2b8] sm:$0xf0]  ;;  %v6626_v23 = vld [vmem:[#allocation9 + $0xf0] sm:$0xf]  ;;  %v9624_v24 = vld [vmem:[#allocation9 + $0x104] sm:$0xf0] }
  0x1a   :  { %v6847_v25 = vor.u32 %v9675_v20, %v6844_v22  ;;  %v6818_v26 = vld [vmem:[#allocation9 + $0x270] sm:$0xf]  ;;  %v9672_v27 = vld [vmem:[#allocation9 + $0x284] sm:$0xf0]  ;;  %v9621_v28 = vld [vmem:[#allocation9 + $0xf4] sm:$0xf]  ;;  %v6627_v29 = vor.u32 %v9624_v24, %v6626_v23 }
  0x1b   :  { %672 = vmatpush.bf16.msra.mxu0 %v6651_v16  ;;  %v6628_v30 = vld [vmem:[#allocation9 + $0x108] sm:$0xf0]  ;;  %v9669_v31 = vld [vmem:[#allocation9 + $0x274] sm:$0xf]  ;;  %v6819_v33 = vor.u32 %v9672_v27, %v6818_v26  ;;  %v6602_v35 = vld [vmem:[#allocation9 + $0xc0] sm:$0xf] }
  0x1c   :  { %v6820_v32 = vld [vmem:[#allocation9 + $0x288] sm:$0xf0]  ;;  %685 = vmatpush.bf16.msra.mxu1 %v6843_v17  ;;  %698 = vmatpush.bf16.msra.mxu2 %v6655_v21  ;;  %v6631_v34 = vor.u32 %v9621_v28, %v6628_v30  ;;  %v9618_v36 = vld [vmem:[#allocation9 + $0xd4] sm:$0xf0]  ;;  %v6794_v37 = vld [vmem:[#allocation9 + $0x240] sm:$0xf] }
  0x1d   :  { %711 = vmatpush.bf16.msra.mxu3 %v6847_v25  ;;  %v6823_v38 = vor.u32 %v9669_v31, %v6820_v32  ;;  %v9666_v39 = vld [vmem:[#allocation9 + $0x254] sm:$0xf0]  ;;  %v9615_v40 = vld [vmem:[#allocation9 + $0xc4] sm:$0xf]  ;;  %v6604_v41 = vld [vmem:[#allocation9 + $0xd8] sm:$0xf0]  ;;  %v6603_v44 = vor.u32 %v9618_v36, %v6602_v35 }
  0x1e   :  { %v9663_v42 = vld [vmem:[#allocation9 + $0x244] sm:$0xf]  ;;  %v6796_v43 = vld [vmem:[#allocation9 + $0x258] sm:$0xf0]  ;;  %v6795_v45 = vor.u32 %v9666_v39, %v6794_v37  ;;  %v6607_v46 = vor.u32 %v9615_v40, %v6604_v41  ;;  %v6578_v47 = vld [vmem:[#allocation9 + $0x90] sm:$0xf] }
  0x1f   :  { %673 = vmatpush.bf16.msra.mxu0 %v6627_v29  ;;  %v9612_v48 = vld [vmem:[#allocation9 + $0xa4] sm:$0xf0]  ;;  %v6770_v49 = vld [vmem:[#allocation9 + $0x210] sm:$0xf]  ;;  %v6799_v50 = vor.u32 %v9663_v42, %v6796_v43  ;;  %v9609_v52 = vld [vmem:[#allocation9 + $0x94] sm:$0xf] }
  0x20   :  { %686 = vmatpush.bf16.msra.mxu1 %v6819_v33  ;;  %699 = vmatpush.bf16.msra.mxu2 %v6631_v34  ;;  %v9660_v51 = vld [vmem:[#allocation9 + $0x224] sm:$0xf0]  ;;  %v6580_v53 = vld [vmem:[#allocation9 + $0xa8] sm:$0xf0]  ;;  %v9657_v54 = vld [vmem:[#allocation9 + $0x214] sm:$0xf]  ;;  %v6579_v56 = vor.u32 %v9612_v48, %v6578_v47 }
  0x21   :  { %712 = vmatpush.bf16.msra.mxu3 %v6823_v38  ;;  %v6772_v55 = vld [vmem:[#allocation9 + $0x228] sm:$0xf0]  ;;  %v6771_v57 = vor.u32 %v9660_v51, %v6770_v49  ;;  %v6583_v58 = vor.u32 %v9609_v52, %v6580_v53  ;;  %v6554_v59 = vld [vmem:[#allocation9 + $0x60] sm:$0xf]  ;;  %v9606_v60 = vld [vmem:[#allocation9 + $0x74] sm:$0xf0] }
  0x22   :  { %v6746_v61 = vld [vmem:[#allocation9 + $0x1e0] sm:$0xf]  ;;  %v6775_v62 = vor.u32 %v9657_v54, %v6772_v55  ;;  %v9654_v63 = vld [vmem:[#allocation9 + $0x1f4] sm:$0xf0]  ;;  %v9603_v0 = vld [vmem:[#allocation9 + $0x64] sm:$0xf]  ;;  %v6555_v4 = vor.u32 %v9606_v60, %v6554_v59 }
  0x23   :  { %674 = vmatpush.bf16.msra.mxu0 %v6603_v44  ;;  %v6556_v1 = vld [vmem:[#allocation9 + $0x78] sm:$0xf0]  ;;  %v9651_v2 = vld [vmem:[#allocation9 + $0x1e4] sm:$0xf]  ;;  %v6747_v5 = vor.u32 %v9654_v63, %v6746_v61  ;;  %v6530_v7 = vld [vmem:[#allocation9 + $0x30] sm:$0xf] }
  0x24   :  { %687 = vmatpush.bf16.msra.mxu1 %v6795_v45  ;;  %700 = vmatpush.bf16.msra.mxu2 %v6607_v46  ;;  %v6748_v3 = vld [vmem:[#allocation9 + $0x1f8] sm:$0xf0]  ;;  %v6559_v6 = vor.u32 %v9603_v0, %v6556_v1  ;;  %v9600_v8 = vld [vmem:[#allocation9 + $0x44] sm:$0xf0]  ;;  %v6722_v9 = vld [vmem:[#allocation9 + $0x1b0] sm:$0xf] }
  0x25   :  { %713 = vmatpush.bf16.msra.mxu3 %v6799_v50  ;;  %v6751_v10 = vor.u32 %v9651_v2, %v6748_v3  ;;  %v9648_v11 = vld [vmem:[#allocation9 + $0x1c4] sm:$0xf0]  ;;  %v9597_v12 = vld [vmem:[#allocation9 + $0x34] sm:$0xf]  ;;  %v6532_v13 = vld [vmem:[#allocation9 + $0x48] sm:$0xf0]  ;;  %v6531_v17 = vor.u32 %v9600_v8, %v6530_v7 }
  0x26   :  { %v9645_v14 = vld [vmem:[#allocation9 + $0x1b4] sm:$0xf]  ;;  %v6724_v15 = vld [vmem:[#allocation9 + $0x1c8] sm:$0xf0]  ;;  %v6506_v16 = vld [vmem:[#allocation9] sm:$0xf]  ;;  %v6723_v21 = vor.u32 %v9648_v11, %v6722_v9  ;;  %v6535_v22 = vor.u32 %v9597_v12, %v6532_v13 }
  0x27   :  { %675 = vmatpush.bf16.msra.mxu0 %v6579_v56  ;;  %v9594_v18 = vld [vmem:[#allocation9 + $0x14] sm:$0xf0]  ;;  %v6698_v19 = vld [vmem:[#allocation9 + $0x180] sm:$0xf]  ;;  %v9591_v23 = vld [vmem:[#allocation9 + $0x4] sm:$0xf]  ;;  %v6727_v26 = vor.u32 %v9645_v14, %v6724_v15 }
  0x28   :  { %688 = vmatpush.bf16.msra.mxu1 %v6771_v57  ;;  %701 = vmatpush.bf16.msra.mxu2 %v6583_v58  ;;  %v9642_v20 = vld [vmem:[#allocation9 + $0x194] sm:$0xf0]  ;;  %v6508_v24 = vld [vmem:[#allocation9 + $0x18] sm:$0xf0]  ;;  %v9639_v25 = vld [vmem:[#allocation9 + $0x184] sm:$0xf]  ;;  %v6507_v33 = vor.u32 %v9594_v18, %v6506_v16 }
  0x29   :  { %714 = vmatpush.bf16.msra.mxu3 %v6775_v62  ;;  %v6700_v27 = vld [vmem:[#allocation9 + $0x198] sm:$0xf0]  ;;  %v6682_v28 = vld [vmem:[#allocation9 + $0x158] sm:$0xf]  ;;  %v9637_v29 = vld [vmem:[#allocation9 + $0x16c] sm:$0xf0]  ;;  %v6699_v37 = vor.u32 %v9642_v20, %v6698_v19  ;;  %v6511_v38 = vor.u32 %v9591_v23, %v6508_v24 }
  0x2a   :  { %v6874_v30 = vld [vmem:[#allocation9 + $0x2d8] sm:$0xf]  ;;  %v9685_v31 = vld [vmem:[#allocation9 + $0x2ec] sm:$0xf0]  ;;  %v81_v32 = vld [vmem:[#allocation7] sm:$0x3]  ;;  %v6703_v42 = vor.u32 %v9639_v25, %v6700_v27  ;;  %v6683_v43 = vor.u32 %v9637_v29, %v6682_v28 }
  0x2b   :  { %676 = vmatpush.bf16.msra.mxu0 %v6555_v4  ;;  %v9634_v34 = vld [vmem:[#allocation9 + $0x15c] sm:$0xf]  ;;  %v6684_v35 = vld [vmem:[#allocation9 + $0x170] sm:$0xf0]  ;;  %v89_v36 = vperm.slane %v81_v32, 0  ;;  %v90_v41 = vperm.slane %v81_v32, 1  ;;  %v6875_v44 = vor.u32 %v9685_v31, %v6874_v30 }
  0x2c   :  { %689 = vmatpush.bf16.msra.mxu1 %v6747_v5  ;;  %702 = vmatpush.bf16.msra.mxu2 %v6559_v6  ;;  %v9682_v39 = vld [vmem:[#allocation9 + $0x2dc] sm:$0xf]  ;;  %v6876_v40 = vld [vmem:[#allocation9 + $0x2f0] sm:$0xf0]  ;;  %v6687_v45 = vor.u32 %v9634_v34, %v6684_v35  ;;  %v6658_v46 = vld [vmem:[#allocation9 + $0x128] sm:$0xf] }
  0x2d   :  { %715 = vmatpush.bf16.msra.mxu3 %v6751_v10  ;;  %v9631_v47 = vld [vmem:[#allocation9 + $0x13c] sm:$0xf0]  ;;  %v6850_v48 = vld [vmem:[#allocation9 + $0x2a8] sm:$0xf]  ;;  %v6879_v49 = vor.u32 %v9682_v39, %v6876_v40  ;;  %v9628_v51 = vld [vmem:[#allocation9 + $0x12c] sm:$0xf]  ;;  %v10586_v53 = vpack.c.bf16 %v89_v36, %v89_v36  ;;  %v10588_v56 = vpack.c.bf16 %v90_v41, %v90_v41 }
  0x2e   :  { %v9679_v50 = vld [vmem:[#allocation9 + $0x2bc] sm:$0xf0]  ;;  %v6660_v52 = vld [vmem:[#allocation9 + $0x140] sm:$0xf0]  ;;  %v9676_v54 = vld [vmem:[#allocation9 + $0x2ac] sm:$0xf]  ;;  %v6659_v57 = vor.u32 %v9631_v47, %v6658_v46 }
  0x2f   :  { %677 = vmatpush.bf16.msra.mxu0 %v6531_v17  ;;  %v6852_v55 = vld [vmem:[#allocation9 + $0x2c0] sm:$0xf0]  ;;  %v6851_v58 = vor.u32 %v9679_v50, %v6850_v48  ;;  %v6663_v59 = vor.u32 %v9628_v51, %v6660_v52  ;;  %v6634_v60 = vld [vmem:[#allocation9 + $0xf8] sm:$0xf]  ;;  %v9625_v61 = vld [vmem:[#allocation9 + $0x10c] sm:$0xf0] }
  0x30   :  { %690 = vmatpush.bf16.msra.mxu1 %v6723_v21  ;;  %703 = vmatpush.bf16.msra.mxu2 %v6535_v22  ;;  %v6826_v62 = vld [vmem:[#allocation9 + $0x278] sm:$0xf]  ;;  %v6855_v63 = vor.u32 %v9676_v54, %v6852_v55  ;;  %v9673_v0 = vld [vmem:[#allocation9 + $0x28c] sm:$0xf0]  ;;  %v9622_v1 = vld [vmem:[#allocation9 + $0xfc] sm:$0xf]  ;;  %v6635_v5 = vor.u32 %v9625_v61, %v6634_v60 }
  0x31   :  { %716 = vmatpush.bf16.msra.mxu3 %v6727_v26  ;;  %v6636_v2 = vld [vmem:[#allocation9 + $0x110] sm:$0xf0]  ;;  %v9670_v3 = vld [vmem:[#allocation9 + $0x27c] sm:$0xf]  ;;  %v6827_v6 = vor.u32 %v9673_v0, %v6826_v62  ;;  %v6610_v8 = vld [vmem:[#allocation9 + $0xc8] sm:$0xf] }
  0x32   :  { %v6828_v4 = vld [vmem:[#allocation9 + $0x290] sm:$0xf0]  ;;  %v6639_v7 = vor.u32 %v9622_v1, %v6636_v2  ;;  %v9619_v9 = vld [vmem:[#allocation9 + $0xdc] sm:$0xf0]  ;;  %v6802_v10 = vld [vmem:[#allocation9 + $0x248] sm:$0xf] }
  0x33   :  { %678 = vmatpush.bf16.msra.mxu0 %v6507_v33  ;;  %v6831_v11 = vor.u32 %v9670_v3, %v6828_v4  ;;  %v9667_v12 = vld [vmem:[#allocation9 + $0x25c] sm:$0xf0]  ;;  %v9616_v13 = vld [vmem:[#allocation9 + $0xcc] sm:$0xf]  ;;  %v6612_v14 = vld [vmem:[#allocation9 + $0xe0] sm:$0xf0]  ;;  %v6611_v17 = vor.u32 %v9619_v9, %v6610_v8 }
  0x34   :  { %691 = vmatpush.bf16.msra.mxu1 %v6699_v37  ;;  %704 = vmatpush.bf16.msra.mxu2 %v6511_v38  ;;  %v9664_v15 = vld [vmem:[#allocation9 + $0x24c] sm:$0xf]  ;;  %v6804_v16 = vld [vmem:[#allocation9 + $0x260] sm:$0xf0]  ;;  %v6803_v18 = vor.u32 %v9667_v12, %v6802_v10  ;;  %v6615_v19 = vor.u32 %v9616_v13, %v6612_v14  ;;  %v6586_v20 = vld [vmem:[#allocation9 + $0x98] sm:$0xf] }
  0x35   :  { %717 = vmatpush.bf16.msra.mxu3 %v6703_v42  ;;  %v9613_v21 = vld [vmem:[#allocation9 + $0xac] sm:$0xf0]  ;;  %v6778_v22 = vld [vmem:[#allocation9 + $0x218] sm:$0xf]  ;;  %v6807_v23 = vor.u32 %v9664_v15, %v6804_v16  ;;  %v9610_v25 = vld [vmem:[#allocation9 + $0x9c] sm:$0xf] }
  0x36   :  { %679 = vmatmul.bf16.vlgmr.msra.gmra.mxu0 %v10586_v53  ;;  %v9661_v24 = vld [vmem:[#allocation9 + $0x22c] sm:$0xf0]  ;;  %v6588_v26 = vld [vmem:[#allocation9 + $0xb0] sm:$0xf0]  ;;  %v9658_v27 = vld [vmem:[#allocation9 + $0x21c] sm:$0xf]  ;;  %v6587_v29 = vor.u32 %v9613_v21, %v6586_v20 }
  0x37   :  { %723 = vmatpush.bf16.msrb.mxu0 %v6683_v43  ;;  %705 = vmatmul.bf16.vlgmr.msra.gmra.mxu2 %v10586_v53  ;;  %v6780_v28 = vld [vmem:[#allocation9 + $0x230] sm:$0xf0]  ;;  %v6779_v30 = vor.u32 %v9661_v24, %v6778_v22  ;;  %v6591_v31 = vor.u32 %v9610_v25, %v6588_v26  ;;  %v6562_v32 = vld [vmem:[#allocation9 + $0x68] sm:$0xf]  ;;  %v9607_v33 = vld [vmem:[#allocation9 + $0x7c] sm:$0xf0] }
  0x38   :  { %736 = vmatpush.bf16.msrb.mxu1 %v6875_v44  ;;  %749 = vmatpush.bf16.msrb.mxu2 %v6687_v45  ;;  %v6754_v34 = vld [vmem:[#allocation9 + $0x1e8] sm:$0xf]  ;;  %v6783_v35 = vor.u32 %v9658_v27, %v6780_v28  ;;  %v9655_v36 = vld [vmem:[#allocation9 + $0x1fc] sm:$0xf0]  ;;  %v9604_v37 = vld [vmem:[#allocation9 + $0x6c] sm:$0xf]  ;;  %v6563_v41 = vor.u32 %v9607_v33, %v6562_v32 }
  0x39   :  { %762 = vmatpush.bf16.msrb.mxu3 %v6879_v49  ;;  %692 = vmatmul.bf16.vlgmr.msra.gmra.mxu1 %v10588_v56  ;;  %v6564_v38 = vld [vmem:[#allocation9 + $0x80] sm:$0xf0]  ;;  %v9652_v39 = vld [vmem:[#allocation9 + $0x1ec] sm:$0xf]  ;;  %v6755_v42 = vor.u32 %v9655_v36, %v6754_v34  ;;  %v6538_v44 = vld [vmem:[#allocation9 + $0x38] sm:$0xf] }
  0x3a   :  { %718 = vmatmul.bf16.vlgmr.msra.gmra.mxu3 %v10588_v56  ;;  %v6756_v40 = vld [vmem:[#allocation9 + $0x200] sm:$0xf0]  ;;  %v6567_v43 = vor.u32 %v9604_v37, %v6564_v38  ;;  %v9601_v45 = vld [vmem:[#allocation9 + $0x4c] sm:$0xf0]  ;;  %v6730_v46 = vld [vmem:[#allocation9 + $0x1b8] sm:$0xf] }
  0x3b   :  { %724 = vmatpush.bf16.msrb.mxu0 %v6659_v57  ;;  %v6759_v47 = vor.u32 %v9652_v39, %v6756_v40  ;;  %v9649_v48 = vld [vmem:[#allocation9 + $0x1cc] sm:$0xf0]  ;;  %v9598_v49 = vld [vmem:[#allocation9 + $0x3c] sm:$0xf]  ;;  %v6540_v50 = vld [vmem:[#allocation9 + $0x50] sm:$0xf0]  ;;  %v6539_v54 = vor.u32 %v9601_v45, %v6538_v44 }
  0x3c   :  { %737 = vmatpush.bf16.msrb.mxu1 %v6851_v58  ;;  %750 = vmatpush.bf16.msrb.mxu2 %v6663_v59  ;;  %v9646_v51 = vld [vmem:[#allocation9 + $0x1bc] sm:$0xf]  ;;  %v6732_v52 = vld [vmem:[#allocation9 + $0x1d0] sm:$0xf0]  ;;  %v6514_v55 = vld [vmem:[#allocation9 + $0x8] sm:$0xf]  ;;  %v6731_v58 = vor.u32 %v9649_v48, %v6730_v46  ;;  %v6543_v59 = vor.u32 %v9598_v49, %v6540_v50 }
  0x3d   :  { %763 = vmatpush.bf16.msrb.mxu3 %v6855_v63  ;;  %v9595_v57 = vld [vmem:[#allocation9 + $0x1c] sm:$0xf0]  ;;  %v6706_v60 = vld [vmem:[#allocation9 + $0x188] sm:$0xf]  ;;  %v9592_v62 = vld [vmem:[#allocation9 + $0xc] sm:$0xf]  ;;  %v6735_v63 = vor.u32 %v9646_v51, %v6732_v52 }
  0x3e   :  { %v9643_v61 = vld [vmem:[#allocation9 + $0x19c] sm:$0xf0]  ;;  %v6516_v0 = vld [vmem:[#allocation9 + $0x20] sm:$0xf0]  ;;  %v9640_v1 = vld [vmem:[#allocation9 + $0x18c] sm:$0xf] }
  0x3f   :  { %725 = vmatpush.bf16.msrb.mxu0 %v6635_v5  ;;  %v6708_v2 = vld [vmem:[#allocation9 + $0x1a0] sm:$0xf0]  ;;  %v6690_v3 = vld [vmem:[#allocation9 + $0x160] sm:$0xf]  ;;  %v9638_v4 = vld [vmem:[#allocation9 + $0x174] sm:$0xf0]  ;;  %v6707_v10 = vor.u32 %v9643_v61, %v6706_v60 }
  0x40   :  { %738 = vmatpush.bf16.msrb.mxu1 %v6827_v6  ;;  %751 = vmatpush.bf16.msrb.mxu2 %v6639_v7  ;;  %v6882_v5 = vld [vmem:[#allocation9 + $0x2e0] sm:$0xf]  ;;  %v6515_v6 = vor.u32 %v9595_v57, %v6514_v55  ;;  %v9686_v7 = vld [vmem:[#allocation9 + $0x2f4] sm:$0xf0]  ;;  %v9635_v8 = vld [vmem:[#allocation9 + $0x164] sm:$0xf]  ;;  %v6711_v14 = vor.u32 %v9640_v1, %v6708_v2  ;;  %v6691_v15 = vor.u32 %v9638_v4, %v6690_v3 }
  0x41   :  { %764 = vmatpush.bf16.msrb.mxu3 %v6831_v11  ;;  %v6692_v9 = vld [vmem:[#allocation9 + $0x178] sm:$0xf0]  ;;  %v6519_v11 = vor.u32 %v9592_v62, %v6516_v0  ;;  %v9683_v12 = vld [vmem:[#allocation9 + $0x2e4] sm:$0xf]  ;;  %v6883_v16 = vor.u32 %v9686_v7, %v6882_v5  ;;  %v6858_v20 = vld [vmem:[#allocation9 + $0x2b0] sm:$0xf] }
  0x42   :  { %v6884_v13 = vld [vmem:[#allocation9 + $0x2f8] sm:$0xf0]  ;;  %v9680_v22 = vld [vmem:[#allocation9 + $0x2c4] sm:$0xf0]  ;;  %v6668_v24 = vld [vmem:[#allocation9 + $0x148] sm:$0xf0] }
  0x43   :  { %726 = vmatpush.bf16.msrb.mxu0 %v6611_v17  ;;  %v6695_v17 = vor.u32 %v9635_v8, %v6692_v9  ;;  %v6887_v21 = vor.u32 %v9683_v12, %v6884_v13  ;;  %v9677_v25 = vld [vmem:[#allocation9 + $0x2b4] sm:$0xf]  ;;  %v6860_v26 = vld [vmem:[#allocation9 + $0x2c8] sm:$0xf0]  ;;  %v6859_v28 = vor.u32 %v9680_v22, %v6858_v20  ;;  %v6834_v32 = vld [vmem:[#allocation9 + $0x280] sm:$0xf] }
  0x44   :  { %739 = vmatpush.bf16.msrb.mxu1 %v6803_v18  ;;  %752 = vmatpush.bf16.msrb.mxu2 %v6615_v19  ;;  %v6666_v18 = vld [vmem:[#allocation9 + $0x130] sm:$0xf]  ;;  %v9632_v19 = vld [vmem:[#allocation9 + $0x144] sm:$0xf0]  ;;  %v6863_v33 = vor.u32 %v9677_v25, %v6860_v26  ;;  %v9674_v34 = vld [vmem:[#allocation9 + $0x294] sm:$0xf0] }
  0x45   :  { %765 = vmatpush.bf16.msrb.mxu3 %v6807_v23  ;;  %v9629_v23 = vld [vmem:[#allocation9 + $0x134] sm:$0xf]  ;;  %v6667_v27 = vor.u32 %v9632_v19, %v6666_v18  ;;  %v6644_v36 = vld [vmem:[#allocation9 + $0x118] sm:$0xf0]  ;;  %v9671_v37 = vld [vmem:[#allocation9 + $0x284] sm:$0xf]  ;;  %v6835_v40 = vor.u32 %v9674_v34, %v6834_v32 }
  0x46   :  { %v6836_v38 = vld [vmem:[#allocation9 + $0x298] sm:$0xf0]  ;;  %v6810_v44 = vld [vmem:[#allocation9 + $0x250] sm:$0xf]  ;;  %v9668_v46 = vld [vmem:[#allocation9 + $0x264] sm:$0xf0] }
  0x47   :  { %727 = vmatpush.bf16.msrb.mxu0 %v6587_v29  ;;  %v6671_v29 = vor.u32 %v9629_v23, %v6668_v24  ;;  %v6839_v45 = vor.u32 %v9671_v37, %v6836_v38  ;;  %v6620_v48 = vld [vmem:[#allocation9 + $0xe8] sm:$0xf0]  ;;  %v9665_v49 = vld [vmem:[#allocation9 + $0x254] sm:$0xf]  ;;  %v6811_v52 = vor.u32 %v9668_v46, %v6810_v44  ;;  %v6594_v55 = vld [vmem:[#allocation9 + $0xa0] sm:$0xf] }
  0x48   :  { %740 = vmatpush.bf16.msrb.mxu1 %v6779_v30  ;;  %753 = vmatpush.bf16.msrb.mxu2 %v6591_v31  ;;  %v6642_v30 = vld [vmem:[#allocation9 + $0x100] sm:$0xf]  ;;  %v9626_v31 = vld [vmem:[#allocation9 + $0x114] sm:$0xf0]  ;;  %v6812_v50 = vld [vmem:[#allocation9 + $0x268] sm:$0xf0] }
  0x49   :  { %766 = vmatpush.bf16.msrb.mxu3 %v6783_v35  ;;  %v9623_v35 = vld [vmem:[#allocation9 + $0x104] sm:$0xf]  ;;  %v6643_v39 = vor.u32 %v9626_v31, %v6642_v30  ;;  %v9614_v57 = vld [vmem:[#allocation9 + $0xb4] sm:$0xf0]  ;;  %v6596_v62 = vld [vmem:[#allocation9 + $0xb8] sm:$0xf0] }
  0x4a   :  { %v9662_v60 = vld [vmem:[#allocation9 + $0x234] sm:$0xf0]  ;;  %v9611_v61 = vld [vmem:[#allocation9 + $0xa4] sm:$0xf]  ;;  %v6788_v0 = vld [vmem:[#allocation9 + $0x238] sm:$0xf0]  ;;  %v6595_v1 = vor.u32 %v9614_v57, %v6594_v55 }
  0x4b   :  { %728 = vmatpush.bf16.msrb.mxu0 %v6563_v41  ;;  %v6647_v41 = vor.u32 %v9623_v35, %v6644_v36  ;;  %v6599_v3 = vor.u32 %v9611_v61, %v6596_v62  ;;  %v6570_v4 = vld [vmem:[#allocation9 + $0x70] sm:$0xf]  ;;  %v9608_v5 = vld [vmem:[#allocation9 + $0x84] sm:$0xf0]  ;;  %v9605_v9 = vld [vmem:[#allocation9 + $0x74] sm:$0xf] }
  0x4c   :  { %741 = vmatpush.bf16.msrb.mxu1 %v6755_v42  ;;  %754 = vmatpush.bf16.msrb.mxu2 %v6567_v43  ;;  %v6618_v42 = vld [vmem:[#allocation9 + $0xd0] sm:$0xf]  ;;  %v9620_v43 = vld [vmem:[#allocation9 + $0xe4] sm:$0xf0]  ;;  %v6764_v12 = vld [vmem:[#allocation9 + $0x208] sm:$0xf0]  ;;  %v6571_v13 = vor.u32 %v9608_v5, %v6570_v4 }
  0x4d   :  { %767 = vmatpush.bf16.msrb.mxu3 %v6759_v47  ;;  %v9617_v47 = vld [vmem:[#allocation9 + $0xd4] sm:$0xf]  ;;  %v6619_v51 = vor.u32 %v9620_v43, %v6618_v42  ;;  %v9656_v8 = vld [vmem:[#allocation9 + $0x204] sm:$0xf0]  ;;  %v6738_v18 = vld [vmem:[#allocation9 + $0x1c0] sm:$0xf] }
  0x4e   :  { %v9650_v20 = vld [vmem:[#allocation9 + $0x1d4] sm:$0xf0]  ;;  %v6548_v22 = vld [vmem:[#allocation9 + $0x58] sm:$0xf0]  ;;  %v9647_v23 = vld [vmem:[#allocation9 + $0x1c4] sm:$0xf] }
  0x4f   :  { %729 = vmatpush.bf16.msrb.mxu0 %v6539_v54  ;;  %v6623_v54 = vor.u32 %v9617_v47, %v6620_v48  ;;  %v6740_v24 = vld [vmem:[#allocation9 + $0x1d8] sm:$0xf0]  ;;  %v6739_v26 = vor.u32 %v9650_v20, %v6738_v18  ;;  %v6714_v30 = vld [vmem:[#allocation9 + $0x190] sm:$0xf]  ;;  %v9644_v32 = vld [vmem:[#allocation9 + $0x1a4] sm:$0xf0] }
  0x50   :  { %742 = vmatpush.bf16.msrb.mxu1 %v6731_v58  ;;  %755 = vmatpush.bf16.msrb.mxu2 %v6543_v59  ;;  %v6786_v58 = vld [vmem:[#allocation9 + $0x220] sm:$0xf]  ;;  %v6815_v59 = vor.u32 %v9665_v49, %v6812_v50  ;;  %v6743_v31 = vor.u32 %v9647_v23, %v6740_v24  ;;  %v6524_v34 = vld [vmem:[#allocation9 + $0x28] sm:$0xf0]  ;;  %v9641_v35 = vld [vmem:[#allocation9 + $0x194] sm:$0xf]  ;;  %v6715_v38 = vor.u32 %v9644_v32, %v6714_v30 }
  0x51   :  { %768 = vmatpush.bf16.msrb.mxu3 %v6735_v63  ;;  %v9659_v63 = vld [vmem:[#allocation9 + $0x224] sm:$0xf]  ;;  %v6787_v2 = vor.u32 %v9662_v60, %v6786_v58  ;;  %v6716_v36 = vld [vmem:[#allocation9 + $0x1a8] sm:$0xf0]  ;;  %v7060_v43 = vld [vmem:[#allocation9 + $0x150] sm:$0xf] }
  0x52   :  { %v6791_v7 = vor.u32 %v9659_v63, %v6788_v0  ;;  %v9732_v44 = vld [vmem:[#allocation9 + $0x164] sm:$0xf0]  ;;  %v9729_v48 = vld [vmem:[#allocation9 + $0x154] sm:$0xf]  ;;  %v7062_v49 = vld [vmem:[#allocation9 + $0x168] sm:$0xf0] }
  0x53   :  { %730 = vmatpush.bf16.msrb.mxu0 %v6515_v6  ;;  %v6762_v6 = vld [vmem:[#allocation9 + $0x1f0] sm:$0xf]  ;;  %v7061_v46 = vor.u32 %v9732_v44, %v7060_v43  ;;  %v9780_v47 = vld [vmem:[#allocation9 + $0x2e4] sm:$0xf0]  ;;  %v9726_v57 = vld [vmem:[#allocation9 + $0x134] sm:$0xf0] }
  0x54   :  { %743 = vmatpush.bf16.msrb.mxu1 %v6707_v10  ;;  %756 = vmatpush.bf16.msrb.mxu2 %v6519_v11  ;;  %v6572_v10 = vld [vmem:[#allocation9 + $0x88] sm:$0xf0]  ;;  %v9653_v11 = vld [vmem:[#allocation9 + $0x1f4] sm:$0xf]  ;;  %v7228_v60 = vld [vmem:[#allocation9 + $0x2a0] sm:$0xf] }
  0x55   :  { %769 = vmatpush.bf16.msrb.mxu3 %v6711_v14  ;;  %v6763_v14 = vor.u32 %v9656_v8, %v6762_v6  ;;  %v6767_v19 = vor.u32 %v9653_v11, %v6764_v12  ;;  %v9774_v61 = vld [vmem:[#allocation9 + $0x2b4] sm:$0xf0]  ;;  %v9723_v62 = vld [vmem:[#allocation9 + $0x124] sm:$0xf]  ;;  %v7038_v0 = vld [vmem:[#allocation9 + $0x138] sm:$0xf0] }
  0x56   :  { %731 = vmatmul.bf16.vlgmr.msrb.gmra.mxu0 %v10586_v53  ;;  %v7229_v63 = vor.u32 %v9774_v61, %v7228_v60  ;;  %v7041_v4 = vor.u32 %v9723_v62, %v7038_v0  ;;  %v9720_v8 = vld [vmem:[#allocation9 + $0x104] sm:$0xf0]  ;;  %v6988_v20 = vld [vmem:[#allocation9 + $0xc0] sm:$0xf]  ;;  %v9759_v30 = vld [vmem:[#allocation9 + $0x244] sm:$0xf] }
  0x57   :  { %775 = vmatpush.bf16.msra.mxu0 %v6691_v15  ;;  %744 = vmatmul.bf16.vlgmr.msrb.gmra.mxu1 %v10588_v56  ;;  %v6575_v15 = vor.u32 %v9605_v9, %v6572_v10  ;;  %v7204_v10 = vld [vmem:[#allocation9 + $0x270] sm:$0xf]  ;;  %v9768_v11 = vld [vmem:[#allocation9 + $0x284] sm:$0xf0]  ;;  %s10610_s1 = sld [smem:[#allocation2]]  ;;  %vm834_vm0 = vcmask 1040384  }
  0x58   :  { %788 = vmatpush.bf16.msra.mxu1 %v6883_v16  ;;  %801 = vmatpush.bf16.msra.mxu2 %v6695_v17  ;;  %v6546_v16 = vld [vmem:[#allocation9 + $0x40] sm:$0xf]  ;;  %v9602_v17 = vld [vmem:[#allocation9 + $0x54] sm:$0xf0]  ;;  %v7205_v12 = vor.u32 %v9768_v11, %v7204_v10  ;;  %v9753_v44 = vld [vmem:[#allocation9 + $0x214] sm:$0xf] }
  0x59   :  { %814 = vmatpush.bf16.msra.mxu3 %v6887_v21  ;;  %757 = vmatmul.bf16.vlgmr.msrb.gmra.mxu2 %v10586_v53  ;;  %v9599_v21 = vld [vmem:[#allocation9 + $0x44] sm:$0xf]  ;;  %v6547_v25 = vor.u32 %v9602_v17, %v6546_v16  ;;  %v7206_v17 = vld [vmem:[#allocation9 + $0x288] sm:$0xf0]  ;;  %v6916_v61 = vld [vmem:[#allocation9 + $0x30] sm:$0xf] }
  0x5a   :  { %770 = vmatmul.bf16.vlgmr.msrb.gmra.mxu3 %v10588_v56  ;;  %v9696_v62 = vld [vmem:[#allocation9 + $0x44] sm:$0xf0]  ;;  %v7108_v0 = vld [vmem:[#allocation9 + $0x1b0] sm:$0xf]  ;;  %v6892_v10 = vld [vmem:[#allocation9] sm:$0xf] }
  0x5b   :  { %776 = vmatpush.bf16.msra.mxu0 %v6667_v27  ;;  %v6551_v27 = vor.u32 %v9599_v21, %v6548_v22  ;;  %v9714_v21 = vld [vmem:[#allocation9 + $0xd4] sm:$0xf0]  ;;  %v7180_v22 = vld [vmem:[#allocation9 + $0x240] sm:$0xf]  ;;  %vm836_vm2 = vcmask 1042434   ;;  %vm838_vm3 = vcmask 1041408  }
  0x5c   :  { %789 = vmatpush.bf16.msra.mxu1 %v6859_v28  ;;  %802 = vmatpush.bf16.msra.mxu2 %v6671_v29  ;;  %v6522_v28 = vld [vmem:[#allocation9 + $0x10] sm:$0xf]  ;;  %v9596_v29 = vld [vmem:[#allocation9 + $0x24] sm:$0xf0]  ;;  %v6989_v24 = vor.u32 %v9714_v21, %v6988_v20  ;;  %v9690_v11 = vld [vmem:[#allocation9 + $0x14] sm:$0xf0] }
  0x5d   :  { %815 = vmatpush.bf16.msra.mxu3 %v6863_v33  ;;  %v9593_v33 = vld [vmem:[#allocation9 + $0x14] sm:$0xf]  ;;  %v6523_v37 = vor.u32 %v9596_v29, %v6522_v28  ;;  %p83_p0 = scmp.eq.s32.totalorder %s10610_s1, 1  ;;  %v9735_v20 = vld [vmem:[#allocation9 + $0x184] sm:$0xf]  ;;  %s10755_s15 = sld [smem:[#allocation2 + $0x2]] }
  0x5e   :  { %v7086_v21 = vld [vmem:[#allocation9 + $0x198] sm:$0xf0]  ;;  %s10829_s17 = sld [smem:[#allocation2 + $0x3]]  ;;  %s10543_s27 = smov [#allocation10]  }
  0x5f   :  { %777 = vmatpush.bf16.msra.mxu0 %v6643_v39  ;;  %v6527_v39 = vor.u32 %v9593_v33, %v6524_v34  ;;  %v6964_v33 = vld [vmem:[#allocation9 + $0x90] sm:$0xf]  ;;  %v9708_v34 = vld [vmem:[#allocation9 + $0xa4] sm:$0xf0]  ;;  %s10615_s3 = scalar_select %p83_p0, 1, 0 }
  0x60   :  { %790 = vmatpush.bf16.msra.mxu1 %v6835_v40  ;;  %803 = vmatpush.bf16.msra.mxu2 %v6647_v41  ;;  %v6719_v40 = vor.u32 %v9641_v35, %v6716_v36  ;;  %v7156_v35 = vld [vmem:[#allocation9 + $0x210] sm:$0xf]  ;;  %v6965_v36 = vor.u32 %v9708_v34, %v6964_v33  ;;  %v7070_v33 = vld [vmem:[#allocation9 + $0x170] sm:$0xf0]  ;;  %s10899_s19 = sld [smem:[#allocation2 + $0x4]]  ;;  %s6490_s28 = sshll.u32 %s10543_s27, 4  ;;  %s6491_s28 = int_to_ptr.vmem [resolvable:$true] %s6490_s28 }
  0x61   :  { %816 = vmatpush.bf16.msra.mxu3 %v6839_v45  ;;  %v7252_v45 = vld [vmem:[#allocation9 + $0x2d0] sm:$0xf]  ;;  %s10973_s21 = sld [smem:[#allocation2 + $0x5]]  ;;  %s6492_s2 = sshll.u32 %s11136_s5, 4  ;;  %s6493_s2 = int_to_ptr.hbm [resolvable:$true] %s6492_s2 }
  0x62   :  { %v7253_v50 = vor.u32 %v9780_v47, %v7252_v45  ;;  %v7158_v45 = vld [vmem:[#allocation9 + $0x228] sm:$0xf0]  ;;  %v6940_v47 = vld [vmem:[#allocation9 + $0x60] sm:$0xf]  ;;  %s11043_s23 = sld [smem:[#allocation2 + $0x6]] }
  0x63   :  { %778 = vmatpush.bf16.msra.mxu0 %v6619_v51  ;;  %v7065_v51 = vor.u32 %v9729_v48, %v7062_v49  ;;  %v9702_v48 = vld [vmem:[#allocation9 + $0x74] sm:$0xf0]  ;;  %v7132_v49 = vld [vmem:[#allocation9 + $0x1e0] sm:$0xf]  ;;  %p1692_p2 = scmp.eq.s32.totalorder %s10755_s15, 1  ;;  %s9205_s25 = sld [smem:[#allocation2 + $0x7]] }
  0x64   :  { %791 = vmatpush.bf16.msra.mxu1 %v6811_v52  ;;  %804 = vmatpush.bf16.msra.mxu2 %v6623_v54  ;;  %v9777_v52 = vld [vmem:[#allocation9 + $0x2d4] sm:$0xf]  ;;  %v7254_v54 = vld [vmem:[#allocation9 + $0x2e8] sm:$0xf0]  ;;  %p2491_p3 = scmp.eq.s32.totalorder %s10829_s17, 1 }
  0x65   :  { %817 = vmatpush.bf16.msra.mxu3 %v6815_v59  ;;  %v7257_v55 = vor.u32 %v9777_v52, %v7254_v54  ;;  %v9699_v52 = vld [vmem:[#allocation9 + $0x64] sm:$0xf]  ;;  %v6942_v54 = vld [vmem:[#allocation9 + $0x78] sm:$0xf0]  ;;  %s10762_s16 = scalar_select %p1692_p2, 1, 0 }
  0x66   :  { %s10836_s18 = scalar_select %p2491_p3, 1, 0 }
  0x67   :  { %779 = vmatpush.bf16.msra.mxu0 %v6595_v1  ;;  %v9771_v1 = vld [vmem:[#allocation9 + $0x2a4] sm:$0xf]  ;;  %p3290_p4 = scmp.eq.s32.totalorder %s10899_s19, 1  ;;  %p4089_p5 = scmp.eq.s32.totalorder %s10973_s21, 1 }
  0x68   :  { %792 = vmatpush.bf16.msra.mxu1 %v6787_v2  ;;  %805 = vmatpush.bf16.msra.mxu2 %v6599_v3  ;;  %v7230_v2 = vld [vmem:[#allocation9 + $0x2b8] sm:$0xf0]  ;;  %p4888_p6 = scmp.eq.s32.totalorder %s11043_s23, 1 }
  0x69   :  { %818 = vmatpush.bf16.msra.mxu3 %v6791_v7  ;;  %v7233_v5 = vor.u32 %v9771_v1, %v7230_v2  ;;  %v7012_v7 = vld [vmem:[#allocation9 + $0xf0] sm:$0xf]  ;;  %v9744_v1 = vld [vmem:[#allocation9 + $0x1c4] sm:$0xf0]  ;;  %s10906_s20 = scalar_select %p3290_p4, 1, 0 }
  0x6a   :  { %v7013_v9 = vor.u32 %v9720_v8, %v7012_v7  ;;  %v7109_v2 = vor.u32 %v9744_v1, %v7108_v0  ;;  %v7110_v7 = vld [vmem:[#allocation9 + $0x1c8] sm:$0xf0]  ;;  %v9721_v0 = vld [vmem:[#allocation9 + $0x10c] sm:$0xf0]  ;;  %v7212_v1 = vld [vmem:[#allocation9 + $0x278] sm:$0xf] }
  0x6b   :  { %780 = vmatpush.bf16.msra.mxu0 %v6571_v13  ;;  %v9717_v13 = vld [vmem:[#allocation9 + $0xf4] sm:$0xf]  ;;  %s10980_s22 = scalar_select %p4089_p5, 1, 0 }
  0x6c   :  { %793 = vmatpush.bf16.msra.mxu1 %v6763_v14  ;;  %806 = vmatpush.bf16.msra.mxu2 %v6575_v15  ;;  %v7014_v14 = vld [vmem:[#allocation9 + $0x108] sm:$0xf0]  ;;  %v9765_v15 = vld [vmem:[#allocation9 + $0x274] sm:$0xf]  ;;  %s11050_s24 = scalar_select %p4888_p6, 1, 0 }
  0x6d   :  { %819 = vmatpush.bf16.msra.mxu3 %v6767_v19  ;;  %v7017_v16 = vor.u32 %v9717_v13, %v7014_v14  ;;  %v7209_v19 = vor.u32 %v9765_v15, %v7206_v17  ;;  %v6893_v14 = vor.u32 %v9690_v11, %v6892_v10  ;;  %v9738_v15 = vld [vmem:[#allocation9 + $0x194] sm:$0xf0]  ;;  %v6894_v17 = vld [vmem:[#allocation9 + $0x18] sm:$0xf0]  ;;  %v7214_v10 = vld [vmem:[#allocation9 + $0x290] sm:$0xf0] }
  0x6e   :  { %p5687_p7 = scmp.eq.s32.totalorder %s9205_s25, 1 }
  0x6f   :  { %781 = vmatpush.bf16.msra.mxu0 %v6547_v25  ;;  %v9762_v25 = vld [vmem:[#allocation9 + $0x254] sm:$0xf0] }
  0x70   :  { %794 = vmatpush.bf16.msra.mxu1 %v6739_v26  ;;  %807 = vmatpush.bf16.msra.mxu2 %v6551_v27  ;;  %v9711_v26 = vld [vmem:[#allocation9 + $0xc4] sm:$0xf]  ;;  %v6990_v27 = vld [vmem:[#allocation9 + $0xd8] sm:$0xf0]  ;;  %v7181_v28 = vor.u32 %v9762_v25, %v7180_v22  ;;  %v7068_v22 = vld [vmem:[#allocation9 + $0x158] sm:$0xf] }
  0x71   :  { %820 = vmatpush.bf16.msra.mxu3 %v6743_v31  ;;  %v6993_v29 = vor.u32 %v9711_v26, %v6990_v27  ;;  %v7182_v31 = vld [vmem:[#allocation9 + $0x258] sm:$0xf0]  ;;  %v9733_v25 = vld [vmem:[#allocation9 + $0x16c] sm:$0xf0]  ;;  %v7260_v26 = vld [vmem:[#allocation9 + $0x2d8] sm:$0xf] }
  0x72   :  { %v7185_v32 = vor.u32 %v9759_v30, %v7182_v31  ;;  %v9781_v27 = vld [vmem:[#allocation9 + $0x2ec] sm:$0xf0]  ;;  %v7069_v30 = vor.u32 %v9733_v25, %v7068_v22  ;;  %v9760_v25 = vld [vmem:[#allocation9 + $0x24c] sm:$0xf]  ;;  %s5688_s26 = scalar_select %p5687_p7, 1, 0 }
  0x73   :  { %782 = vmatpush.bf16.msra.mxu0 %v6523_v37  ;;  %v9756_v37 = vld [vmem:[#allocation9 + $0x224] sm:$0xf0]  ;;  %v7261_v31 = vor.u32 %v9781_v27, %v7260_v26  ;;  %v7190_v26 = vld [vmem:[#allocation9 + $0x260] sm:$0xf0] }
  0x74   :  { %795 = vmatpush.bf16.msra.mxu1 %v6715_v38  ;;  %808 = vmatpush.bf16.msra.mxu2 %v6527_v39  ;;  %v9705_v38 = vld [vmem:[#allocation9 + $0x94] sm:$0xf]  ;;  %v6966_v39 = vld [vmem:[#allocation9 + $0xa8] sm:$0xf0] }
  0x75   :  { %821 = vmatpush.bf16.msra.mxu3 %v6719_v40  ;;  %v7157_v40 = vor.u32 %v9756_v37, %v7156_v35  ;;  %v6969_v43 = vor.u32 %v9705_v38, %v6966_v39  ;;  %v9778_v35 = vld [vmem:[#allocation9 + $0x2dc] sm:$0xf]  ;;  %v7044_v37 = vld [vmem:[#allocation9 + $0x128] sm:$0xf] }
  0x76   :  { %783 = vmatmul.bf16.vlgmr.msra.gmra.mxu0 %v10586_v53  ;;  %v9754_v38 = vld [vmem:[#allocation9 + $0x21c] sm:$0xf] }
  0x77   :  { %796 = vmatmul.bf16.vlgmr.msra.gmra.mxu1 %v10588_v56  ;;  %809 = vmatmul.bf16.vlgmr.msra.gmra.mxu2 %v10586_v53 }
  0x78   :  { %822 = vmatmul.bf16.vlgmr.msra.gmra.mxu3 %v10588_v56  ;;  %1481 = vmatpush.bf16.msrb.mxu0 %v7061_v46  ;;  %v7036_v56 = vld [vmem:[#allocation9 + $0x120] sm:$0xf]  ;;  %v7161_v46 = vor.u32 %v9753_v44, %v7158_v45  ;;  %v10626_v44 = vld [vmem:[#allocation6 + $0x1] ss:$2 sm:$0x3f] }
  0x79   :  { %1494 = vmatpush.bf16.msrb.mxu1 %v7253_v50  ;;  %1507 = vmatpush.bf16.msrb.mxu2 %v7065_v51  ;;  %v7037_v59 = vor.u32 %v9726_v57, %v7036_v56  ;;  %v6941_v50 = vor.u32 %v9702_v48, %v6940_v47  ;;  %v9750_v51 = vld [vmem:[#allocation9 + $0x1f4] sm:$0xf0]  ;;  %v6945_v56 = vor.u32 %v9699_v52, %v6942_v54  ;;  %v9747_v57 = vld [vmem:[#allocation9 + $0x1e4] sm:$0xf]  ;;  %v9724_v47 = vld [vmem:[#allocation9 + $0x12c] sm:$0xf] }
  0x7a   :  { %1520 = vmatpush.bf16.msrb.mxu3 %v7257_v55  ;;  %v7133_v55 = vor.u32 %v9750_v51, %v7132_v49  ;;  %v7046_v48 = vld [vmem:[#allocation9 + $0x140] sm:$0xf0] }
  0x7c   :  { %1482 = vmatpush.bf16.msrb.mxu0 %v7037_v59  ;;  %v7134_v59 = vld [vmem:[#allocation9 + $0x1f8] sm:$0xf0] }
  0x7d   :  { %1495 = vmatpush.bf16.msrb.mxu1 %v7229_v63  ;;  %1508 = vmatpush.bf16.msrb.mxu2 %v7041_v4  ;;  %v7137_v60 = vor.u32 %v9747_v57, %v7134_v59  ;;  %v6917_v63 = vor.u32 %v9696_v62, %v6916_v61  ;;  %v6918_v4 = vld [vmem:[#allocation9 + $0x48] sm:$0xf0]  ;;  %v7238_v57 = vld [vmem:[#allocation9 + $0x2c0] sm:$0xf0] }
  0x7e   :  { %1521 = vmatpush.bf16.msrb.mxu3 %v7233_v5  ;;  %v9741_v5 = vld [vmem:[#allocation9 + $0x1b4] sm:$0xf] }
  0x80   :  { %1483 = vmatpush.bf16.msrb.mxu0 %v7013_v9  ;;  %v7113_v9 = vor.u32 %v9741_v5, %v7110_v7  ;;  %v7022_v5 = vld [vmem:[#allocation9 + $0x110] sm:$0xf0] }
  0x81   :  { %1496 = vmatpush.bf16.msrb.mxu1 %v7205_v12  ;;  %1509 = vmatpush.bf16.msrb.mxu2 %v7017_v16  ;;  %v7084_v12 = vld [vmem:[#allocation9 + $0x180] sm:$0xf]  ;;  %v9687_v16 = vld [vmem:[#allocation9 + $0x4] sm:$0xf] }
  0x82   :  { %1522 = vmatpush.bf16.msrb.mxu3 %v7209_v19  ;;  %v6897_v19 = vor.u32 %v9687_v16, %v6894_v17 }
  0x84   :  { %1484 = vmatpush.bf16.msrb.mxu0 %v6989_v24  ;;  %v7089_v24 = vor.u32 %v9735_v20, %v7086_v21  ;;  %v6998_v20 = vld [vmem:[#allocation9 + $0xe0] sm:$0xf0] }
  0x85   :  { %1497 = vmatpush.bf16.msrb.mxu1 %v7181_v28  ;;  %1510 = vmatpush.bf16.msrb.mxu2 %v6993_v29 }
  0x86   :  { %1523 = vmatpush.bf16.msrb.mxu3 %v7185_v32  ;;  %v9730_v32 = vld [vmem:[#allocation9 + $0x15c] sm:$0xf] }
  0x87   :  { %v7073_v34 = vor.u32 %v9730_v32, %v7070_v33  ;;  %v7164_v33 = vld [vmem:[#allocation9 + $0x218] sm:$0xf] }
  0x88   :  { %1485 = vmatpush.bf16.msrb.mxu0 %v6965_v36  ;;  %v7262_v36 = vld [vmem:[#allocation9 + $0x2f0] sm:$0xf0] }
  0x89   :  { %1498 = vmatpush.bf16.msrb.mxu1 %v7157_v40  ;;  %1511 = vmatpush.bf16.msrb.mxu2 %v6969_v43  ;;  %v7265_v39 = vor.u32 %v9778_v35, %v7262_v36  ;;  %v10624_v43 = vld [vmem:[#allocation6] ss:$2 sm:$0x3f] }
  0x8a   :  { %1524 = vmatpush.bf16.msrb.mxu3 %v7161_v46  ;;  %v9775_v46 = vld [vmem:[#allocation9 + $0x2bc] sm:$0xf0]  ;;  %v9706_v35 = vld [vmem:[#allocation9 + $0x9c] sm:$0xf] }
  0x8c   :  { %1486 = vmatpush.bf16.msrb.mxu0 %v6941_v50 }
  0x8d   :  { %1499 = vmatpush.bf16.msrb.mxu1 %v7133_v55  ;;  %1512 = vmatpush.bf16.msrb.mxu2 %v6945_v56  ;;  %v7049_v55 = vor.u32 %v9724_v47, %v7046_v48  ;;  %v9772_v56 = vld [vmem:[#allocation9 + $0x2ac] sm:$0xf]  ;;  %v9751_v48 = vld [vmem:[#allocation9 + $0x1fc] sm:$0xf0] }
  0x8e   :  { %1525 = vmatpush.bf16.msrb.mxu3 %v7137_v60  ;;  %v7241_v62 = vor.u32 %v9772_v56, %v7238_v57 }
  0x90   :  { %1487 = vmatpush.bf16.msrb.mxu0 %v6917_v63  ;;  %v7020_v63 = vld [vmem:[#allocation9 + $0xf8] sm:$0xf] }
  0x91   :  { %1500 = vmatpush.bf16.msrb.mxu1 %v7109_v2  ;;  %v7021_v2 = vor.u32 %v9721_v0, %v7020_v63  ;;  %v9745_v0 = vld [vmem:[#allocation9 + $0x1cc] sm:$0xf0] }
  0x92   :  { %1526 = vmatpush.bf16.msrb.mxu3 %v7113_v9  ;;  %v9766_v9 = vld [vmem:[#allocation9 + $0x27c] sm:$0xf] }
  0x94   :  { %1488 = vmatpush.bf16.msrb.mxu0 %v6893_v14  ;;  %v9715_v14 = vld [vmem:[#allocation9 + $0xdc] sm:$0xf0] }
  0x96   :  { %1527 = vmatpush.bf16.msrb.mxu3 %v7089_v24 }
  0x98   :  { %1533 = vmatpush.bf16.msra.mxu0 %v7069_v30  ;;  %v6972_v30 = vld [vmem:[#allocation9 + $0x98] sm:$0xf] }
  0x9a   :  { %1572 = vmatpush.bf16.msra.mxu3 %v7265_v39  ;;  %v7166_v39 = vld [vmem:[#allocation9 + $0x230] sm:$0xf0] }
  0x9e   :  { %1573 = vmatpush.bf16.msra.mxu3 %v7241_v62 }
  0xb3   :  { %v10602_v41 = vpop.f32.mrf.mxu0 }
  0xb6   :  { %v10604_v42 = vpop.f32.mrf.mxu1 }
  0xb7   :  { %v694_v59 = vadd.f32 %v10604_v42, %v10602_v41  ;;  %v7217_v42 = vor.u32 %v9766_v9, %v7214_v10  ;;  %v6900_v10 = vld [vmem:[#allocation9 + $0x8] sm:$0xf] }
  0xb9   :  { %1574 = vmatpush.bf16.msra.mxu3 %v7217_v42  ;;  %v9691_v42 = vld [vmem:[#allocation9 + $0x1c] sm:$0xf0] }
  0xba   :  { %v10606_v53 = vpop.f32.mrf.mxu2 }
  0xbb   :  { %v682_v3 = vpop.f32.mrf.mxu0 }
  0xbc   :  { %v9693_v3 = vld [vmem:[#allocation9 + $0x34] sm:$0xf] }
  0xbd   :  { %v10608_v58 = vpop.f32.mrf.mxu3 }
  0xbe   :  { %v695_v6 = vpop.f32.mrf.mxu1  ;;  %v720_v28 = vadd.f32 %v10608_v58, %v10606_v53  ;;  %v9727_v53 = vld [vmem:[#allocation9 + $0x13c] sm:$0xf0]  ;;  %v7236_v58 = vld [vmem:[#allocation9 + $0x2a8] sm:$0xf] }
  0xbf   :  { %v6921_v6 = vor.u32 %v9693_v3, %v6918_v4  ;;  %v7045_v45 = vor.u32 %v9727_v53, %v7044_v37  ;;  %v7237_v54 = vor.u32 %v9775_v46, %v7236_v58  ;;  %v9769_v3 = vld [vmem:[#allocation9 + $0x28c] sm:$0xf0]  ;;  %v9718_v4 = vld [vmem:[#allocation9 + $0xfc] sm:$0xf]  ;;  %v6974_v37 = vld [vmem:[#allocation9 + $0xb0] sm:$0xf0]  ;;  %v7169_v58 = vor.u32 %v9754_v38, %v7166_v39 }
  0xc0   :  { %v831_v49 = vrot.slane %v720_v28, 7  ;;  %v7213_v7 = vor.u32 %v9769_v3, %v7212_v1  ;;  %v7193_v28 = vor.u32 %v9760_v25, %v7190_v26  ;;  %v6977_v53 = vor.u32 %v9706_v35, %v6974_v37  ;;  %v7140_v46 = vld [vmem:[#allocation9 + $0x1e8] sm:$0xf]  ;;  %v9694_v1 = vld [vmem:[#allocation9 + $0x3c] sm:$0xf] }
  0xc1   :  { %1513 = vmatpush.bf16.msrb.mxu2 %v6921_v6  ;;  %1534 = vmatpush.bf16.msra.mxu0 %v7045_v45  ;;  %v9703_v45 = vld [vmem:[#allocation9 + $0x7c] sm:$0xf0]  ;;  %v6926_v3 = vld [vmem:[#allocation9 + $0x50] sm:$0xf0] }
  0xc2   :  { %v708_v18 = vpop.f32.mrf.mxu2  ;;  %v835_v11 = vsel %vm834_vm0, %v694_v59, %v831_v49  ;;  %1575 = vmatpush.bf16.msra.mxu3 %v7193_v28  ;;  %v9700_v49 = vld [vmem:[#allocation9 + $0x6c] sm:$0xf]  ;;  %v6924_v59 = vld [vmem:[#allocation9 + $0x38] sm:$0xf] }
  0xc3   :  { %v7085_v18 = vor.u32 %v9738_v15, %v7084_v12  ;;  %v7188_v15 = vld [vmem:[#allocation9 + $0x248] sm:$0xf] }
  0xc5   :  { %v721_v23 = vpop.f32.mrf.mxu3  ;;  %1501 = vmatpush.bf16.msrb.mxu1 %v7085_v18  ;;  %1514 = vmatpush.bf16.msrb.mxu2 %v6897_v19  ;;  %v9763_v18 = vld [vmem:[#allocation9 + $0x25c] sm:$0xf0]  ;;  %v9712_v19 = vld [vmem:[#allocation9 + $0xcc] sm:$0xf] }
  0xc6   :  { %v85_v23 = vstv %s10615_s3  ;;  %1535 = vmatpush.bf16.msra.mxu0 %v7021_v2  ;;  %v7001_v24 = vor.u32 %v9712_v19, %v6998_v20  ;;  %1576 = vmatpush.bf16.msra.mxu3 %v7169_v58  ;;  %v80_v19 = vld [vmem:[%s11135_s4] sm:$0x3]  ;;  %s10685_s4 = sld [smem:[#allocation2 + $0x1]] }
  0xc7   :  { %vm10620_vm1 = vcmp.eq.s32.totalorder %v85_v23, 1  ;;  %v7189_v23 = vor.u32 %v9763_v18, %v7188_v15  ;;  %v7094_v18 = vld [vmem:[#allocation9 + $0x1a0] sm:$0xf0]  ;;  %v10647_v25 = vperm.slane %v80_v19, 0 }
  0xc8   :  { %v10634_v41 = vsel %vm10620_vm1, %v10626_v44, %v10624_v43 }
  0xc9   :  { %1546 = vmatpush.bf16.msra.mxu1 %v7261_v31  ;;  %1559 = vmatpush.bf16.msra.mxu2 %v7073_v34  ;;  %v9709_v31 = vld [vmem:[#allocation9 + $0xac] sm:$0xf0]  ;;  %v875_v58 = vrot.slane %v10634_v41, 4 }
  0xca   :  { %v6973_v32 = vor.u32 %v9709_v31, %v6972_v30  ;;  %v9757_v34 = vld [vmem:[#allocation9 + $0x22c] sm:$0xf0] }
  0xcb   :  { %v7165_v36 = vor.u32 %v9757_v34, %v7164_v33 }
  0xcc   :  { %p893_p1 = scmp.eq.s32.totalorder %s10685_s4, 1 }
  0xcd   :  { %1547 = vmatpush.bf16.msra.mxu1 %v7237_v54  ;;  %1560 = vmatpush.bf16.msra.mxu2 %v7049_v55  ;;  %v9748_v54 = vld [vmem:[#allocation9 + $0x1ec] sm:$0xf]  ;;  %v7142_v55 = vld [vmem:[#allocation9 + $0x200] sm:$0xf0] }
  0xce   :  { %v7145_v56 = vor.u32 %v9748_v54, %v7142_v55  ;;  %s10692_s14 = scalar_select %p893_p1, 1, 0 }
  0xd0   :  { %1577 = vmatpush.bf16.msra.mxu3 %v7145_v56 }
  0xd1   :  { %1548 = vmatpush.bf16.msra.mxu1 %v7213_v7  ;;  %v6929_v7 = vor.u32 %v9694_v1, %v6926_v3  ;;  %v9731_v1 = vld [vmem:[#allocation9 + $0x164] sm:$0xf] }
  0xd2   :  { %v9779_v3 = vld [vmem:[#allocation9 + $0x2e4] sm:$0xf] }
  0xd3   :  { %v732_v8 = vpop.f32.mrf.mxu0 }
  0xd4   :  { %v745_v13 = vpop.f32.mrf.mxu1 }
  0xd5   :  { %v746_v29 = vadd.f32 %v745_v13, %v732_v8  ;;  %v7025_v8 = vor.u32 %v9718_v4, %v7022_v5  ;;  %v6996_v13 = vld [vmem:[#allocation9 + $0xc8] sm:$0xf]  ;;  %1549 = vmatpush.bf16.msra.mxu1 %v7189_v23  ;;  %v9742_v4 = vld [vmem:[#allocation9 + $0x1bc] sm:$0xf]  ;;  %v7118_v5 = vld [vmem:[#allocation9 + $0x1d0] sm:$0xf0] }
  0xd6   :  { %v6997_v17 = vor.u32 %v9715_v14, %v6996_v13  ;;  %v9739_v13 = vld [vmem:[#allocation9 + $0x19c] sm:$0xf0]  ;;  %v9688_v14 = vld [vmem:[#allocation9 + $0xc] sm:$0xf] }
  0xd7   :  { %v832_v50 = vrot.slane %v746_v29, 6  ;;  %1561 = vmatpush.bf16.msra.mxu2 %v7025_v8  ;;  %v7121_v8 = vor.u32 %v9742_v4, %v7118_v5  ;;  %v7270_v4 = vld [vmem:[#allocation9 + $0x2f8] sm:$0xf0] }
  0xd8   :  { %1536 = vmatpush.bf16.msra.mxu0 %v6997_v17  ;;  %v9736_v17 = vld [vmem:[#allocation9 + $0x18c] sm:$0xf] }
  0xd9   :  { %1550 = vmatpush.bf16.msra.mxu1 %v7165_v36  ;;  %1578 = vmatpush.bf16.msra.mxu3 %v7121_v8 }
  0xdb   :  { %v734_v52 = vpop.f32.mrf.mxu0  ;;  %1562 = vmatpush.bf16.msra.mxu2 %v7001_v24 }
  0xdc   :  { %v758_v40 = vpop.f32.mrf.mxu2  ;;  %v747_v61 = vpop.f32.mrf.mxu1  ;;  %1537 = vmatpush.bf16.msra.mxu0 %v6973_v32 }
  0xdd   :  { %v771_v51 = vpop.f32.mrf.mxu3  ;;  %v7116_v61 = vld [vmem:[#allocation9 + $0x1b8] sm:$0xf] }
  0xde   :  { %v772_v60 = vadd.f32 %v771_v51, %v758_v40  ;;  %v6948_v40 = vld [vmem:[#allocation9 + $0x68] sm:$0xf]  ;;  %v7141_v51 = vor.u32 %v9751_v48, %v7140_v46  ;;  %v7117_v2 = vor.u32 %v9745_v0, %v7116_v61  ;;  %v9734_v61 = vld [vmem:[#allocation9 + $0x174] sm:$0xf0] }
  0xdf   :  { %v6949_v47 = vor.u32 %v9703_v45, %v6948_v40  ;;  %1563 = vmatpush.bf16.msra.mxu2 %v6977_v53  ;;  %v9782_v0 = vld [vmem:[#allocation9 + $0x2f4] sm:$0xf0] }
  0xe0   :  { %v833_v6 = vrot.slane %v772_v60, 5  ;;  %v9697_v60 = vld [vmem:[#allocation9 + $0x4c] sm:$0xf0]  ;;  %1551 = vmatpush.bf16.msra.mxu1 %v7141_v51 }
  0xe1   :  { %1538 = vmatpush.bf16.msra.mxu0 %v6949_v47  ;;  %v6925_v63 = vor.u32 %v9697_v60, %v6924_v59 }
  0xe2   :  { %v837_v12 = vsel %vm836_vm2, %v832_v50, %v833_v6  ;;  %v6950_v50 = vld [vmem:[#allocation9 + $0x80] sm:$0xf0] }
  0xe3   :  { %v839_v16 = vsel %vm838_vm3, %v835_v11, %v837_v12  ;;  %v6953_v52 = vor.u32 %v9700_v49, %v6950_v50  ;;  %v6901_v11 = vor.u32 %v9691_v42, %v6900_v10  ;;  %v7092_v12 = vld [vmem:[#allocation9 + $0x188] sm:$0xf]  ;;  %v7052_v42 = vld [vmem:[#allocation9 + $0x130] sm:$0xf] }
  0xe4   :  { %v841_v21 = vadd.f32 %v839_v16, %v10634_v41  ;;  %v760_v22 = vpop.f32.mrf.mxu2  ;;  %1552 = vmatpush.bf16.msra.mxu1 %v7117_v2  ;;  %v7093_v15 = vor.u32 %v9739_v13, %v7092_v12  ;;  %v6902_v16 = vld [vmem:[#allocation9 + $0x20] sm:$0xf0]  ;;  %v7076_v41 = vld [vmem:[#allocation9 + $0x160] sm:$0xf]  ;;  %v7078_v2 = vld [vmem:[#allocation9 + $0x178] sm:$0xf0]  ;;  %v7273_v13 = vor.u32 %v9779_v3, %v7270_v4 }
  0xe5   :  { %v773_v27 = vpop.f32.mrf.mxu3  ;;  %1564 = vmatpush.bf16.msra.mxu2 %v6953_v52  ;;  %1539 = vmatpush.bf16.msra.mxu0 %v6925_v63  ;;  %v6905_v20 = vor.u32 %v9688_v14, %v6902_v16  ;;  %v886_v52 = vlaneseq  ;;  %v7268_v63 = vld [vmem:[#allocation9 + $0x2e0] sm:$0xf]  ;;  %v7081_v12 = vor.u32 %v9731_v1, %v7078_v2  ;;  %v7244_v14 = vld [vmem:[#allocation9 + $0x2b0] sm:$0xf]  ;;  %v9725_v16 = vld [vmem:[#allocation9 + $0x134] sm:$0xf] }
  0xe6   :  { %v6888_v29 = vmul.f32 -1.442695, %v841_v21  ;;  %v7097_v21 = vor.u32 %v9736_v17, %v7094_v18  ;;  %v10649_v27 = vperm.slane %v80_v19, 1  ;;  %v7269_v10 = vor.u32 %v9782_v0, %v7268_v63  ;;  %v7054_v17 = vld [vmem:[#allocation9 + $0x148] sm:$0xf0] }
  0xe7   :  { %vm10658_vm8 = vcmp.lt.s32.totalorder %v886_v52, 256  ;;  %v9773_v18 = vld [vmem:[#allocation9 + $0x2b4] sm:$0xf]  ;;  %v7246_v19 = vld [vmem:[#allocation9 + $0x2c8] sm:$0xf0] }
  0xe8   :  { %10366 = vpow2.f32 %v6888_v29  ;;  %1553 = vmatpush.bf16.msra.mxu1 %v7093_v15  ;;  %1579 = vmatpush.bf16.msra.mxu3 %v7097_v21  ;;  %v9776_v15 = vld [vmem:[#allocation9 + $0x2c4] sm:$0xf0]  ;;  %v6956_v1 = vld [vmem:[#allocation9 + $0x70] sm:$0xf] }
  0xe9   :  { %1565 = vmatpush.bf16.msra.mxu2 %v6929_v7  ;;  %1540 = vmatpush.bf16.msra.mxu0 %v6901_v11  ;;  %v9728_v11 = vld [vmem:[#allocation9 + $0x144] sm:$0xf0]  ;;  %v7245_v21 = vor.u32 %v9776_v15, %v7244_v14  ;;  %v6932_v14 = vld [vmem:[#allocation9 + $0x40] sm:$0xf]  ;;  %v9698_v15 = vld [vmem:[#allocation9 + $0x54] sm:$0xf0] }
  0xea   :  { %v9704_v2 = vld [vmem:[#allocation9 + $0x84] sm:$0xf0] }
  0xed   :  { %1566 = vmatpush.bf16.msra.mxu2 %v6905_v20  ;;  %v7053_v20 = vor.u32 %v9728_v11, %v7052_v42  ;;  %v9749_v42 = vld [vmem:[#allocation9 + $0x1f4] sm:$0xf]  ;;  %v7150_v11 = vld [vmem:[#allocation9 + $0x208] sm:$0xf0] }
  0xee   :  { %v10367_v57 = vpop.eup %10366 }
  0xef   :  { %v10640_v62 = vadd.f32 1.0, %v10367_v57  ;;  %v10414_v57 = vld [vmem:[#allocation7] sm:$0x3] }
  0xf1   :  { %10368 = vrcp.f32 %v10640_v62  ;;  %v857_v32 = vand.u32 2147483648, %v10640_v62  ;;  %v855_v35 = vand.u32 2147483647, %v10640_v62  ;;  %vm851_vm5 = vweird.f32 %v10640_v62 }
  0xf3   :  { %v784_v6 = vpop.f32.mrf.mxu0  ;;  %v858_v39 = vor.u32 1.1754944e-38, %v857_v32  ;;  %vm856_vm7 = vcmp.eq.f32.partialorder %v855_v35, 8.507059e+37  ;;  %v9767_v32 = vld [vmem:[#allocation9 + $0x284] sm:$0xf] }
  0xf4   :  { %v797_v9 = vpop.f32.mrf.mxu1 }
  0xf5   :  { %v798_v24 = vadd.f32 %v797_v9, %v784_v6  ;;  %v7077_v9 = vor.u32 %v9734_v61, %v7076_v41  ;;  %v9755_v41 = vld [vmem:[#allocation9 + $0x224] sm:$0xf]  ;;  %v7174_v61 = vld [vmem:[#allocation9 + $0x238] sm:$0xf0] }
  0xf6   :  { %v7177_v4 = vor.u32 %v9755_v41, %v7174_v61  ;;  %v9870_v41 = vld [vmem:[#allocation9 + $0x2b4] sm:$0xf0]  ;;  %v9819_v61 = vld [vmem:[#allocation9 + $0x124] sm:$0xf] }
  0xf7   :  { %v10369_v22 = vpop.eup %10368  ;;  %v866_v36 = vadd.f32 %v10647_v25, %v798_v24  ;;  %v7057_v24 = vor.u32 %v9725_v16, %v7054_v17  ;;  %v7153_v17 = vor.u32 %v9749_v42, %v7150_v11  ;;  %v9864_v42 = vld [vmem:[#allocation9 + $0x284] sm:$0xf0]  ;;  %v9813_v11 = vld [vmem:[#allocation9 + $0xf4] sm:$0xf] }
  0xf8   :  { %v847_v23 = vmul.f32 %v10369_v22, %v10640_v62  ;;  %vm852_vm4 = vweird.f32 %v10369_v22 }
  0xf9   :  { %vm853_vm6 = vmor %vm851_vm5, %vm852_vm4 }
  0xfa   :  { %v810_v26 = vpop.f32.mrf.mxu2  ;;  %v848_v29 = vsub.f32 1.0, %v847_v23  ;;  %v9722_v23 = vld [vmem:[#allocation9 + $0x114] sm:$0xf0] }
  0xfb   :  { %v823_v28 = vpop.f32.mrf.mxu3  ;;  %v786_v30 = vpop.f32.mrf.mxu0 }
  0xfc   :  { %v824_v31 = vadd.f32 %v823_v28, %v810_v26  ;;  %v799_v33 = vpop.f32.mrf.mxu1  ;;  %v849_v34 = vmul.f32 %v10369_v22, %v848_v29  ;;  %v7249_v26 = vor.u32 %v9773_v18, %v7246_v19  ;;  %v7220_v28 = vld [vmem:[#allocation9 + $0x280] sm:$0xf]  ;;  %v9770_v29 = vld [vmem:[#allocation9 + $0x294] sm:$0xf0]  ;;  %v9719_v30 = vld [vmem:[#allocation9 + $0x104] sm:$0xf] }
  0xfd   :  { %v7222_v33 = vld [vmem:[#allocation9 + $0x298] sm:$0xf0]  ;;  %v7221_v35 = vor.u32 %v9770_v29, %v7220_v28  ;;  %v7124_v18 = vld [vmem:[#allocation9 + $0x1c0] sm:$0xf]  ;;  %v9746_v19 = vld [vmem:[#allocation9 + $0x1d4] sm:$0xf0] }
  0xfe   :  { %v867_v37 = vadd.f32 %v10649_v27, %v824_v31  ;;  %v850_v38 = vadd.f32 %v10369_v22, %v849_v34  ;;  %v7030_v31 = vld [vmem:[#allocation9 + $0x118] sm:$0xf0]  ;;  %v6908_v28 = vld [vmem:[#allocation9 + $0x10] sm:$0xf]  ;;  %v9692_v29 = vld [vmem:[#allocation9 + $0x24] sm:$0xf0] }
 0x100   :  { %v870_v53 = vrot.slane %v867_v37, 7  ;;  %v854_v40 = vsel %vm853_vm6, %v10369_v22, %v850_v38  ;;  %v7028_v22 = vld [vmem:[#allocation9 + $0x100] sm:$0xf]  ;;  %v9716_v37 = vld [vmem:[#allocation9 + $0xe4] sm:$0xf0]  ;;  %v7033_v38 = vor.u32 %v9719_v30, %v7030_v31 }
 0x101   :  { %v859_v45 = vsel %vm856_vm7, %v858_v39, %v854_v40  ;;  %v7029_v34 = vor.u32 %v9722_v23, %v7028_v22  ;;  %v7225_v39 = vor.u32 %v9767_v32, %v7222_v33  ;;  %v9713_v40 = vld [vmem:[#allocation9 + $0xd4] sm:$0xf]  ;;  %v9743_v22 = vld [vmem:[#allocation9 + $0x1c4] sm:$0xf]  ;;  %v7126_v23 = vld [vmem:[#allocation9 + $0x1d8] sm:$0xf0] }
 0x102   :  { %v871_v46 = vsel %vm834_vm0, %v866_v36, %v870_v53  ;;  %v812_v47 = vpop.f32.mrf.mxu2  ;;  %v880_v51 = vrot.slane %v859_v45, 2  ;;  %v7004_v36 = vld [vmem:[#allocation9 + $0xd0] sm:$0xf]  ;;  %v7129_v31 = vor.u32 %v9743_v22, %v7126_v23  ;;  %v9740_v33 = vld [vmem:[#allocation9 + $0x1a4] sm:$0xf0] }
 0x103   :  { %v873_v48 = vmul.f32 %v871_v46, %v859_v45  ;;  %v825_v49 = vpop.f32.mrf.mxu3  ;;  %v7196_v53 = vld [vmem:[#allocation9 + $0x250] sm:$0xf]  ;;  %v7006_v45 = vld [vmem:[#allocation9 + $0xe8] sm:$0xf0]  ;;  %v9761_v46 = vld [vmem:[#allocation9 + $0x254] sm:$0xf] }
 0x104   :  { %v882_v54 = vsub.f32 1.0, %v880_v51  ;;  %v884_v59 = vmul.f32 %v10414_v57, %v880_v51  ;;  %v7198_v47 = vld [vmem:[#allocation9 + $0x268] sm:$0xf0]  ;;  %v9710_v51 = vld [vmem:[#allocation9 + $0xb4] sm:$0xf0]  ;;  %v7009_v52 = vor.u32 %v9713_v40, %v7006_v45 }
 0x105   :  { %v877_v50 = vadd.f32 %v875_v58, %v873_v48  ;;  %v9764_v58 = vld [vmem:[#allocation9 + $0x264] sm:$0xf0]  ;;  %v7005_v48 = vor.u32 %v9716_v37, %v7004_v36  ;;  %v9707_v57 = vld [vmem:[#allocation9 + $0xa4] sm:$0xf]  ;;  %v7100_v32 = vld [vmem:[#allocation9 + $0x190] sm:$0xf] }
 0x106   :  { %v7197_v49 = vor.u32 %v9764_v58, %v7196_v53  ;;  %v9737_v36 = vld [vmem:[#allocation9 + $0x194] sm:$0xf]  ;;  %v7102_v37 = vld [vmem:[#allocation9 + $0x1a8] sm:$0xf0]  ;;  %v7446_v40 = vld [vmem:[#allocation9 + $0x150] sm:$0xf] }
 0x107   :  { %10370 = vtanh.f32 %v877_v50  ;;  %v6980_v50 = vld [vmem:[#allocation9 + $0xa0] sm:$0xf]  ;;  %v7105_v58 = vor.u32 %v9737_v36, %v7102_v37  ;;  %v9828_v45 = vld [vmem:[#allocation9 + $0x164] sm:$0xf0]  ;;  %v7542_v36 = vld [vmem:[#allocation9 + $0x210] sm:$0xf] }
 0x108   :  { %v6981_v63 = vor.u32 %v9710_v51, %v6980_v50  ;;  %v7448_v50 = vld [vmem:[#allocation9 + $0x168] sm:$0xf0]  ;;  %v7566_v22 = vld [vmem:[#allocation9 + $0x240] sm:$0xf] }
 0x10d   :  { %v10371_v55 = vpop.eup %10370 }
 0x10e   :  { %v883_v56 = vmul.f32 %v10371_v55, %v882_v54  ;;  %v7201_v54 = vor.u32 %v9761_v46, %v7198_v47  ;;  %v7172_v55 = vld [vmem:[#allocation9 + $0x220] sm:$0xf]  ;;  %v7638_v46 = vld [vmem:[#allocation9 + $0x2d0] sm:$0xf]  ;;  %v7447_v47 = vor.u32 %v9828_v45, %v7446_v40  ;;  %v9849_v45 = vld [vmem:[#allocation9 + $0x214] sm:$0xf] }
 0x110   :  { %v10662_v62 = vadd.f32 %v884_v59, %v883_v56  ;;  %v9758_v56 = vld [vmem:[#allocation9 + $0x234] sm:$0xf0]  ;;  %v6982_v59 = vld [vmem:[#allocation9 + $0xb8] sm:$0xf0] }
 0x111   :  { %v7173_v0 = vor.u32 %v9758_v56, %v7172_v55  ;;  %v6985_v3 = vor.u32 %v9707_v57, %v6982_v59  ;;  %v7640_v55 = vld [vmem:[#allocation9 + $0x2e8] sm:$0xf0]  ;;  %v7422_v57 = vld [vmem:[#allocation9 + $0x120] sm:$0xf] }
 0x112   :  { %890 = vst.msk [vmem:[#allocation10] ss:$8 sm:$0x3] %vm10658_vm8, %v10662_v62  ;;  %v899_v5 = vperm.slane %v10662_v62, 0  ;;  %v900_v6 = vperm.slane %v10662_v62, 1 }
 0x114   :  { %v10669_v7 = vpack.c.bf16 %v899_v5, %v899_v5  ;;  %v10671_v8 = vpack.c.bf16 %v900_v6, %v900_v6  ;;  %v7148_v5 = vld [vmem:[#allocation9 + $0x1f0] sm:$0xf]  ;;  %v9752_v6 = vld [vmem:[#allocation9 + $0x204] sm:$0xf0] }
 0x116   :  { %1489 = vmatmul.bf16.vlgmr.msrb.gmra.mxu0 %v10669_v7  ;;  %1502 = vmatmul.bf16.vlgmr.msrb.gmra.mxu1 %v10671_v8 }
 0x117   :  { %1515 = vmatmul.bf16.vlgmr.msrb.gmra.mxu2 %v10669_v7  ;;  %1528 = vmatmul.bf16.vlgmr.msrb.gmra.mxu3 %v10671_v8 }
 0x118   :  { %1585 = vmatpush.bf16.msrb.mxu0 %v7077_v9  ;;  %1598 = vmatpush.bf16.msrb.mxu1 %v7269_v10  ;;  %v9701_v9 = vld [vmem:[#allocation9 + $0x74] sm:$0xf]  ;;  %v6958_v10 = vld [vmem:[#allocation9 + $0x88] sm:$0xf0] }
 0x119   :  { %1611 = vmatpush.bf16.msrb.mxu2 %v7081_v12  ;;  %1624 = vmatpush.bf16.msrb.mxu3 %v7273_v13  ;;  %v6957_v12 = vor.u32 %v9704_v2, %v6956_v1  ;;  %v7149_v13 = vor.u32 %v9752_v6, %v7148_v5  ;;  %v6961_v16 = vor.u32 %v9701_v9, %v6958_v10  ;;  %v9867_v1 = vld [vmem:[#allocation9 + $0x2a4] sm:$0xf]  ;;  %v7616_v2 = vld [vmem:[#allocation9 + $0x2b8] sm:$0xf0]  ;;  %v7398_v5 = vld [vmem:[#allocation9 + $0xf0] sm:$0xf] }
 0x11a   :  { %v9816_v6 = vld [vmem:[#allocation9 + $0x104] sm:$0xf0]  ;;  %v7590_v9 = vld [vmem:[#allocation9 + $0x270] sm:$0xf] }
 0x11b   :  { %v7399_v10 = vor.u32 %v9816_v6, %v7398_v5  ;;  %v9840_v5 = vld [vmem:[#allocation9 + $0x1c4] sm:$0xf0]  ;;  %v9789_v6 = vld [vmem:[#allocation9 + $0x34] sm:$0xf] }
 0x11c   :  { %1586 = vmatpush.bf16.msrb.mxu0 %v7053_v20  ;;  %1599 = vmatpush.bf16.msrb.mxu1 %v7245_v21  ;;  %v9695_v20 = vld [vmem:[#allocation9 + $0x44] sm:$0xf]  ;;  %v6934_v21 = vld [vmem:[#allocation9 + $0x58] sm:$0xf0] }
 0x11d   :  { %1612 = vmatpush.bf16.msrb.mxu2 %v7057_v24  ;;  %1625 = vmatpush.bf16.msrb.mxu3 %v7249_v26  ;;  %v6933_v24 = vor.u32 %v9698_v15, %v6932_v14  ;;  %v7125_v26 = vor.u32 %v9746_v19, %v7124_v18  ;;  %v6937_v30 = vor.u32 %v9695_v20, %v6934_v21  ;;  %v9861_v15 = vld [vmem:[#allocation9 + $0x274] sm:$0xf]  ;;  %v7374_v20 = vld [vmem:[#allocation9 + $0xc0] sm:$0xf]  ;;  %v9810_v21 = vld [vmem:[#allocation9 + $0xd4] sm:$0xf0] }
 0x11e   :  { %v7375_v23 = vor.u32 %v9810_v21, %v7374_v20  ;;  %v895_v20 = vstv %s10692_s14 }
 0x11f   :  { %vm10698_vm9 = vcmp.eq.s32.totalorder %v895_v20, 1 }
 0x120   :  { %1587 = vmatpush.bf16.msrb.mxu0 %v7029_v34  ;;  %1600 = vmatpush.bf16.msrb.mxu1 %v7221_v35  ;;  %v9689_v34 = vld [vmem:[#allocation9 + $0x14] sm:$0xf]  ;;  %v6910_v35 = vld [vmem:[#allocation9 + $0x28] sm:$0xf0] }
 0x121   :  { %1613 = vmatpush.bf16.msrb.mxu2 %v7033_v38  ;;  %1626 = vmatpush.bf16.msrb.mxu3 %v7225_v39  ;;  %v6909_v38 = vor.u32 %v9692_v29, %v6908_v28  ;;  %v7101_v39 = vor.u32 %v9740_v33, %v7100_v32  ;;  %v6913_v53 = vor.u32 %v9689_v34, %v6910_v35  ;;  %v7376_v28 = vld [vmem:[#allocation9 + $0xd8] sm:$0xf0]  ;;  %v7350_v34 = vld [vmem:[#allocation9 + $0x90] sm:$0xf]  ;;  %v9804_v35 = vld [vmem:[#allocation9 + $0xa4] sm:$0xf0] }
 0x122   :  { %v7568_v32 = vld [vmem:[#allocation9 + $0x258] sm:$0xf0]  ;;  %v7351_v37 = vor.u32 %v9804_v35, %v7350_v34  ;;  %v9831_v35 = vld [vmem:[#allocation9 + $0x184] sm:$0xf] }
 0x124   :  { %1588 = vmatpush.bf16.msrb.mxu0 %v7005_v48  ;;  %1601 = vmatpush.bf16.msrb.mxu1 %v7197_v49  ;;  %v9876_v48 = vld [vmem:[#allocation9 + $0x2e4] sm:$0xf0]  ;;  %v9825_v49 = vld [vmem:[#allocation9 + $0x154] sm:$0xf] }
 0x125   :  { %1614 = vmatpush.bf16.msrb.mxu2 %v7009_v52  ;;  %1627 = vmatpush.bf16.msrb.mxu3 %v7201_v54  ;;  %v7639_v51 = vor.u32 %v9876_v48, %v7638_v46  ;;  %v7451_v52 = vor.u32 %v9825_v49, %v7448_v50  ;;  %v9873_v54 = vld [vmem:[#allocation9 + $0x2d4] sm:$0xf]  ;;  %v7544_v46 = vld [vmem:[#allocation9 + $0x228] sm:$0xf0] }
 0x126   :  { %1541 = vmatmul.bf16.vlgmr.msra.gmra.mxu0 %v10669_v7  ;;  %1554 = vmatmul.bf16.vlgmr.msra.gmra.mxu1 %v10671_v8  ;;  %v7643_v56 = vor.u32 %v9873_v54, %v7640_v55  ;;  %v7547_v49 = vor.u32 %v9849_v45, %v7544_v46  ;;  %v9798_v54 = vld [vmem:[#allocation9 + $0x74] sm:$0xf0]  ;;  %v7518_v55 = vld [vmem:[#allocation9 + $0x1e0] sm:$0xf]  ;;  %v9826_v45 = vld [vmem:[#allocation9 + $0x15c] sm:$0xf] }
 0x127   :  { %1567 = vmatmul.bf16.vlgmr.msra.gmra.mxu2 %v10669_v7  ;;  %1580 = vmatmul.bf16.vlgmr.msra.gmra.mxu3 %v10671_v8  ;;  %v7456_v46 = vld [vmem:[#allocation9 + $0x170] sm:$0xf0] }
 0x128   :  { %1589 = vmatpush.bf16.msrb.mxu0 %v6981_v63  ;;  %1602 = vmatpush.bf16.msrb.mxu1 %v7173_v0  ;;  %v7424_v0 = vld [vmem:[#allocation9 + $0x138] sm:$0xf0] }
 0x129   :  { %1615 = vmatpush.bf16.msrb.mxu2 %v6985_v3  ;;  %1628 = vmatpush.bf16.msrb.mxu3 %v7177_v4  ;;  %v7427_v3 = vor.u32 %v9819_v61, %v7424_v0  ;;  %v7619_v4 = vor.u32 %v9867_v1, %v7616_v2  ;;  %v7302_v1 = vld [vmem:[#allocation9 + $0x30] sm:$0xf]  ;;  %v9792_v2 = vld [vmem:[#allocation9 + $0x44] sm:$0xf0] }
 0x12c   :  { %1590 = vmatpush.bf16.msrb.mxu0 %v6957_v12  ;;  %1603 = vmatpush.bf16.msrb.mxu1 %v7149_v13  ;;  %v7400_v12 = vld [vmem:[#allocation9 + $0x108] sm:$0xf0]  ;;  %v7591_v13 = vor.u32 %v9864_v42, %v7590_v9 }
 0x12d   :  { %1616 = vmatpush.bf16.msrb.mxu2 %v6961_v16  ;;  %1629 = vmatpush.bf16.msrb.mxu3 %v7153_v17  ;;  %v7403_v14 = vor.u32 %v9813_v11, %v7400_v12  ;;  %v7592_v16 = vld [vmem:[#allocation9 + $0x288] sm:$0xf0] }
 0x12e   :  { %v7595_v17 = vor.u32 %v9861_v15, %v7592_v16  ;;  %v7304_v9 = vld [vmem:[#allocation9 + $0x48] sm:$0xf0] }
 0x12f   :  { %v7496_v15 = vld [vmem:[#allocation9 + $0x1c8] sm:$0xf0] }
 0x130   :  { %1591 = vmatpush.bf16.msrb.mxu0 %v6933_v24  ;;  %1604 = vmatpush.bf16.msrb.mxu1 %v7125_v26  ;;  %v9858_v24 = vld [vmem:[#allocation9 + $0x254] sm:$0xf0]  ;;  %v9807_v26 = vld [vmem:[#allocation9 + $0xc4] sm:$0xf] }
 0x131   :  { %1617 = vmatpush.bf16.msrb.mxu2 %v6937_v30  ;;  %1630 = vmatpush.bf16.msrb.mxu3 %v7129_v31  ;;  %v7567_v29 = vor.u32 %v9858_v24, %v7566_v22  ;;  %v7379_v30 = vor.u32 %v9807_v26, %v7376_v28  ;;  %v9855_v31 = vld [vmem:[#allocation9 + $0x244] sm:$0xf]  ;;  %v7278_v22 = vld [vmem:[#allocation9] sm:$0xf]  ;;  %v9834_v28 = vld [vmem:[#allocation9 + $0x194] sm:$0xf0] }
 0x132   :  { %v7571_v33 = vor.u32 %v9855_v31, %v7568_v32  ;;  %v7470_v24 = vld [vmem:[#allocation9 + $0x180] sm:$0xf] }
 0x134   :  { %1592 = vmatpush.bf16.msrb.mxu0 %v6909_v38  ;;  %1605 = vmatpush.bf16.msrb.mxu1 %v7101_v39  ;;  %v9852_v38 = vld [vmem:[#allocation9 + $0x224] sm:$0xf0]  ;;  %v9801_v39 = vld [vmem:[#allocation9 + $0x94] sm:$0xf] }
 0x135   :  { %1618 = vmatpush.bf16.msrb.mxu2 %v6913_v53  ;;  %1631 = vmatpush.bf16.msrb.mxu3 %v7105_v58  ;;  %v7352_v53 = vld [vmem:[#allocation9 + $0xa8] sm:$0xf0]  ;;  %v7543_v58 = vor.u32 %v9852_v38, %v7542_v36  ;;  %v7472_v36 = vld [vmem:[#allocation9 + $0x198] sm:$0xf0]  ;;  %v7454_v38 = vld [vmem:[#allocation9 + $0x158] sm:$0xf] }
 0x136   :  { %v7355_v40 = vor.u32 %v9801_v39, %v7352_v53  ;;  %v9829_v39 = vld [vmem:[#allocation9 + $0x16c] sm:$0xf0]  ;;  %v7646_v53 = vld [vmem:[#allocation9 + $0x2d8] sm:$0xf] }
 0x137   :  { %1593 = vmatmul.bf16.vlgmr.msrb.gmra.mxu0 %v10669_v7  ;;  %1606 = vmatmul.bf16.vlgmr.msrb.gmra.mxu1 %v10671_v8 }
 0x138   :  { %1619 = vmatmul.bf16.vlgmr.msrb.gmra.mxu2 %v10669_v7  ;;  %1632 = vmatmul.bf16.vlgmr.msrb.gmra.mxu3 %v10671_v8  ;;  %v9822_v7 = vld [vmem:[#allocation9 + $0x134] sm:$0xf0]  ;;  %v7614_v8 = vld [vmem:[#allocation9 + $0x2a0] sm:$0xf] }
 0x139   :  { %2280 = vmatpush.bf16.msra.mxu0 %v7447_v47  ;;  %2293 = vmatpush.bf16.msra.mxu1 %v7639_v51  ;;  %v7423_v59 = vor.u32 %v9822_v7, %v7422_v57  ;;  %v7615_v63 = vor.u32 %v9870_v41, %v7614_v8  ;;  %v9846_v57 = vld [vmem:[#allocation9 + $0x1f4] sm:$0xf0]  ;;  %v9795_v7 = vld [vmem:[#allocation9 + $0x64] sm:$0xf]  ;;  %v7328_v8 = vld [vmem:[#allocation9 + $0x78] sm:$0xf0] }
 0x13a   :  { %2306 = vmatpush.bf16.msra.mxu2 %v7451_v52  ;;  %2319 = vmatpush.bf16.msra.mxu3 %v7643_v56  ;;  %v7326_v52 = vld [vmem:[#allocation9 + $0x60] sm:$0xf]  ;;  %v9843_v41 = vld [vmem:[#allocation9 + $0x1e4] sm:$0xf]  ;;  %v7331_v61 = vor.u32 %v9795_v7, %v7328_v8  ;;  %v7622_v7 = vld [vmem:[#allocation9 + $0x2a8] sm:$0xf] }
 0x13b   :  { %v7327_v56 = vor.u32 %v9798_v54, %v7326_v52  ;;  %v7430_v52 = vld [vmem:[#allocation9 + $0x128] sm:$0xf] }
 0x13d   :  { %2281 = vmatpush.bf16.msra.mxu0 %v7423_v59  ;;  %2294 = vmatpush.bf16.msra.mxu1 %v7615_v63  ;;  %v7519_v59 = vor.u32 %v9846_v57, %v7518_v55  ;;  %v7520_v63 = vld [vmem:[#allocation9 + $0x1f8] sm:$0xf0]  ;;  %v9823_v57 = vld [vmem:[#allocation9 + $0x13c] sm:$0xf0] }
 0x13e   :  { %2307 = vmatpush.bf16.msra.mxu2 %v7427_v3  ;;  %2320 = vmatpush.bf16.msra.mxu3 %v7619_v4  ;;  %v7523_v0 = vor.u32 %v9843_v41, %v7520_v63  ;;  %v7494_v3 = vld [vmem:[#allocation9 + $0x1b0] sm:$0xf]  ;;  %v7303_v4 = vor.u32 %v9792_v2, %v7302_v1  ;;  %v7431_v63 = vor.u32 %v9823_v57, %v7430_v52  ;;  %v9820_v1 = vld [vmem:[#allocation9 + $0x12c] sm:$0xf]  ;;  %v7432_v2 = vld [vmem:[#allocation9 + $0x140] sm:$0xf0] }
 0x13f   :  { %v7495_v12 = vor.u32 %v9840_v5, %v7494_v3  ;;  %v9868_v3 = vld [vmem:[#allocation9 + $0x2ac] sm:$0xf]  ;;  %v7624_v5 = vld [vmem:[#allocation9 + $0x2c0] sm:$0xf0]  ;;  %v9802_v52 = vld [vmem:[#allocation9 + $0x9c] sm:$0xf] }
 0x140   :  { %v9850_v57 = vld [vmem:[#allocation9 + $0x21c] sm:$0xf] }
 0x141   :  { %2282 = vmatpush.bf16.msra.mxu0 %v7399_v10  ;;  %2295 = vmatpush.bf16.msra.mxu1 %v7591_v13  ;;  %v7307_v13 = vor.u32 %v9789_v6, %v7304_v9 }
 0x142   :  { %2308 = vmatpush.bf16.msra.mxu2 %v7403_v14  ;;  %2321 = vmatpush.bf16.msra.mxu3 %v7595_v17  ;;  %v9837_v14 = vld [vmem:[#allocation9 + $0x1b4] sm:$0xf] }
 0x143   :  { %v7499_v21 = vor.u32 %v9837_v14, %v7496_v15  ;;  %v7598_v15 = vld [vmem:[#allocation9 + $0x278] sm:$0xf] }
 0x145   :  { %2283 = vmatpush.bf16.msra.mxu0 %v7375_v23  ;;  %2296 = vmatpush.bf16.msra.mxu1 %v7567_v29  ;;  %v9786_v23 = vld [vmem:[#allocation9 + $0x14] sm:$0xf0]  ;;  %v9783_v29 = vld [vmem:[#allocation9 + $0x4] sm:$0xf] }
 0x146   :  { %2309 = vmatpush.bf16.msra.mxu2 %v7379_v30  ;;  %2322 = vmatpush.bf16.msra.mxu3 %v7571_v33  ;;  %v7279_v26 = vor.u32 %v9786_v23, %v7278_v22  ;;  %v7280_v30 = vld [vmem:[#allocation9 + $0x18] sm:$0xf0]  ;;  %v7471_v33 = vor.u32 %v9834_v28, %v7470_v24  ;;  %v7600_v23 = vld [vmem:[#allocation9 + $0x290] sm:$0xf0]  ;;  %v7382_v28 = vld [vmem:[#allocation9 + $0xc8] sm:$0xf] }
 0x147   :  { %v7283_v34 = vor.u32 %v9783_v29, %v7280_v30  ;;  %v9862_v22 = vld [vmem:[#allocation9 + $0x27c] sm:$0xf]  ;;  %v9811_v29 = vld [vmem:[#allocation9 + $0xdc] sm:$0xf0]  ;;  %v7574_v30 = vld [vmem:[#allocation9 + $0x248] sm:$0xf] }
 0x149   :  { %2284 = vmatpush.bf16.msra.mxu0 %v7351_v37  ;;  %2297 = vmatpush.bf16.msra.mxu1 %v7543_v58  ;;  %v7475_v37 = vor.u32 %v9831_v35, %v7472_v36  ;;  %v7455_v58 = vor.u32 %v9829_v39, %v7454_v38  ;;  %v9808_v35 = vld [vmem:[#allocation9 + $0xcc] sm:$0xf]  ;;  %v7384_v36 = vld [vmem:[#allocation9 + $0xe0] sm:$0xf0] }
 0x14a   :  { %2310 = vmatpush.bf16.msra.mxu2 %v7355_v40  ;;  %2323 = vmatpush.bf16.msra.mxu3 %v7547_v49  ;;  %v9877_v40 = vld [vmem:[#allocation9 + $0x2ec] sm:$0xf0]  ;;  %v7459_v49 = vor.u32 %v9826_v45, %v7456_v46  ;;  %v7387_v39 = vor.u32 %v9808_v35, %v7384_v36 }
 0x14d   :  { %2285 = vmatpush.bf16.msra.mxu0 %v7327_v56  ;;  %2298 = vmatpush.bf16.msra.mxu1 %v7519_v59  ;;  %v9871_v59 = vld [vmem:[#allocation9 + $0x2bc] sm:$0xf0] }
 0x14e   :  { %2311 = vmatpush.bf16.msra.mxu2 %v7331_v61  ;;  %2324 = vmatpush.bf16.msra.mxu3 %v7523_v0  ;;  %v7623_v0 = vor.u32 %v9871_v59, %v7622_v7  ;;  %v7552_v7 = vld [vmem:[#allocation9 + $0x230] sm:$0xf0] }
 0x14f   :  { %v7555_v59 = vor.u32 %v9850_v57, %v7552_v7 }
 0x151   :  { %2286 = vmatpush.bf16.msra.mxu0 %v7303_v4  ;;  %2299 = vmatpush.bf16.msra.mxu1 %v7495_v12  ;;  %v7435_v4 = vor.u32 %v9820_v1, %v7432_v2  ;;  %v9817_v12 = vld [vmem:[#allocation9 + $0x10c] sm:$0xf0]  ;;  %v9796_v1 = vld [vmem:[#allocation9 + $0x6c] sm:$0xf]  ;;  %v7336_v2 = vld [vmem:[#allocation9 + $0x80] sm:$0xf0] }
 0x152   :  { %2312 = vmatpush.bf16.msra.mxu2 %v7307_v13  ;;  %2325 = vmatpush.bf16.msra.mxu3 %v7499_v21  ;;  %v10708_v13 = vsel %vm10698_vm9, %v10626_v44, %v10624_v43  ;;  %v7408_v21 = vld [vmem:[#allocation9 + $0x110] sm:$0xf0]  ;;  %v7603_v44 = vor.u32 %v9862_v22, %v7600_v23  ;;  %v9790_v22 = vld [vmem:[#allocation9 + $0x3c] sm:$0xf] }
 0x153   :  { %v7312_v23 = vld [vmem:[#allocation9 + $0x50] sm:$0xf0] }
 0x155   :  { %2287 = vmatpush.bf16.msra.mxu0 %v7279_v26  ;;  %2300 = vmatpush.bf16.msra.mxu1 %v7471_v33  ;;  %v7383_v33 = vor.u32 %v9811_v29, %v7382_v28  ;;  %v7286_v28 = vld [vmem:[#allocation9 + $0x8] sm:$0xf]  ;;  %v9787_v29 = vld [vmem:[#allocation9 + $0x1c] sm:$0xf0] }
 0x156   :  { %2313 = vmatpush.bf16.msra.mxu2 %v7283_v34  ;;  %2326 = vmatpush.bf16.msra.mxu3 %v7475_v37  ;;  %v9859_v34 = vld [vmem:[#allocation9 + $0x25c] sm:$0xf0] }
 0x157   :  { %v7575_v38 = vor.u32 %v9859_v34, %v7574_v30  ;;  %v9784_v34 = vld [vmem:[#allocation9 + $0xc] sm:$0xf] }
 0x159   :  { %2332 = vmatpush.bf16.msrb.mxu0 %v7455_v58  ;;  %v7576_v58 = vld [vmem:[#allocation9 + $0x260] sm:$0xf0] }
 0x15a   :  { %2358 = vmatpush.bf16.msrb.mxu2 %v7459_v49  ;;  %v7550_v49 = vld [vmem:[#allocation9 + $0x218] sm:$0xf] }
 0x15d   :  { %2333 = vmatpush.bf16.msrb.mxu0 %v7431_v63 }
 0x15e   :  { %2359 = vmatpush.bf16.msrb.mxu2 %v7435_v4 }
 0x193   :  { %v10687_v18 = vpop.f32.mrf.mxu0  ;;  %v10689_v19 = vpop.f32.mrf.mxu1 }
 0x194   :  { %v1504_v6 = vadd.f32 %v10689_v19, %v10687_v18 }
 0x19a   :  { %v1516_v47 = vpop.f32.mrf.mxu2  ;;  %v1529_v48 = vpop.f32.mrf.mxu3 }
 0x19b   :  { %v1492_v50 = vpop.f32.mrf.mxu0  ;;  %v1505_v51 = vpop.f32.mrf.mxu1  ;;  %v10694_v10 = vadd.f32 %v1529_v48, %v1516_v47  ;;  %v7647_v48 = vor.u32 %v9877_v40, %v7646_v53  ;;  %v9856_v53 = vld [vmem:[#allocation9 + $0x24c] sm:$0xf] }
 0x19c   :  { %v9874_v50 = vld [vmem:[#allocation9 + $0x2dc] sm:$0xf]  ;;  %v7648_v51 = vld [vmem:[#allocation9 + $0x2f0] sm:$0xf0]  ;;  %v7579_v46 = vor.u32 %v9856_v53, %v7576_v58  ;;  %v7480_v53 = vld [vmem:[#allocation9 + $0x1a0] sm:$0xf0] }
 0x19d   :  { %v1641_v31 = vrot.slane %v10694_v10, 7  ;;  %v7651_v56 = vor.u32 %v9874_v50, %v7648_v51  ;;  %2345 = vmatpush.bf16.msrb.mxu1 %v7647_v48  ;;  %v9805_v48 = vld [vmem:[#allocation9 + $0xac] sm:$0xf0] }
 0x19e   :  { %v9853_v51 = vld [vmem:[#allocation9 + $0x22c] sm:$0xf0] }
 0x19f   :  { %2371 = vmatpush.bf16.msrb.mxu3 %v7651_v56  ;;  %v1644_v20 = vsel %vm834_vm0, %v1504_v6, %v1641_v31 }
 0x1a1   :  { %2346 = vmatpush.bf16.msrb.mxu1 %v7623_v0  ;;  %v9847_v0 = vld [vmem:[#allocation9 + $0x1fc] sm:$0xf0] }
 0x1a2   :  { %v1518_v42 = vpop.f32.mrf.mxu2  ;;  %v1531_v11 = vpop.f32.mrf.mxu3 }
 0x1a3   :  { %v1542_v16 = vpop.f32.mrf.mxu0  ;;  %v1555_v17 = vpop.f32.mrf.mxu1  ;;  %v7627_v42 = vor.u32 %v9868_v3, %v7624_v5  ;;  %v7406_v11 = vld [vmem:[#allocation9 + $0xf8] sm:$0xf] }
 0x1a4   :  { %v1556_v47 = vadd.f32 %v1555_v17, %v1542_v16  ;;  %v7407_v14 = vor.u32 %v9817_v12, %v7406_v11  ;;  %v9865_v16 = vld [vmem:[#allocation9 + $0x28c] sm:$0xf0]  ;;  %v9814_v17 = vld [vmem:[#allocation9 + $0xfc] sm:$0xf] }
 0x1a5   :  { %v7599_v19 = vor.u32 %v9865_v16, %v7598_v15  ;;  %2372 = vmatpush.bf16.msrb.mxu3 %v7627_v42  ;;  %v7411_v43 = vor.u32 %v9814_v17, %v7408_v21  ;;  %v7528_v42 = vld [vmem:[#allocation9 + $0x200] sm:$0xf0]  ;;  %v7310_v16 = vld [vmem:[#allocation9 + $0x38] sm:$0xf]  ;;  %v9793_v17 = vld [vmem:[#allocation9 + $0x4c] sm:$0xf0] }
 0x1a6   :  { %v1642_v9 = vrot.slane %v1556_v47, 6  ;;  %2334 = vmatpush.bf16.msrb.mxu0 %v7407_v14  ;;  %v7358_v47 = vld [vmem:[#allocation9 + $0x98] sm:$0xf] }
 0x1a7   :  { %2347 = vmatpush.bf16.msrb.mxu1 %v7599_v19  ;;  %2360 = vmatpush.bf16.msrb.mxu2 %v7411_v43  ;;  %v7359_v50 = vor.u32 %v9805_v48, %v7358_v47  ;;  %v7311_v19 = vor.u32 %v9793_v17, %v7310_v16  ;;  %v7315_v43 = vor.u32 %v9790_v22, %v7312_v23 }
 0x1a9   :  { %2373 = vmatpush.bf16.msrb.mxu3 %v7603_v44  ;;  %v7504_v44 = vld [vmem:[#allocation9 + $0x1d0] sm:$0xf0] }
 0x1aa   :  { %v1568_v54 = vpop.f32.mrf.mxu2  ;;  %v1581_v55 = vpop.f32.mrf.mxu3  ;;  %2335 = vmatpush.bf16.msrb.mxu0 %v7383_v33  ;;  %v9835_v33 = vld [vmem:[#allocation9 + $0x19c] sm:$0xf0] }
 0x1ab   :  { %v1582_v8 = vadd.f32 %v1581_v55, %v1568_v54  ;;  %v1544_v41 = vpop.f32.mrf.mxu0  ;;  %v1557_v61 = vpop.f32.mrf.mxu1  ;;  %v7360_v54 = vld [vmem:[#allocation9 + $0xb0] sm:$0xf0]  ;;  %2348 = vmatpush.bf16.msrb.mxu1 %v7575_v38  ;;  %2361 = vmatpush.bf16.msrb.mxu2 %v7387_v39  ;;  %v7551_v55 = vor.u32 %v9853_v51, %v7550_v49  ;;  %v7288_v38 = vld [vmem:[#allocation9 + $0x20] sm:$0xf0]  ;;  %v9832_v39 = vld [vmem:[#allocation9 + $0x18c] sm:$0xf] }
 0x1ac   :  { %v7363_v56 = vor.u32 %v9802_v52, %v7360_v54  ;;  %v9799_v41 = vld [vmem:[#allocation9 + $0x7c] sm:$0xf0]  ;;  %v7526_v61 = vld [vmem:[#allocation9 + $0x1e8] sm:$0xf]  ;;  %v7483_v47 = vor.u32 %v9832_v39, %v7480_v53  ;;  %v7416_v39 = vld [vmem:[#allocation9 + $0x118] sm:$0xf0] }
 0x1ad   :  { %v1643_v10 = vrot.slane %v1582_v8, 5  ;;  %2374 = vmatpush.bf16.msrb.mxu3 %v7579_v46  ;;  %v7334_v8 = vld [vmem:[#allocation9 + $0x68] sm:$0xf]  ;;  %v7527_v6 = vor.u32 %v9847_v0, %v7526_v61  ;;  %v7291_v46 = vor.u32 %v9784_v34, %v7288_v38  ;;  %v9815_v38 = vld [vmem:[#allocation9 + $0x104] sm:$0xf] }
 0x1ae   :  { %2336 = vmatpush.bf16.msrb.mxu0 %v7359_v50  ;;  %v7335_v63 = vor.u32 %v9799_v41, %v7334_v8  ;;  %v1677_v8 = vrot.slane %v10708_v13, 4  ;;  %v9863_v53 = vld [vmem:[#allocation9 + $0x284] sm:$0xf] }
 0x1af   :  { %v1645_v18 = vsel %vm836_vm2, %v1642_v9, %v1643_v10  ;;  %2349 = vmatpush.bf16.msrb.mxu1 %v7551_v55  ;;  %2362 = vmatpush.bf16.msrb.mxu2 %v7363_v56  ;;  %v7339_v9 = vor.u32 %v9796_v1, %v7336_v2  ;;  %v9844_v10 = vld [vmem:[#allocation9 + $0x1ec] sm:$0xf] }
 0x1b0   :  { %v1646_v24 = vsel %vm838_vm3, %v1644_v20, %v1645_v18  ;;  %v7531_v15 = vor.u32 %v9844_v10, %v7528_v42  ;;  %v7502_v20 = vld [vmem:[#allocation9 + $0x1b8] sm:$0xf]  ;;  %v9841_v18 = vld [vmem:[#allocation9 + $0x1cc] sm:$0xf0]  ;;  %v7654_v10 = vld [vmem:[#allocation9 + $0x2e0] sm:$0xf] }
 0x1b1   :  { %v1648_v26 = vadd.f32 %v1646_v24, %v10708_v13  ;;  %2375 = vmatpush.bf16.msrb.mxu3 %v7555_v59  ;;  %v7503_v21 = vor.u32 %v9841_v18, %v7502_v20  ;;  %v9838_v24 = vld [vmem:[#allocation9 + $0x1bc] sm:$0xf]  ;;  %v9878_v13 = vld [vmem:[#allocation9 + $0x2f4] sm:$0xf0]  ;;  %v9827_v42 = vld [vmem:[#allocation9 + $0x164] sm:$0xf] }
 0x1b2   :  { %v1570_v32 = vpop.f32.mrf.mxu2  ;;  %v1583_v31 = vpop.f32.mrf.mxu3  ;;  %2337 = vmatpush.bf16.msrb.mxu0 %v7335_v63  ;;  %v7655_v18 = vor.u32 %v9878_v13, %v7654_v10  ;;  %v7342_v10 = vld [vmem:[#allocation9 + $0x70] sm:$0xf]  ;;  %v9800_v13 = vld [vmem:[#allocation9 + $0x84] sm:$0xf0] }
 0x1b3   :  { %v7274_v37 = vmul.f32 -1.442695, %v1648_v26  ;;  %2350 = vmatpush.bf16.msrb.mxu1 %v7527_v6  ;;  %2363 = vmatpush.bf16.msrb.mxu2 %v7339_v9  ;;  %v7507_v26 = vor.u32 %v9838_v24, %v7504_v44  ;;  %v7287_v32 = vor.u32 %v9787_v29, %v7286_v28  ;;  %v7478_v31 = vld [vmem:[#allocation9 + $0x188] sm:$0xf]  ;;  %v9830_v6 = vld [vmem:[#allocation9 + $0x174] sm:$0xf0] }
 0x1b4   :  { %v10714_v40 = vpop.f32.mrf.mxu0  ;;  %v10716_v45 = vpop.f32.mrf.mxu1  ;;  %v7630_v24 = vld [vmem:[#allocation9 + $0x2b0] sm:$0xf]  ;;  %v9821_v44 = vld [vmem:[#allocation9 + $0x134] sm:$0xf]  ;;  %v7632_v29 = vld [vmem:[#allocation9 + $0x2c8] sm:$0xf0] }
 0x1b5   :  { %10372 = vpow2.f32 %v7274_v37  ;;  %2376 = vmatpush.bf16.msrb.mxu3 %v7531_v15  ;;  %v7479_v37 = vor.u32 %v9835_v33, %v7478_v31  ;;  %v1608_v51 = vadd.f32 %v10716_v45, %v10714_v40  ;;  %v9869_v28 = vld [vmem:[#allocation9 + $0x2b4] sm:$0xf]  ;;  %v7414_v31 = vld [vmem:[#allocation9 + $0x100] sm:$0xf]  ;;  %v9818_v33 = vld [vmem:[#allocation9 + $0x114] sm:$0xf0] }
 0x1b6   :  { %2338 = vmatpush.bf16.msrb.mxu0 %v7311_v19  ;;  %v7438_v19 = vld [vmem:[#allocation9 + $0x130] sm:$0xf] }
 0x1b7   :  { %2351 = vmatpush.bf16.msrb.mxu1 %v7503_v21  ;;  %2364 = vmatpush.bf16.msrb.mxu2 %v7315_v43  ;;  %v1668_v7 = vadd.f32 %v1608_v51, %v10647_v25  ;;  %v9824_v21 = vld [vmem:[#allocation9 + $0x144] sm:$0xf0] }
 0x1b8   :  { %v9872_v43 = vld [vmem:[#allocation9 + $0x2c4] sm:$0xf0] }
 0x1b9   :  { %2377 = vmatpush.bf16.msrb.mxu3 %v7507_v26  ;;  %v7440_v26 = vld [vmem:[#allocation9 + $0x148] sm:$0xf0] }
 0x1ba   :  { %2339 = vmatpush.bf16.msrb.mxu0 %v7287_v32  ;;  %v7631_v32 = vor.u32 %v9872_v43, %v7630_v24  ;;  %v7443_v34 = vor.u32 %v9821_v44, %v7440_v26  ;;  %v7510_v44 = vld [vmem:[#allocation9 + $0x1c0] sm:$0xf]  ;;  %v9842_v26 = vld [vmem:[#allocation9 + $0x1d4] sm:$0xf0] }
 0x1bb   :  { %v10373_v3 = vpop.eup %10372  ;;  %v1620_v4 = vpop.f32.mrf.mxu2  ;;  %2352 = vmatpush.bf16.msrb.mxu1 %v7479_v37  ;;  %2365 = vmatpush.bf16.msrb.mxu2 %v7291_v46  ;;  %v9866_v37 = vld [vmem:[#allocation9 + $0x294] sm:$0xf0]  ;;  %v7415_v46 = vor.u32 %v9818_v33, %v7414_v31  ;;  %v7511_v33 = vor.u32 %v9842_v26, %v7510_v44  ;;  %v7760_v44 = vld [vmem:[#allocation9 + $0xc0] sm:$0xf] }
 0x1bc   :  { %v1633_v5 = vpop.f32.mrf.mxu3  ;;  %v10718_v11 = vadd.f32 1.0, %v10373_v3  ;;  %v1596_v12 = vpop.f32.mrf.mxu0  ;;  %v9906_v26 = vld [vmem:[#allocation9 + $0xd4] sm:$0xf0] }
 0x1bd   :  { %v1609_v14 = vpop.f32.mrf.mxu1  ;;  %v1634_v30 = vadd.f32 %v1633_v5, %v1620_v4  ;;  %2378 = vmatpush.bf16.msrb.mxu3 %v7483_v47  ;;  %v7462_v5 = vld [vmem:[#allocation9 + $0x160] sm:$0xf]  ;;  %v9875_v12 = vld [vmem:[#allocation9 + $0x2e4] sm:$0xf] }
 0x1be   :  { %10374 = vrcp.f32 %v10718_v11  ;;  %v1664_v52 = vand.u32 2147483648, %v10718_v11  ;;  %v1662_v55 = vand.u32 2147483647, %v10718_v11  ;;  %vm1658_vm11 = vweird.f32 %v10718_v11  ;;  %v7656_v14 = vld [vmem:[#allocation9 + $0x2f8] sm:$0xf0] }
 0x1bf   :  { %v1669_v49 = vadd.f32 %v1634_v30, %v10649_v27  ;;  %v7463_v20 = vor.u32 %v9830_v6, %v7462_v5  ;;  %v7659_v23 = vor.u32 %v9875_v12, %v7656_v14  ;;  %v7439_v30 = vor.u32 %v9824_v21, %v7438_v19  ;;  %v7534_v12 = vld [vmem:[#allocation9 + $0x1f0] sm:$0xf]  ;;  %v9848_v14 = vld [vmem:[#allocation9 + $0x204] sm:$0xf0] }
 0x1c0   :  { %v1665_v59 = vor.u32 1.1754944e-38, %v1664_v52  ;;  %vm1663_vm13 = vcmp.eq.f32.partialorder %v1662_v55, 8.507059e+37  ;;  %v7582_v52 = vld [vmem:[#allocation9 + $0x250] sm:$0xf]  ;;  %v9809_v55 = vld [vmem:[#allocation9 + $0xd4] sm:$0xf]  ;;  %v7343_v19 = vor.u32 %v9800_v13, %v7342_v10  ;;  %v7535_v21 = vor.u32 %v9848_v14, %v7534_v12 }
 0x1c1   :  { %v1672_v56 = vrot.slane %v1669_v49, 7  ;;  %v9812_v49 = vld [vmem:[#allocation9 + $0xe4] sm:$0xf0]  ;;  %v7976_v12 = vld [vmem:[#allocation9 + $0x270] sm:$0xf] }
 0x1c3   :  { %v1622_v35 = vpop.f32.mrf.mxu2  ;;  %v1673_v45 = vsel %vm834_vm0, %v1668_v7, %v1672_v56  ;;  %v7392_v56 = vld [vmem:[#allocation9 + $0xe8] sm:$0xf0] }
 0x1c4   :  { %v1635_v36 = vpop.f32.mrf.mxu3  ;;  %v10375_v58 = vpop.eup %10374  ;;  %v7635_v35 = vor.u32 %v9869_v28, %v7632_v29  ;;  %v7584_v7 = vld [vmem:[#allocation9 + $0x268] sm:$0xf0]  ;;  %v9791_v28 = vld [vmem:[#allocation9 + $0x44] sm:$0xf]  ;;  %v7320_v29 = vld [vmem:[#allocation9 + $0x58] sm:$0xf0] }
 0x1c5   :  { %v1654_v48 = vmul.f32 %v10375_v58, %v10718_v11  ;;  %vm1659_vm10 = vweird.f32 %v10375_v58  ;;  %v7464_v11 = vld [vmem:[#allocation9 + $0x178] sm:$0xf0]  ;;  %v7606_v36 = vld [vmem:[#allocation9 + $0x280] sm:$0xf] }
 0x1c6   :  { %vm1660_vm12 = vmor %vm1658_vm11, %vm1659_vm10  ;;  %v7467_v22 = vor.u32 %v9827_v42, %v7464_v11  ;;  %v7607_v47 = vor.u32 %v9866_v37, %v7606_v36  ;;  %v7323_v36 = vor.u32 %v9791_v28, %v7320_v29  ;;  %v7952_v28 = vld [vmem:[#allocation9 + $0x240] sm:$0xf]  ;;  %v7761_v29 = vor.u32 %v9906_v26, %v7760_v44  ;;  %v9882_v26 = vld [vmem:[#allocation9 + $0x14] sm:$0xf0] }
 0x1c7   :  { %v1655_v50 = vsub.f32 1.0, %v1654_v48  ;;  %v7390_v48 = vld [vmem:[#allocation9 + $0xd0] sm:$0xf]  ;;  %v7664_v44 = vld [vmem:[#allocation9] sm:$0xf] }
 0x1c9   :  { %v1656_v54 = vmul.f32 %v10375_v58, %v1655_v50  ;;  %v7419_v50 = vor.u32 %v9815_v38, %v7416_v39  ;;  %v7486_v38 = vld [vmem:[#allocation9 + $0x190] sm:$0xf]  ;;  %v9836_v39 = vld [vmem:[#allocation9 + $0x1a4] sm:$0xf0] }
 0x1cb   :  { %v1657_v57 = vadd.f32 %v10375_v58, %v1656_v54  ;;  %v9860_v54 = vld [vmem:[#allocation9 + $0x264] sm:$0xf0] }
 0x1cd   :  { %v1661_v41 = vsel %vm1660_vm12, %v10375_v58, %v1657_v57  ;;  %v7608_v58 = vld [vmem:[#allocation9 + $0x298] sm:$0xf0]  ;;  %v9857_v57 = vld [vmem:[#allocation9 + $0x254] sm:$0xf] }
 0x1ce   :  { %v1666_v40 = vsel %vm1663_vm13, %v1665_v59, %v1661_v41  ;;  %v7611_v51 = vor.u32 %v9863_v53, %v7608_v58  ;;  %v7391_v59 = vor.u32 %v9812_v49, %v7390_v48  ;;  %v7366_v41 = vld [vmem:[#allocation9 + $0xa0] sm:$0xf]  ;;  %v9785_v53 = vld [vmem:[#allocation9 + $0x14] sm:$0xf]  ;;  %v7296_v58 = vld [vmem:[#allocation9 + $0x28] sm:$0xf0]  ;;  %v7487_v49 = vor.u32 %v9836_v39, %v7486_v38 }
 0x1cf   :  { %v1675_v61 = vmul.f32 %v1673_v45, %v1666_v40  ;;  %v1682_v0 = vrot.slane %v1666_v40, 2  ;;  %v9806_v40 = vld [vmem:[#allocation9 + $0xb4] sm:$0xf0]  ;;  %v7395_v45 = vor.u32 %v9809_v55, %v7392_v56  ;;  %v8024_v55 = vld [vmem:[#allocation9 + $0x2d0] sm:$0xf] }
 0x1d0   :  { %v7367_v5 = vor.u32 %v9806_v40, %v7366_v41  ;;  %v9969_v40 = vld [vmem:[#allocation9 + $0x2d4] sm:$0xf]  ;;  %v7736_v38 = vld [vmem:[#allocation9 + $0x90] sm:$0xf]  ;;  %v9900_v39 = vld [vmem:[#allocation9 + $0xa4] sm:$0xf0] }
 0x1d1   :  { %v1679_v63 = vadd.f32 %v1677_v8, %v1675_v61  ;;  %v1684_v1 = vsub.f32 1.0, %v1682_v0  ;;  %v1686_v4 = vmul.f32 %v1682_v0, %v10662_v62  ;;  %v7583_v8 = vor.u32 %v9860_v54, %v7582_v52  ;;  %v9854_v0 = vld [vmem:[#allocation9 + $0x234] sm:$0xf0]  ;;  %v7832_v52 = vld [vmem:[#allocation9 + $0x150] sm:$0xf] }
 0x1d2   :  { %v7587_v61 = vor.u32 %v9857_v57, %v7584_v7  ;;  %v9924_v54 = vld [vmem:[#allocation9 + $0x164] sm:$0xf0]  ;;  %v9921_v7 = vld [vmem:[#allocation9 + $0x154] sm:$0xf] }
 0x1d3   :  { %10376 = vtanh.f32 %v1679_v63  ;;  %v7558_v63 = vld [vmem:[#allocation9 + $0x220] sm:$0xf]  ;;  %v7833_v56 = vor.u32 %v9924_v54, %v7832_v52  ;;  %v9972_v57 = vld [vmem:[#allocation9 + $0x2e4] sm:$0xf0]  ;;  %v7930_v52 = vld [vmem:[#allocation9 + $0x228] sm:$0xf0] }
 0x1d4   :  { %v7559_v6 = vor.u32 %v9854_v0, %v7558_v63  ;;  %v7808_v63 = vld [vmem:[#allocation9 + $0x120] sm:$0xf] }
 0x1d9   :  { %v10377_v2 = vpop.eup %10376 }
 0x1da   :  { %v1685_v3 = vmul.f32 %v10377_v2, %v1684_v1  ;;  %v9803_v1 = vld [vmem:[#allocation9 + $0xa4] sm:$0xf]  ;;  %v7368_v2 = vld [vmem:[#allocation9 + $0xb8] sm:$0xf0] }
 0x1db   :  { %v7371_v42 = vor.u32 %v9803_v1, %v7368_v2  ;;  %v9966_v1 = vld [vmem:[#allocation9 + $0x2b4] sm:$0xf0]  ;;  %v9915_v2 = vld [vmem:[#allocation9 + $0x124] sm:$0xf] }
 0x1dc   :  { %v10732_v9 = vadd.f32 %v1686_v4, %v1685_v3  ;;  %v9851_v3 = vld [vmem:[#allocation9 + $0x224] sm:$0xf]  ;;  %v7560_v4 = vld [vmem:[#allocation9 + $0x238] sm:$0xf0] }
 0x1dd   :  { %v7563_v11 = vor.u32 %v9851_v3, %v7560_v4  ;;  %v7810_v4 = vld [vmem:[#allocation9 + $0x138] sm:$0xf0] }
 0x1de   :  { %1689 = vst.msk [vmem:[#allocation10 + $0x1] ss:$8 sm:$0x3] %vm10658_vm8, %v10732_v9  ;;  %v1698_v15 = vperm.slane %v10732_v9, 0  ;;  %v1699_v16 = vperm.slane %v10732_v9, 1  ;;  %v7813_v10 = vor.u32 %v9915_v2, %v7810_v4 }
 0x1df   :  { %v9888_v4 = vld [vmem:[#allocation9 + $0x44] sm:$0xf0] }
 0x1e0   :  { %v10739_v17 = vpack.c.bf16 %v1698_v15, %v1698_v15  ;;  %v10741_v62 = vpack.c.bf16 %v1699_v16, %v1699_v16  ;;  %v9797_v15 = vld [vmem:[#allocation9 + $0x74] sm:$0xf]  ;;  %v7344_v16 = vld [vmem:[#allocation9 + $0x88] sm:$0xf0] }
 0x1e1   :  { %v7347_v24 = vor.u32 %v9797_v15, %v7344_v16  ;;  %v9960_v15 = vld [vmem:[#allocation9 + $0x284] sm:$0xf0]  ;;  %v9909_v16 = vld [vmem:[#allocation9 + $0xf4] sm:$0xf] }
 0x1e2   :  { %2288 = vmatmul.bf16.vlgmr.msra.gmra.mxu0 %v10739_v17  ;;  %2301 = vmatmul.bf16.vlgmr.msra.gmra.mxu1 %v10741_v62 }
 0x1e3   :  { %2314 = vmatmul.bf16.vlgmr.msra.gmra.mxu2 %v10739_v17  ;;  %2327 = vmatmul.bf16.vlgmr.msra.gmra.mxu3 %v10741_v62 }
 0x1e4   :  { %2384 = vmatpush.bf16.msra.mxu0 %v7463_v20  ;;  %2397 = vmatpush.bf16.msra.mxu1 %v7655_v18  ;;  %v9845_v20 = vld [vmem:[#allocation9 + $0x1f4] sm:$0xf]  ;;  %v7536_v18 = vld [vmem:[#allocation9 + $0x208] sm:$0xf0] }
 0x1e5   :  { %2410 = vmatpush.bf16.msra.mxu2 %v7467_v22  ;;  %2423 = vmatpush.bf16.msra.mxu3 %v7659_v23  ;;  %v7318_v22 = vld [vmem:[#allocation9 + $0x40] sm:$0xf]  ;;  %v9794_v23 = vld [vmem:[#allocation9 + $0x54] sm:$0xf0]  ;;  %v7539_v43 = vor.u32 %v9845_v20, %v7536_v18  ;;  %v7786_v20 = vld [vmem:[#allocation9 + $0x108] sm:$0xf0]  ;;  %v7977_v18 = vor.u32 %v9960_v15, %v7976_v12 }
 0x1e6   :  { %v7319_v31 = vor.u32 %v9794_v23, %v7318_v22  ;;  %v7978_v22 = vld [vmem:[#allocation9 + $0x288] sm:$0xf0] }
 0x1e8   :  { %2385 = vmatpush.bf16.msra.mxu0 %v7439_v30  ;;  %2398 = vmatpush.bf16.msra.mxu1 %v7631_v32  ;;  %v9839_v30 = vld [vmem:[#allocation9 + $0x1c4] sm:$0xf]  ;;  %v7512_v32 = vld [vmem:[#allocation9 + $0x1d8] sm:$0xf0] }
 0x1e9   :  { %2411 = vmatpush.bf16.msra.mxu2 %v7443_v34  ;;  %2424 = vmatpush.bf16.msra.mxu3 %v7635_v35  ;;  %v7294_v34 = vld [vmem:[#allocation9 + $0x10] sm:$0xf]  ;;  %v9788_v35 = vld [vmem:[#allocation9 + $0x24] sm:$0xf0]  ;;  %v7515_v37 = vor.u32 %v9839_v30, %v7512_v32  ;;  %v9954_v30 = vld [vmem:[#allocation9 + $0x254] sm:$0xf0] }
 0x1ea   :  { %v7295_v48 = vor.u32 %v9788_v35, %v7294_v34  ;;  %v9903_v32 = vld [vmem:[#allocation9 + $0xc4] sm:$0xf] }
 0x1eb   :  { %v9951_v35 = vld [vmem:[#allocation9 + $0x244] sm:$0xf] }
 0x1ec   :  { %2386 = vmatpush.bf16.msra.mxu0 %v7415_v46  ;;  %2399 = vmatpush.bf16.msra.mxu1 %v7607_v47  ;;  %v9833_v46 = vld [vmem:[#allocation9 + $0x194] sm:$0xf]  ;;  %v7488_v47 = vld [vmem:[#allocation9 + $0x1a8] sm:$0xf0] }
 0x1ed   :  { %2412 = vmatpush.bf16.msra.mxu2 %v7419_v50  ;;  %2425 = vmatpush.bf16.msra.mxu3 %v7611_v51  ;;  %v7299_v50 = vor.u32 %v9785_v53, %v7296_v58  ;;  %v7491_v51 = vor.u32 %v9833_v46, %v7488_v47  ;;  %v7928_v53 = vld [vmem:[#allocation9 + $0x210] sm:$0xf]  ;;  %v7737_v58 = vor.u32 %v9900_v39, %v7736_v38  ;;  %v9948_v46 = vld [vmem:[#allocation9 + $0x224] sm:$0xf0]  ;;  %v9897_v47 = vld [vmem:[#allocation9 + $0x94] sm:$0xf] }
 0x1ee   :  { %v7858_v38 = vld [vmem:[#allocation9 + $0x198] sm:$0xf0] }
 0x1f0   :  { %2387 = vmatpush.bf16.msra.mxu0 %v7391_v59  ;;  %2400 = vmatpush.bf16.msra.mxu1 %v7583_v8  ;;  %v7834_v59 = vld [vmem:[#allocation9 + $0x168] sm:$0xf0]  ;;  %v8025_v8 = vor.u32 %v9972_v57, %v8024_v55 }
 0x1f1   :  { %2413 = vmatpush.bf16.msra.mxu2 %v7395_v45  ;;  %2426 = vmatpush.bf16.msra.mxu3 %v7587_v61  ;;  %v7837_v41 = vor.u32 %v9921_v7, %v7834_v59  ;;  %v8026_v45 = vld [vmem:[#allocation9 + $0x2e8] sm:$0xf0]  ;;  %v7712_v59 = vld [vmem:[#allocation9 + $0x60] sm:$0xf] }
 0x1f2   :  { %2340 = vmatmul.bf16.vlgmr.msrb.gmra.mxu0 %v10739_v17  ;;  %2353 = vmatmul.bf16.vlgmr.msrb.gmra.mxu1 %v10741_v62  ;;  %v8029_v61 = vor.u32 %v9969_v40, %v8026_v45  ;;  %v9942_v45 = vld [vmem:[#allocation9 + $0x1f4] sm:$0xf0] }
 0x1f3   :  { %2366 = vmatmul.bf16.vlgmr.msrb.gmra.mxu2 %v10739_v17  ;;  %2379 = vmatmul.bf16.vlgmr.msrb.gmra.mxu3 %v10741_v62 }
 0x1f4   :  { %2388 = vmatpush.bf16.msra.mxu0 %v7367_v5  ;;  %2401 = vmatpush.bf16.msra.mxu1 %v7559_v6  ;;  %v9963_v5 = vld [vmem:[#allocation9 + $0x2a4] sm:$0xf]  ;;  %v8002_v6 = vld [vmem:[#allocation9 + $0x2b8] sm:$0xf0] }
 0x1f5   :  { %2414 = vmatpush.bf16.msra.mxu2 %v7371_v42  ;;  %2427 = vmatpush.bf16.msra.mxu3 %v7563_v11  ;;  %v8005_v13 = vor.u32 %v9963_v5, %v8002_v6  ;;  %v7784_v42 = vld [vmem:[#allocation9 + $0xf0] sm:$0xf]  ;;  %v9912_v11 = vld [vmem:[#allocation9 + $0x104] sm:$0xf0] }
 0x1f6   :  { %v7785_v14 = vor.u32 %v9912_v11, %v7784_v42  ;;  %v7880_v5 = vld [vmem:[#allocation9 + $0x1b0] sm:$0xf]  ;;  %v7690_v42 = vld [vmem:[#allocation9 + $0x48] sm:$0xf0] }
 0x1f8   :  { %2389 = vmatpush.bf16.msra.mxu0 %v7343_v19  ;;  %2402 = vmatpush.bf16.msra.mxu1 %v7535_v21  ;;  %v7789_v19 = vor.u32 %v9909_v16, %v7786_v20  ;;  %v9957_v21 = vld [vmem:[#allocation9 + $0x274] sm:$0xf] }
 0x1f9   :  { %2415 = vmatpush.bf16.msra.mxu2 %v7347_v24  ;;  %2428 = vmatpush.bf16.msra.mxu3 %v7539_v43  ;;  %v7981_v23 = vor.u32 %v9957_v21, %v7978_v22  ;;  %v9933_v20 = vld [vmem:[#allocation9 + $0x1b4] sm:$0xf]  ;;  %v1694_v22 = vstv %s10762_s16 }
 0x1fa   :  { %vm10768_vm14 = vcmp.eq.s32.totalorder %v1694_v22, 1 }
 0x1fc   :  { %2390 = vmatpush.bf16.msra.mxu0 %v7319_v31  ;;  %2403 = vmatpush.bf16.msra.mxu1 %v7511_v33  ;;  %v7762_v31 = vld [vmem:[#allocation9 + $0xd8] sm:$0xf0]  ;;  %v7953_v33 = vor.u32 %v9954_v30, %v7952_v28  ;;  %v7856_v28 = vld [vmem:[#allocation9 + $0x180] sm:$0xf]  ;;  %v9930_v30 = vld [vmem:[#allocation9 + $0x194] sm:$0xf0] }
 0x1fd   :  { %2416 = vmatpush.bf16.msra.mxu2 %v7323_v36  ;;  %2429 = vmatpush.bf16.msra.mxu3 %v7515_v37  ;;  %v7765_v34 = vor.u32 %v9903_v32, %v7762_v31  ;;  %v7954_v36 = vld [vmem:[#allocation9 + $0x258] sm:$0xf0]  ;;  %v9879_v32 = vld [vmem:[#allocation9 + $0x4] sm:$0xf] }
 0x1fe   :  { %v7957_v37 = vor.u32 %v9951_v35, %v7954_v36  ;;  %v7666_v31 = vld [vmem:[#allocation9 + $0x18] sm:$0xf0]  ;;  %v7857_v35 = vor.u32 %v9930_v30, %v7856_v28 }
 0x1ff   :  { %v7669_v36 = vor.u32 %v9879_v32, %v7666_v31  ;;  %v7768_v31 = vld [vmem:[#allocation9 + $0xc8] sm:$0xf] }
 0x200   :  { %2391 = vmatpush.bf16.msra.mxu0 %v7295_v48  ;;  %2404 = vmatpush.bf16.msra.mxu1 %v7487_v49  ;;  %v7738_v48 = vld [vmem:[#allocation9 + $0xa8] sm:$0xf0]  ;;  %v7929_v49 = vor.u32 %v9948_v46, %v7928_v53  ;;  %v7840_v53 = vld [vmem:[#allocation9 + $0x158] sm:$0xf] }
 0x201   :  { %2417 = vmatpush.bf16.msra.mxu2 %v7299_v50  ;;  %2430 = vmatpush.bf16.msra.mxu3 %v7491_v51  ;;  %v7741_v50 = vor.u32 %v9897_v47, %v7738_v48  ;;  %v9945_v51 = vld [vmem:[#allocation9 + $0x214] sm:$0xf]  ;;  %v8032_v46 = vld [vmem:[#allocation9 + $0x2d8] sm:$0xf]  ;;  %v9973_v48 = vld [vmem:[#allocation9 + $0x2ec] sm:$0xf0] }
 0x203   :  { %2392 = vmatmul.bf16.vlgmr.msra.gmra.mxu0 %v10739_v17  ;;  %2405 = vmatmul.bf16.vlgmr.msra.gmra.mxu1 %v10741_v62 }
 0x204   :  { %2418 = vmatmul.bf16.vlgmr.msra.gmra.mxu2 %v10739_v17  ;;  %2431 = vmatmul.bf16.vlgmr.msra.gmra.mxu3 %v10741_v62  ;;  %v9918_v17 = vld [vmem:[#allocation9 + $0x134] sm:$0xf0]  ;;  %v8000_v62 = vld [vmem:[#allocation9 + $0x2a0] sm:$0xf] }
 0x205   :  { %3079 = vmatpush.bf16.msrb.mxu0 %v7833_v56  ;;  %3092 = vmatpush.bf16.msrb.mxu1 %v8025_v8  ;;  %v7809_v0 = vor.u32 %v9918_v17, %v7808_v63  ;;  %v8001_v3 = vor.u32 %v9966_v1, %v8000_v62  ;;  %v7933_v56 = vor.u32 %v9945_v51, %v7930_v52  ;;  %v9894_v8 = vld [vmem:[#allocation9 + $0x74] sm:$0xf0]  ;;  %v7714_v17 = vld [vmem:[#allocation9 + $0x78] sm:$0xf0] }
 0x206   :  { %3105 = vmatpush.bf16.msrb.mxu2 %v7837_v41  ;;  %3118 = vmatpush.bf16.msrb.mxu3 %v8029_v61  ;;  %v7904_v41 = vld [vmem:[#allocation9 + $0x1e0] sm:$0xf]  ;;  %v7713_v40 = vor.u32 %v9894_v8, %v7712_v59  ;;  %v9891_v61 = vld [vmem:[#allocation9 + $0x64] sm:$0xf]  ;;  %v7906_v1 = vld [vmem:[#allocation9 + $0x1f8] sm:$0xf0]  ;;  %v8033_v52 = vor.u32 %v9973_v48, %v8032_v46 }
 0x207   :  { %v7905_v63 = vor.u32 %v9942_v45, %v7904_v41  ;;  %v7717_v62 = vor.u32 %v9891_v61, %v7714_v17  ;;  %v9919_v41 = vld [vmem:[#allocation9 + $0x13c] sm:$0xf0]  ;;  %v9952_v48 = vld [vmem:[#allocation9 + $0x24c] sm:$0xf] }
 0x208   :  { %v9967_v45 = vld [vmem:[#allocation9 + $0x2bc] sm:$0xf0] }
 0x209   :  { %3080 = vmatpush.bf16.msrb.mxu0 %v7809_v0  ;;  %3093 = vmatpush.bf16.msrb.mxu1 %v8001_v3  ;;  %v9939_v0 = vld [vmem:[#allocation9 + $0x1e4] sm:$0xf]  ;;  %v7688_v3 = vld [vmem:[#allocation9 + $0x30] sm:$0xf] }
 0x20a   :  { %3106 = vmatpush.bf16.msrb.mxu2 %v7813_v10  ;;  %3119 = vmatpush.bf16.msrb.mxu3 %v8005_v13  ;;  %v7909_v2 = vor.u32 %v9939_v0, %v7906_v1  ;;  %v7689_v6 = vor.u32 %v9888_v4, %v7688_v3  ;;  %v9936_v10 = vld [vmem:[#allocation9 + $0x1c4] sm:$0xf0]  ;;  %v9885_v13 = vld [vmem:[#allocation9 + $0x34] sm:$0xf]  ;;  %v9916_v1 = vld [vmem:[#allocation9 + $0x12c] sm:$0xf] }
 0x20b   :  { %v7881_v15 = vor.u32 %v9936_v10, %v7880_v5  ;;  %v7693_v16 = vor.u32 %v9885_v13, %v7690_v42  ;;  %v9964_v3 = vld [vmem:[#allocation9 + $0x2ac] sm:$0xf]  ;;  %v8010_v5 = vld [vmem:[#allocation9 + $0x2c0] sm:$0xf0] }
 0x20c   :  { %v8013_v42 = vor.u32 %v9964_v3, %v8010_v5  ;;  %v9892_v3 = vld [vmem:[#allocation9 + $0x6c] sm:$0xf] }
 0x20d   :  { %3081 = vmatpush.bf16.msrb.mxu0 %v7785_v14  ;;  %3094 = vmatpush.bf16.msrb.mxu1 %v7977_v18  ;;  %v7882_v18 = vld [vmem:[#allocation9 + $0x1c8] sm:$0xf0] }
 0x20e   :  { %3107 = vmatpush.bf16.msrb.mxu2 %v7789_v19  ;;  %3120 = vmatpush.bf16.msrb.mxu3 %v7981_v23  ;;  %v7885_v23 = vor.u32 %v9933_v20, %v7882_v18  ;;  %v7984_v18 = vld [vmem:[#allocation9 + $0x278] sm:$0xf] }
 0x211   :  { %3082 = vmatpush.bf16.msrb.mxu0 %v7761_v29  ;;  %3095 = vmatpush.bf16.msrb.mxu1 %v7953_v33  ;;  %v7665_v29 = vor.u32 %v9882_v26, %v7664_v44  ;;  %v9958_v44 = vld [vmem:[#allocation9 + $0x27c] sm:$0xf]  ;;  %v7986_v26 = vld [vmem:[#allocation9 + $0x290] sm:$0xf0] }
 0x212   :  { %3108 = vmatpush.bf16.msrb.mxu2 %v7765_v34  ;;  %3121 = vmatpush.bf16.msrb.mxu3 %v7957_v37  ;;  %v9927_v37 = vld [vmem:[#allocation9 + $0x184] sm:$0xf]  ;;  %v7989_v30 = vor.u32 %v9958_v44, %v7986_v26  ;;  %v9907_v34 = vld [vmem:[#allocation9 + $0xdc] sm:$0xf0] }
 0x213   :  { %v7861_v39 = vor.u32 %v9927_v37, %v7858_v38  ;;  %v7769_v37 = vor.u32 %v9907_v34, %v7768_v31  ;;  %v9955_v38 = vld [vmem:[#allocation9 + $0x25c] sm:$0xf0]  ;;  %v7890_v31 = vld [vmem:[#allocation9 + $0x1d0] sm:$0xf0] }
 0x215   :  { %3083 = vmatpush.bf16.msrb.mxu0 %v7737_v58  ;;  %3096 = vmatpush.bf16.msrb.mxu1 %v7929_v49  ;;  %v9925_v58 = vld [vmem:[#allocation9 + $0x16c] sm:$0xf0]  ;;  %v9922_v49 = vld [vmem:[#allocation9 + $0x15c] sm:$0xf] }
 0x216   :  { %3109 = vmatpush.bf16.msrb.mxu2 %v7741_v50  ;;  %3122 = vmatpush.bf16.msrb.mxu3 %v7933_v56  ;;  %v7841_v47 = vor.u32 %v9925_v58, %v7840_v53  ;;  %v7842_v50 = vld [vmem:[#allocation9 + $0x170] sm:$0xf0]  ;;  %v7770_v53 = vld [vmem:[#allocation9 + $0xe0] sm:$0xf0] }
 0x217   :  { %v8034_v56 = vld [vmem:[#allocation9 + $0x2f0] sm:$0xf0] }
 0x219   :  { %3084 = vmatpush.bf16.msrb.mxu0 %v7713_v40  ;;  %3097 = vmatpush.bf16.msrb.mxu1 %v7905_v63  ;;  %v8008_v40 = vld [vmem:[#allocation9 + $0x2a8] sm:$0xf] }
 0x21a   :  { %3110 = vmatpush.bf16.msrb.mxu2 %v7717_v62  ;;  %3123 = vmatpush.bf16.msrb.mxu3 %v7909_v2  ;;  %v8009_v62 = vor.u32 %v9967_v45, %v8008_v40  ;;  %v7818_v2 = vld [vmem:[#allocation9 + $0x140] sm:$0xf0]  ;;  %v9946_v45 = vld [vmem:[#allocation9 + $0x21c] sm:$0xf] }
 0x21b   :  { %v7821_v4 = vor.u32 %v9916_v1, %v7818_v2  ;;  %v9943_v2 = vld [vmem:[#allocation9 + $0x1fc] sm:$0xf0] }
 0x21d   :  { %3085 = vmatpush.bf16.msrb.mxu0 %v7689_v6  ;;  %3098 = vmatpush.bf16.msrb.mxu1 %v7881_v15  ;;  %v10776_v15 = vld [vmem:[#allocation6 + $0x1] ss:$2 sm:$0x3f] }
 0x21e   :  { %3111 = vmatpush.bf16.msrb.mxu2 %v7693_v16  ;;  %3124 = vmatpush.bf16.msrb.mxu3 %v7885_v23  ;;  %v7794_v23 = vld [vmem:[#allocation9 + $0x110] sm:$0xf0] }
 0x221   :  { %3086 = vmatpush.bf16.msrb.mxu0 %v7665_v29  ;;  %3099 = vmatpush.bf16.msrb.mxu1 %v7857_v35  ;;  %v7960_v35 = vld [vmem:[#allocation9 + $0x248] sm:$0xf] }
 0x222   :  { %3112 = vmatpush.bf16.msrb.mxu2 %v7669_v36  ;;  %3125 = vmatpush.bf16.msrb.mxu3 %v7861_v39  ;;  %v9904_v39 = vld [vmem:[#allocation9 + $0xcc] sm:$0xf]  ;;  %v7961_v46 = vor.u32 %v9955_v38, %v7960_v35  ;;  %v7672_v35 = vld [vmem:[#allocation9 + $0x8] sm:$0xf] }
 0x223   :  { %v7864_v38 = vld [vmem:[#allocation9 + $0x188] sm:$0xf] }
 0x225   :  { %3131 = vmatpush.bf16.msra.mxu0 %v7841_v47  ;;  %3144 = vmatpush.bf16.msra.mxu1 %v8033_v52  ;;  %v7773_v47 = vor.u32 %v9904_v39, %v7770_v53  ;;  %v9931_v39 = vld [vmem:[#allocation9 + $0x19c] sm:$0xf0]  ;;  %v9880_v53 = vld [vmem:[#allocation9 + $0xc] sm:$0xf] }
 0x229   :  { %3145 = vmatpush.bf16.msra.mxu1 %v8009_v62  ;;  %v7912_v62 = vld [vmem:[#allocation9 + $0x1e8] sm:$0xf] }
 0x25f   :  { %v10757_v24 = vpop.f32.mrf.mxu0  ;;  %v10759_v43 = vpop.f32.mrf.mxu1 }
 0x260   :  { %v2303_v6 = vadd.f32 %v10759_v43, %v10757_v24  ;;  %v9910_v24 = vld [vmem:[#allocation9 + $0xfc] sm:$0xf] }
 0x261   :  { %v7797_v29 = vor.u32 %v9910_v24, %v7794_v23  ;;  %v9937_v23 = vld [vmem:[#allocation9 + $0x1cc] sm:$0xf0] }
 0x266   :  { %v2315_v54 = vpop.f32.mrf.mxu2  ;;  %v2328_v55 = vpop.f32.mrf.mxu3 }
 0x267   :  { %v2291_v57 = vpop.f32.mrf.mxu0  ;;  %v2304_v7 = vpop.f32.mrf.mxu1  ;;  %v10764_v11 = vadd.f32 %v2328_v55, %v2315_v54  ;;  %v7845_v54 = vor.u32 %v9922_v49, %v7842_v50  ;;  %v9970_v55 = vld [vmem:[#allocation9 + $0x2dc] sm:$0xf]  ;;  %v7962_v49 = vld [vmem:[#allocation9 + $0x260] sm:$0xf0] }
 0x268   :  { %v7816_v57 = vld [vmem:[#allocation9 + $0x128] sm:$0xf]  ;;  %v8037_v8 = vor.u32 %v9970_v55, %v8034_v56  ;;  %v7965_v52 = vor.u32 %v9952_v48, %v7962_v49  ;;  %v9901_v55 = vld [vmem:[#allocation9 + $0xac] sm:$0xf0]  ;;  %v7936_v56 = vld [vmem:[#allocation9 + $0x218] sm:$0xf] }
 0x269   :  { %v2440_v33 = vrot.slane %v10764_v11, 7  ;;  %3157 = vmatpush.bf16.msra.mxu2 %v7845_v54  ;;  %v7817_v0 = vor.u32 %v9919_v41, %v7816_v57  ;;  %v7792_v11 = vld [vmem:[#allocation9 + $0xf8] sm:$0xf]  ;;  %v7674_v48 = vld [vmem:[#allocation9 + $0x20] sm:$0xf0] }
 0x26a   :  { %3170 = vmatpush.bf16.msra.mxu3 %v8037_v8  ;;  %v7744_v54 = vld [vmem:[#allocation9 + $0x98] sm:$0xf]  ;;  %v7746_v8 = vld [vmem:[#allocation9 + $0xb0] sm:$0xf0]  ;;  %v9928_v49 = vld [vmem:[#allocation9 + $0x18c] sm:$0xf] }
 0x26b   :  { %3132 = vmatpush.bf16.msra.mxu0 %v7817_v0  ;;  %v2443_v43 = vsel %vm834_vm0, %v2303_v6, %v2440_v33  ;;  %v7745_v57 = vor.u32 %v9901_v55, %v7744_v54  ;;  %v9895_v0 = vld [vmem:[#allocation9 + $0x7c] sm:$0xf0]  ;;  %v7677_v55 = vor.u32 %v9880_v53, %v7674_v48 }
 0x26c   :  { %v7800_v53 = vld [vmem:[#allocation9 + $0x100] sm:$0xf] }
 0x26d   :  { %3158 = vmatpush.bf16.msra.mxu2 %v7821_v4  ;;  %v7722_v4 = vld [vmem:[#allocation9 + $0x80] sm:$0xf0]  ;;  %v7992_v48 = vld [vmem:[#allocation9 + $0x280] sm:$0xf] }
 0x26e   :  { %v2317_v12 = vpop.f32.mrf.mxu2  ;;  %v2330_v14 = vpop.f32.mrf.mxu3  ;;  %3171 = vmatpush.bf16.msra.mxu3 %v8013_v42  ;;  %v7725_v42 = vor.u32 %v9892_v3, %v7722_v4 }
 0x26f   :  { %v2341_v19 = vpop.f32.mrf.mxu0  ;;  %v2354_v21 = vpop.f32.mrf.mxu1  ;;  %v9913_v12 = vld [vmem:[#allocation9 + $0x10c] sm:$0xf0] }
 0x270   :  { %v2355_v51 = vadd.f32 %v2354_v21, %v2341_v19  ;;  %v10774_v14 = vld [vmem:[#allocation6] ss:$2 sm:$0x3f]  ;;  %v7793_v20 = vor.u32 %v9913_v12, %v7792_v11  ;;  %v9940_v11 = vld [vmem:[#allocation9 + $0x1ec] sm:$0xf] }
 0x271   :  { %v10782_v16 = vsel %vm10768_vm14, %v10776_v15, %v10774_v14  ;;  %v9961_v19 = vld [vmem:[#allocation9 + $0x28c] sm:$0xf0]  ;;  %3159 = vmatpush.bf16.msra.mxu2 %v7797_v29  ;;  %v7914_v12 = vld [vmem:[#allocation9 + $0x200] sm:$0xf0]  ;;  %v7698_v29 = vld [vmem:[#allocation9 + $0x50] sm:$0xf0] }
 0x272   :  { %v2441_v10 = vrot.slane %v2355_v51, 6  ;;  %v7985_v22 = vor.u32 %v9961_v19, %v7984_v18  ;;  %3133 = vmatpush.bf16.msra.mxu0 %v7793_v20  ;;  %3172 = vmatpush.bf16.msra.mxu3 %v7989_v30  ;;  %v7917_v24 = vor.u32 %v9940_v11, %v7914_v12  ;;  %v9934_v30 = vld [vmem:[#allocation9 + $0x1bc] sm:$0xf]  ;;  %v9926_v11 = vld [vmem:[#allocation9 + $0x174] sm:$0xf0] }
 0x273   :  { %v7893_v34 = vor.u32 %v9934_v30, %v7890_v31  ;;  %v8016_v31 = vld [vmem:[#allocation9 + $0x2b0] sm:$0xf] }
 0x274   :  { %3146 = vmatpush.bf16.msra.mxu1 %v7985_v22  ;;  %v7888_v22 = vld [vmem:[#allocation9 + $0x1b8] sm:$0xf] }
 0x275   :  { %3160 = vmatpush.bf16.msra.mxu2 %v7773_v47  ;;  %v7889_v26 = vor.u32 %v9937_v23, %v7888_v22  ;;  %v7865_v47 = vor.u32 %v9931_v39, %v7864_v38 }
 0x276   :  { %v2367_v7 = vpop.f32.mrf.mxu2  ;;  %v2380_v59 = vpop.f32.mrf.mxu3  ;;  %3134 = vmatpush.bf16.msra.mxu0 %v7769_v37  ;;  %3173 = vmatpush.bf16.msra.mxu3 %v7965_v52  ;;  %v7866_v52 = vld [vmem:[#allocation9 + $0x1a0] sm:$0xf0] }
 0x277   :  { %v2381_v61 = vadd.f32 %v2380_v59, %v2367_v7  ;;  %v2343_v63 = vpop.f32.mrf.mxu0  ;;  %v2356_v17 = vpop.f32.mrf.mxu1  ;;  %v9949_v7 = vld [vmem:[#allocation9 + $0x22c] sm:$0xf0]  ;;  %v9898_v59 = vld [vmem:[#allocation9 + $0x9c] sm:$0xf] }
 0x278   :  { %3147 = vmatpush.bf16.msra.mxu1 %v7961_v46  ;;  %v7937_v41 = vor.u32 %v9949_v7, %v7936_v56  ;;  %v7749_v40 = vor.u32 %v9898_v59, %v7746_v8  ;;  %v7720_v17 = vld [vmem:[#allocation9 + $0x68] sm:$0xf]  ;;  %v7869_v56 = vor.u32 %v9928_v49, %v7866_v52  ;;  %v9962_v49 = vld [vmem:[#allocation9 + $0x294] sm:$0xf0]  ;;  %v9911_v52 = vld [vmem:[#allocation9 + $0x104] sm:$0xf] }
 0x279   :  { %v2442_v13 = vrot.slane %v2381_v61, 5  ;;  %v7938_v61 = vld [vmem:[#allocation9 + $0x230] sm:$0xf0]  ;;  %v7721_v1 = vor.u32 %v9895_v0, %v7720_v17 }
 0x27a   :  { %v7941_v63 = vor.u32 %v9946_v45, %v7938_v61  ;;  %3135 = vmatpush.bf16.msra.mxu0 %v7745_v57  ;;  %3161 = vmatpush.bf16.msra.mxu2 %v7749_v40 }
 0x27b   :  { %v2444_v21 = vsel %vm836_vm2, %v2441_v10, %v2442_v13  ;;  %v7913_v13 = vor.u32 %v9943_v2, %v7912_v62  ;;  %v2476_v62 = vrot.slane %v10782_v16, 4 }
 0x27c   :  { %v2445_v28 = vsel %vm838_vm3, %v2443_v43, %v2444_v21  ;;  %3148 = vmatpush.bf16.msra.mxu1 %v7937_v41  ;;  %3174 = vmatpush.bf16.msra.mxu3 %v7941_v63  ;;  %v7696_v43 = vld [vmem:[#allocation9 + $0x38] sm:$0xf]  ;;  %v9889_v21 = vld [vmem:[#allocation9 + $0x4c] sm:$0xf0] }
 0x27d   :  { %v2447_v32 = vadd.f32 %v2445_v28, %v10782_v16  ;;  %v7697_v44 = vor.u32 %v9889_v21, %v7696_v43  ;;  %v9886_v28 = vld [vmem:[#allocation9 + $0x3c] sm:$0xf]  ;;  %v9974_v16 = vld [vmem:[#allocation9 + $0x2f4] sm:$0xf0] }
 0x27e   :  { %v2369_v36 = vpop.f32.mrf.mxu2  ;;  %v2382_v33 = vpop.f32.mrf.mxu3  ;;  %3136 = vmatpush.bf16.msra.mxu0 %v7721_v1  ;;  %3162 = vmatpush.bf16.msra.mxu2 %v7725_v42  ;;  %v7848_v42 = vld [vmem:[#allocation9 + $0x160] sm:$0xf]  ;;  %v8042_v43 = vld [vmem:[#allocation9 + $0x2f8] sm:$0xf0] }
 0x27f   :  { %v7660_v58 = vmul.f32 -1.442695, %v2447_v32  ;;  %v7701_v32 = vor.u32 %v9886_v28, %v7698_v29  ;;  %v9883_v36 = vld [vmem:[#allocation9 + $0x1c] sm:$0xf0]  ;;  %v7824_v28 = vld [vmem:[#allocation9 + $0x130] sm:$0xf] }
 0x280   :  { %v10788_v50 = vpop.f32.mrf.mxu0  ;;  %v10790_v51 = vpop.f32.mrf.mxu1  ;;  %3149 = vmatpush.bf16.msra.mxu1 %v7913_v13  ;;  %3175 = vmatpush.bf16.msra.mxu3 %v7917_v24  ;;  %v7673_v37 = vor.u32 %v9883_v36, %v7672_v35  ;;  %v9971_v24 = vld [vmem:[#allocation9 + $0x2e4] sm:$0xf]  ;;  %v9920_v29 = vld [vmem:[#allocation9 + $0x144] sm:$0xf0]  ;;  %v9917_v35 = vld [vmem:[#allocation9 + $0x134] sm:$0xf] }
 0x281   :  { %10378 = vpow2.f32 %v7660_v58  ;;  %v2407_v8 = vadd.f32 %v10790_v51, %v10788_v50  ;;  %v7826_v36 = vld [vmem:[#allocation9 + $0x148] sm:$0xf0]  ;;  %v7825_v38 = vor.u32 %v9920_v29, %v7824_v28  ;;  %v9941_v28 = vld [vmem:[#allocation9 + $0x1f4] sm:$0xf] }
 0x282   :  { %3137 = vmatpush.bf16.msra.mxu0 %v7697_v44  ;;  %3163 = vmatpush.bf16.msra.mxu2 %v7701_v32  ;;  %v7849_v44 = vor.u32 %v9926_v11, %v7848_v42  ;;  %v8045_v32 = vor.u32 %v9971_v24, %v8042_v43  ;;  %v9947_v42 = vld [vmem:[#allocation9 + $0x224] sm:$0xf]  ;;  %v7946_v11 = vld [vmem:[#allocation9 + $0x238] sm:$0xf0]  ;;  %v7922_v29 = vld [vmem:[#allocation9 + $0x208] sm:$0xf0] }
 0x283   :  { %v2467_v17 = vadd.f32 %v2407_v8, %v10647_v25  ;;  %v9908_v8 = vld [vmem:[#allocation9 + $0xe4] sm:$0xf0]  ;;  %v7949_v43 = vor.u32 %v9947_v42, %v7946_v11  ;;  %v10062_v42 = vld [vmem:[#allocation9 + $0x2b4] sm:$0xf0]  ;;  %v10011_v11 = vld [vmem:[#allocation9 + $0x124] sm:$0xf] }
 0x284   :  { %3150 = vmatpush.bf16.msra.mxu1 %v7889_v26  ;;  %3176 = vmatpush.bf16.msra.mxu3 %v7893_v34  ;;  %v9968_v34 = vld [vmem:[#allocation9 + $0x2c4] sm:$0xf0] }
 0x285   :  { %v8017_v39 = vor.u32 %v9968_v34, %v8016_v31  ;;  %v7704_v31 = vld [vmem:[#allocation9 + $0x40] sm:$0xf]  ;;  %v9890_v34 = vld [vmem:[#allocation9 + $0x54] sm:$0xf0] }
 0x286   :  { %3138 = vmatpush.bf16.msra.mxu0 %v7673_v37  ;;  %3164 = vmatpush.bf16.msra.mxu2 %v7677_v55  ;;  %v8018_v37 = vld [vmem:[#allocation9 + $0x2c8] sm:$0xf0]  ;;  %v9959_v55 = vld [vmem:[#allocation9 + $0x284] sm:$0xf] }
 0x287   :  { %v10379_v5 = vpop.eup %10378  ;;  %v2419_v6 = vpop.f32.mrf.mxu2 }
 0x288   :  { %v2432_v10 = vpop.f32.mrf.mxu3  ;;  %v10792_v20 = vadd.f32 1.0, %v10379_v5  ;;  %v2395_v18 = vpop.f32.mrf.mxu0  ;;  %3151 = vmatpush.bf16.msra.mxu1 %v7865_v47  ;;  %3177 = vmatpush.bf16.msra.mxu3 %v7869_v56  ;;  %v7994_v56 = vld [vmem:[#allocation9 + $0x298] sm:$0xf0] }
 0x289   :  { %v2408_v19 = vpop.f32.mrf.mxu1  ;;  %v2433_v33 = vadd.f32 %v2432_v10, %v2419_v6  ;;  %v9923_v18 = vld [vmem:[#allocation9 + $0x164] sm:$0xf] }
 0x28a   :  { %10380 = vrcp.f32 %v10792_v20  ;;  %v2463_v41 = vand.u32 2147483648, %v10792_v20  ;;  %v2461_v45 = vand.u32 2147483647, %v10792_v20  ;;  %vm2457_vm1 = vweird.f32 %v10792_v20  ;;  %v7850_v19 = vld [vmem:[#allocation9 + $0x178] sm:$0xf0] }
 0x28b   :  { %v2468_v7 = vadd.f32 %v2433_v33, %v10649_v27  ;;  %v7853_v30 = vor.u32 %v9923_v18, %v7850_v19  ;;  %v9965_v33 = vld [vmem:[#allocation9 + $0x2b4] sm:$0xf]  ;;  %v7728_v18 = vld [vmem:[#allocation9 + $0x70] sm:$0xf]  ;;  %v9896_v19 = vld [vmem:[#allocation9 + $0x84] sm:$0xf0] }
 0x28c   :  { %v2464_v0 = vor.u32 1.1754944e-38, %v2463_v41  ;;  %vm2462_vm5 = vcmp.eq.f32.partialorder %v2461_v45, 8.507059e+37  ;;  %v8021_v47 = vor.u32 %v9965_v33, %v8018_v37  ;;  %v7968_v45 = vld [vmem:[#allocation9 + $0x250] sm:$0xf]  ;;  %v7896_v33 = vld [vmem:[#allocation9 + $0x1c0] sm:$0xf] }
 0x28d   :  { %v2471_v61 = vrot.slane %v2468_v7, 7  ;;  %v7993_v7 = vor.u32 %v9962_v49, %v7992_v48  ;;  %v9938_v37 = vld [vmem:[#allocation9 + $0x1d4] sm:$0xf0]  ;;  %v7680_v48 = vld [vmem:[#allocation9 + $0x10] sm:$0xf] }
 0x28e   :  { %v9884_v49 = vld [vmem:[#allocation9 + $0x24] sm:$0xf0] }
 0x28f   :  { %v2421_v58 = vpop.f32.mrf.mxu2  ;;  %v2472_v51 = vsel %vm834_vm0, %v2467_v17, %v2471_v61  ;;  %v9956_v61 = vld [vmem:[#allocation9 + $0x264] sm:$0xf0]  ;;  %v7778_v17 = vld [vmem:[#allocation9 + $0xe8] sm:$0xf0] }
 0x290   :  { %v2434_v46 = vpop.f32.mrf.mxu3  ;;  %v10381_v54 = vpop.eup %10380  ;;  %v9914_v58 = vld [vmem:[#allocation9 + $0x114] sm:$0xf0] }
 0x291   :  { %v2453_v57 = vmul.f32 %v10381_v54, %v10792_v20  ;;  %vm2458_vm15 = vweird.f32 %v10381_v54  ;;  %v8040_v20 = vld [vmem:[#allocation9 + $0x2e0] sm:$0xf]  ;;  %v7829_v46 = vor.u32 %v9917_v35, %v7826_v36  ;;  %v7925_v36 = vor.u32 %v9941_v28, %v7922_v29  ;;  %v10056_v28 = vld [vmem:[#allocation9 + $0x284] sm:$0xf0]  ;;  %v10005_v29 = vld [vmem:[#allocation9 + $0xf4] sm:$0xf] }
 0x292   :  { %vm2459_vm4 = vmor %vm2457_vm1, %vm2458_vm15  ;;  %v8041_v26 = vor.u32 %v9974_v16, %v8040_v20 }
 0x293   :  { %v2454_v59 = vsub.f32 1.0, %v2453_v57  ;;  %v7801_v57 = vor.u32 %v9914_v58, %v7800_v53  ;;  %v9935_v53 = vld [vmem:[#allocation9 + $0x1c4] sm:$0xf]  ;;  %v7898_v58 = vld [vmem:[#allocation9 + $0x1d8] sm:$0xf0] }
 0x295   :  { %v2455_v40 = vmul.f32 %v10381_v54, %v2454_v59  ;;  %v7776_v59 = vld [vmem:[#allocation9 + $0xd0] sm:$0xf] }
 0x297   :  { %v2456_v63 = vadd.f32 %v10381_v54, %v2455_v40  ;;  %v7997_v40 = vor.u32 %v9959_v55, %v7994_v56  ;;  %v7872_v55 = vld [vmem:[#allocation9 + $0x190] sm:$0xf]  ;;  %v9932_v56 = vld [vmem:[#allocation9 + $0x1a4] sm:$0xf0] }
 0x299   :  { %v2460_v1 = vsel %vm2459_vm4, %v10381_v54, %v2456_v63  ;;  %v7802_v54 = vld [vmem:[#allocation9 + $0x118] sm:$0xf0]  ;;  %v9905_v63 = vld [vmem:[#allocation9 + $0xd4] sm:$0xf] }
 0x29a   :  { %v2465_v50 = vsel %vm2462_vm5, %v2464_v0, %v2460_v1  ;;  %v7805_v41 = vor.u32 %v9911_v52, %v7802_v54  ;;  %v9953_v0 = vld [vmem:[#allocation9 + $0x254] sm:$0xf]  ;;  %v7777_v1 = vor.u32 %v9908_v8, %v7776_v59  ;;  %v7901_v54 = vor.u32 %v9935_v53, %v7898_v58  ;;  %v7874_v8 = vld [vmem:[#allocation9 + $0x1a8] sm:$0xf0]  ;;  %v8338_v53 = vld [vmem:[#allocation9 + $0x240] sm:$0xf] }
 0x29b   :  { %v2474_v2 = vmul.f32 %v2472_v51, %v2465_v50  ;;  %v2481_v4 = vrot.slane %v2465_v50, 2  ;;  %v7969_v50 = vor.u32 %v9956_v61, %v7968_v45  ;;  %v7752_v51 = vld [vmem:[#allocation9 + $0xa0] sm:$0xf]  ;;  %v9929_v59 = vld [vmem:[#allocation9 + $0x194] sm:$0xf] }
 0x29c   :  { %v7877_v61 = vor.u32 %v9929_v59, %v7874_v8  ;;  %v8314_v59 = vld [vmem:[#allocation9 + $0x210] sm:$0xf] }
 0x29d   :  { %v2478_v3 = vadd.f32 %v2476_v62, %v2474_v2  ;;  %v2483_v5 = vsub.f32 1.0, %v2481_v4  ;;  %v2485_v13 = vmul.f32 %v2481_v4, %v10732_v9  ;;  %v7970_v62 = vld [vmem:[#allocation9 + $0x268] sm:$0xf0]  ;;  %v9902_v2 = vld [vmem:[#allocation9 + $0xb4] sm:$0xf0] }
 0x29e   :  { %v7973_v4 = vor.u32 %v9953_v0, %v7970_v62  ;;  %v7753_v20 = vor.u32 %v9902_v2, %v7752_v51  ;;  %v8410_v0 = vld [vmem:[#allocation9 + $0x2d0] sm:$0xf]  ;;  %v8220_v51 = vld [vmem:[#allocation9 + $0x168] sm:$0xf0] }
 0x29f   :  { %10382 = vtanh.f32 %v2478_v3  ;;  %v7781_v3 = vor.u32 %v9905_v63, %v7778_v17  ;;  %v8218_v63 = vld [vmem:[#allocation9 + $0x150] sm:$0xf]  ;;  %v10020_v17 = vld [vmem:[#allocation9 + $0x164] sm:$0xf0] }
 0x2a0   :  { %v8219_v62 = vor.u32 %v10020_v17, %v8218_v63  ;;  %v10041_v17 = vld [vmem:[#allocation9 + $0x214] sm:$0xf] }
 0x2a5   :  { %v10383_v6 = vpop.eup %10382 }
 0x2a6   :  { %v2484_v10 = vmul.f32 %v10383_v6, %v2483_v5  ;;  %v7944_v5 = vld [vmem:[#allocation9 + $0x220] sm:$0xf]  ;;  %v9950_v6 = vld [vmem:[#allocation9 + $0x234] sm:$0xf0] }
 0x2a7   :  { %v7945_v16 = vor.u32 %v9950_v6, %v7944_v5  ;;  %v8412_v5 = vld [vmem:[#allocation9 + $0x2e8] sm:$0xf0] }
 0x2a8   :  { %v10806_v12 = vadd.f32 %v2485_v13, %v2484_v10  ;;  %v9899_v10 = vld [vmem:[#allocation9 + $0xa4] sm:$0xf]  ;;  %v7754_v13 = vld [vmem:[#allocation9 + $0xb8] sm:$0xf0] }
 0x2a9   :  { %v7757_v24 = vor.u32 %v9899_v10, %v7754_v13  ;;  %v8194_v10 = vld [vmem:[#allocation9 + $0x120] sm:$0xf] }
 0x2aa   :  { %2488 = vst.msk [vmem:[#allocation10 + $0x2] ss:$8 sm:$0x3] %vm10658_vm8, %v10806_v12  ;;  %v2497_v21 = vperm.slane %v10806_v12, 0  ;;  %v2498_v22 = vperm.slane %v10806_v12, 1 }
 0x2ac   :  { %v10813_v23 = vpack.c.bf16 %v2497_v21, %v2497_v21  ;;  %v10815_v9 = vpack.c.bf16 %v2498_v22, %v2498_v22  ;;  %v7920_v21 = vld [vmem:[#allocation9 + $0x1f0] sm:$0xf]  ;;  %v9944_v22 = vld [vmem:[#allocation9 + $0x204] sm:$0xf0] }
 0x2ae   :  { %3087 = vmatmul.bf16.vlgmr.msrb.gmra.mxu0 %v10813_v23  ;;  %3100 = vmatmul.bf16.vlgmr.msrb.gmra.mxu1 %v10815_v9 }
 0x2af   :  { %3113 = vmatmul.bf16.vlgmr.msrb.gmra.mxu2 %v10813_v23  ;;  %3126 = vmatmul.bf16.vlgmr.msrb.gmra.mxu3 %v10815_v9 }
 0x2b0   :  { %3183 = vmatpush.bf16.msrb.mxu0 %v7849_v44  ;;  %3196 = vmatpush.bf16.msrb.mxu1 %v8041_v26  ;;  %v9893_v44 = vld [vmem:[#allocation9 + $0x74] sm:$0xf]  ;;  %v7730_v26 = vld [vmem:[#allocation9 + $0x88] sm:$0xf0] }
 0x2b1   :  { %3209 = vmatpush.bf16.msrb.mxu2 %v7853_v30  ;;  %3222 = vmatpush.bf16.msrb.mxu3 %v8045_v32  ;;  %v7729_v30 = vor.u32 %v9896_v19, %v7728_v18  ;;  %v7921_v32 = vor.u32 %v9944_v22, %v7920_v21  ;;  %v7733_v35 = vor.u32 %v9893_v44, %v7730_v26  ;;  %v10059_v18 = vld [vmem:[#allocation9 + $0x2a4] sm:$0xf]  ;;  %v8388_v19 = vld [vmem:[#allocation9 + $0x2b8] sm:$0xf0]  ;;  %v8170_v21 = vld [vmem:[#allocation9 + $0xf0] sm:$0xf] }
 0x2b2   :  { %v10008_v22 = vld [vmem:[#allocation9 + $0x104] sm:$0xf0]  ;;  %v8362_v44 = vld [vmem:[#allocation9 + $0x270] sm:$0xf] }
 0x2b3   :  { %v8171_v26 = vor.u32 %v10008_v22, %v8170_v21  ;;  %v10032_v21 = vld [vmem:[#allocation9 + $0x1c4] sm:$0xf0]  ;;  %v9981_v22 = vld [vmem:[#allocation9 + $0x34] sm:$0xf] }
 0x2b4   :  { %3184 = vmatpush.bf16.msrb.mxu0 %v7825_v38  ;;  %3197 = vmatpush.bf16.msrb.mxu1 %v8017_v39  ;;  %v9887_v38 = vld [vmem:[#allocation9 + $0x44] sm:$0xf]  ;;  %v7706_v39 = vld [vmem:[#allocation9 + $0x58] sm:$0xf0] }
 0x2b5   :  { %3210 = vmatpush.bf16.msrb.mxu2 %v7829_v46  ;;  %3223 = vmatpush.bf16.msrb.mxu3 %v8021_v47  ;;  %v7705_v46 = vor.u32 %v9890_v34, %v7704_v31  ;;  %v7897_v47 = vor.u32 %v9938_v37, %v7896_v33  ;;  %v7709_v52 = vor.u32 %v9887_v38, %v7706_v39  ;;  %v10053_v34 = vld [vmem:[#allocation9 + $0x274] sm:$0xf]  ;;  %v8146_v38 = vld [vmem:[#allocation9 + $0xc0] sm:$0xf]  ;;  %v10002_v39 = vld [vmem:[#allocation9 + $0xd4] sm:$0xf0] }
 0x2b6   :  { %v8147_v58 = vor.u32 %v10002_v39, %v8146_v38  ;;  %v2493_v38 = vstv %s10836_s18 }
 0x2b7   :  { %vm10842_vm6 = vcmp.eq.s32.totalorder %v2493_v38, 1 }
 0x2b8   :  { %3185 = vmatpush.bf16.msrb.mxu0 %v7801_v57  ;;  %3198 = vmatpush.bf16.msrb.mxu1 %v7993_v7  ;;  %v9881_v57 = vld [vmem:[#allocation9 + $0x14] sm:$0xf]  ;;  %v7682_v7 = vld [vmem:[#allocation9 + $0x28] sm:$0xf0] }
 0x2b9   :  { %3211 = vmatpush.bf16.msrb.mxu2 %v7805_v41  ;;  %3224 = vmatpush.bf16.msrb.mxu3 %v7997_v40  ;;  %v7681_v41 = vor.u32 %v9884_v49, %v7680_v48  ;;  %v7873_v40 = vor.u32 %v9932_v56, %v7872_v55  ;;  %v7685_v45 = vor.u32 %v9881_v57, %v7682_v7  ;;  %v8148_v48 = vld [vmem:[#allocation9 + $0xd8] sm:$0xf0]  ;;  %v8122_v57 = vld [vmem:[#allocation9 + $0x90] sm:$0xf]  ;;  %v9996_v7 = vld [vmem:[#allocation9 + $0xa4] sm:$0xf0] }
 0x2ba   :  { %v8340_v55 = vld [vmem:[#allocation9 + $0x258] sm:$0xf0]  ;;  %v8123_v8 = vor.u32 %v9996_v7, %v8122_v57  ;;  %v10023_v7 = vld [vmem:[#allocation9 + $0x184] sm:$0xf] }
 0x2bc   :  { %3186 = vmatpush.bf16.msrb.mxu0 %v7777_v1  ;;  %3199 = vmatpush.bf16.msrb.mxu1 %v7969_v50  ;;  %v10068_v1 = vld [vmem:[#allocation9 + $0x2e4] sm:$0xf0]  ;;  %v10017_v50 = vld [vmem:[#allocation9 + $0x154] sm:$0xf] }
 0x2bd   :  { %3212 = vmatpush.bf16.msrb.mxu2 %v7781_v3  ;;  %3225 = vmatpush.bf16.msrb.mxu3 %v7973_v4  ;;  %v8411_v2 = vor.u32 %v10068_v1, %v8410_v0  ;;  %v8223_v3 = vor.u32 %v10017_v50, %v8220_v51  ;;  %v10065_v4 = vld [vmem:[#allocation9 + $0x2d4] sm:$0xf]  ;;  %v8316_v0 = vld [vmem:[#allocation9 + $0x228] sm:$0xf0] }
 0x2be   :  { %3139 = vmatmul.bf16.vlgmr.msra.gmra.mxu0 %v10813_v23  ;;  %3152 = vmatmul.bf16.vlgmr.msra.gmra.mxu1 %v10815_v9  ;;  %v8415_v6 = vor.u32 %v10065_v4, %v8412_v5  ;;  %v8319_v50 = vor.u32 %v10041_v17, %v8316_v0  ;;  %v9990_v4 = vld [vmem:[#allocation9 + $0x74] sm:$0xf0]  ;;  %v8290_v5 = vld [vmem:[#allocation9 + $0x1e0] sm:$0xf]  ;;  %v10018_v17 = vld [vmem:[#allocation9 + $0x15c] sm:$0xf] }
 0x2bf   :  { %3165 = vmatmul.bf16.vlgmr.msra.gmra.mxu2 %v10813_v23  ;;  %3178 = vmatmul.bf16.vlgmr.msra.gmra.mxu3 %v10815_v9  ;;  %v8228_v0 = vld [vmem:[#allocation9 + $0x170] sm:$0xf0] }
 0x2c0   :  { %3187 = vmatpush.bf16.msrb.mxu0 %v7753_v20  ;;  %3200 = vmatpush.bf16.msrb.mxu1 %v7945_v16  ;;  %v8196_v16 = vld [vmem:[#allocation9 + $0x138] sm:$0xf0] }
 0x2c1   :  { %3213 = vmatpush.bf16.msrb.mxu2 %v7757_v24  ;;  %3226 = vmatpush.bf16.msrb.mxu3 %v7949_v43  ;;  %v8199_v24 = vor.u32 %v10011_v11, %v8196_v16  ;;  %v8391_v43 = vor.u32 %v10059_v18, %v8388_v19  ;;  %v8074_v18 = vld [vmem:[#allocation9 + $0x30] sm:$0xf]  ;;  %v9984_v19 = vld [vmem:[#allocation9 + $0x44] sm:$0xf0] }
 0x2c4   :  { %3188 = vmatpush.bf16.msrb.mxu0 %v7729_v30  ;;  %3201 = vmatpush.bf16.msrb.mxu1 %v7921_v32  ;;  %v8172_v30 = vld [vmem:[#allocation9 + $0x108] sm:$0xf0]  ;;  %v8363_v32 = vor.u32 %v10056_v28, %v8362_v44 }
 0x2c5   :  { %3214 = vmatpush.bf16.msrb.mxu2 %v7733_v35  ;;  %3227 = vmatpush.bf16.msrb.mxu3 %v7925_v36  ;;  %v8175_v31 = vor.u32 %v10005_v29, %v8172_v30  ;;  %v8364_v35 = vld [vmem:[#allocation9 + $0x288] sm:$0xf0] }
 0x2c6   :  { %v8367_v36 = vor.u32 %v10053_v34, %v8364_v35  ;;  %v8076_v44 = vld [vmem:[#allocation9 + $0x48] sm:$0xf0] }
 0x2c7   :  { %v8268_v34 = vld [vmem:[#allocation9 + $0x1c8] sm:$0xf0] }
 0x2c8   :  { %3189 = vmatpush.bf16.msrb.mxu0 %v7705_v46  ;;  %3202 = vmatpush.bf16.msrb.mxu1 %v7897_v47  ;;  %v10050_v46 = vld [vmem:[#allocation9 + $0x254] sm:$0xf0]  ;;  %v9999_v47 = vld [vmem:[#allocation9 + $0xc4] sm:$0xf] }
 0x2c9   :  { %3215 = vmatpush.bf16.msrb.mxu2 %v7709_v52  ;;  %3228 = vmatpush.bf16.msrb.mxu3 %v7901_v54  ;;  %v8339_v49 = vor.u32 %v10050_v46, %v8338_v53  ;;  %v8151_v52 = vor.u32 %v9999_v47, %v8148_v48  ;;  %v10047_v54 = vld [vmem:[#allocation9 + $0x244] sm:$0xf]  ;;  %v8050_v53 = vld [vmem:[#allocation9] sm:$0xf]  ;;  %v10026_v48 = vld [vmem:[#allocation9 + $0x194] sm:$0xf0] }
 0x2ca   :  { %v8343_v56 = vor.u32 %v10047_v54, %v8340_v55  ;;  %v8242_v46 = vld [vmem:[#allocation9 + $0x180] sm:$0xf] }
 0x2cc   :  { %3190 = vmatpush.bf16.msrb.mxu0 %v7681_v41  ;;  %3203 = vmatpush.bf16.msrb.mxu1 %v7873_v40  ;;  %v10044_v41 = vld [vmem:[#allocation9 + $0x224] sm:$0xf0]  ;;  %v9993_v40 = vld [vmem:[#allocation9 + $0x94] sm:$0xf] }
 0x2cd   :  { %3216 = vmatpush.bf16.msrb.mxu2 %v7685_v45  ;;  %3229 = vmatpush.bf16.msrb.mxu3 %v7877_v61  ;;  %v8124_v45 = vld [vmem:[#allocation9 + $0xa8] sm:$0xf0]  ;;  %v8315_v61 = vor.u32 %v10044_v41, %v8314_v59  ;;  %v8244_v59 = vld [vmem:[#allocation9 + $0x198] sm:$0xf0]  ;;  %v8226_v41 = vld [vmem:[#allocation9 + $0x158] sm:$0xf] }
 0x2ce   :  { %v8127_v63 = vor.u32 %v9993_v40, %v8124_v45  ;;  %v10021_v40 = vld [vmem:[#allocation9 + $0x16c] sm:$0xf0]  ;;  %v8418_v45 = vld [vmem:[#allocation9 + $0x2d8] sm:$0xf] }
 0x2cf   :  { %3191 = vmatmul.bf16.vlgmr.msrb.gmra.mxu0 %v10813_v23  ;;  %3204 = vmatmul.bf16.vlgmr.msrb.gmra.mxu1 %v10815_v9 }
 0x2d0   :  { %3217 = vmatmul.bf16.vlgmr.msrb.gmra.mxu2 %v10813_v23  ;;  %3230 = vmatmul.bf16.vlgmr.msrb.gmra.mxu3 %v10815_v9  ;;  %v10014_v23 = vld [vmem:[#allocation9 + $0x134] sm:$0xf0]  ;;  %v8386_v9 = vld [vmem:[#allocation9 + $0x2a0] sm:$0xf] }
 0x2d1   :  { %3878 = vmatpush.bf16.msra.mxu0 %v8219_v62  ;;  %3891 = vmatpush.bf16.msra.mxu1 %v8411_v2  ;;  %v8195_v13 = vor.u32 %v10014_v23, %v8194_v10  ;;  %v8387_v20 = vor.u32 %v10062_v42, %v8386_v9  ;;  %v10038_v10 = vld [vmem:[#allocation9 + $0x1f4] sm:$0xf0]  ;;  %v9987_v23 = vld [vmem:[#allocation9 + $0x64] sm:$0xf]  ;;  %v8100_v9 = vld [vmem:[#allocation9 + $0x78] sm:$0xf0] }
 0x2d2   :  { %3904 = vmatpush.bf16.msra.mxu2 %v8223_v3  ;;  %3917 = vmatpush.bf16.msra.mxu3 %v8415_v6  ;;  %v8098_v3 = vld [vmem:[#allocation9 + $0x60] sm:$0xf]  ;;  %v10035_v42 = vld [vmem:[#allocation9 + $0x1e4] sm:$0xf]  ;;  %v8103_v11 = vor.u32 %v9987_v23, %v8100_v9  ;;  %v8394_v23 = vld [vmem:[#allocation9 + $0x2a8] sm:$0xf] }
 0x2d3   :  { %v8099_v6 = vor.u32 %v9990_v4, %v8098_v3  ;;  %v8202_v3 = vld [vmem:[#allocation9 + $0x128] sm:$0xf] }
 0x2d5   :  { %3879 = vmatpush.bf16.msra.mxu0 %v8195_v13  ;;  %3892 = vmatpush.bf16.msra.mxu1 %v8387_v20  ;;  %v8291_v13 = vor.u32 %v10038_v10, %v8290_v5  ;;  %v8292_v20 = vld [vmem:[#allocation9 + $0x1f8] sm:$0xf0]  ;;  %v10015_v10 = vld [vmem:[#allocation9 + $0x13c] sm:$0xf0] }
 0x2d6   :  { %3905 = vmatpush.bf16.msra.mxu2 %v8199_v24  ;;  %3918 = vmatpush.bf16.msra.mxu3 %v8391_v43  ;;  %v8295_v16 = vor.u32 %v10035_v42, %v8292_v20  ;;  %v8266_v24 = vld [vmem:[#allocation9 + $0x1b0] sm:$0xf]  ;;  %v8075_v43 = vor.u32 %v9984_v19, %v8074_v18  ;;  %v8203_v20 = vor.u32 %v10015_v10, %v8202_v3  ;;  %v10012_v18 = vld [vmem:[#allocation9 + $0x12c] sm:$0xf]  ;;  %v8204_v19 = vld [vmem:[#allocation9 + $0x140] sm:$0xf0] }
 0x2d7   :  { %v8267_v30 = vor.u32 %v10032_v21, %v8266_v24  ;;  %v10060_v24 = vld [vmem:[#allocation9 + $0x2ac] sm:$0xf]  ;;  %v8396_v21 = vld [vmem:[#allocation9 + $0x2c0] sm:$0xf0]  ;;  %v9994_v3 = vld [vmem:[#allocation9 + $0x9c] sm:$0xf] }
 0x2d8   :  { %v10042_v10 = vld [vmem:[#allocation9 + $0x21c] sm:$0xf] }
 0x2d9   :  { %3880 = vmatpush.bf16.msra.mxu0 %v8171_v26  ;;  %3893 = vmatpush.bf16.msra.mxu1 %v8363_v32  ;;  %v8079_v32 = vor.u32 %v9981_v22, %v8076_v44 }
 0x2da   :  { %3906 = vmatpush.bf16.msra.mxu2 %v8175_v31  ;;  %3919 = vmatpush.bf16.msra.mxu3 %v8367_v36  ;;  %v10029_v31 = vld [vmem:[#allocation9 + $0x1b4] sm:$0xf] }
 0x2db   :  { %v8271_v39 = vor.u32 %v10029_v31, %v8268_v34  ;;  %v8370_v34 = vld [vmem:[#allocation9 + $0x278] sm:$0xf] }
 0x2dd   :  { %3881 = vmatpush.bf16.msra.mxu0 %v8147_v58  ;;  %3894 = vmatpush.bf16.msra.mxu1 %v8339_v49  ;;  %v9978_v58 = vld [vmem:[#allocation9 + $0x14] sm:$0xf0]  ;;  %v9975_v49 = vld [vmem:[#allocation9 + $0x4] sm:$0xf] }
 0x2de   :  { %3907 = vmatpush.bf16.msra.mxu2 %v8151_v52  ;;  %3920 = vmatpush.bf16.msra.mxu3 %v8343_v56  ;;  %v8051_v47 = vor.u32 %v9978_v58, %v8050_v53  ;;  %v8052_v52 = vld [vmem:[#allocation9 + $0x18] sm:$0xf0]  ;;  %v8243_v56 = vor.u32 %v10026_v48, %v8242_v46  ;;  %v8372_v58 = vld [vmem:[#allocation9 + $0x290] sm:$0xf0]  ;;  %v8154_v48 = vld [vmem:[#allocation9 + $0xc8] sm:$0xf] }
 0x2df   :  { %v8055_v57 = vor.u32 %v9975_v49, %v8052_v52  ;;  %v10054_v53 = vld [vmem:[#allocation9 + $0x27c] sm:$0xf]  ;;  %v10003_v49 = vld [vmem:[#allocation9 + $0xdc] sm:$0xf0]  ;;  %v8346_v52 = vld [vmem:[#allocation9 + $0x248] sm:$0xf] }
 0x2e1   :  { %3882 = vmatpush.bf16.msra.mxu0 %v8123_v8  ;;  %3895 = vmatpush.bf16.msra.mxu1 %v8315_v61  ;;  %v8247_v8 = vor.u32 %v10023_v7, %v8244_v59  ;;  %v8227_v61 = vor.u32 %v10021_v40, %v8226_v41  ;;  %v10000_v7 = vld [vmem:[#allocation9 + $0xcc] sm:$0xf]  ;;  %v8156_v59 = vld [vmem:[#allocation9 + $0xe0] sm:$0xf0] }
 0x2e2   :  { %3908 = vmatpush.bf16.msra.mxu2 %v8127_v63  ;;  %3921 = vmatpush.bf16.msra.mxu3 %v8319_v50  ;;  %v10069_v63 = vld [vmem:[#allocation9 + $0x2ec] sm:$0xf0]  ;;  %v8231_v50 = vor.u32 %v10018_v17, %v8228_v0  ;;  %v8159_v40 = vor.u32 %v10000_v7, %v8156_v59 }
 0x2e5   :  { %3883 = vmatpush.bf16.msra.mxu0 %v8099_v6  ;;  %3896 = vmatpush.bf16.msra.mxu1 %v8291_v13  ;;  %v10063_v13 = vld [vmem:[#allocation9 + $0x2bc] sm:$0xf0] }
 0x2e6   :  { %3909 = vmatpush.bf16.msra.mxu2 %v8103_v11  ;;  %3922 = vmatpush.bf16.msra.mxu3 %v8295_v16  ;;  %v8395_v16 = vor.u32 %v10063_v13, %v8394_v23  ;;  %v8324_v23 = vld [vmem:[#allocation9 + $0x230] sm:$0xf0] }
 0x2e7   :  { %v8327_v13 = vor.u32 %v10042_v10, %v8324_v23 }
 0x2e9   :  { %3884 = vmatpush.bf16.msra.mxu0 %v8075_v43  ;;  %3897 = vmatpush.bf16.msra.mxu1 %v8267_v30  ;;  %v8207_v43 = vor.u32 %v10012_v18, %v8204_v19  ;;  %v10009_v30 = vld [vmem:[#allocation9 + $0x10c] sm:$0xf0]  ;;  %v9988_v18 = vld [vmem:[#allocation9 + $0x6c] sm:$0xf]  ;;  %v8108_v19 = vld [vmem:[#allocation9 + $0x80] sm:$0xf0] }
 0x2ea   :  { %3910 = vmatpush.bf16.msra.mxu2 %v8079_v32  ;;  %3923 = vmatpush.bf16.msra.mxu3 %v8271_v39  ;;  %v10852_v32 = vsel %vm10842_vm6, %v10776_v15, %v10774_v14  ;;  %v8180_v39 = vld [vmem:[#allocation9 + $0x110] sm:$0xf0]  ;;  %v8375_v15 = vor.u32 %v10054_v53, %v8372_v58  ;;  %v9982_v53 = vld [vmem:[#allocation9 + $0x3c] sm:$0xf] }
 0x2eb   :  { %v8084_v58 = vld [vmem:[#allocation9 + $0x50] sm:$0xf0] }
 0x2ed   :  { %3885 = vmatpush.bf16.msra.mxu0 %v8051_v47  ;;  %3898 = vmatpush.bf16.msra.mxu1 %v8243_v56  ;;  %v8155_v56 = vor.u32 %v10003_v49, %v8154_v48  ;;  %v8058_v48 = vld [vmem:[#allocation9 + $0x8] sm:$0xf]  ;;  %v9979_v49 = vld [vmem:[#allocation9 + $0x1c] sm:$0xf0] }
 0x2ee   :  { %3911 = vmatpush.bf16.msra.mxu2 %v8055_v57  ;;  %3924 = vmatpush.bf16.msra.mxu3 %v8247_v8  ;;  %v10051_v57 = vld [vmem:[#allocation9 + $0x25c] sm:$0xf0] }
 0x2ef   :  { %v8347_v41 = vor.u32 %v10051_v57, %v8346_v52  ;;  %v9976_v57 = vld [vmem:[#allocation9 + $0xc] sm:$0xf] }
 0x2f1   :  { %3930 = vmatpush.bf16.msrb.mxu0 %v8227_v61  ;;  %v8348_v61 = vld [vmem:[#allocation9 + $0x260] sm:$0xf0] }
 0x2f2   :  { %3956 = vmatpush.bf16.msrb.mxu2 %v8231_v50  ;;  %v8322_v50 = vld [vmem:[#allocation9 + $0x218] sm:$0xf] }
 0x2f5   :  { %3931 = vmatpush.bf16.msrb.mxu0 %v8203_v20 }
 0x2f6   :  { %3957 = vmatpush.bf16.msrb.mxu2 %v8207_v43 }
 0x32b   :  { %v10831_v33 = vpop.f32.mrf.mxu0  ;;  %v10833_v37 = vpop.f32.mrf.mxu1 }
 0x32c   :  { %v3102_v22 = vadd.f32 %v10833_v37, %v10831_v33 }
 0x332   :  { %v3114_v62 = vpop.f32.mrf.mxu2  ;;  %v3127_v1 = vpop.f32.mrf.mxu3 }
 0x333   :  { %v3090_v51 = vpop.f32.mrf.mxu0  ;;  %v3103_v2 = vpop.f32.mrf.mxu1  ;;  %v10838_v26 = vadd.f32 %v3127_v1, %v3114_v62  ;;  %v8419_v1 = vor.u32 %v10069_v63, %v8418_v45  ;;  %v10048_v45 = vld [vmem:[#allocation9 + $0x24c] sm:$0xf] }
 0x334   :  { %v10066_v51 = vld [vmem:[#allocation9 + $0x2dc] sm:$0xf]  ;;  %v8420_v2 = vld [vmem:[#allocation9 + $0x2f0] sm:$0xf0]  ;;  %v8351_v0 = vor.u32 %v10048_v45, %v8348_v61  ;;  %v8252_v45 = vld [vmem:[#allocation9 + $0x1a0] sm:$0xf0] }
 0x335   :  { %v3239_v54 = vrot.slane %v10838_v26, 7  ;;  %v8423_v6 = vor.u32 %v10066_v51, %v8420_v2  ;;  %3943 = vmatpush.bf16.msrb.mxu1 %v8419_v1  ;;  %v9997_v1 = vld [vmem:[#allocation9 + $0xac] sm:$0xf0] }
 0x336   :  { %v10045_v2 = vld [vmem:[#allocation9 + $0x22c] sm:$0xf0] }
 0x337   :  { %3969 = vmatpush.bf16.msrb.mxu3 %v8423_v6  ;;  %v3242_v38 = vsel %vm834_vm0, %v3102_v22, %v3239_v54 }
 0x339   :  { %3944 = vmatpush.bf16.msrb.mxu1 %v8395_v16  ;;  %v10039_v16 = vld [vmem:[#allocation9 + $0x1fc] sm:$0xf0] }
 0x33a   :  { %v3116_v28 = vpop.f32.mrf.mxu2  ;;  %v3129_v29 = vpop.f32.mrf.mxu3 }
 0x33b   :  { %v3140_v35 = vpop.f32.mrf.mxu0  ;;  %v3153_v36 = vpop.f32.mrf.mxu1  ;;  %v8399_v28 = vor.u32 %v10060_v24, %v8396_v21  ;;  %v8178_v29 = vld [vmem:[#allocation9 + $0xf8] sm:$0xf] }
 0x33c   :  { %v3154_v62 = vadd.f32 %v3153_v36, %v3140_v35  ;;  %v8179_v31 = vor.u32 %v10009_v30, %v8178_v29  ;;  %v10057_v35 = vld [vmem:[#allocation9 + $0x28c] sm:$0xf0]  ;;  %v10006_v36 = vld [vmem:[#allocation9 + $0xfc] sm:$0xf] }
 0x33d   :  { %v8371_v37 = vor.u32 %v10057_v35, %v8370_v34  ;;  %3970 = vmatpush.bf16.msrb.mxu3 %v8399_v28  ;;  %v8183_v14 = vor.u32 %v10006_v36, %v8180_v39  ;;  %v8300_v28 = vld [vmem:[#allocation9 + $0x200] sm:$0xf0]  ;;  %v8082_v35 = vld [vmem:[#allocation9 + $0x38] sm:$0xf]  ;;  %v9985_v36 = vld [vmem:[#allocation9 + $0x4c] sm:$0xf0] }
 0x33e   :  { %v3240_v44 = vrot.slane %v3154_v62, 6  ;;  %3932 = vmatpush.bf16.msrb.mxu0 %v8179_v31  ;;  %v8130_v62 = vld [vmem:[#allocation9 + $0x98] sm:$0xf] }
 0x33f   :  { %3945 = vmatpush.bf16.msrb.mxu1 %v8371_v37  ;;  %3958 = vmatpush.bf16.msrb.mxu2 %v8183_v14  ;;  %v8131_v51 = vor.u32 %v9997_v1, %v8130_v62  ;;  %v8083_v37 = vor.u32 %v9985_v36, %v8082_v35  ;;  %v8087_v14 = vor.u32 %v9982_v53, %v8084_v58 }
 0x341   :  { %3971 = vmatpush.bf16.msrb.mxu3 %v8375_v15  ;;  %v8276_v15 = vld [vmem:[#allocation9 + $0x1d0] sm:$0xf0] }
 0x342   :  { %v3166_v4 = vpop.f32.mrf.mxu2  ;;  %v3179_v5 = vpop.f32.mrf.mxu3  ;;  %3933 = vmatpush.bf16.msrb.mxu0 %v8155_v56  ;;  %v10027_v56 = vld [vmem:[#allocation9 + $0x19c] sm:$0xf0] }
 0x343   :  { %v3180_v9 = vadd.f32 %v3179_v5, %v3166_v4  ;;  %v3142_v42 = vpop.f32.mrf.mxu0  ;;  %v3155_v11 = vpop.f32.mrf.mxu1  ;;  %v8132_v4 = vld [vmem:[#allocation9 + $0xb0] sm:$0xf0]  ;;  %3946 = vmatpush.bf16.msrb.mxu1 %v8347_v41  ;;  %3959 = vmatpush.bf16.msrb.mxu2 %v8159_v40  ;;  %v8323_v5 = vor.u32 %v10045_v2, %v8322_v50  ;;  %v8060_v41 = vld [vmem:[#allocation9 + $0x20] sm:$0xf0]  ;;  %v10024_v40 = vld [vmem:[#allocation9 + $0x18c] sm:$0xf] }
 0x344   :  { %v8135_v6 = vor.u32 %v9994_v3, %v8132_v4  ;;  %v9991_v42 = vld [vmem:[#allocation9 + $0x7c] sm:$0xf0]  ;;  %v8298_v11 = vld [vmem:[#allocation9 + $0x1e8] sm:$0xf]  ;;  %v8255_v62 = vor.u32 %v10024_v40, %v8252_v45  ;;  %v8188_v40 = vld [vmem:[#allocation9 + $0x118] sm:$0xf0] }
 0x345   :  { %v3241_v26 = vrot.slane %v3180_v9, 5  ;;  %3972 = vmatpush.bf16.msrb.mxu3 %v8351_v0  ;;  %v8106_v9 = vld [vmem:[#allocation9 + $0x68] sm:$0xf]  ;;  %v8299_v22 = vor.u32 %v10039_v16, %v8298_v11  ;;  %v8063_v0 = vor.u32 %v9976_v57, %v8060_v41  ;;  %v10007_v41 = vld [vmem:[#allocation9 + $0x104] sm:$0xf] }
 0x346   :  { %3934 = vmatpush.bf16.msrb.mxu0 %v8131_v51  ;;  %v8107_v20 = vor.u32 %v9991_v42, %v8106_v9  ;;  %v3275_v9 = vrot.slane %v10852_v32, 4  ;;  %v10055_v45 = vld [vmem:[#allocation9 + $0x284] sm:$0xf] }
 0x347   :  { %v3243_v33 = vsel %vm836_vm2, %v3240_v44, %v3241_v26  ;;  %3947 = vmatpush.bf16.msrb.mxu1 %v8323_v5  ;;  %3960 = vmatpush.bf16.msrb.mxu2 %v8135_v6  ;;  %v8111_v44 = vor.u32 %v9988_v18, %v8108_v19  ;;  %v10036_v26 = vld [vmem:[#allocation9 + $0x1ec] sm:$0xf] }
 0x348   :  { %v3244_v46 = vsel %vm838_vm3, %v3242_v38, %v3243_v33  ;;  %v8303_v34 = vor.u32 %v10036_v26, %v8300_v28  ;;  %v8274_v38 = vld [vmem:[#allocation9 + $0x1b8] sm:$0xf]  ;;  %v10033_v33 = vld [vmem:[#allocation9 + $0x1cc] sm:$0xf0]  ;;  %v8426_v26 = vld [vmem:[#allocation9 + $0x2e0] sm:$0xf] }
 0x349   :  { %v3246_v47 = vadd.f32 %v3244_v46, %v10852_v32  ;;  %3973 = vmatpush.bf16.msrb.mxu3 %v8327_v13  ;;  %v8275_v39 = vor.u32 %v10033_v33, %v8274_v38  ;;  %v10030_v46 = vld [vmem:[#allocation9 + $0x1bc] sm:$0xf]  ;;  %v10070_v32 = vld [vmem:[#allocation9 + $0x2f4] sm:$0xf0]  ;;  %v10019_v28 = vld [vmem:[#allocation9 + $0x164] sm:$0xf] }
 0x34a   :  { %v3168_v55 = vpop.f32.mrf.mxu2  ;;  %v3181_v54 = vpop.f32.mrf.mxu3  ;;  %3935 = vmatpush.bf16.msrb.mxu0 %v8107_v20  ;;  %v8427_v33 = vor.u32 %v10070_v32, %v8426_v26  ;;  %v8114_v26 = vld [vmem:[#allocation9 + $0x70] sm:$0xf]  ;;  %v9992_v32 = vld [vmem:[#allocation9 + $0x84] sm:$0xf0] }
 0x34b   :  { %v8046_v8 = vmul.f32 -1.442695, %v3246_v47  ;;  %3948 = vmatpush.bf16.msrb.mxu1 %v8299_v22  ;;  %3961 = vmatpush.bf16.msrb.mxu2 %v8111_v44  ;;  %v8279_v47 = vor.u32 %v10030_v46, %v8276_v15  ;;  %v8059_v55 = vor.u32 %v9979_v49, %v8058_v48  ;;  %v8250_v54 = vld [vmem:[#allocation9 + $0x188] sm:$0xf]  ;;  %v10022_v22 = vld [vmem:[#allocation9 + $0x174] sm:$0xf0] }
 0x34c   :  { %v10858_v63 = vpop.f32.mrf.mxu0  ;;  %v10860_v17 = vpop.f32.mrf.mxu1  ;;  %v8402_v46 = vld [vmem:[#allocation9 + $0x2b0] sm:$0xf]  ;;  %v10013_v15 = vld [vmem:[#allocation9 + $0x134] sm:$0xf]  ;;  %v8404_v49 = vld [vmem:[#allocation9 + $0x2c8] sm:$0xf0] }
 0x34d   :  { %10384 = vpow2.f32 %v8046_v8  ;;  %3974 = vmatpush.bf16.msrb.mxu3 %v8303_v34  ;;  %v8251_v8 = vor.u32 %v10027_v56, %v8250_v54  ;;  %v3206_v2 = vadd.f32 %v10860_v17, %v10858_v63  ;;  %v10061_v48 = vld [vmem:[#allocation9 + $0x2b4] sm:$0xf]  ;;  %v8186_v54 = vld [vmem:[#allocation9 + $0x100] sm:$0xf]  ;;  %v10010_v56 = vld [vmem:[#allocation9 + $0x114] sm:$0xf0] }
 0x34e   :  { %3936 = vmatpush.bf16.msrb.mxu0 %v8083_v37  ;;  %v8210_v37 = vld [vmem:[#allocation9 + $0x130] sm:$0xf] }
 0x34f   :  { %3949 = vmatpush.bf16.msrb.mxu1 %v8275_v39  ;;  %3962 = vmatpush.bf16.msrb.mxu2 %v8087_v14  ;;  %v3266_v23 = vadd.f32 %v3206_v2, %v10647_v25  ;;  %v10016_v39 = vld [vmem:[#allocation9 + $0x144] sm:$0xf0] }
 0x350   :  { %v10064_v14 = vld [vmem:[#allocation9 + $0x2c4] sm:$0xf0] }
 0x351   :  { %3975 = vmatpush.bf16.msrb.mxu3 %v8279_v47  ;;  %v8212_v47 = vld [vmem:[#allocation9 + $0x148] sm:$0xf0] }
 0x352   :  { %3937 = vmatpush.bf16.msrb.mxu0 %v8059_v55  ;;  %v8403_v55 = vor.u32 %v10064_v14, %v8402_v46  ;;  %v8215_v57 = vor.u32 %v10013_v15, %v8212_v47  ;;  %v8282_v15 = vld [vmem:[#allocation9 + $0x1c0] sm:$0xf]  ;;  %v10034_v47 = vld [vmem:[#allocation9 + $0x1d4] sm:$0xf0] }
 0x353   :  { %v10385_v24 = vpop.eup %10384  ;;  %v3218_v43 = vpop.f32.mrf.mxu2  ;;  %3950 = vmatpush.bf16.msrb.mxu1 %v8251_v8  ;;  %3963 = vmatpush.bf16.msrb.mxu2 %v8063_v0  ;;  %v10058_v8 = vld [vmem:[#allocation9 + $0x294] sm:$0xf0]  ;;  %v8187_v0 = vor.u32 %v10010_v56, %v8186_v54  ;;  %v8283_v56 = vor.u32 %v10034_v47, %v8282_v15  ;;  %v8532_v15 = vld [vmem:[#allocation9 + $0xc0] sm:$0xf] }
 0x354   :  { %v3231_v21 = vpop.f32.mrf.mxu3  ;;  %v10862_v29 = vadd.f32 1.0, %v10385_v24  ;;  %v3194_v30 = vpop.f32.mrf.mxu0  ;;  %v10098_v47 = vld [vmem:[#allocation9 + $0xd4] sm:$0xf0] }
 0x355   :  { %v3207_v31 = vpop.f32.mrf.mxu1  ;;  %v3232_v52 = vadd.f32 %v3231_v21, %v3218_v43  ;;  %3976 = vmatpush.bf16.msrb.mxu3 %v8255_v62  ;;  %v8234_v21 = vld [vmem:[#allocation9 + $0x160] sm:$0xf]  ;;  %v10067_v30 = vld [vmem:[#allocation9 + $0x2e4] sm:$0xf] }
 0x356   :  { %10386 = vrcp.f32 %v10862_v29  ;;  %v3262_v3 = vand.u32 2147483648, %v10862_v29  ;;  %v3260_v5 = vand.u32 2147483647, %v10862_v29  ;;  %vm3256_vm9 = vweird.f32 %v10862_v29  ;;  %v8428_v31 = vld [vmem:[#allocation9 + $0x2f8] sm:$0xf0] }
 0x357   :  { %v3267_v50 = vadd.f32 %v3232_v52, %v10649_v27  ;;  %v8235_v38 = vor.u32 %v10022_v22, %v8234_v21  ;;  %v8431_v58 = vor.u32 %v10067_v30, %v8428_v31  ;;  %v8211_v52 = vor.u32 %v10016_v39, %v8210_v37  ;;  %v8306_v30 = vld [vmem:[#allocation9 + $0x1f0] sm:$0xf]  ;;  %v10040_v31 = vld [vmem:[#allocation9 + $0x204] sm:$0xf0] }
 0x358   :  { %v3263_v13 = vor.u32 1.1754944e-38, %v3262_v3  ;;  %vm3261_vm11 = vcmp.eq.f32.partialorder %v3260_v5, 8.507059e+37  ;;  %v8354_v3 = vld [vmem:[#allocation9 + $0x250] sm:$0xf]  ;;  %v10001_v5 = vld [vmem:[#allocation9 + $0xd4] sm:$0xf]  ;;  %v8115_v37 = vor.u32 %v9992_v32, %v8114_v26  ;;  %v8307_v39 = vor.u32 %v10040_v31, %v8306_v30 }
 0x359   :  { %v3270_v6 = vrot.slane %v3267_v50, 7  ;;  %v10004_v50 = vld [vmem:[#allocation9 + $0xe4] sm:$0xf0]  ;;  %v8748_v30 = vld [vmem:[#allocation9 + $0x270] sm:$0xf] }
 0x35b   :  { %v3220_v7 = vpop.f32.mrf.mxu2  ;;  %v3271_v17 = vsel %vm834_vm0, %v3266_v23, %v3270_v6  ;;  %v8164_v6 = vld [vmem:[#allocation9 + $0xe8] sm:$0xf0] }
 0x35c   :  { %v3233_v59 = vpop.f32.mrf.mxu3  ;;  %v10387_v61 = vpop.eup %10386  ;;  %v8407_v7 = vor.u32 %v10061_v48, %v8404_v49  ;;  %v8356_v23 = vld [vmem:[#allocation9 + $0x268] sm:$0xf0]  ;;  %v9983_v48 = vld [vmem:[#allocation9 + $0x44] sm:$0xf]  ;;  %v8092_v49 = vld [vmem:[#allocation9 + $0x58] sm:$0xf0] }
 0x35d   :  { %v3252_v1 = vmul.f32 %v10387_v61, %v10862_v29  ;;  %vm3257_vm7 = vweird.f32 %v10387_v61  ;;  %v8236_v29 = vld [vmem:[#allocation9 + $0x178] sm:$0xf0]  ;;  %v8378_v59 = vld [vmem:[#allocation9 + $0x280] sm:$0xf] }
 0x35e   :  { %vm3258_vm10 = vmor %vm3256_vm9, %vm3257_vm7  ;;  %v8239_v53 = vor.u32 %v10019_v28, %v8236_v29  ;;  %v8379_v62 = vor.u32 %v10058_v8, %v8378_v59  ;;  %v8095_v59 = vor.u32 %v9983_v48, %v8092_v49  ;;  %v8724_v48 = vld [vmem:[#allocation9 + $0x240] sm:$0xf]  ;;  %v8533_v49 = vor.u32 %v10098_v47, %v8532_v15  ;;  %v10074_v47 = vld [vmem:[#allocation9 + $0x14] sm:$0xf0] }
 0x35f   :  { %v3253_v51 = vsub.f32 1.0, %v3252_v1  ;;  %v8162_v1 = vld [vmem:[#allocation9 + $0xd0] sm:$0xf]  ;;  %v8436_v15 = vld [vmem:[#allocation9] sm:$0xf] }
 0x361   :  { %v3254_v4 = vmul.f32 %v10387_v61, %v3253_v51  ;;  %v8191_v51 = vor.u32 %v10007_v41, %v8188_v40  ;;  %v8258_v41 = vld [vmem:[#allocation9 + $0x190] sm:$0xf]  ;;  %v10028_v40 = vld [vmem:[#allocation9 + $0x1a4] sm:$0xf0] }
 0x363   :  { %v3255_v10 = vadd.f32 %v10387_v61, %v3254_v4  ;;  %v10052_v4 = vld [vmem:[#allocation9 + $0x264] sm:$0xf0] }
 0x365   :  { %v3259_v42 = vsel %vm3258_vm10, %v10387_v61, %v3255_v10  ;;  %v8380_v61 = vld [vmem:[#allocation9 + $0x298] sm:$0xf0]  ;;  %v10049_v10 = vld [vmem:[#allocation9 + $0x254] sm:$0xf] }
 0x366   :  { %v3264_v63 = vsel %vm3261_vm11, %v3263_v13, %v3259_v42  ;;  %v8383_v2 = vor.u32 %v10055_v45, %v8380_v61  ;;  %v8163_v13 = vor.u32 %v10004_v50, %v8162_v1  ;;  %v8138_v42 = vld [vmem:[#allocation9 + $0xa0] sm:$0xf]  ;;  %v9977_v45 = vld [vmem:[#allocation9 + $0x14] sm:$0xf]  ;;  %v8068_v61 = vld [vmem:[#allocation9 + $0x28] sm:$0xf0]  ;;  %v8259_v50 = vor.u32 %v10028_v40, %v8258_v41 }
 0x367   :  { %v3273_v11 = vmul.f32 %v3271_v17, %v3264_v63  ;;  %v3280_v16 = vrot.slane %v3264_v63, 2  ;;  %v9998_v63 = vld [vmem:[#allocation9 + $0xb4] sm:$0xf0]  ;;  %v8167_v17 = vor.u32 %v10001_v5, %v8164_v6  ;;  %v8796_v5 = vld [vmem:[#allocation9 + $0x2d0] sm:$0xf] }
 0x368   :  { %v8139_v21 = vor.u32 %v9998_v63, %v8138_v42  ;;  %v10161_v63 = vld [vmem:[#allocation9 + $0x2d4] sm:$0xf]  ;;  %v8508_v41 = vld [vmem:[#allocation9 + $0x90] sm:$0xf]  ;;  %v10092_v40 = vld [vmem:[#allocation9 + $0xa4] sm:$0xf0] }
 0x369   :  { %v3277_v20 = vadd.f32 %v3275_v9, %v3273_v11  ;;  %v3282_v18 = vsub.f32 1.0, %v3280_v16  ;;  %v3284_v43 = vmul.f32 %v3280_v16, %v10806_v12  ;;  %v8355_v9 = vor.u32 %v10052_v4, %v8354_v3  ;;  %v10046_v16 = vld [vmem:[#allocation9 + $0x234] sm:$0xf0]  ;;  %v8604_v3 = vld [vmem:[#allocation9 + $0x150] sm:$0xf] }
 0x36a   :  { %v8359_v11 = vor.u32 %v10049_v10, %v8356_v23  ;;  %v10116_v4 = vld [vmem:[#allocation9 + $0x164] sm:$0xf0]  ;;  %v10113_v23 = vld [vmem:[#allocation9 + $0x154] sm:$0xf] }
 0x36b   :  { %10388 = vtanh.f32 %v3277_v20  ;;  %v8330_v20 = vld [vmem:[#allocation9 + $0x220] sm:$0xf]  ;;  %v8605_v6 = vor.u32 %v10116_v4, %v8604_v3  ;;  %v10164_v10 = vld [vmem:[#allocation9 + $0x2e4] sm:$0xf0]  ;;  %v8702_v3 = vld [vmem:[#allocation9 + $0x228] sm:$0xf0] }
 0x36c   :  { %v8331_v22 = vor.u32 %v10046_v16, %v8330_v20  ;;  %v8580_v20 = vld [vmem:[#allocation9 + $0x120] sm:$0xf] }
 0x371   :  { %v10389_v19 = vpop.eup %10388 }
 0x372   :  { %v3283_v24 = vmul.f32 %v10389_v19, %v3282_v18  ;;  %v9995_v18 = vld [vmem:[#allocation9 + $0xa4] sm:$0xf]  ;;  %v8140_v19 = vld [vmem:[#allocation9 + $0xb8] sm:$0xf0] }
 0x373   :  { %v8143_v28 = vor.u32 %v9995_v18, %v8140_v19  ;;  %v10158_v18 = vld [vmem:[#allocation9 + $0x2b4] sm:$0xf0]  ;;  %v10107_v19 = vld [vmem:[#allocation9 + $0x124] sm:$0xf] }
 0x374   :  { %v10876_v44 = vadd.f32 %v3284_v43, %v3283_v24  ;;  %v10043_v24 = vld [vmem:[#allocation9 + $0x224] sm:$0xf]  ;;  %v8332_v43 = vld [vmem:[#allocation9 + $0x238] sm:$0xf0] }
 0x375   :  { %v8335_v29 = vor.u32 %v10043_v24, %v8332_v43  ;;  %v8582_v43 = vld [vmem:[#allocation9 + $0x138] sm:$0xf0] }
 0x376   :  { %3287 = vst.msk [vmem:[#allocation10 + $0x3] ss:$8 sm:$0x3] %vm10658_vm8, %v10876_v44  ;;  %v3296_v34 = vperm.slane %v10876_v44, 0  ;;  %v3297_v35 = vperm.slane %v10876_v44, 1  ;;  %v8585_v26 = vor.u32 %v10107_v19, %v8582_v43 }
 0x377   :  { %v10080_v43 = vld [vmem:[#allocation9 + $0x44] sm:$0xf0] }
 0x378   :  { %v10883_v36 = vpack.c.bf16 %v3296_v34, %v3296_v34  ;;  %v10885_v12 = vpack.c.bf16 %v3297_v35, %v3297_v35  ;;  %v9989_v34 = vld [vmem:[#allocation9 + $0x74] sm:$0xf]  ;;  %v8116_v35 = vld [vmem:[#allocation9 + $0x88] sm:$0xf0] }
 0x379   :  { %v8119_v46 = vor.u32 %v9989_v34, %v8116_v35  ;;  %v10152_v34 = vld [vmem:[#allocation9 + $0x284] sm:$0xf0]  ;;  %v10101_v35 = vld [vmem:[#allocation9 + $0xf4] sm:$0xf] }
 0x37a   :  { %3886 = vmatmul.bf16.vlgmr.msra.gmra.mxu0 %v10883_v36  ;;  %3899 = vmatmul.bf16.vlgmr.msra.gmra.mxu1 %v10885_v12 }
 0x37b   :  { %3912 = vmatmul.bf16.vlgmr.msra.gmra.mxu2 %v10883_v36  ;;  %3925 = vmatmul.bf16.vlgmr.msra.gmra.mxu3 %v10885_v12 }
 0x37c   :  { %3982 = vmatpush.bf16.msra.mxu0 %v8235_v38  ;;  %3995 = vmatpush.bf16.msra.mxu1 %v8427_v33  ;;  %v10037_v38 = vld [vmem:[#allocation9 + $0x1f4] sm:$0xf]  ;;  %v8308_v33 = vld [vmem:[#allocation9 + $0x208] sm:$0xf0] }
 0x37d   :  { %4008 = vmatpush.bf16.msra.mxu2 %v8239_v53  ;;  %4021 = vmatpush.bf16.msra.mxu3 %v8431_v58  ;;  %v8090_v53 = vld [vmem:[#allocation9 + $0x40] sm:$0xf]  ;;  %v9986_v58 = vld [vmem:[#allocation9 + $0x54] sm:$0xf0]  ;;  %v8311_v14 = vor.u32 %v10037_v38, %v8308_v33  ;;  %v8558_v38 = vld [vmem:[#allocation9 + $0x108] sm:$0xf0]  ;;  %v8749_v33 = vor.u32 %v10152_v34, %v8748_v30 }
 0x37e   :  { %v8091_v54 = vor.u32 %v9986_v58, %v8090_v53  ;;  %v8750_v53 = vld [vmem:[#allocation9 + $0x288] sm:$0xf0] }
 0x380   :  { %3983 = vmatpush.bf16.msra.mxu0 %v8211_v52  ;;  %3996 = vmatpush.bf16.msra.mxu1 %v8403_v55  ;;  %v10031_v52 = vld [vmem:[#allocation9 + $0x1c4] sm:$0xf]  ;;  %v8284_v55 = vld [vmem:[#allocation9 + $0x1d8] sm:$0xf0] }
 0x381   :  { %4009 = vmatpush.bf16.msra.mxu2 %v8215_v57  ;;  %4022 = vmatpush.bf16.msra.mxu3 %v8407_v7  ;;  %v8066_v57 = vld [vmem:[#allocation9 + $0x10] sm:$0xf]  ;;  %v9980_v7 = vld [vmem:[#allocation9 + $0x24] sm:$0xf0]  ;;  %v8287_v8 = vor.u32 %v10031_v52, %v8284_v55  ;;  %v10146_v52 = vld [vmem:[#allocation9 + $0x254] sm:$0xf0] }
 0x382   :  { %v8067_v1 = vor.u32 %v9980_v7, %v8066_v57  ;;  %v10095_v55 = vld [vmem:[#allocation9 + $0xc4] sm:$0xf] }
 0x383   :  { %v10143_v7 = vld [vmem:[#allocation9 + $0x244] sm:$0xf] }
 0x384   :  { %3984 = vmatpush.bf16.msra.mxu0 %v8187_v0  ;;  %3997 = vmatpush.bf16.msra.mxu1 %v8379_v62  ;;  %v10025_v0 = vld [vmem:[#allocation9 + $0x194] sm:$0xf]  ;;  %v8260_v62 = vld [vmem:[#allocation9 + $0x1a8] sm:$0xf0] }
 0x385   :  { %4010 = vmatpush.bf16.msra.mxu2 %v8191_v51  ;;  %4023 = vmatpush.bf16.msra.mxu3 %v8383_v2  ;;  %v8071_v51 = vor.u32 %v9977_v45, %v8068_v61  ;;  %v8263_v2 = vor.u32 %v10025_v0, %v8260_v62  ;;  %v8700_v45 = vld [vmem:[#allocation9 + $0x210] sm:$0xf]  ;;  %v8509_v61 = vor.u32 %v10092_v40, %v8508_v41  ;;  %v10140_v0 = vld [vmem:[#allocation9 + $0x224] sm:$0xf0]  ;;  %v10089_v62 = vld [vmem:[#allocation9 + $0x94] sm:$0xf] }
 0x386   :  { %v8630_v41 = vld [vmem:[#allocation9 + $0x198] sm:$0xf0] }
 0x388   :  { %3985 = vmatpush.bf16.msra.mxu0 %v8163_v13  ;;  %3998 = vmatpush.bf16.msra.mxu1 %v8355_v9  ;;  %v8606_v13 = vld [vmem:[#allocation9 + $0x168] sm:$0xf0]  ;;  %v8797_v9 = vor.u32 %v10164_v10, %v8796_v5 }
 0x389   :  { %4011 = vmatpush.bf16.msra.mxu2 %v8167_v17  ;;  %4024 = vmatpush.bf16.msra.mxu3 %v8359_v11  ;;  %v8609_v42 = vor.u32 %v10113_v23, %v8606_v13  ;;  %v8798_v17 = vld [vmem:[#allocation9 + $0x2e8] sm:$0xf0]  ;;  %v8484_v13 = vld [vmem:[#allocation9 + $0x60] sm:$0xf] }
 0x38a   :  { %3938 = vmatmul.bf16.vlgmr.msrb.gmra.mxu0 %v10883_v36  ;;  %3951 = vmatmul.bf16.vlgmr.msrb.gmra.mxu1 %v10885_v12  ;;  %v8801_v11 = vor.u32 %v10161_v63, %v8798_v17  ;;  %v10134_v17 = vld [vmem:[#allocation9 + $0x1f4] sm:$0xf0] }
 0x38b   :  { %3964 = vmatmul.bf16.vlgmr.msrb.gmra.mxu2 %v10883_v36  ;;  %3977 = vmatmul.bf16.vlgmr.msrb.gmra.mxu3 %v10885_v12 }
 0x38c   :  { %3986 = vmatpush.bf16.msra.mxu0 %v8139_v21  ;;  %3999 = vmatpush.bf16.msra.mxu1 %v8331_v22  ;;  %v10155_v21 = vld [vmem:[#allocation9 + $0x2a4] sm:$0xf]  ;;  %v8774_v22 = vld [vmem:[#allocation9 + $0x2b8] sm:$0xf0] }
 0x38d   :  { %4012 = vmatpush.bf16.msra.mxu2 %v8143_v28  ;;  %4025 = vmatpush.bf16.msra.mxu3 %v8335_v29  ;;  %v8777_v32 = vor.u32 %v10155_v21, %v8774_v22  ;;  %v8556_v28 = vld [vmem:[#allocation9 + $0xf0] sm:$0xf]  ;;  %v10104_v29 = vld [vmem:[#allocation9 + $0x104] sm:$0xf0] }
 0x38e   :  { %v8557_v31 = vor.u32 %v10104_v29, %v8556_v28  ;;  %v8652_v21 = vld [vmem:[#allocation9 + $0x1b0] sm:$0xf]  ;;  %v8462_v28 = vld [vmem:[#allocation9 + $0x48] sm:$0xf0] }
 0x390   :  { %3987 = vmatpush.bf16.msra.mxu0 %v8115_v37  ;;  %4000 = vmatpush.bf16.msra.mxu1 %v8307_v39  ;;  %v8561_v37 = vor.u32 %v10101_v35, %v8558_v38  ;;  %v10149_v39 = vld [vmem:[#allocation9 + $0x274] sm:$0xf] }
 0x391   :  { %4013 = vmatpush.bf16.msra.mxu2 %v8119_v46  ;;  %4026 = vmatpush.bf16.msra.mxu3 %v8311_v14  ;;  %v8753_v58 = vor.u32 %v10149_v39, %v8750_v53  ;;  %v10125_v38 = vld [vmem:[#allocation9 + $0x1b4] sm:$0xf]  ;;  %v3292_v53 = vstv %s10906_s20 }
 0x392   :  { %vm10912_vm12 = vcmp.eq.s32.totalorder %v3292_v53, 1 }
 0x394   :  { %3988 = vmatpush.bf16.msra.mxu0 %v8091_v54  ;;  %4001 = vmatpush.bf16.msra.mxu1 %v8283_v56  ;;  %v8534_v54 = vld [vmem:[#allocation9 + $0xd8] sm:$0xf0]  ;;  %v8725_v56 = vor.u32 %v10146_v52, %v8724_v48  ;;  %v8628_v48 = vld [vmem:[#allocation9 + $0x180] sm:$0xf]  ;;  %v10122_v52 = vld [vmem:[#allocation9 + $0x194] sm:$0xf0] }
 0x395   :  { %4014 = vmatpush.bf16.msra.mxu2 %v8095_v59  ;;  %4027 = vmatpush.bf16.msra.mxu3 %v8287_v8  ;;  %v8537_v57 = vor.u32 %v10095_v55, %v8534_v54  ;;  %v8726_v59 = vld [vmem:[#allocation9 + $0x258] sm:$0xf0]  ;;  %v10071_v55 = vld [vmem:[#allocation9 + $0x4] sm:$0xf] }
 0x396   :  { %v8729_v8 = vor.u32 %v10143_v7, %v8726_v59  ;;  %v8438_v54 = vld [vmem:[#allocation9 + $0x18] sm:$0xf0]  ;;  %v8629_v7 = vor.u32 %v10122_v52, %v8628_v48 }
 0x397   :  { %v8441_v59 = vor.u32 %v10071_v55, %v8438_v54  ;;  %v8540_v54 = vld [vmem:[#allocation9 + $0xc8] sm:$0xf] }
 0x398   :  { %3989 = vmatpush.bf16.msra.mxu0 %v8067_v1  ;;  %4002 = vmatpush.bf16.msra.mxu1 %v8259_v50  ;;  %v8510_v1 = vld [vmem:[#allocation9 + $0xa8] sm:$0xf0]  ;;  %v8701_v50 = vor.u32 %v10140_v0, %v8700_v45  ;;  %v8612_v45 = vld [vmem:[#allocation9 + $0x158] sm:$0xf] }
 0x399   :  { %4015 = vmatpush.bf16.msra.mxu2 %v8071_v51  ;;  %4028 = vmatpush.bf16.msra.mxu3 %v8263_v2  ;;  %v8513_v51 = vor.u32 %v10089_v62, %v8510_v1  ;;  %v10137_v2 = vld [vmem:[#allocation9 + $0x214] sm:$0xf]  ;;  %v8804_v0 = vld [vmem:[#allocation9 + $0x2d8] sm:$0xf]  ;;  %v10165_v1 = vld [vmem:[#allocation9 + $0x2ec] sm:$0xf0] }
 0x39b   :  { %3990 = vmatmul.bf16.vlgmr.msra.gmra.mxu0 %v10883_v36  ;;  %4003 = vmatmul.bf16.vlgmr.msra.gmra.mxu1 %v10885_v12 }
 0x39c   :  { %4016 = vmatmul.bf16.vlgmr.msra.gmra.mxu2 %v10883_v36  ;;  %4029 = vmatmul.bf16.vlgmr.msra.gmra.mxu3 %v10885_v12  ;;  %v10110_v36 = vld [vmem:[#allocation9 + $0x134] sm:$0xf0]  ;;  %v8772_v12 = vld [vmem:[#allocation9 + $0x2a0] sm:$0xf] }
 0x39d   :  { %4677 = vmatpush.bf16.msrb.mxu0 %v8605_v6  ;;  %4690 = vmatpush.bf16.msrb.mxu1 %v8797_v9  ;;  %v8581_v16 = vor.u32 %v10110_v36, %v8580_v20  ;;  %v8773_v24 = vor.u32 %v10158_v18, %v8772_v12  ;;  %v8705_v6 = vor.u32 %v10137_v2, %v8702_v3  ;;  %v10086_v9 = vld [vmem:[#allocation9 + $0x74] sm:$0xf0]  ;;  %v8486_v36 = vld [vmem:[#allocation9 + $0x78] sm:$0xf0] }
 0x39e   :  { %4703 = vmatpush.bf16.msrb.mxu2 %v8609_v42  ;;  %4716 = vmatpush.bf16.msrb.mxu3 %v8801_v11  ;;  %v8676_v42 = vld [vmem:[#allocation9 + $0x1e0] sm:$0xf]  ;;  %v8485_v63 = vor.u32 %v10086_v9, %v8484_v13  ;;  %v10083_v11 = vld [vmem:[#allocation9 + $0x64] sm:$0xf]  ;;  %v8678_v18 = vld [vmem:[#allocation9 + $0x1f8] sm:$0xf0]  ;;  %v8805_v3 = vor.u32 %v10165_v1, %v8804_v0 }
 0x39f   :  { %v8677_v20 = vor.u32 %v10134_v17, %v8676_v42  ;;  %v8489_v12 = vor.u32 %v10083_v11, %v8486_v36  ;;  %v10111_v42 = vld [vmem:[#allocation9 + $0x13c] sm:$0xf0]  ;;  %v10144_v1 = vld [vmem:[#allocation9 + $0x24c] sm:$0xf] }
 0x3a0   :  { %v10159_v17 = vld [vmem:[#allocation9 + $0x2bc] sm:$0xf0] }
 0x3a1   :  { %4678 = vmatpush.bf16.msrb.mxu0 %v8581_v16  ;;  %4691 = vmatpush.bf16.msrb.mxu1 %v8773_v24  ;;  %v10131_v16 = vld [vmem:[#allocation9 + $0x1e4] sm:$0xf]  ;;  %v8460_v24 = vld [vmem:[#allocation9 + $0x30] sm:$0xf] }
 0x3a2   :  { %4704 = vmatpush.bf16.msrb.mxu2 %v8585_v26  ;;  %4717 = vmatpush.bf16.msrb.mxu3 %v8777_v32  ;;  %v8681_v19 = vor.u32 %v10131_v16, %v8678_v18  ;;  %v8461_v22 = vor.u32 %v10080_v43, %v8460_v24  ;;  %v10128_v26 = vld [vmem:[#allocation9 + $0x1c4] sm:$0xf0]  ;;  %v10077_v32 = vld [vmem:[#allocation9 + $0x34] sm:$0xf]  ;;  %v10108_v18 = vld [vmem:[#allocation9 + $0x12c] sm:$0xf] }
 0x3a3   :  { %v8653_v34 = vor.u32 %v10128_v26, %v8652_v21  ;;  %v8465_v35 = vor.u32 %v10077_v32, %v8462_v28  ;;  %v10156_v24 = vld [vmem:[#allocation9 + $0x2ac] sm:$0xf]  ;;  %v8782_v21 = vld [vmem:[#allocation9 + $0x2c0] sm:$0xf0] }
 0x3a4   :  { %v8785_v28 = vor.u32 %v10156_v24, %v8782_v21  ;;  %v10084_v24 = vld [vmem:[#allocation9 + $0x6c] sm:$0xf] }
 0x3a5   :  { %4679 = vmatpush.bf16.msrb.mxu0 %v8557_v31  ;;  %4692 = vmatpush.bf16.msrb.mxu1 %v8749_v33  ;;  %v8654_v33 = vld [vmem:[#allocation9 + $0x1c8] sm:$0xf0] }
 0x3a6   :  { %4705 = vmatpush.bf16.msrb.mxu2 %v8561_v37  ;;  %4718 = vmatpush.bf16.msrb.mxu3 %v8753_v58  ;;  %v8657_v58 = vor.u32 %v10125_v38, %v8654_v33  ;;  %v8756_v33 = vld [vmem:[#allocation9 + $0x278] sm:$0xf] }
 0x3a9   :  { %4680 = vmatpush.bf16.msrb.mxu0 %v8533_v49  ;;  %4693 = vmatpush.bf16.msrb.mxu1 %v8725_v56  ;;  %v8437_v49 = vor.u32 %v10074_v47, %v8436_v15  ;;  %v10150_v15 = vld [vmem:[#allocation9 + $0x27c] sm:$0xf]  ;;  %v8758_v47 = vld [vmem:[#allocation9 + $0x290] sm:$0xf0] }
 0x3aa   :  { %4706 = vmatpush.bf16.msrb.mxu2 %v8537_v57  ;;  %4719 = vmatpush.bf16.msrb.mxu3 %v8729_v8  ;;  %v10119_v8 = vld [vmem:[#allocation9 + $0x184] sm:$0xf]  ;;  %v8761_v52 = vor.u32 %v10150_v15, %v8758_v47  ;;  %v10099_v57 = vld [vmem:[#allocation9 + $0xdc] sm:$0xf0] }
 0x3ab   :  { %v8633_v40 = vor.u32 %v10119_v8, %v8630_v41  ;;  %v8541_v8 = vor.u32 %v10099_v57, %v8540_v54  ;;  %v10147_v41 = vld [vmem:[#allocation9 + $0x25c] sm:$0xf0]  ;;  %v8662_v54 = vld [vmem:[#allocation9 + $0x1d0] sm:$0xf0] }
 0x3ad   :  { %4681 = vmatpush.bf16.msrb.mxu0 %v8509_v61  ;;  %4694 = vmatpush.bf16.msrb.mxu1 %v8701_v50  ;;  %v10117_v61 = vld [vmem:[#allocation9 + $0x16c] sm:$0xf0]  ;;  %v10114_v50 = vld [vmem:[#allocation9 + $0x15c] sm:$0xf] }
 0x3ae   :  { %4707 = vmatpush.bf16.msrb.mxu2 %v8513_v51  ;;  %4720 = vmatpush.bf16.msrb.mxu3 %v8705_v6  ;;  %v8613_v62 = vor.u32 %v10117_v61, %v8612_v45  ;;  %v8614_v51 = vld [vmem:[#allocation9 + $0x170] sm:$0xf0]  ;;  %v8542_v45 = vld [vmem:[#allocation9 + $0xe0] sm:$0xf0] }
 0x3af   :  { %v8806_v6 = vld [vmem:[#allocation9 + $0x2f0] sm:$0xf0] }
 0x3b1   :  { %4682 = vmatpush.bf16.msrb.mxu0 %v8485_v63  ;;  %4695 = vmatpush.bf16.msrb.mxu1 %v8677_v20  ;;  %v8780_v63 = vld [vmem:[#allocation9 + $0x2a8] sm:$0xf] }
 0x3b2   :  { %4708 = vmatpush.bf16.msrb.mxu2 %v8489_v12  ;;  %4721 = vmatpush.bf16.msrb.mxu3 %v8681_v19  ;;  %v8781_v12 = vor.u32 %v10159_v17, %v8780_v63  ;;  %v8590_v19 = vld [vmem:[#allocation9 + $0x140] sm:$0xf0]  ;;  %v10138_v17 = vld [vmem:[#allocation9 + $0x21c] sm:$0xf] }
 0x3b3   :  { %v8593_v43 = vor.u32 %v10108_v18, %v8590_v19  ;;  %v10135_v19 = vld [vmem:[#allocation9 + $0x1fc] sm:$0xf0] }
 0x3b5   :  { %4683 = vmatpush.bf16.msrb.mxu0 %v8461_v22  ;;  %4696 = vmatpush.bf16.msrb.mxu1 %v8653_v34  ;;  %v10920_v34 = vld [vmem:[#allocation6 + $0x1] ss:$2 sm:$0x3f] }
 0x3b6   :  { %4709 = vmatpush.bf16.msrb.mxu2 %v8465_v35  ;;  %4722 = vmatpush.bf16.msrb.mxu3 %v8657_v58  ;;  %v8566_v58 = vld [vmem:[#allocation9 + $0x110] sm:$0xf0] }
 0x3b9   :  { %4684 = vmatpush.bf16.msrb.mxu0 %v8437_v49  ;;  %4697 = vmatpush.bf16.msrb.mxu1 %v8629_v7  ;;  %v8732_v7 = vld [vmem:[#allocation9 + $0x248] sm:$0xf] }
 0x3ba   :  { %4710 = vmatpush.bf16.msrb.mxu2 %v8441_v59  ;;  %4723 = vmatpush.bf16.msrb.mxu3 %v8633_v40  ;;  %v10096_v40 = vld [vmem:[#allocation9 + $0xcc] sm:$0xf]  ;;  %v8733_v0 = vor.u32 %v10147_v41, %v8732_v7  ;;  %v8444_v7 = vld [vmem:[#allocation9 + $0x8] sm:$0xf] }
 0x3bb   :  { %v8636_v41 = vld [vmem:[#allocation9 + $0x188] sm:$0xf] }
 0x3bd   :  { %4729 = vmatpush.bf16.msra.mxu0 %v8613_v62  ;;  %4742 = vmatpush.bf16.msra.mxu1 %v8805_v3  ;;  %v8545_v62 = vor.u32 %v10096_v40, %v8542_v45  ;;  %v10123_v40 = vld [vmem:[#allocation9 + $0x19c] sm:$0xf0]  ;;  %v10072_v45 = vld [vmem:[#allocation9 + $0xc] sm:$0xf] }
 0x3c1   :  { %4743 = vmatpush.bf16.msra.mxu1 %v8781_v12  ;;  %v8684_v12 = vld [vmem:[#allocation9 + $0x1e8] sm:$0xf] }
 0x3f7   :  { %v10901_v46 = vpop.f32.mrf.mxu0  ;;  %v10903_v14 = vpop.f32.mrf.mxu1 }
 0x3f8   :  { %v3901_v22 = vadd.f32 %v10903_v14, %v10901_v46  ;;  %v10102_v46 = vld [vmem:[#allocation9 + $0xfc] sm:$0xf] }
 0x3f9   :  { %v8569_v49 = vor.u32 %v10102_v46, %v8566_v58  ;;  %v10129_v58 = vld [vmem:[#allocation9 + $0x1cc] sm:$0xf0] }
 0x3fe   :  { %v3913_v4 = vpop.f32.mrf.mxu2  ;;  %v3926_v5 = vpop.f32.mrf.mxu3 }
 0x3ff   :  { %v3889_v10 = vpop.f32.mrf.mxu0  ;;  %v3902_v23 = vpop.f32.mrf.mxu1  ;;  %v10908_v29 = vadd.f32 %v3926_v5, %v3913_v4  ;;  %v8617_v4 = vor.u32 %v10114_v50, %v8614_v51  ;;  %v10162_v5 = vld [vmem:[#allocation9 + $0x2dc] sm:$0xf]  ;;  %v8734_v50 = vld [vmem:[#allocation9 + $0x260] sm:$0xf0] }
 0x400   :  { %v8588_v10 = vld [vmem:[#allocation9 + $0x128] sm:$0xf]  ;;  %v8809_v9 = vor.u32 %v10162_v5, %v8806_v6  ;;  %v8737_v3 = vor.u32 %v10144_v1, %v8734_v50  ;;  %v10093_v5 = vld [vmem:[#allocation9 + $0xac] sm:$0xf0]  ;;  %v8708_v6 = vld [vmem:[#allocation9 + $0x218] sm:$0xf] }
 0x401   :  { %v4038_v56 = vrot.slane %v10908_v29, 7  ;;  %4755 = vmatpush.bf16.msra.mxu2 %v8617_v4  ;;  %v8589_v16 = vor.u32 %v10111_v42, %v8588_v10  ;;  %v8564_v29 = vld [vmem:[#allocation9 + $0xf8] sm:$0xf]  ;;  %v8446_v1 = vld [vmem:[#allocation9 + $0x20] sm:$0xf0] }
 0x402   :  { %4768 = vmatpush.bf16.msra.mxu3 %v8809_v9  ;;  %v8516_v4 = vld [vmem:[#allocation9 + $0x98] sm:$0xf]  ;;  %v8518_v9 = vld [vmem:[#allocation9 + $0xb0] sm:$0xf0]  ;;  %v10120_v50 = vld [vmem:[#allocation9 + $0x18c] sm:$0xf] }
 0x403   :  { %4730 = vmatpush.bf16.msra.mxu0 %v8589_v16  ;;  %v4041_v14 = vsel %vm834_vm0, %v3901_v22, %v4038_v56  ;;  %v8517_v10 = vor.u32 %v10093_v5, %v8516_v4  ;;  %v10087_v16 = vld [vmem:[#allocation9 + $0x7c] sm:$0xf0]  ;;  %v8449_v5 = vor.u32 %v10072_v45, %v8446_v1 }
 0x404   :  { %v8572_v45 = vld [vmem:[#allocation9 + $0x100] sm:$0xf] }
 0x405   :  { %4756 = vmatpush.bf16.msra.mxu2 %v8593_v43  ;;  %v8494_v43 = vld [vmem:[#allocation9 + $0x80] sm:$0xf0]  ;;  %v8764_v1 = vld [vmem:[#allocation9 + $0x280] sm:$0xf] }
 0x406   :  { %v3915_v30 = vpop.f32.mrf.mxu2  ;;  %v3928_v31 = vpop.f32.mrf.mxu3  ;;  %4769 = vmatpush.bf16.msra.mxu3 %v8785_v28  ;;  %v8497_v28 = vor.u32 %v10084_v24, %v8494_v43 }
 0x407   :  { %v3939_v37 = vpop.f32.mrf.mxu0  ;;  %v3952_v39 = vpop.f32.mrf.mxu1  ;;  %v10105_v30 = vld [vmem:[#allocation9 + $0x10c] sm:$0xf0] }
 0x408   :  { %v3953_v2 = vadd.f32 %v3952_v39, %v3939_v37  ;;  %v10918_v31 = vld [vmem:[#allocation6] ss:$2 sm:$0x3f]  ;;  %v8565_v38 = vor.u32 %v10105_v30, %v8564_v29  ;;  %v10132_v29 = vld [vmem:[#allocation9 + $0x1ec] sm:$0xf] }
 0x409   :  { %v10926_v35 = vsel %vm10912_vm12, %v10920_v34, %v10918_v31  ;;  %v10153_v37 = vld [vmem:[#allocation9 + $0x28c] sm:$0xf0]  ;;  %4757 = vmatpush.bf16.msra.mxu2 %v8569_v49  ;;  %v8686_v30 = vld [vmem:[#allocation9 + $0x200] sm:$0xf0]  ;;  %v8470_v49 = vld [vmem:[#allocation9 + $0x50] sm:$0xf0] }
 0x40a   :  { %v4039_v26 = vrot.slane %v3953_v2, 6  ;;  %v8757_v53 = vor.u32 %v10153_v37, %v8756_v33  ;;  %4731 = vmatpush.bf16.msra.mxu0 %v8565_v38  ;;  %4770 = vmatpush.bf16.msra.mxu3 %v8761_v52  ;;  %v8689_v46 = vor.u32 %v10132_v29, %v8686_v30  ;;  %v10126_v52 = vld [vmem:[#allocation9 + $0x1bc] sm:$0xf]  ;;  %v10118_v29 = vld [vmem:[#allocation9 + $0x174] sm:$0xf0] }
 0x40b   :  { %v8665_v57 = vor.u32 %v10126_v52, %v8662_v54  ;;  %v8788_v54 = vld [vmem:[#allocation9 + $0x2b0] sm:$0xf] }
 0x40c   :  { %4744 = vmatpush.bf16.msra.mxu1 %v8757_v53  ;;  %v8660_v53 = vld [vmem:[#allocation9 + $0x1b8] sm:$0xf] }
 0x40d   :  { %4758 = vmatpush.bf16.msra.mxu2 %v8545_v62  ;;  %v8661_v47 = vor.u32 %v10129_v58, %v8660_v53  ;;  %v8637_v62 = vor.u32 %v10123_v40, %v8636_v41 }
 0x40e   :  { %v3965_v23 = vpop.f32.mrf.mxu2  ;;  %v3978_v13 = vpop.f32.mrf.mxu3  ;;  %4732 = vmatpush.bf16.msra.mxu0 %v8541_v8  ;;  %4771 = vmatpush.bf16.msra.mxu3 %v8737_v3  ;;  %v8638_v3 = vld [vmem:[#allocation9 + $0x1a0] sm:$0xf0] }
 0x40f   :  { %v3979_v11 = vadd.f32 %v3978_v13, %v3965_v23  ;;  %v3941_v20 = vpop.f32.mrf.mxu0  ;;  %v3954_v36 = vpop.f32.mrf.mxu1  ;;  %v10141_v23 = vld [vmem:[#allocation9 + $0x22c] sm:$0xf0]  ;;  %v10090_v13 = vld [vmem:[#allocation9 + $0x9c] sm:$0xf] }
 0x410   :  { %4745 = vmatpush.bf16.msra.mxu1 %v8733_v0  ;;  %v8709_v42 = vor.u32 %v10141_v23, %v8708_v6  ;;  %v8521_v63 = vor.u32 %v10090_v13, %v8518_v9  ;;  %v8492_v36 = vld [vmem:[#allocation9 + $0x68] sm:$0xf]  ;;  %v8641_v6 = vor.u32 %v10120_v50, %v8638_v3  ;;  %v10154_v50 = vld [vmem:[#allocation9 + $0x294] sm:$0xf0]  ;;  %v10103_v3 = vld [vmem:[#allocation9 + $0x104] sm:$0xf] }
 0x411   :  { %v4040_v32 = vrot.slane %v3979_v11, 5  ;;  %v8710_v11 = vld [vmem:[#allocation9 + $0x230] sm:$0xf0]  ;;  %v8493_v18 = vor.u32 %v10087_v16, %v8492_v36 }
 0x412   :  { %v8713_v20 = vor.u32 %v10138_v17, %v8710_v11  ;;  %4733 = vmatpush.bf16.msra.mxu0 %v8517_v10  ;;  %4759 = vmatpush.bf16.msra.mxu2 %v8521_v63 }
 0x413   :  { %v4042_v39 = vsel %vm836_vm2, %v4039_v26, %v4040_v32  ;;  %v8685_v32 = vor.u32 %v10135_v19, %v8684_v12  ;;  %v4074_v12 = vrot.slane %v10926_v35, 4 }
 0x414   :  { %v4043_v48 = vsel %vm838_vm3, %v4041_v14, %v4042_v39  ;;  %4746 = vmatpush.bf16.msra.mxu1 %v8709_v42  ;;  %4772 = vmatpush.bf16.msra.mxu3 %v8713_v20  ;;  %v8468_v14 = vld [vmem:[#allocation9 + $0x38] sm:$0xf]  ;;  %v10081_v39 = vld [vmem:[#allocation9 + $0x4c] sm:$0xf0] }
 0x415   :  { %v4045_v55 = vadd.f32 %v4043_v48, %v10926_v35  ;;  %v8469_v15 = vor.u32 %v10081_v39, %v8468_v14  ;;  %v10078_v48 = vld [vmem:[#allocation9 + $0x3c] sm:$0xf]  ;;  %v10166_v35 = vld [vmem:[#allocation9 + $0x2f4] sm:$0xf0] }
 0x416   :  { %v3967_v59 = vpop.f32.mrf.mxu2  ;;  %v3980_v56 = vpop.f32.mrf.mxu3  ;;  %4734 = vmatpush.bf16.msra.mxu0 %v8493_v18  ;;  %4760 = vmatpush.bf16.msra.mxu2 %v8497_v28  ;;  %v8620_v28 = vld [vmem:[#allocation9 + $0x160] sm:$0xf]  ;;  %v8814_v14 = vld [vmem:[#allocation9 + $0x2f8] sm:$0xf0] }
 0x417   :  { %v8432_v61 = vmul.f32 -1.442695, %v4045_v55  ;;  %v8473_v55 = vor.u32 %v10078_v48, %v8470_v49  ;;  %v10075_v59 = vld [vmem:[#allocation9 + $0x1c] sm:$0xf0]  ;;  %v8596_v48 = vld [vmem:[#allocation9 + $0x130] sm:$0xf] }
 0x418   :  { %v10932_v51 = vpop.f32.mrf.mxu0  ;;  %v10934_v2 = vpop.f32.mrf.mxu1  ;;  %4747 = vmatpush.bf16.msra.mxu1 %v8685_v32  ;;  %4773 = vmatpush.bf16.msra.mxu3 %v8689_v46  ;;  %v8445_v8 = vor.u32 %v10075_v59, %v8444_v7  ;;  %v10163_v46 = vld [vmem:[#allocation9 + $0x2e4] sm:$0xf]  ;;  %v10112_v49 = vld [vmem:[#allocation9 + $0x144] sm:$0xf0]  ;;  %v10109_v7 = vld [vmem:[#allocation9 + $0x134] sm:$0xf] }
 0x419   :  { %10390 = vpow2.f32 %v8432_v61  ;;  %v4005_v9 = vadd.f32 %v10934_v2, %v10932_v51  ;;  %v8598_v59 = vld [vmem:[#allocation9 + $0x148] sm:$0xf0]  ;;  %v8597_v41 = vor.u32 %v10112_v49, %v8596_v48  ;;  %v10133_v48 = vld [vmem:[#allocation9 + $0x1f4] sm:$0xf] }
 0x41a   :  { %4735 = vmatpush.bf16.msra.mxu0 %v8469_v15  ;;  %4761 = vmatpush.bf16.msra.mxu2 %v8473_v55  ;;  %v8621_v15 = vor.u32 %v10118_v29, %v8620_v28  ;;  %v8817_v55 = vor.u32 %v10163_v46, %v8814_v14  ;;  %v10139_v28 = vld [vmem:[#allocation9 + $0x224] sm:$0xf]  ;;  %v8718_v29 = vld [vmem:[#allocation9 + $0x238] sm:$0xf0]  ;;  %v8694_v49 = vld [vmem:[#allocation9 + $0x208] sm:$0xf0] }
 0x41b   :  { %v4065_v36 = vadd.f32 %v4005_v9, %v10647_v25  ;;  %v10100_v9 = vld [vmem:[#allocation9 + $0xe4] sm:$0xf0]  ;;  %v8721_v14 = vor.u32 %v10139_v28, %v8718_v29  ;;  %v10254_v28 = vld [vmem:[#allocation9 + $0x2b4] sm:$0xf0]  ;;  %v10203_v29 = vld [vmem:[#allocation9 + $0x124] sm:$0xf] }
 0x41c   :  { %4748 = vmatpush.bf16.msra.mxu1 %v8661_v47  ;;  %4774 = vmatpush.bf16.msra.mxu3 %v8665_v57  ;;  %v10160_v57 = vld [vmem:[#allocation9 + $0x2c4] sm:$0xf0] }
 0x41d   :  { %v8789_v40 = vor.u32 %v10160_v57, %v8788_v54  ;;  %v8476_v54 = vld [vmem:[#allocation9 + $0x40] sm:$0xf]  ;;  %v10082_v57 = vld [vmem:[#allocation9 + $0x54] sm:$0xf0] }
 0x41e   :  { %4736 = vmatpush.bf16.msra.mxu0 %v8445_v8  ;;  %4762 = vmatpush.bf16.msra.mxu2 %v8449_v5  ;;  %v8790_v8 = vld [vmem:[#allocation9 + $0x2c8] sm:$0xf0]  ;;  %v10151_v5 = vld [vmem:[#allocation9 + $0x284] sm:$0xf] }
 0x41f   :  { %v10391_v21 = vpop.eup %10390  ;;  %v4017_v22 = vpop.f32.mrf.mxu2 }
 0x420   :  { %v4030_v26 = vpop.f32.mrf.mxu3  ;;  %v10936_v38 = vadd.f32 1.0, %v10391_v21  ;;  %v3993_v33 = vpop.f32.mrf.mxu0  ;;  %4749 = vmatpush.bf16.msra.mxu1 %v8637_v62  ;;  %4775 = vmatpush.bf16.msra.mxu3 %v8641_v6  ;;  %v8766_v6 = vld [vmem:[#allocation9 + $0x298] sm:$0xf0] }
 0x421   :  { %v4006_v37 = vpop.f32.mrf.mxu1  ;;  %v4031_v56 = vadd.f32 %v4030_v26, %v4017_v22  ;;  %v10115_v33 = vld [vmem:[#allocation9 + $0x164] sm:$0xf] }
 0x422   :  { %10392 = vrcp.f32 %v10936_v38  ;;  %v4061_v42 = vand.u32 2147483648, %v10936_v38  ;;  %v4059_v17 = vand.u32 2147483647, %v10936_v38  ;;  %vm4055_vm14 = vweird.f32 %v10936_v38  ;;  %v8622_v37 = vld [vmem:[#allocation9 + $0x178] sm:$0xf0] }
 0x423   :  { %v4066_v23 = vadd.f32 %v4031_v56, %v10649_v27  ;;  %v8625_v52 = vor.u32 %v10115_v33, %v8622_v37  ;;  %v10157_v56 = vld [vmem:[#allocation9 + $0x2b4] sm:$0xf]  ;;  %v8500_v33 = vld [vmem:[#allocation9 + $0x70] sm:$0xf]  ;;  %v10088_v37 = vld [vmem:[#allocation9 + $0x84] sm:$0xf0] }
 0x424   :  { %v4062_v16 = vor.u32 1.1754944e-38, %v4061_v42  ;;  %vm4060_vm1 = vcmp.eq.f32.partialorder %v4059_v17, 8.507059e+37  ;;  %v8793_v62 = vor.u32 %v10157_v56, %v8790_v8  ;;  %v8740_v17 = vld [vmem:[#allocation9 + $0x250] sm:$0xf]  ;;  %v8668_v56 = vld [vmem:[#allocation9 + $0x1c0] sm:$0xf] }
 0x425   :  { %v4069_v11 = vrot.slane %v4066_v23, 7  ;;  %v8765_v23 = vor.u32 %v10154_v50, %v8764_v1  ;;  %v10130_v8 = vld [vmem:[#allocation9 + $0x1d4] sm:$0xf0]  ;;  %v8452_v1 = vld [vmem:[#allocation9 + $0x10] sm:$0xf] }
 0x426   :  { %v10076_v50 = vld [vmem:[#allocation9 + $0x24] sm:$0xf0] }
 0x427   :  { %v4019_v61 = vpop.f32.mrf.mxu2  ;;  %v4070_v2 = vsel %vm834_vm0, %v4065_v36, %v4069_v11  ;;  %v10148_v11 = vld [vmem:[#allocation9 + $0x264] sm:$0xf0]  ;;  %v8550_v36 = vld [vmem:[#allocation9 + $0xe8] sm:$0xf0] }
 0x428   :  { %v4032_v0 = vpop.f32.mrf.mxu3  ;;  %v10393_v4 = vpop.eup %10392  ;;  %v10106_v61 = vld [vmem:[#allocation9 + $0x114] sm:$0xf0] }
 0x429   :  { %v4051_v10 = vmul.f32 %v10393_v4, %v10936_v38  ;;  %vm4056_vm13 = vweird.f32 %v10393_v4  ;;  %v8812_v38 = vld [vmem:[#allocation9 + $0x2e0] sm:$0xf]  ;;  %v8601_v0 = vor.u32 %v10109_v7, %v8598_v59  ;;  %v8697_v59 = vor.u32 %v10133_v48, %v8694_v49  ;;  %v10248_v48 = vld [vmem:[#allocation9 + $0x284] sm:$0xf0]  ;;  %v10197_v49 = vld [vmem:[#allocation9 + $0xf4] sm:$0xf] }
 0x42a   :  { %vm4057_vm15 = vmor %vm4055_vm14, %vm4056_vm13  ;;  %v8813_v47 = vor.u32 %v10166_v35, %v8812_v38 }
 0x42b   :  { %v4052_v13 = vsub.f32 1.0, %v4051_v10  ;;  %v8573_v10 = vor.u32 %v10106_v61, %v8572_v45  ;;  %v10127_v45 = vld [vmem:[#allocation9 + $0x1c4] sm:$0xf]  ;;  %v8670_v61 = vld [vmem:[#allocation9 + $0x1d8] sm:$0xf0] }
 0x42d   :  { %v4053_v63 = vmul.f32 %v10393_v4, %v4052_v13  ;;  %v8548_v13 = vld [vmem:[#allocation9 + $0xd0] sm:$0xf] }
 0x42f   :  { %v4054_v20 = vadd.f32 %v10393_v4, %v4053_v63  ;;  %v8769_v63 = vor.u32 %v10151_v5, %v8766_v6  ;;  %v8644_v5 = vld [vmem:[#allocation9 + $0x190] sm:$0xf]  ;;  %v10124_v6 = vld [vmem:[#allocation9 + $0x1a4] sm:$0xf0] }
 0x431   :  { %v4058_v18 = vsel %vm4057_vm15, %v10393_v4, %v4054_v20  ;;  %v8574_v4 = vld [vmem:[#allocation9 + $0x118] sm:$0xf0]  ;;  %v10097_v20 = vld [vmem:[#allocation9 + $0xd4] sm:$0xf] }
 0x432   :  { %v4063_v51 = vsel %vm4060_vm1, %v4062_v16, %v4058_v18  ;;  %v8577_v42 = vor.u32 %v10103_v3, %v8574_v4  ;;  %v10145_v16 = vld [vmem:[#allocation9 + $0x254] sm:$0xf]  ;;  %v8549_v18 = vor.u32 %v10100_v9, %v8548_v13  ;;  %v8673_v4 = vor.u32 %v10127_v45, %v8670_v61  ;;  %v8646_v9 = vld [vmem:[#allocation9 + $0x1a8] sm:$0xf0]  ;;  %v9110_v45 = vld [vmem:[#allocation9 + $0x240] sm:$0xf] }
 0x433   :  { %v4072_v19 = vmul.f32 %v4070_v2, %v4063_v51  ;;  %v4079_v43 = vrot.slane %v4063_v51, 2  ;;  %v8741_v51 = vor.u32 %v10148_v11, %v8740_v17  ;;  %v8524_v2 = vld [vmem:[#allocation9 + $0xa0] sm:$0xf]  ;;  %v10121_v13 = vld [vmem:[#allocation9 + $0x194] sm:$0xf] }
 0x434   :  { %v8649_v11 = vor.u32 %v10121_v13, %v8646_v9  ;;  %v9086_v13 = vld [vmem:[#allocation9 + $0x210] sm:$0xf] }
 0x435   :  { %v4076_v24 = vadd.f32 %v4074_v12, %v4072_v19  ;;  %v4081_v21 = vsub.f32 1.0, %v4079_v43  ;;  %v4083_v32 = vmul.f32 %v4079_v43, %v10876_v44  ;;  %v8742_v12 = vld [vmem:[#allocation9 + $0x268] sm:$0xf0]  ;;  %v10094_v19 = vld [vmem:[#allocation9 + $0xb4] sm:$0xf0] }
 0x436   :  { %v8745_v43 = vor.u32 %v10145_v16, %v8742_v12  ;;  %v8525_v38 = vor.u32 %v10094_v19, %v8524_v2  ;;  %v9182_v16 = vld [vmem:[#allocation9 + $0x2d0] sm:$0xf]  ;;  %v8992_v2 = vld [vmem:[#allocation9 + $0x168] sm:$0xf0] }
 0x437   :  { %10394 = vtanh.f32 %v4076_v24  ;;  %v8553_v24 = vor.u32 %v10097_v20, %v8550_v36  ;;  %v8990_v20 = vld [vmem:[#allocation9 + $0x150] sm:$0xf]  ;;  %v10212_v36 = vld [vmem:[#allocation9 + $0x164] sm:$0xf0] }
 0x438   :  { %v8991_v12 = vor.u32 %v10212_v36, %v8990_v20  ;;  %v10233_v36 = vld [vmem:[#allocation9 + $0x214] sm:$0xf] }
 0x43d   :  { %v10395_v22 = vpop.eup %10394 }
 0x43e   :  { %v4082_v26 = vmul.f32 %v10395_v22, %v4081_v21  ;;  %v8716_v21 = vld [vmem:[#allocation9 + $0x220] sm:$0xf]  ;;  %v10142_v22 = vld [vmem:[#allocation9 + $0x234] sm:$0xf0] }
 0x43f   :  { %v8717_v35 = vor.u32 %v10142_v22, %v8716_v21  ;;  %v9184_v21 = vld [vmem:[#allocation9 + $0x2e8] sm:$0xf0] }
 0x440   :  { %v10950_v30 = vadd.f32 %v4083_v32, %v4082_v26  ;;  %v10091_v26 = vld [vmem:[#allocation9 + $0xa4] sm:$0xf]  ;;  %v8526_v32 = vld [vmem:[#allocation9 + $0xb8] sm:$0xf0] }
 0x441   :  { %v8529_v46 = vor.u32 %v10091_v26, %v8526_v32  ;;  %v8966_v26 = vld [vmem:[#allocation9 + $0x120] sm:$0xf] }
 0x442   :  { %4086 = vst.msk [vmem:[#allocation10 + $0x4] ss:$8 sm:$0x3] %vm10658_vm8, %v10950_v30  ;;  %v4095_v39 = vperm.slane %v10950_v30, 0  ;;  %v4096_v53 = vperm.slane %v10950_v30, 1 }
 0x444   :  { %v10957_v58 = vpack.c.bf16 %v4095_v39, %v4095_v39  ;;  %v10959_v44 = vpack.c.bf16 %v4096_v53, %v4096_v53  ;;  %v8692_v39 = vld [vmem:[#allocation9 + $0x1f0] sm:$0xf]  ;;  %v10136_v53 = vld [vmem:[#allocation9 + $0x204] sm:$0xf0] }
 0x446   :  { %4685 = vmatmul.bf16.vlgmr.msrb.gmra.mxu0 %v10957_v58  ;;  %4698 = vmatmul.bf16.vlgmr.msrb.gmra.mxu1 %v10959_v44 }
 0x447   :  { %4711 = vmatmul.bf16.vlgmr.msrb.gmra.mxu2 %v10957_v58  ;;  %4724 = vmatmul.bf16.vlgmr.msrb.gmra.mxu3 %v10959_v44 }
 0x448   :  { %4781 = vmatpush.bf16.msrb.mxu0 %v8621_v15  ;;  %4794 = vmatpush.bf16.msrb.mxu1 %v8813_v47  ;;  %v10085_v15 = vld [vmem:[#allocation9 + $0x74] sm:$0xf]  ;;  %v8502_v47 = vld [vmem:[#allocation9 + $0x88] sm:$0xf0] }
 0x449   :  { %4807 = vmatpush.bf16.msrb.mxu2 %v8625_v52  ;;  %4820 = vmatpush.bf16.msrb.mxu3 %v8817_v55  ;;  %v8501_v52 = vor.u32 %v10088_v37, %v8500_v33  ;;  %v8693_v55 = vor.u32 %v10136_v53, %v8692_v39  ;;  %v8505_v7 = vor.u32 %v10085_v15, %v8502_v47  ;;  %v10251_v33 = vld [vmem:[#allocation9 + $0x2a4] sm:$0xf]  ;;  %v9160_v37 = vld [vmem:[#allocation9 + $0x2b8] sm:$0xf0]  ;;  %v8942_v39 = vld [vmem:[#allocation9 + $0xf0] sm:$0xf] }
 0x44a   :  { %v10200_v53 = vld [vmem:[#allocation9 + $0x104] sm:$0xf0]  ;;  %v9134_v15 = vld [vmem:[#allocation9 + $0x270] sm:$0xf] }
 0x44b   :  { %v8943_v47 = vor.u32 %v10200_v53, %v8942_v39  ;;  %v10224_v39 = vld [vmem:[#allocation9 + $0x1c4] sm:$0xf0]  ;;  %v10173_v53 = vld [vmem:[#allocation9 + $0x34] sm:$0xf] }
 0x44c   :  { %4782 = vmatpush.bf16.msrb.mxu0 %v8597_v41  ;;  %4795 = vmatpush.bf16.msrb.mxu1 %v8789_v40  ;;  %v10079_v41 = vld [vmem:[#allocation9 + $0x44] sm:$0xf]  ;;  %v8478_v40 = vld [vmem:[#allocation9 + $0x58] sm:$0xf0] }
 0x44d   :  { %4808 = vmatpush.bf16.msrb.mxu2 %v8601_v0  ;;  %4821 = vmatpush.bf16.msrb.mxu3 %v8793_v62  ;;  %v8477_v0 = vor.u32 %v10082_v57, %v8476_v54  ;;  %v8669_v62 = vor.u32 %v10130_v8, %v8668_v56  ;;  %v8481_v3 = vor.u32 %v10079_v41, %v8478_v40  ;;  %v10245_v57 = vld [vmem:[#allocation9 + $0x274] sm:$0xf]  ;;  %v8918_v41 = vld [vmem:[#allocation9 + $0xc0] sm:$0xf]  ;;  %v10194_v40 = vld [vmem:[#allocation9 + $0xd4] sm:$0xf0] }
 0x44e   :  { %v8919_v61 = vor.u32 %v10194_v40, %v8918_v41  ;;  %v4091_v41 = vstv %s10980_s22 }
 0x44f   :  { %vm10986_vm4 = vcmp.eq.s32.totalorder %v4091_v41, 1 }
 0x450   :  { %4783 = vmatpush.bf16.msrb.mxu0 %v8573_v10  ;;  %4796 = vmatpush.bf16.msrb.mxu1 %v8765_v23  ;;  %v10073_v10 = vld [vmem:[#allocation9 + $0x14] sm:$0xf]  ;;  %v8454_v23 = vld [vmem:[#allocation9 + $0x28] sm:$0xf0] }
 0x451   :  { %4809 = vmatpush.bf16.msrb.mxu2 %v8577_v42  ;;  %4822 = vmatpush.bf16.msrb.mxu3 %v8769_v63  ;;  %v8453_v42 = vor.u32 %v10076_v50, %v8452_v1  ;;  %v8645_v63 = vor.u32 %v10124_v6, %v8644_v5  ;;  %v8457_v17 = vor.u32 %v10073_v10, %v8454_v23  ;;  %v8920_v1 = vld [vmem:[#allocation9 + $0xd8] sm:$0xf0]  ;;  %v8894_v10 = vld [vmem:[#allocation9 + $0x90] sm:$0xf]  ;;  %v10188_v23 = vld [vmem:[#allocation9 + $0xa4] sm:$0xf0] }
 0x452   :  { %v9112_v5 = vld [vmem:[#allocation9 + $0x258] sm:$0xf0]  ;;  %v8895_v9 = vor.u32 %v10188_v23, %v8894_v10  ;;  %v10215_v23 = vld [vmem:[#allocation9 + $0x184] sm:$0xf] }
 0x454   :  { %4784 = vmatpush.bf16.msrb.mxu0 %v8549_v18  ;;  %4797 = vmatpush.bf16.msrb.mxu1 %v8741_v51  ;;  %v10260_v18 = vld [vmem:[#allocation9 + $0x2e4] sm:$0xf0]  ;;  %v10209_v51 = vld [vmem:[#allocation9 + $0x154] sm:$0xf] }
 0x455   :  { %4810 = vmatpush.bf16.msrb.mxu2 %v8553_v24  ;;  %4823 = vmatpush.bf16.msrb.mxu3 %v8745_v43  ;;  %v9183_v19 = vor.u32 %v10260_v18, %v9182_v16  ;;  %v8995_v24 = vor.u32 %v10209_v51, %v8992_v2  ;;  %v10257_v43 = vld [vmem:[#allocation9 + $0x2d4] sm:$0xf]  ;;  %v9088_v16 = vld [vmem:[#allocation9 + $0x228] sm:$0xf0] }
 0x456   :  { %4737 = vmatmul.bf16.vlgmr.msra.gmra.mxu0 %v10957_v58  ;;  %4750 = vmatmul.bf16.vlgmr.msra.gmra.mxu1 %v10959_v44  ;;  %v9187_v22 = vor.u32 %v10257_v43, %v9184_v21  ;;  %v9091_v51 = vor.u32 %v10233_v36, %v9088_v16  ;;  %v10182_v43 = vld [vmem:[#allocation9 + $0x74] sm:$0xf0]  ;;  %v9062_v21 = vld [vmem:[#allocation9 + $0x1e0] sm:$0xf]  ;;  %v10210_v36 = vld [vmem:[#allocation9 + $0x15c] sm:$0xf] }
 0x457   :  { %4763 = vmatmul.bf16.vlgmr.msra.gmra.mxu2 %v10957_v58  ;;  %4776 = vmatmul.bf16.vlgmr.msra.gmra.mxu3 %v10959_v44  ;;  %v9000_v16 = vld [vmem:[#allocation9 + $0x170] sm:$0xf0] }
 0x458   :  { %4785 = vmatpush.bf16.msrb.mxu0 %v8525_v38  ;;  %4798 = vmatpush.bf16.msrb.mxu1 %v8717_v35  ;;  %v8968_v35 = vld [vmem:[#allocation9 + $0x138] sm:$0xf0] }
 0x459   :  { %4811 = vmatpush.bf16.msrb.mxu2 %v8529_v46  ;;  %4824 = vmatpush.bf16.msrb.mxu3 %v8721_v14  ;;  %v8971_v46 = vor.u32 %v10203_v29, %v8968_v35  ;;  %v9163_v14 = vor.u32 %v10251_v33, %v9160_v37  ;;  %v8846_v33 = vld [vmem:[#allocation9 + $0x30] sm:$0xf]  ;;  %v10176_v37 = vld [vmem:[#allocation9 + $0x44] sm:$0xf0] }
 0x45c   :  { %4786 = vmatpush.bf16.msrb.mxu0 %v8501_v52  ;;  %4799 = vmatpush.bf16.msrb.mxu1 %v8693_v55  ;;  %v8944_v52 = vld [vmem:[#allocation9 + $0x108] sm:$0xf0]  ;;  %v9135_v55 = vor.u32 %v10248_v48, %v9134_v15 }
 0x45d   :  { %4812 = vmatpush.bf16.msrb.mxu2 %v8505_v7  ;;  %4825 = vmatpush.bf16.msrb.mxu3 %v8697_v59  ;;  %v8947_v54 = vor.u32 %v10197_v49, %v8944_v52  ;;  %v9136_v7 = vld [vmem:[#allocation9 + $0x288] sm:$0xf0] }
 0x45e   :  { %v9139_v59 = vor.u32 %v10245_v57, %v9136_v7  ;;  %v8848_v15 = vld [vmem:[#allocation9 + $0x48] sm:$0xf0] }
 0x45f   :  { %v9040_v57 = vld [vmem:[#allocation9 + $0x1c8] sm:$0xf0] }
 0x460   :  { %4787 = vmatpush.bf16.msrb.mxu0 %v8477_v0  ;;  %4800 = vmatpush.bf16.msrb.mxu1 %v8669_v62  ;;  %v10242_v0 = vld [vmem:[#allocation9 + $0x254] sm:$0xf0]  ;;  %v10191_v62 = vld [vmem:[#allocation9 + $0xc4] sm:$0xf] }
 0x461   :  { %4813 = vmatpush.bf16.msrb.mxu2 %v8481_v3  ;;  %4826 = vmatpush.bf16.msrb.mxu3 %v8673_v4  ;;  %v9111_v50 = vor.u32 %v10242_v0, %v9110_v45  ;;  %v8923_v3 = vor.u32 %v10191_v62, %v8920_v1  ;;  %v10239_v4 = vld [vmem:[#allocation9 + $0x244] sm:$0xf]  ;;  %v8822_v45 = vld [vmem:[#allocation9] sm:$0xf]  ;;  %v10218_v1 = vld [vmem:[#allocation9 + $0x194] sm:$0xf0] }
 0x462   :  { %v9115_v6 = vor.u32 %v10239_v4, %v9112_v5  ;;  %v9014_v0 = vld [vmem:[#allocation9 + $0x180] sm:$0xf] }
 0x464   :  { %4788 = vmatpush.bf16.msrb.mxu0 %v8453_v42  ;;  %4801 = vmatpush.bf16.msrb.mxu1 %v8645_v63  ;;  %v10236_v42 = vld [vmem:[#allocation9 + $0x224] sm:$0xf0]  ;;  %v10185_v63 = vld [vmem:[#allocation9 + $0x94] sm:$0xf] }
 0x465   :  { %4814 = vmatpush.bf16.msrb.mxu2 %v8457_v17  ;;  %4827 = vmatpush.bf16.msrb.mxu3 %v8649_v11  ;;  %v8896_v17 = vld [vmem:[#allocation9 + $0xa8] sm:$0xf0]  ;;  %v9087_v11 = vor.u32 %v10236_v42, %v9086_v13  ;;  %v9016_v13 = vld [vmem:[#allocation9 + $0x198] sm:$0xf0]  ;;  %v8998_v42 = vld [vmem:[#allocation9 + $0x158] sm:$0xf] }
 0x466   :  { %v8899_v20 = vor.u32 %v10185_v63, %v8896_v17  ;;  %v10213_v63 = vld [vmem:[#allocation9 + $0x16c] sm:$0xf0]  ;;  %v9190_v17 = vld [vmem:[#allocation9 + $0x2d8] sm:$0xf] }
 0x467   :  { %4789 = vmatmul.bf16.vlgmr.msrb.gmra.mxu0 %v10957_v58  ;;  %4802 = vmatmul.bf16.vlgmr.msrb.gmra.mxu1 %v10959_v44 }
 0x468   :  { %4815 = vmatmul.bf16.vlgmr.msrb.gmra.mxu2 %v10957_v58  ;;  %4828 = vmatmul.bf16.vlgmr.msrb.gmra.mxu3 %v10959_v44  ;;  %v10206_v58 = vld [vmem:[#allocation9 + $0x134] sm:$0xf0]  ;;  %v9158_v44 = vld [vmem:[#allocation9 + $0x2a0] sm:$0xf] }
 0x469   :  { %5476 = vmatpush.bf16.msra.mxu0 %v8991_v12  ;;  %5489 = vmatpush.bf16.msra.mxu1 %v9183_v19  ;;  %v8967_v32 = vor.u32 %v10206_v58, %v8966_v26  ;;  %v9159_v38 = vor.u32 %v10254_v28, %v9158_v44  ;;  %v10230_v26 = vld [vmem:[#allocation9 + $0x1f4] sm:$0xf0]  ;;  %v10179_v58 = vld [vmem:[#allocation9 + $0x64] sm:$0xf]  ;;  %v8872_v44 = vld [vmem:[#allocation9 + $0x78] sm:$0xf0] }
 0x46a   :  { %5502 = vmatpush.bf16.msra.mxu2 %v8995_v24  ;;  %5515 = vmatpush.bf16.msra.mxu3 %v9187_v22  ;;  %v8870_v24 = vld [vmem:[#allocation9 + $0x60] sm:$0xf]  ;;  %v10227_v28 = vld [vmem:[#allocation9 + $0x1e4] sm:$0xf]  ;;  %v8875_v29 = vor.u32 %v10179_v58, %v8872_v44  ;;  %v9166_v58 = vld [vmem:[#allocation9 + $0x2a8] sm:$0xf] }
 0x46b   :  { %v8871_v22 = vor.u32 %v10182_v43, %v8870_v24  ;;  %v8974_v24 = vld [vmem:[#allocation9 + $0x128] sm:$0xf] }
 0x46d   :  { %5477 = vmatpush.bf16.msra.mxu0 %v8967_v32  ;;  %5490 = vmatpush.bf16.msra.mxu1 %v9159_v38  ;;  %v9063_v32 = vor.u32 %v10230_v26, %v9062_v21  ;;  %v9064_v38 = vld [vmem:[#allocation9 + $0x1f8] sm:$0xf0]  ;;  %v10207_v26 = vld [vmem:[#allocation9 + $0x13c] sm:$0xf0] }
 0x46e   :  { %5503 = vmatpush.bf16.msra.mxu2 %v8971_v46  ;;  %5516 = vmatpush.bf16.msra.mxu3 %v9163_v14  ;;  %v9067_v35 = vor.u32 %v10227_v28, %v9064_v38  ;;  %v9038_v46 = vld [vmem:[#allocation9 + $0x1b0] sm:$0xf]  ;;  %v8847_v14 = vor.u32 %v10176_v37, %v8846_v33  ;;  %v8975_v38 = vor.u32 %v10207_v26, %v8974_v24  ;;  %v10204_v33 = vld [vmem:[#allocation9 + $0x12c] sm:$0xf]  ;;  %v8976_v37 = vld [vmem:[#allocation9 + $0x140] sm:$0xf0] }
 0x46f   :  { %v9039_v52 = vor.u32 %v10224_v39, %v9038_v46  ;;  %v10252_v46 = vld [vmem:[#allocation9 + $0x2ac] sm:$0xf]  ;;  %v9168_v39 = vld [vmem:[#allocation9 + $0x2c0] sm:$0xf0]  ;;  %v10186_v24 = vld [vmem:[#allocation9 + $0x9c] sm:$0xf] }
 0x470   :  { %v10234_v26 = vld [vmem:[#allocation9 + $0x21c] sm:$0xf] }
 0x471   :  { %5478 = vmatpush.bf16.msra.mxu0 %v8943_v47  ;;  %5491 = vmatpush.bf16.msra.mxu1 %v9135_v55  ;;  %v8851_v55 = vor.u32 %v10173_v53, %v8848_v15 }
 0x472   :  { %5504 = vmatpush.bf16.msra.mxu2 %v8947_v54  ;;  %5517 = vmatpush.bf16.msra.mxu3 %v9139_v59  ;;  %v10221_v54 = vld [vmem:[#allocation9 + $0x1b4] sm:$0xf] }
 0x473   :  { %v9043_v40 = vor.u32 %v10221_v54, %v9040_v57  ;;  %v9142_v57 = vld [vmem:[#allocation9 + $0x278] sm:$0xf] }
 0x475   :  { %5479 = vmatpush.bf16.msra.mxu0 %v8919_v61  ;;  %5492 = vmatpush.bf16.msra.mxu1 %v9111_v50  ;;  %v10170_v61 = vld [vmem:[#allocation9 + $0x14] sm:$0xf0]  ;;  %v10167_v50 = vld [vmem:[#allocation9 + $0x4] sm:$0xf] }
 0x476   :  { %5505 = vmatpush.bf16.msra.mxu2 %v8923_v3  ;;  %5518 = vmatpush.bf16.msra.mxu3 %v9115_v6  ;;  %v8823_v62 = vor.u32 %v10170_v61, %v8822_v45  ;;  %v8824_v3 = vld [vmem:[#allocation9 + $0x18] sm:$0xf0]  ;;  %v9015_v6 = vor.u32 %v10218_v1, %v9014_v0  ;;  %v9144_v61 = vld [vmem:[#allocation9 + $0x290] sm:$0xf0]  ;;  %v8926_v1 = vld [vmem:[#allocation9 + $0xc8] sm:$0xf] }
 0x477   :  { %v8827_v10 = vor.u32 %v10167_v50, %v8824_v3  ;;  %v10246_v45 = vld [vmem:[#allocation9 + $0x27c] sm:$0xf]  ;;  %v10195_v50 = vld [vmem:[#allocation9 + $0xdc] sm:$0xf0]  ;;  %v9118_v3 = vld [vmem:[#allocation9 + $0x248] sm:$0xf] }
 0x479   :  { %5480 = vmatpush.bf16.msra.mxu0 %v8895_v9  ;;  %5493 = vmatpush.bf16.msra.mxu1 %v9087_v11  ;;  %v9019_v9 = vor.u32 %v10215_v23, %v9016_v13  ;;  %v8999_v11 = vor.u32 %v10213_v63, %v8998_v42  ;;  %v10192_v23 = vld [vmem:[#allocation9 + $0xcc] sm:$0xf]  ;;  %v8928_v13 = vld [vmem:[#allocation9 + $0xe0] sm:$0xf0] }
 0x47a   :  { %5506 = vmatpush.bf16.msra.mxu2 %v8899_v20  ;;  %5519 = vmatpush.bf16.msra.mxu3 %v9091_v51  ;;  %v10261_v20 = vld [vmem:[#allocation9 + $0x2ec] sm:$0xf0]  ;;  %v9003_v51 = vor.u32 %v10210_v36, %v9000_v16  ;;  %v8931_v63 = vor.u32 %v10192_v23, %v8928_v13 }
 0x47d   :  { %5481 = vmatpush.bf16.msra.mxu0 %v8871_v22  ;;  %5494 = vmatpush.bf16.msra.mxu1 %v9063_v32  ;;  %v10255_v32 = vld [vmem:[#allocation9 + $0x2bc] sm:$0xf0] }
 0x47e   :  { %5507 = vmatpush.bf16.msra.mxu2 %v8875_v29  ;;  %5520 = vmatpush.bf16.msra.mxu3 %v9067_v35  ;;  %v9167_v35 = vor.u32 %v10255_v32, %v9166_v58  ;;  %v9096_v58 = vld [vmem:[#allocation9 + $0x230] sm:$0xf0] }
 0x47f   :  { %v9099_v32 = vor.u32 %v10234_v26, %v9096_v58 }
 0x481   :  { %5482 = vmatpush.bf16.msra.mxu0 %v8847_v14  ;;  %5495 = vmatpush.bf16.msra.mxu1 %v9039_v52  ;;  %v8979_v14 = vor.u32 %v10204_v33, %v8976_v37  ;;  %v10201_v52 = vld [vmem:[#allocation9 + $0x10c] sm:$0xf0]  ;;  %v10180_v33 = vld [vmem:[#allocation9 + $0x6c] sm:$0xf]  ;;  %v8880_v37 = vld [vmem:[#allocation9 + $0x80] sm:$0xf0] }
 0x482   :  { %5508 = vmatpush.bf16.msra.mxu2 %v8851_v55  ;;  %5521 = vmatpush.bf16.msra.mxu3 %v9043_v40  ;;  %v10996_v55 = vsel %vm10986_vm4, %v10920_v34, %v10918_v31  ;;  %v8952_v40 = vld [vmem:[#allocation9 + $0x110] sm:$0xf0]  ;;  %v9147_v34 = vor.u32 %v10246_v45, %v9144_v61  ;;  %v10174_v45 = vld [vmem:[#allocation9 + $0x3c] sm:$0xf] }
 0x483   :  { %v8856_v61 = vld [vmem:[#allocation9 + $0x50] sm:$0xf0] }
 0x485   :  { %5483 = vmatpush.bf16.msra.mxu0 %v8823_v62  ;;  %5496 = vmatpush.bf16.msra.mxu1 %v9015_v6  ;;  %v8927_v6 = vor.u32 %v10195_v50, %v8926_v1  ;;  %v8830_v1 = vld [vmem:[#allocation9 + $0x8] sm:$0xf]  ;;  %v10171_v50 = vld [vmem:[#allocation9 + $0x1c] sm:$0xf0] }
 0x486   :  { %5509 = vmatpush.bf16.msra.mxu2 %v8827_v10  ;;  %5522 = vmatpush.bf16.msra.mxu3 %v9019_v9  ;;  %v10243_v10 = vld [vmem:[#allocation9 + $0x25c] sm:$0xf0] }
 0x487   :  { %v9119_v42 = vor.u32 %v10243_v10, %v9118_v3  ;;  %v10168_v10 = vld [vmem:[#allocation9 + $0xc] sm:$0xf] }
 0x489   :  { %5528 = vmatpush.bf16.msrb.mxu0 %v8999_v11  ;;  %v9120_v11 = vld [vmem:[#allocation9 + $0x260] sm:$0xf0] }
 0x48a   :  { %5554 = vmatpush.bf16.msrb.mxu2 %v9003_v51  ;;  %v9094_v51 = vld [vmem:[#allocation9 + $0x218] sm:$0xf] }
 0x48d   :  { %5529 = vmatpush.bf16.msrb.mxu0 %v8975_v38 }
 0x48e   :  { %5555 = vmatpush.bf16.msrb.mxu2 %v8979_v14 }
 0x4c3   :  { %v10975_v56 = vpop.f32.mrf.mxu0  ;;  %v10977_v8 = vpop.f32.mrf.mxu1 }
 0x4c4   :  { %v4700_v53 = vadd.f32 %v10977_v8, %v10975_v56 }
 0x4ca   :  { %v4712_v12 = vpop.f32.mrf.mxu2  ;;  %v4725_v18 = vpop.f32.mrf.mxu3 }
 0x4cb   :  { %v4688_v2 = vpop.f32.mrf.mxu0  ;;  %v4701_v19 = vpop.f32.mrf.mxu1  ;;  %v10982_v47 = vadd.f32 %v4725_v18, %v4712_v12  ;;  %v9191_v18 = vor.u32 %v10261_v20, %v9190_v17  ;;  %v10240_v17 = vld [vmem:[#allocation9 + $0x24c] sm:$0xf] }
 0x4cc   :  { %v10258_v2 = vld [vmem:[#allocation9 + $0x2dc] sm:$0xf]  ;;  %v9192_v19 = vld [vmem:[#allocation9 + $0x2f0] sm:$0xf0]  ;;  %v9123_v16 = vor.u32 %v10240_v17, %v9120_v11  ;;  %v9024_v17 = vld [vmem:[#allocation9 + $0x1a0] sm:$0xf0] }
 0x4cd   :  { %v4837_v4 = vrot.slane %v10982_v47, 7  ;;  %v9195_v22 = vor.u32 %v10258_v2, %v9192_v19  ;;  %5541 = vmatpush.bf16.msrb.mxu1 %v9191_v18  ;;  %v10189_v18 = vld [vmem:[#allocation9 + $0xac] sm:$0xf0] }
 0x4ce   :  { %v10237_v19 = vld [vmem:[#allocation9 + $0x22c] sm:$0xf0] }
 0x4cf   :  { %5567 = vmatpush.bf16.msrb.mxu3 %v9195_v22  ;;  %v4840_v41 = vsel %vm834_vm0, %v4700_v53, %v4837_v4 }
 0x4d1   :  { %5542 = vmatpush.bf16.msrb.mxu1 %v9167_v35  ;;  %v10231_v35 = vld [vmem:[#allocation9 + $0x1fc] sm:$0xf0] }
 0x4d2   :  { %v4714_v48 = vpop.f32.mrf.mxu2  ;;  %v4727_v49 = vpop.f32.mrf.mxu3 }
 0x4d3   :  { %v4738_v7 = vpop.f32.mrf.mxu0  ;;  %v4751_v59 = vpop.f32.mrf.mxu1  ;;  %v9171_v48 = vor.u32 %v10252_v46, %v9168_v39  ;;  %v8950_v49 = vld [vmem:[#allocation9 + $0xf8] sm:$0xf] }
 0x4d4   :  { %v4752_v12 = vadd.f32 %v4751_v59, %v4738_v7  ;;  %v8951_v54 = vor.u32 %v10201_v52, %v8950_v49  ;;  %v10249_v7 = vld [vmem:[#allocation9 + $0x28c] sm:$0xf0]  ;;  %v10198_v59 = vld [vmem:[#allocation9 + $0xfc] sm:$0xf] }
 0x4d5   :  { %v9143_v8 = vor.u32 %v10249_v7, %v9142_v57  ;;  %5568 = vmatpush.bf16.msrb.mxu3 %v9171_v48  ;;  %v8955_v31 = vor.u32 %v10198_v59, %v8952_v40  ;;  %v9072_v48 = vld [vmem:[#allocation9 + $0x200] sm:$0xf0]  ;;  %v8854_v7 = vld [vmem:[#allocation9 + $0x38] sm:$0xf]  ;;  %v10177_v59 = vld [vmem:[#allocation9 + $0x4c] sm:$0xf0] }
 0x4d6   :  { %v4838_v15 = vrot.slane %v4752_v12, 6  ;;  %5530 = vmatpush.bf16.msrb.mxu0 %v8951_v54  ;;  %v8902_v12 = vld [vmem:[#allocation9 + $0x98] sm:$0xf] }
 0x4d7   :  { %5543 = vmatpush.bf16.msrb.mxu1 %v9143_v8  ;;  %5556 = vmatpush.bf16.msrb.mxu2 %v8955_v31  ;;  %v8903_v2 = vor.u32 %v10189_v18, %v8902_v12  ;;  %v8855_v8 = vor.u32 %v10177_v59, %v8854_v7  ;;  %v8859_v31 = vor.u32 %v10174_v45, %v8856_v61 }
 0x4d9   :  { %5569 = vmatpush.bf16.msrb.mxu3 %v9147_v34  ;;  %v9048_v34 = vld [vmem:[#allocation9 + $0x1d0] sm:$0xf0] }
 0x4da   :  { %v4764_v43 = vpop.f32.mrf.mxu2  ;;  %v4777_v21 = vpop.f32.mrf.mxu3  ;;  %5531 = vmatpush.bf16.msrb.mxu0 %v8927_v6  ;;  %v10219_v6 = vld [vmem:[#allocation9 + $0x19c] sm:$0xf0] }
 0x4db   :  { %v4778_v44 = vadd.f32 %v4777_v21, %v4764_v43  ;;  %v4740_v28 = vpop.f32.mrf.mxu0  ;;  %v4753_v29 = vpop.f32.mrf.mxu1  ;;  %v8904_v43 = vld [vmem:[#allocation9 + $0xb0] sm:$0xf0]  ;;  %5544 = vmatpush.bf16.msrb.mxu1 %v9119_v42  ;;  %5557 = vmatpush.bf16.msrb.mxu2 %v8931_v63  ;;  %v9095_v21 = vor.u32 %v10237_v19, %v9094_v51  ;;  %v8832_v42 = vld [vmem:[#allocation9 + $0x20] sm:$0xf0]  ;;  %v10216_v63 = vld [vmem:[#allocation9 + $0x18c] sm:$0xf] }
 0x4dc   :  { %v8907_v22 = vor.u32 %v10186_v24, %v8904_v43  ;;  %v10183_v28 = vld [vmem:[#allocation9 + $0x7c] sm:$0xf0]  ;;  %v9070_v29 = vld [vmem:[#allocation9 + $0x1e8] sm:$0xf]  ;;  %v9027_v12 = vor.u32 %v10216_v63, %v9024_v17  ;;  %v8960_v63 = vld [vmem:[#allocation9 + $0x118] sm:$0xf0] }
 0x4dd   :  { %v4839_v47 = vrot.slane %v4778_v44, 5  ;;  %5570 = vmatpush.bf16.msrb.mxu3 %v9123_v16  ;;  %v8878_v44 = vld [vmem:[#allocation9 + $0x68] sm:$0xf]  ;;  %v9071_v53 = vor.u32 %v10231_v35, %v9070_v29  ;;  %v8835_v16 = vor.u32 %v10168_v10, %v8832_v42  ;;  %v10199_v42 = vld [vmem:[#allocation9 + $0x104] sm:$0xf] }
 0x4de   :  { %5532 = vmatpush.bf16.msrb.mxu0 %v8903_v2  ;;  %v8879_v38 = vor.u32 %v10183_v28, %v8878_v44  ;;  %v4873_v44 = vrot.slane %v10996_v55, 4  ;;  %v10247_v17 = vld [vmem:[#allocation9 + $0x284] sm:$0xf] }
 0x4df   :  { %v4841_v56 = vsel %vm836_vm2, %v4838_v15, %v4839_v47  ;;  %5545 = vmatpush.bf16.msrb.mxu1 %v9095_v21  ;;  %5558 = vmatpush.bf16.msrb.mxu2 %v8907_v22  ;;  %v8883_v15 = vor.u32 %v10180_v33, %v8880_v37  ;;  %v10228_v47 = vld [vmem:[#allocation9 + $0x1ec] sm:$0xf] }
 0x4e0   :  { %v4842_v0 = vsel %vm838_vm3, %v4840_v41, %v4841_v56  ;;  %v9075_v57 = vor.u32 %v10228_v47, %v9072_v48  ;;  %v9046_v41 = vld [vmem:[#allocation9 + $0x1b8] sm:$0xf]  ;;  %v10225_v56 = vld [vmem:[#allocation9 + $0x1cc] sm:$0xf0]  ;;  %v9198_v47 = vld [vmem:[#allocation9 + $0x2e0] sm:$0xf] }
 0x4e1   :  { %v4844_v62 = vadd.f32 %v4842_v0, %v10996_v55  ;;  %5571 = vmatpush.bf16.msrb.mxu3 %v9099_v32  ;;  %v9047_v40 = vor.u32 %v10225_v56, %v9046_v41  ;;  %v10222_v0 = vld [vmem:[#allocation9 + $0x1bc] sm:$0xf]  ;;  %v10262_v55 = vld [vmem:[#allocation9 + $0x2f4] sm:$0xf0]  ;;  %v10211_v48 = vld [vmem:[#allocation9 + $0x164] sm:$0xf] }
 0x4e2   :  { %v4766_v5 = vpop.f32.mrf.mxu2  ;;  %v4779_v4 = vpop.f32.mrf.mxu3  ;;  %5533 = vmatpush.bf16.msrb.mxu0 %v8879_v38  ;;  %v9199_v56 = vor.u32 %v10262_v55, %v9198_v47  ;;  %v8886_v47 = vld [vmem:[#allocation9 + $0x70] sm:$0xf]  ;;  %v10184_v55 = vld [vmem:[#allocation9 + $0x84] sm:$0xf0] }
 0x4e3   :  { %v8818_v9 = vmul.f32 -1.442695, %v4844_v62  ;;  %5546 = vmatpush.bf16.msrb.mxu1 %v9071_v53  ;;  %5559 = vmatpush.bf16.msrb.mxu2 %v8883_v15  ;;  %v9051_v62 = vor.u32 %v10222_v0, %v9048_v34  ;;  %v8831_v5 = vor.u32 %v10171_v50, %v8830_v1  ;;  %v9022_v4 = vld [vmem:[#allocation9 + $0x188] sm:$0xf]  ;;  %v10214_v53 = vld [vmem:[#allocation9 + $0x174] sm:$0xf0] }
 0x4e4   :  { %v11002_v20 = vpop.f32.mrf.mxu0  ;;  %v11004_v36 = vpop.f32.mrf.mxu1  ;;  %v9174_v0 = vld [vmem:[#allocation9 + $0x2b0] sm:$0xf]  ;;  %v10205_v34 = vld [vmem:[#allocation9 + $0x134] sm:$0xf]  ;;  %v9176_v50 = vld [vmem:[#allocation9 + $0x2c8] sm:$0xf0] }
 0x4e5   :  { %10396 = vpow2.f32 %v8818_v9  ;;  %5572 = vmatpush.bf16.msrb.mxu3 %v9075_v57  ;;  %v9023_v9 = vor.u32 %v10219_v6, %v9022_v4  ;;  %v4804_v19 = vadd.f32 %v11004_v36, %v11002_v20  ;;  %v10253_v1 = vld [vmem:[#allocation9 + $0x2b4] sm:$0xf]  ;;  %v8958_v4 = vld [vmem:[#allocation9 + $0x100] sm:$0xf]  ;;  %v10202_v6 = vld [vmem:[#allocation9 + $0x114] sm:$0xf0] }
 0x4e6   :  { %5534 = vmatpush.bf16.msrb.mxu0 %v8855_v8  ;;  %v8982_v8 = vld [vmem:[#allocation9 + $0x130] sm:$0xf] }
 0x4e7   :  { %5547 = vmatpush.bf16.msrb.mxu1 %v9047_v40  ;;  %5560 = vmatpush.bf16.msrb.mxu2 %v8859_v31  ;;  %v4864_v58 = vadd.f32 %v4804_v19, %v10647_v25  ;;  %v10208_v40 = vld [vmem:[#allocation9 + $0x144] sm:$0xf0] }
 0x4e8   :  { %v10256_v31 = vld [vmem:[#allocation9 + $0x2c4] sm:$0xf0] }
 0x4e9   :  { %5573 = vmatpush.bf16.msrb.mxu3 %v9051_v62  ;;  %v8984_v62 = vld [vmem:[#allocation9 + $0x148] sm:$0xf0] }
 0x4ea   :  { %5535 = vmatpush.bf16.msrb.mxu0 %v8831_v5  ;;  %v9175_v5 = vor.u32 %v10256_v31, %v9174_v0  ;;  %v8987_v10 = vor.u32 %v10205_v34, %v8984_v62  ;;  %v9054_v34 = vld [vmem:[#allocation9 + $0x1c0] sm:$0xf]  ;;  %v10226_v62 = vld [vmem:[#allocation9 + $0x1d4] sm:$0xf0] }
 0x4eb   :  { %v10397_v46 = vpop.eup %10396  ;;  %v4816_v14 = vpop.f32.mrf.mxu2  ;;  %5548 = vmatpush.bf16.msrb.mxu1 %v9023_v9  ;;  %5561 = vmatpush.bf16.msrb.mxu2 %v8835_v16  ;;  %v10250_v9 = vld [vmem:[#allocation9 + $0x294] sm:$0xf0]  ;;  %v8959_v16 = vor.u32 %v10202_v6, %v8958_v4  ;;  %v9055_v6 = vor.u32 %v10226_v62, %v9054_v34  ;;  %v9304_v34 = vld [vmem:[#allocation9 + $0xc0] sm:$0xf] }
 0x4ec   :  { %v4829_v39 = vpop.f32.mrf.mxu3  ;;  %v11006_v49 = vadd.f32 1.0, %v10397_v46  ;;  %v4792_v52 = vpop.f32.mrf.mxu0  ;;  %v10290_v62 = vld [vmem:[#allocation9 + $0xd4] sm:$0xf0] }
 0x4ed   :  { %v4805_v54 = vpop.f32.mrf.mxu1  ;;  %v4830_v3 = vadd.f32 %v4829_v39, %v4816_v14  ;;  %5574 = vmatpush.bf16.msrb.mxu3 %v9027_v12  ;;  %v9006_v39 = vld [vmem:[#allocation9 + $0x160] sm:$0xf]  ;;  %v10259_v52 = vld [vmem:[#allocation9 + $0x2e4] sm:$0xf] }
 0x4ee   :  { %10398 = vrcp.f32 %v11006_v49  ;;  %v4860_v24 = vand.u32 2147483648, %v11006_v49  ;;  %v4858_v21 = vand.u32 2147483647, %v11006_v49  ;;  %vm4854_vm6 = vweird.f32 %v11006_v49  ;;  %v9200_v54 = vld [vmem:[#allocation9 + $0x2f8] sm:$0xf0] }
 0x4ef   :  { %v4865_v51 = vadd.f32 %v4830_v3, %v10649_v27  ;;  %v9007_v41 = vor.u32 %v10214_v53, %v9006_v39  ;;  %v9203_v61 = vor.u32 %v10259_v52, %v9200_v54  ;;  %v8983_v3 = vor.u32 %v10208_v40, %v8982_v8  ;;  %v9078_v52 = vld [vmem:[#allocation9 + $0x1f0] sm:$0xf]  ;;  %v10232_v54 = vld [vmem:[#allocation9 + $0x204] sm:$0xf0] }
 0x4f0   :  { %v4861_v32 = vor.u32 1.1754944e-38, %v4860_v24  ;;  %vm4859_vm9 = vcmp.eq.f32.partialorder %v4858_v21, 8.507059e+37  ;;  %v9126_v24 = vld [vmem:[#allocation9 + $0x250] sm:$0xf]  ;;  %v10193_v21 = vld [vmem:[#allocation9 + $0xd4] sm:$0xf]  ;;  %v8887_v8 = vor.u32 %v10184_v55, %v8886_v47  ;;  %v9079_v40 = vor.u32 %v10232_v54, %v9078_v52 }
 0x4f1   :  { %v4868_v22 = vrot.slane %v4865_v51, 7  ;;  %v10196_v51 = vld [vmem:[#allocation9 + $0xe4] sm:$0xf0]  ;;  %v9520_v52 = vld [vmem:[#allocation9 + $0x270] sm:$0xf] }
 0x4f3   :  { %v4818_v23 = vpop.f32.mrf.mxu2  ;;  %v4869_v36 = vsel %vm834_vm0, %v4864_v58, %v4868_v22  ;;  %v8936_v22 = vld [vmem:[#allocation9 + $0xe8] sm:$0xf0] }
 0x4f4   :  { %v4831_v13 = vpop.f32.mrf.mxu3  ;;  %v10399_v11 = vpop.eup %10398  ;;  %v9179_v23 = vor.u32 %v10253_v1, %v9176_v50  ;;  %v9128_v58 = vld [vmem:[#allocation9 + $0x268] sm:$0xf0]  ;;  %v10175_v1 = vld [vmem:[#allocation9 + $0x44] sm:$0xf]  ;;  %v8864_v50 = vld [vmem:[#allocation9 + $0x58] sm:$0xf0] }
 0x4f5   :  { %v4850_v18 = vmul.f32 %v10399_v11, %v11006_v49  ;;  %vm4855_vm5 = vweird.f32 %v10399_v11  ;;  %v9008_v49 = vld [vmem:[#allocation9 + $0x178] sm:$0xf0]  ;;  %v9150_v13 = vld [vmem:[#allocation9 + $0x280] sm:$0xf] }
 0x4f6   :  { %vm4856_vm7 = vmor %vm4854_vm6, %vm4855_vm5  ;;  %v9011_v45 = vor.u32 %v10211_v48, %v9008_v49  ;;  %v9151_v12 = vor.u32 %v10250_v9, %v9150_v13  ;;  %v8867_v13 = vor.u32 %v10175_v1, %v8864_v50  ;;  %v9496_v1 = vld [vmem:[#allocation9 + $0x240] sm:$0xf]  ;;  %v9305_v50 = vor.u32 %v10290_v62, %v9304_v34  ;;  %v10266_v62 = vld [vmem:[#allocation9 + $0x14] sm:$0xf0] }
 0x4f7   :  { %v4851_v2 = vsub.f32 1.0, %v4850_v18  ;;  %v8934_v18 = vld [vmem:[#allocation9 + $0xd0] sm:$0xf]  ;;  %v9208_v34 = vld [vmem:[#allocation9] sm:$0xf] }
 0x4f9   :  { %v4852_v43 = vmul.f32 %v10399_v11, %v4851_v2  ;;  %v8963_v2 = vor.u32 %v10199_v42, %v8960_v63  ;;  %v9030_v42 = vld [vmem:[#allocation9 + $0x190] sm:$0xf]  ;;  %v10220_v63 = vld [vmem:[#allocation9 + $0x1a4] sm:$0xf0] }
 0x4fb   :  { %v4853_v26 = vadd.f32 %v10399_v11, %v4852_v43  ;;  %v10244_v43 = vld [vmem:[#allocation9 + $0x264] sm:$0xf0] }
 0x4fd   :  { %v4857_v28 = vsel %vm4856_vm7, %v10399_v11, %v4853_v26  ;;  %v9152_v11 = vld [vmem:[#allocation9 + $0x298] sm:$0xf0]  ;;  %v10241_v26 = vld [vmem:[#allocation9 + $0x254] sm:$0xf] }
 0x4fe   :  { %v4862_v20 = vsel %vm4859_vm9, %v4861_v32, %v4857_v28  ;;  %v9155_v19 = vor.u32 %v10247_v17, %v9152_v11  ;;  %v8935_v32 = vor.u32 %v10196_v51, %v8934_v18  ;;  %v8910_v28 = vld [vmem:[#allocation9 + $0xa0] sm:$0xf]  ;;  %v10169_v17 = vld [vmem:[#allocation9 + $0x14] sm:$0xf]  ;;  %v8840_v11 = vld [vmem:[#allocation9 + $0x28] sm:$0xf0]  ;;  %v9031_v51 = vor.u32 %v10220_v63, %v9030_v42 }
 0x4ff   :  { %v4871_v29 = vmul.f32 %v4869_v36, %v4862_v20  ;;  %v4878_v35 = vrot.slane %v4862_v20, 2  ;;  %v10190_v20 = vld [vmem:[#allocation9 + $0xb4] sm:$0xf0]  ;;  %v8939_v36 = vor.u32 %v10193_v21, %v8936_v22  ;;  %v9568_v21 = vld [vmem:[#allocation9 + $0x2d0] sm:$0xf] }
 0x500   :  { %v8911_v39 = vor.u32 %v10190_v20, %v8910_v28  ;;  %v10353_v20 = vld [vmem:[#allocation9 + $0x2d4] sm:$0xf]  ;;  %v9280_v42 = vld [vmem:[#allocation9 + $0x90] sm:$0xf]  ;;  %v10284_v63 = vld [vmem:[#allocation9 + $0xa4] sm:$0xf0] }
 0x501   :  { %v4875_v38 = vadd.f32 %v4873_v44, %v4871_v29  ;;  %v4880_v33 = vsub.f32 1.0, %v4878_v35  ;;  %v4882_v14 = vmul.f32 %v4878_v35, %v10950_v30  ;;  %v9127_v44 = vor.u32 %v10244_v43, %v9126_v24  ;;  %v10238_v35 = vld [vmem:[#allocation9 + $0x234] sm:$0xf0]  ;;  %v9376_v24 = vld [vmem:[#allocation9 + $0x150] sm:$0xf] }
 0x502   :  { %v9131_v29 = vor.u32 %v10241_v26, %v9128_v58  ;;  %v10308_v43 = vld [vmem:[#allocation9 + $0x164] sm:$0xf0]  ;;  %v10305_v58 = vld [vmem:[#allocation9 + $0x154] sm:$0xf] }
 0x503   :  { %10400 = vtanh.f32 %v4875_v38  ;;  %v9102_v38 = vld [vmem:[#allocation9 + $0x220] sm:$0xf]  ;;  %v9377_v22 = vor.u32 %v10308_v43, %v9376_v24  ;;  %v10356_v26 = vld [vmem:[#allocation9 + $0x2e4] sm:$0xf0]  ;;  %v9474_v24 = vld [vmem:[#allocation9 + $0x228] sm:$0xf0] }
 0x504   :  { %v9103_v53 = vor.u32 %v10238_v35, %v9102_v38  ;;  %v9352_v38 = vld [vmem:[#allocation9 + $0x120] sm:$0xf] }
 0x509   :  { %v10401_v37 = vpop.eup %10400 }
 0x50a   :  { %v4881_v46 = vmul.f32 %v10401_v37, %v4880_v33  ;;  %v10187_v33 = vld [vmem:[#allocation9 + $0xa4] sm:$0xf]  ;;  %v8912_v37 = vld [vmem:[#allocation9 + $0xb8] sm:$0xf0] }
 0x50b   :  { %v8915_v48 = vor.u32 %v10187_v33, %v8912_v37  ;;  %v10350_v33 = vld [vmem:[#allocation9 + $0x2b4] sm:$0xf0]  ;;  %v10299_v37 = vld [vmem:[#allocation9 + $0x124] sm:$0xf] }
 0x50c   :  { %v11020_v15 = vadd.f32 %v4882_v14, %v4881_v46  ;;  %v10235_v46 = vld [vmem:[#allocation9 + $0x224] sm:$0xf]  ;;  %v9104_v14 = vld [vmem:[#allocation9 + $0x238] sm:$0xf0] }
 0x50d   :  { %v9107_v49 = vor.u32 %v10235_v46, %v9104_v14  ;;  %v9354_v14 = vld [vmem:[#allocation9 + $0x138] sm:$0xf0] }
 0x50e   :  { %4885 = vst.msk [vmem:[#allocation10 + $0x5] ss:$8 sm:$0x3] %vm10658_vm8, %v11020_v15  ;;  %v4894_v57 = vperm.slane %v11020_v15, 0  ;;  %v4895_v7 = vperm.slane %v11020_v15, 1  ;;  %v9357_v47 = vor.u32 %v10299_v37, %v9354_v14 }
 0x50f   :  { %v10272_v14 = vld [vmem:[#allocation9 + $0x44] sm:$0xf0] }
 0x510   :  { %v11027_v59 = vpack.c.bf16 %v4894_v57, %v4894_v57  ;;  %v11029_v30 = vpack.c.bf16 %v4895_v7, %v4895_v7  ;;  %v10181_v57 = vld [vmem:[#allocation9 + $0x74] sm:$0xf]  ;;  %v8888_v7 = vld [vmem:[#allocation9 + $0x88] sm:$0xf0] }
 0x511   :  { %v8891_v0 = vor.u32 %v10181_v57, %v8888_v7  ;;  %v10344_v57 = vld [vmem:[#allocation9 + $0x284] sm:$0xf0]  ;;  %v10293_v7 = vld [vmem:[#allocation9 + $0xf4] sm:$0xf] }
 0x512   :  { %5484 = vmatmul.bf16.vlgmr.msra.gmra.mxu0 %v11027_v59  ;;  %5497 = vmatmul.bf16.vlgmr.msra.gmra.mxu1 %v11029_v30 }
 0x513   :  { %5510 = vmatmul.bf16.vlgmr.msra.gmra.mxu2 %v11027_v59  ;;  %5523 = vmatmul.bf16.vlgmr.msra.gmra.mxu3 %v11029_v30 }
 0x514   :  { %5580 = vmatpush.bf16.msra.mxu0 %v9007_v41  ;;  %5593 = vmatpush.bf16.msra.mxu1 %v9199_v56  ;;  %v10229_v41 = vld [vmem:[#allocation9 + $0x1f4] sm:$0xf]  ;;  %v9080_v56 = vld [vmem:[#allocation9 + $0x208] sm:$0xf0] }
 0x515   :  { %5606 = vmatpush.bf16.msra.mxu2 %v9011_v45  ;;  %5619 = vmatpush.bf16.msra.mxu3 %v9203_v61  ;;  %v8862_v45 = vld [vmem:[#allocation9 + $0x40] sm:$0xf]  ;;  %v10178_v61 = vld [vmem:[#allocation9 + $0x54] sm:$0xf0]  ;;  %v9083_v31 = vor.u32 %v10229_v41, %v9080_v56  ;;  %v9330_v41 = vld [vmem:[#allocation9 + $0x108] sm:$0xf0]  ;;  %v9521_v56 = vor.u32 %v10344_v57, %v9520_v52 }
 0x516   :  { %v8863_v4 = vor.u32 %v10178_v61, %v8862_v45  ;;  %v9522_v45 = vld [vmem:[#allocation9 + $0x288] sm:$0xf0] }
 0x518   :  { %5581 = vmatpush.bf16.msra.mxu0 %v8983_v3  ;;  %5594 = vmatpush.bf16.msra.mxu1 %v9175_v5  ;;  %v10223_v3 = vld [vmem:[#allocation9 + $0x1c4] sm:$0xf]  ;;  %v9056_v5 = vld [vmem:[#allocation9 + $0x1d8] sm:$0xf0] }
 0x519   :  { %5607 = vmatpush.bf16.msra.mxu2 %v8987_v10  ;;  %5620 = vmatpush.bf16.msra.mxu3 %v9179_v23  ;;  %v8838_v10 = vld [vmem:[#allocation9 + $0x10] sm:$0xf]  ;;  %v10172_v23 = vld [vmem:[#allocation9 + $0x24] sm:$0xf0]  ;;  %v9059_v9 = vor.u32 %v10223_v3, %v9056_v5  ;;  %v10338_v3 = vld [vmem:[#allocation9 + $0x254] sm:$0xf0] }
 0x51a   :  { %v8839_v18 = vor.u32 %v10172_v23, %v8838_v10  ;;  %v10287_v5 = vld [vmem:[#allocation9 + $0xc4] sm:$0xf] }
 0x51b   :  { %v10335_v23 = vld [vmem:[#allocation9 + $0x244] sm:$0xf] }
 0x51c   :  { %5582 = vmatpush.bf16.msra.mxu0 %v8959_v16  ;;  %5595 = vmatpush.bf16.msra.mxu1 %v9151_v12  ;;  %v10217_v16 = vld [vmem:[#allocation9 + $0x194] sm:$0xf]  ;;  %v9032_v12 = vld [vmem:[#allocation9 + $0x1a8] sm:$0xf0] }
 0x51d   :  { %5608 = vmatpush.bf16.msra.mxu2 %v8963_v2  ;;  %5621 = vmatpush.bf16.msra.mxu3 %v9155_v19  ;;  %v8843_v2 = vor.u32 %v10169_v17, %v8840_v11  ;;  %v9035_v19 = vor.u32 %v10217_v16, %v9032_v12  ;;  %v9472_v17 = vld [vmem:[#allocation9 + $0x210] sm:$0xf]  ;;  %v9281_v11 = vor.u32 %v10284_v63, %v9280_v42  ;;  %v10332_v16 = vld [vmem:[#allocation9 + $0x224] sm:$0xf0]  ;;  %v10281_v12 = vld [vmem:[#allocation9 + $0x94] sm:$0xf] }
 0x51e   :  { %v9402_v42 = vld [vmem:[#allocation9 + $0x198] sm:$0xf0] }
 0x520   :  { %5583 = vmatpush.bf16.msra.mxu0 %v8935_v32  ;;  %5596 = vmatpush.bf16.msra.mxu1 %v9127_v44  ;;  %v9378_v32 = vld [vmem:[#allocation9 + $0x168] sm:$0xf0]  ;;  %v9569_v44 = vor.u32 %v10356_v26, %v9568_v21 }
 0x521   :  { %5609 = vmatpush.bf16.msra.mxu2 %v8939_v36  ;;  %5622 = vmatpush.bf16.msra.mxu3 %v9131_v29  ;;  %v9381_v28 = vor.u32 %v10305_v58, %v9378_v32  ;;  %v9570_v36 = vld [vmem:[#allocation9 + $0x2e8] sm:$0xf0]  ;;  %v9256_v32 = vld [vmem:[#allocation9 + $0x60] sm:$0xf] }
 0x522   :  { %5536 = vmatmul.bf16.vlgmr.msrb.gmra.mxu0 %v11027_v59  ;;  %5549 = vmatmul.bf16.vlgmr.msrb.gmra.mxu1 %v11029_v30  ;;  %v9573_v29 = vor.u32 %v10353_v20, %v9570_v36  ;;  %v10326_v36 = vld [vmem:[#allocation9 + $0x1f4] sm:$0xf0] }
 0x523   :  { %5562 = vmatmul.bf16.vlgmr.msrb.gmra.mxu2 %v11027_v59  ;;  %5575 = vmatmul.bf16.vlgmr.msrb.gmra.mxu3 %v11029_v30 }
 0x524   :  { %5584 = vmatpush.bf16.msra.mxu0 %v8911_v39  ;;  %5597 = vmatpush.bf16.msra.mxu1 %v9103_v53  ;;  %v10347_v39 = vld [vmem:[#allocation9 + $0x2a4] sm:$0xf]  ;;  %v9546_v53 = vld [vmem:[#allocation9 + $0x2b8] sm:$0xf0] }
 0x525   :  { %5610 = vmatpush.bf16.msra.mxu2 %v8915_v48  ;;  %5623 = vmatpush.bf16.msra.mxu3 %v9107_v49  ;;  %v9549_v55 = vor.u32 %v10347_v39, %v9546_v53  ;;  %v9328_v48 = vld [vmem:[#allocation9 + $0xf0] sm:$0xf]  ;;  %v10296_v49 = vld [vmem:[#allocation9 + $0x104] sm:$0xf0] }
 0x526   :  { %v9329_v54 = vor.u32 %v10296_v49, %v9328_v48  ;;  %v9424_v39 = vld [vmem:[#allocation9 + $0x1b0] sm:$0xf]  ;;  %v9234_v48 = vld [vmem:[#allocation9 + $0x48] sm:$0xf0] }
 0x528   :  { %5585 = vmatpush.bf16.msra.mxu0 %v8887_v8  ;;  %5598 = vmatpush.bf16.msra.mxu1 %v9079_v40  ;;  %v9333_v8 = vor.u32 %v10293_v7, %v9330_v41  ;;  %v10341_v40 = vld [vmem:[#allocation9 + $0x274] sm:$0xf] }
 0x529   :  { %5611 = vmatpush.bf16.msra.mxu2 %v8891_v0  ;;  %5624 = vmatpush.bf16.msra.mxu3 %v9083_v31  ;;  %v9525_v61 = vor.u32 %v10341_v40, %v9522_v45  ;;  %v10317_v41 = vld [vmem:[#allocation9 + $0x1b4] sm:$0xf]  ;;  %v4890_v45 = vstv %s11050_s24 }
 0x52a   :  { %vm11056_vm10 = vcmp.eq.s32.totalorder %v4890_v45, 1 }
 0x52c   :  { %5586 = vmatpush.bf16.msra.mxu0 %v8863_v4  ;;  %5599 = vmatpush.bf16.msra.mxu1 %v9055_v6  ;;  %v9306_v4 = vld [vmem:[#allocation9 + $0xd8] sm:$0xf0]  ;;  %v9497_v6 = vor.u32 %v10338_v3, %v9496_v1  ;;  %v9400_v1 = vld [vmem:[#allocation9 + $0x180] sm:$0xf]  ;;  %v10314_v3 = vld [vmem:[#allocation9 + $0x194] sm:$0xf0] }
 0x52d   :  { %5612 = vmatpush.bf16.msra.mxu2 %v8867_v13  ;;  %5625 = vmatpush.bf16.msra.mxu3 %v9059_v9  ;;  %v9309_v10 = vor.u32 %v10287_v5, %v9306_v4  ;;  %v9498_v13 = vld [vmem:[#allocation9 + $0x258] sm:$0xf0]  ;;  %v10263_v5 = vld [vmem:[#allocation9 + $0x4] sm:$0xf] }
 0x52e   :  { %v9501_v9 = vor.u32 %v10335_v23, %v9498_v13  ;;  %v9210_v4 = vld [vmem:[#allocation9 + $0x18] sm:$0xf0]  ;;  %v9401_v23 = vor.u32 %v10314_v3, %v9400_v1 }
 0x52f   :  { %v9213_v13 = vor.u32 %v10263_v5, %v9210_v4  ;;  %v9312_v4 = vld [vmem:[#allocation9 + $0xc8] sm:$0xf] }
 0x530   :  { %5587 = vmatpush.bf16.msra.mxu0 %v8839_v18  ;;  %5600 = vmatpush.bf16.msra.mxu1 %v9031_v51  ;;  %v9282_v18 = vld [vmem:[#allocation9 + $0xa8] sm:$0xf0]  ;;  %v9473_v51 = vor.u32 %v10332_v16, %v9472_v17  ;;  %v9384_v17 = vld [vmem:[#allocation9 + $0x158] sm:$0xf] }
 0x531   :  { %5613 = vmatpush.bf16.msra.mxu2 %v8843_v2  ;;  %5626 = vmatpush.bf16.msra.mxu3 %v9035_v19  ;;  %v9285_v2 = vor.u32 %v10281_v12, %v9282_v18  ;;  %v10329_v19 = vld [vmem:[#allocation9 + $0x214] sm:$0xf]  ;;  %v9576_v16 = vld [vmem:[#allocation9 + $0x2d8] sm:$0xf]  ;;  %v10357_v18 = vld [vmem:[#allocation9 + $0x2ec] sm:$0xf0] }
 0x533   :  { %5588 = vmatmul.bf16.vlgmr.msra.gmra.mxu0 %v11027_v59  ;;  %5601 = vmatmul.bf16.vlgmr.msra.gmra.mxu1 %v11029_v30 }
 0x534   :  { %5614 = vmatmul.bf16.vlgmr.msra.gmra.mxu2 %v11027_v59  ;;  %5627 = vmatmul.bf16.vlgmr.msra.gmra.mxu3 %v11029_v30  ;;  %v10302_v59 = vld [vmem:[#allocation9 + $0x134] sm:$0xf0]  ;;  %v9544_v30 = vld [vmem:[#allocation9 + $0x2a0] sm:$0xf] }
 0x535   :  { %6275 = vmatpush.bf16.msrb.mxu0 %v9377_v22  ;;  %6288 = vmatpush.bf16.msrb.mxu1 %v9569_v44  ;;  %v9353_v35 = vor.u32 %v10302_v59, %v9352_v38  ;;  %v9545_v46 = vor.u32 %v10350_v33, %v9544_v30  ;;  %v9477_v22 = vor.u32 %v10329_v19, %v9474_v24  ;;  %v10278_v44 = vld [vmem:[#allocation9 + $0x74] sm:$0xf0]  ;;  %v9258_v59 = vld [vmem:[#allocation9 + $0x78] sm:$0xf0] }
 0x536   :  { %6301 = vmatpush.bf16.msrb.mxu2 %v9381_v28  ;;  %6314 = vmatpush.bf16.msrb.mxu3 %v9573_v29  ;;  %v9448_v28 = vld [vmem:[#allocation9 + $0x1e0] sm:$0xf]  ;;  %v9257_v20 = vor.u32 %v10278_v44, %v9256_v32  ;;  %v10275_v29 = vld [vmem:[#allocation9 + $0x64] sm:$0xf]  ;;  %v9450_v33 = vld [vmem:[#allocation9 + $0x1f8] sm:$0xf0]  ;;  %v9577_v24 = vor.u32 %v10357_v18, %v9576_v16 }
 0x537   :  { %v9449_v38 = vor.u32 %v10326_v36, %v9448_v28  ;;  %v9261_v30 = vor.u32 %v10275_v29, %v9258_v59  ;;  %v10303_v28 = vld [vmem:[#allocation9 + $0x13c] sm:$0xf0]  ;;  %v10336_v18 = vld [vmem:[#allocation9 + $0x24c] sm:$0xf] }
 0x538   :  { %v10351_v36 = vld [vmem:[#allocation9 + $0x2bc] sm:$0xf0] }
 0x539   :  { %6276 = vmatpush.bf16.msrb.mxu0 %v9353_v35  ;;  %6289 = vmatpush.bf16.msrb.mxu1 %v9545_v46  ;;  %v10323_v35 = vld [vmem:[#allocation9 + $0x1e4] sm:$0xf]  ;;  %v9232_v46 = vld [vmem:[#allocation9 + $0x30] sm:$0xf] }
 0x53a   :  { %6302 = vmatpush.bf16.msrb.mxu2 %v9357_v47  ;;  %6315 = vmatpush.bf16.msrb.mxu3 %v9549_v55  ;;  %v9453_v37 = vor.u32 %v10323_v35, %v9450_v33  ;;  %v9233_v53 = vor.u32 %v10272_v14, %v9232_v46  ;;  %v10320_v47 = vld [vmem:[#allocation9 + $0x1c4] sm:$0xf0]  ;;  %v10269_v55 = vld [vmem:[#allocation9 + $0x34] sm:$0xf]  ;;  %v10300_v33 = vld [vmem:[#allocation9 + $0x12c] sm:$0xf] }
 0x53b   :  { %v9425_v57 = vor.u32 %v10320_v47, %v9424_v39  ;;  %v9237_v7 = vor.u32 %v10269_v55, %v9234_v48  ;;  %v10348_v46 = vld [vmem:[#allocation9 + $0x2ac] sm:$0xf]  ;;  %v9554_v39 = vld [vmem:[#allocation9 + $0x2c0] sm:$0xf0] }
 0x53c   :  { %v9557_v48 = vor.u32 %v10348_v46, %v9554_v39  ;;  %v10276_v46 = vld [vmem:[#allocation9 + $0x6c] sm:$0xf] }
 0x53d   :  { %6277 = vmatpush.bf16.msrb.mxu0 %v9329_v54  ;;  %6290 = vmatpush.bf16.msrb.mxu1 %v9521_v56  ;;  %v9426_v56 = vld [vmem:[#allocation9 + $0x1c8] sm:$0xf0] }
 0x53e   :  { %6303 = vmatpush.bf16.msrb.mxu2 %v9333_v8  ;;  %6316 = vmatpush.bf16.msrb.mxu3 %v9525_v61  ;;  %v9429_v61 = vor.u32 %v10317_v41, %v9426_v56  ;;  %v9528_v56 = vld [vmem:[#allocation9 + $0x278] sm:$0xf] }
 0x541   :  { %6278 = vmatpush.bf16.msrb.mxu0 %v9305_v50  ;;  %6291 = vmatpush.bf16.msrb.mxu1 %v9497_v6  ;;  %v9209_v50 = vor.u32 %v10266_v62, %v9208_v34  ;;  %v10342_v34 = vld [vmem:[#allocation9 + $0x27c] sm:$0xf]  ;;  %v9530_v62 = vld [vmem:[#allocation9 + $0x290] sm:$0xf0] }
 0x542   :  { %6304 = vmatpush.bf16.msrb.mxu2 %v9309_v10  ;;  %6317 = vmatpush.bf16.msrb.mxu3 %v9501_v9  ;;  %v10311_v9 = vld [vmem:[#allocation9 + $0x184] sm:$0xf]  ;;  %v9533_v3 = vor.u32 %v10342_v34, %v9530_v62  ;;  %v10291_v10 = vld [vmem:[#allocation9 + $0xdc] sm:$0xf0] }
 0x543   :  { %v9405_v63 = vor.u32 %v10311_v9, %v9402_v42  ;;  %v9313_v9 = vor.u32 %v10291_v10, %v9312_v4  ;;  %v10339_v42 = vld [vmem:[#allocation9 + $0x25c] sm:$0xf0]  ;;  %v9434_v4 = vld [vmem:[#allocation9 + $0x1d0] sm:$0xf0] }
 0x545   :  { %6279 = vmatpush.bf16.msrb.mxu0 %v9281_v11  ;;  %6292 = vmatpush.bf16.msrb.mxu1 %v9473_v51  ;;  %v10309_v11 = vld [vmem:[#allocation9 + $0x16c] sm:$0xf0]  ;;  %v10306_v51 = vld [vmem:[#allocation9 + $0x15c] sm:$0xf] }
 0x546   :  { %6305 = vmatpush.bf16.msrb.mxu2 %v9285_v2  ;;  %6318 = vmatpush.bf16.msrb.mxu3 %v9477_v22  ;;  %v9385_v12 = vor.u32 %v10309_v11, %v9384_v17  ;;  %v9386_v2 = vld [vmem:[#allocation9 + $0x170] sm:$0xf0]  ;;  %v9314_v17 = vld [vmem:[#allocation9 + $0xe0] sm:$0xf0] }
 0x547   :  { %v9578_v22 = vld [vmem:[#allocation9 + $0x2f0] sm:$0xf0] }
 0x549   :  { %6280 = vmatpush.bf16.msrb.mxu0 %v9257_v20  ;;  %6293 = vmatpush.bf16.msrb.mxu1 %v9449_v38  ;;  %v9552_v20 = vld [vmem:[#allocation9 + $0x2a8] sm:$0xf] }
 0x54a   :  { %6306 = vmatpush.bf16.msrb.mxu2 %v9261_v30  ;;  %6319 = vmatpush.bf16.msrb.mxu3 %v9453_v37  ;;  %v9553_v30 = vor.u32 %v10351_v36, %v9552_v20  ;;  %v9362_v37 = vld [vmem:[#allocation9 + $0x140] sm:$0xf0]  ;;  %v10330_v36 = vld [vmem:[#allocation9 + $0x21c] sm:$0xf] }
 0x54b   :  { %v9365_v14 = vor.u32 %v10300_v33, %v9362_v37  ;;  %v10327_v37 = vld [vmem:[#allocation9 + $0x1fc] sm:$0xf0] }
 0x54d   :  { %6281 = vmatpush.bf16.msrb.mxu0 %v9233_v53  ;;  %6294 = vmatpush.bf16.msrb.mxu1 %v9425_v57  ;;  %v11064_v57 = vld [vmem:[#allocation6 + $0x1] ss:$2 sm:$0x3f] }
 0x54e   :  { %6307 = vmatpush.bf16.msrb.mxu2 %v9237_v7  ;;  %6320 = vmatpush.bf16.msrb.mxu3 %v9429_v61  ;;  %v9338_v61 = vld [vmem:[#allocation9 + $0x110] sm:$0xf0] }
 0x551   :  { %6282 = vmatpush.bf16.msrb.mxu0 %v9209_v50  ;;  %6295 = vmatpush.bf16.msrb.mxu1 %v9401_v23  ;;  %v9504_v23 = vld [vmem:[#allocation9 + $0x248] sm:$0xf] }
 0x552   :  { %6308 = vmatpush.bf16.msrb.mxu2 %v9213_v13  ;;  %6321 = vmatpush.bf16.msrb.mxu3 %v9405_v63  ;;  %v10288_v63 = vld [vmem:[#allocation9 + $0xcc] sm:$0xf]  ;;  %v9505_v16 = vor.u32 %v10339_v42, %v9504_v23  ;;  %v9216_v23 = vld [vmem:[#allocation9 + $0x8] sm:$0xf] }
 0x553   :  { %v9408_v42 = vld [vmem:[#allocation9 + $0x188] sm:$0xf] }
 0x555   :  { %6327 = vmatpush.bf16.msra.mxu0 %v9385_v12  ;;  %6340 = vmatpush.bf16.msra.mxu1 %v9577_v24  ;;  %v9317_v12 = vor.u32 %v10288_v63, %v9314_v17  ;;  %v10315_v63 = vld [vmem:[#allocation9 + $0x19c] sm:$0xf0]  ;;  %v10264_v17 = vld [vmem:[#allocation9 + $0xc] sm:$0xf] }
 0x559   :  { %6341 = vmatpush.bf16.msra.mxu1 %v9553_v30  ;;  %v9456_v30 = vld [vmem:[#allocation9 + $0x1e8] sm:$0xf] }
 0x58f   :  { %v11045_v0 = vpop.f32.mrf.mxu0  ;;  %v11047_v31 = vpop.f32.mrf.mxu1 }
 0x590   :  { %v5499_v53 = vadd.f32 %v11047_v31, %v11045_v0  ;;  %v10294_v0 = vld [vmem:[#allocation9 + $0xfc] sm:$0xf] }
 0x591   :  { %v9341_v50 = vor.u32 %v10294_v0, %v9338_v61  ;;  %v10321_v61 = vld [vmem:[#allocation9 + $0x1cc] sm:$0xf0] }
 0x596   :  { %v5511_v43 = vpop.f32.mrf.mxu2  ;;  %v5524_v21 = vpop.f32.mrf.mxu3 }
 0x597   :  { %v5487_v26 = vpop.f32.mrf.mxu0  ;;  %v5500_v58 = vpop.f32.mrf.mxu1  ;;  %v11052_v49 = vadd.f32 %v5524_v21, %v5511_v43  ;;  %v9389_v43 = vor.u32 %v10306_v51, %v9386_v2  ;;  %v10354_v21 = vld [vmem:[#allocation9 + $0x2dc] sm:$0xf]  ;;  %v9506_v51 = vld [vmem:[#allocation9 + $0x260] sm:$0xf0] }
 0x598   :  { %v9360_v26 = vld [vmem:[#allocation9 + $0x128] sm:$0xf]  ;;  %v9581_v44 = vor.u32 %v10354_v21, %v9578_v22  ;;  %v9509_v24 = vor.u32 %v10336_v18, %v9506_v51  ;;  %v10285_v21 = vld [vmem:[#allocation9 + $0xac] sm:$0xf0]  ;;  %v9480_v22 = vld [vmem:[#allocation9 + $0x218] sm:$0xf] }
 0x599   :  { %v5636_v6 = vrot.slane %v11052_v49, 7  ;;  %6353 = vmatpush.bf16.msra.mxu2 %v9389_v43  ;;  %v9361_v35 = vor.u32 %v10303_v28, %v9360_v26  ;;  %v9336_v49 = vld [vmem:[#allocation9 + $0xf8] sm:$0xf]  ;;  %v9218_v18 = vld [vmem:[#allocation9 + $0x20] sm:$0xf0] }
 0x59a   :  { %6366 = vmatpush.bf16.msra.mxu3 %v9581_v44  ;;  %v9288_v43 = vld [vmem:[#allocation9 + $0x98] sm:$0xf]  ;;  %v9290_v44 = vld [vmem:[#allocation9 + $0xb0] sm:$0xf0]  ;;  %v10312_v51 = vld [vmem:[#allocation9 + $0x18c] sm:$0xf] }
 0x59b   :  { %6328 = vmatpush.bf16.msra.mxu0 %v9361_v35  ;;  %v5639_v31 = vsel %vm834_vm0, %v5499_v53, %v5636_v6  ;;  %v9289_v26 = vor.u32 %v10285_v21, %v9288_v43  ;;  %v10279_v35 = vld [vmem:[#allocation9 + $0x7c] sm:$0xf0]  ;;  %v9221_v21 = vor.u32 %v10264_v17, %v9218_v18 }
 0x59c   :  { %v9344_v17 = vld [vmem:[#allocation9 + $0x100] sm:$0xf] }
 0x59d   :  { %6354 = vmatpush.bf16.msra.mxu2 %v9365_v14  ;;  %v9266_v14 = vld [vmem:[#allocation9 + $0x80] sm:$0xf0]  ;;  %v9536_v18 = vld [vmem:[#allocation9 + $0x280] sm:$0xf] }
 0x59e   :  { %v5513_v52 = vpop.f32.mrf.mxu2  ;;  %v5526_v54 = vpop.f32.mrf.mxu3  ;;  %6367 = vmatpush.bf16.msra.mxu3 %v9557_v48  ;;  %v9269_v48 = vor.u32 %v10276_v46, %v9266_v14 }
 0x59f   :  { %v5537_v8 = vpop.f32.mrf.mxu0  ;;  %v5550_v40 = vpop.f32.mrf.mxu1  ;;  %v10297_v52 = vld [vmem:[#allocation9 + $0x10c] sm:$0xf0] }
 0x5a0   :  { %v5551_v19 = vadd.f32 %v5550_v40, %v5537_v8  ;;  %v11062_v54 = vld [vmem:[#allocation6] ss:$2 sm:$0x3f]  ;;  %v9337_v41 = vor.u32 %v10297_v52, %v9336_v49  ;;  %v10324_v49 = vld [vmem:[#allocation9 + $0x1ec] sm:$0xf] }
 0x5a1   :  { %v11070_v7 = vsel %vm11056_vm10, %v11064_v57, %v11062_v54  ;;  %v10345_v8 = vld [vmem:[#allocation9 + $0x28c] sm:$0xf0]  ;;  %6355 = vmatpush.bf16.msra.mxu2 %v9341_v50  ;;  %v9458_v52 = vld [vmem:[#allocation9 + $0x200] sm:$0xf0]  ;;  %v9242_v50 = vld [vmem:[#allocation9 + $0x50] sm:$0xf0] }
 0x5a2   :  { %v5637_v47 = vrot.slane %v5551_v19, 6  ;;  %v9529_v45 = vor.u32 %v10345_v8, %v9528_v56  ;;  %6329 = vmatpush.bf16.msra.mxu0 %v9337_v41  ;;  %6368 = vmatpush.bf16.msra.mxu3 %v9533_v3  ;;  %v9461_v0 = vor.u32 %v10324_v49, %v9458_v52  ;;  %v10318_v3 = vld [vmem:[#allocation9 + $0x1bc] sm:$0xf]  ;;  %v10310_v49 = vld [vmem:[#allocation9 + $0x174] sm:$0xf0] }
 0x5a3   :  { %v9437_v10 = vor.u32 %v10318_v3, %v9434_v4  ;;  %v9560_v4 = vld [vmem:[#allocation9 + $0x2b0] sm:$0xf] }
 0x5a4   :  { %6342 = vmatpush.bf16.msra.mxu1 %v9529_v45  ;;  %v9432_v45 = vld [vmem:[#allocation9 + $0x1b8] sm:$0xf] }
 0x5a5   :  { %6356 = vmatpush.bf16.msra.mxu2 %v9317_v12  ;;  %v9433_v62 = vor.u32 %v10321_v61, %v9432_v45  ;;  %v9409_v12 = vor.u32 %v10315_v63, %v9408_v42 }
 0x5a6   :  { %v5563_v58 = vpop.f32.mrf.mxu2  ;;  %v5576_v32 = vpop.f32.mrf.mxu3  ;;  %6330 = vmatpush.bf16.msra.mxu0 %v9313_v9  ;;  %6369 = vmatpush.bf16.msra.mxu3 %v9509_v24  ;;  %v9410_v24 = vld [vmem:[#allocation9 + $0x1a0] sm:$0xf0] }
 0x5a7   :  { %v5577_v29 = vadd.f32 %v5576_v32, %v5563_v58  ;;  %v5539_v38 = vpop.f32.mrf.mxu0  ;;  %v5552_v59 = vpop.f32.mrf.mxu1  ;;  %v10333_v58 = vld [vmem:[#allocation9 + $0x22c] sm:$0xf0]  ;;  %v10282_v32 = vld [vmem:[#allocation9 + $0x9c] sm:$0xf] }
 0x5a8   :  { %6343 = vmatpush.bf16.msra.mxu1 %v9505_v16  ;;  %v9481_v28 = vor.u32 %v10333_v58, %v9480_v22  ;;  %v9293_v20 = vor.u32 %v10282_v32, %v9290_v44  ;;  %v9264_v59 = vld [vmem:[#allocation9 + $0x68] sm:$0xf]  ;;  %v9413_v22 = vor.u32 %v10312_v51, %v9410_v24  ;;  %v10346_v51 = vld [vmem:[#allocation9 + $0x294] sm:$0xf0]  ;;  %v10295_v24 = vld [vmem:[#allocation9 + $0x104] sm:$0xf] }
 0x5a9   :  { %v5638_v55 = vrot.slane %v5577_v29, 5  ;;  %v9482_v29 = vld [vmem:[#allocation9 + $0x230] sm:$0xf0]  ;;  %v9265_v33 = vor.u32 %v10279_v35, %v9264_v59 }
 0x5aa   :  { %v9485_v38 = vor.u32 %v10330_v36, %v9482_v29  ;;  %6331 = vmatpush.bf16.msra.mxu0 %v9289_v26  ;;  %6357 = vmatpush.bf16.msra.mxu2 %v9293_v20 }
 0x5ab   :  { %v5640_v40 = vsel %vm836_vm2, %v5637_v47, %v5638_v55  ;;  %v9457_v55 = vor.u32 %v10327_v37, %v9456_v30  ;;  %v5672_v30 = vrot.slane %v11070_v7, 4 }
 0x5ac   :  { %v5641_v1 = vsel %vm838_vm3, %v5639_v31, %v5640_v40  ;;  %6344 = vmatpush.bf16.msra.mxu1 %v9481_v28  ;;  %6370 = vmatpush.bf16.msra.mxu3 %v9485_v38  ;;  %v9240_v31 = vld [vmem:[#allocation9 + $0x38] sm:$0xf]  ;;  %v10273_v40 = vld [vmem:[#allocation9 + $0x4c] sm:$0xf0] }
 0x5ad   :  { %v5643_v5 = vadd.f32 %v5641_v1, %v11070_v7  ;;  %v9241_v34 = vor.u32 %v10273_v40, %v9240_v31  ;;  %v10270_v1 = vld [vmem:[#allocation9 + $0x3c] sm:$0xf]  ;;  %v10358_v7 = vld [vmem:[#allocation9 + $0x2f4] sm:$0xf0] }
 0x5ae   :  { %v5565_v13 = vpop.f32.mrf.mxu2  ;;  %v5578_v6 = vpop.f32.mrf.mxu3  ;;  %6332 = vmatpush.bf16.msra.mxu0 %v9265_v33  ;;  %6358 = vmatpush.bf16.msra.mxu2 %v9269_v48  ;;  %v9392_v48 = vld [vmem:[#allocation9 + $0x160] sm:$0xf]  ;;  %v9586_v31 = vld [vmem:[#allocation9 + $0x2f8] sm:$0xf0] }
 0x5af   :  { %v9204_v11 = vmul.f32 -1.442695, %v5643_v5  ;;  %v9245_v5 = vor.u32 %v10270_v1, %v9242_v50  ;;  %v10267_v13 = vld [vmem:[#allocation9 + $0x1c] sm:$0xf0]  ;;  %v9368_v1 = vld [vmem:[#allocation9 + $0x130] sm:$0xf] }
 0x5b0   :  { %v11076_v2 = vpop.f32.mrf.mxu0  ;;  %v11078_v19 = vpop.f32.mrf.mxu1  ;;  %6345 = vmatpush.bf16.msra.mxu1 %v9457_v55  ;;  %6371 = vmatpush.bf16.msra.mxu3 %v9461_v0  ;;  %v9217_v9 = vor.u32 %v10267_v13, %v9216_v23  ;;  %v10355_v0 = vld [vmem:[#allocation9 + $0x2e4] sm:$0xf]  ;;  %v10304_v50 = vld [vmem:[#allocation9 + $0x144] sm:$0xf0]  ;;  %v10301_v23 = vld [vmem:[#allocation9 + $0x134] sm:$0xf] }
 0x5b1   :  { %10402 = vpow2.f32 %v9204_v11  ;;  %v5603_v44 = vadd.f32 %v11078_v19, %v11076_v2  ;;  %v9370_v13 = vld [vmem:[#allocation9 + $0x148] sm:$0xf0]  ;;  %v9369_v42 = vor.u32 %v10304_v50, %v9368_v1  ;;  %v10325_v1 = vld [vmem:[#allocation9 + $0x1f4] sm:$0xf] }
 0x5b2   :  { %6333 = vmatpush.bf16.msra.mxu0 %v9241_v34  ;;  %6359 = vmatpush.bf16.msra.mxu2 %v9245_v5  ;;  %v9393_v34 = vor.u32 %v10310_v49, %v9392_v48  ;;  %v9589_v5 = vor.u32 %v10355_v0, %v9586_v31  ;;  %v10331_v48 = vld [vmem:[#allocation9 + $0x224] sm:$0xf]  ;;  %v9490_v49 = vld [vmem:[#allocation9 + $0x238] sm:$0xf0]  ;;  %v9466_v50 = vld [vmem:[#allocation9 + $0x208] sm:$0xf0] }
 0x5b3   :  { %v5663_v59 = vadd.f32 %v5603_v44, %v10647_v25  ;;  %v10292_v44 = vld [vmem:[#allocation9 + $0xe4] sm:$0xf0]  ;;  %v9493_v31 = vor.u32 %v10331_v48, %v9490_v49 }
 0x5b4   :  { %6346 = vmatpush.bf16.msra.mxu1 %v9433_v62  ;;  %6372 = vmatpush.bf16.msra.mxu3 %v9437_v10  ;;  %v10352_v10 = vld [vmem:[#allocation9 + $0x2c4] sm:$0xf0] }
 0x5b5   :  { %v9561_v63 = vor.u32 %v10352_v10, %v9560_v4  ;;  %v9248_v4 = vld [vmem:[#allocation9 + $0x40] sm:$0xf]  ;;  %v10274_v10 = vld [vmem:[#allocation9 + $0x54] sm:$0xf0] }
 0x5b6   :  { %6334 = vmatpush.bf16.msra.mxu0 %v9217_v9  ;;  %6360 = vmatpush.bf16.msra.mxu2 %v9221_v21  ;;  %v9562_v9 = vld [vmem:[#allocation9 + $0x2c8] sm:$0xf0]  ;;  %v10343_v21 = vld [vmem:[#allocation9 + $0x284] sm:$0xf] }
 0x5b7   :  { %v10403_v39 = vpop.eup %10402  ;;  %v5615_v53 = vpop.f32.mrf.mxu2 }
 0x5b8   :  { %v5628_v47 = vpop.f32.mrf.mxu3  ;;  %v11080_v41 = vadd.f32 1.0, %v10403_v39  ;;  %v5591_v56 = vpop.f32.mrf.mxu0  ;;  %6347 = vmatpush.bf16.msra.mxu1 %v9409_v12  ;;  %6373 = vmatpush.bf16.msra.mxu3 %v9413_v22  ;;  %v9538_v22 = vld [vmem:[#allocation9 + $0x298] sm:$0xf0] }
 0x5b9   :  { %v5604_v8 = vpop.f32.mrf.mxu1  ;;  %v5629_v6 = vadd.f32 %v5628_v47, %v5615_v53  ;;  %v10307_v56 = vld [vmem:[#allocation9 + $0x164] sm:$0xf] }
 0x5ba   :  { %10404 = vrcp.f32 %v11080_v41  ;;  %v5659_v28 = vand.u32 2147483648, %v11080_v41  ;;  %v5657_v36 = vand.u32 2147483647, %v11080_v41  ;;  %vm5653_vm12 = vweird.f32 %v11080_v41  ;;  %v9394_v8 = vld [vmem:[#allocation9 + $0x178] sm:$0xf0] }
 0x5bb   :  { %v5664_v58 = vadd.f32 %v5629_v6, %v10649_v27  ;;  %v9397_v3 = vor.u32 %v10307_v56, %v9394_v8  ;;  %v10349_v6 = vld [vmem:[#allocation9 + $0x2b4] sm:$0xf]  ;;  %v9272_v56 = vld [vmem:[#allocation9 + $0x70] sm:$0xf]  ;;  %v10280_v8 = vld [vmem:[#allocation9 + $0x84] sm:$0xf0] }
 0x5bc   :  { %v5660_v35 = vor.u32 1.1754944e-38, %v5659_v28  ;;  %vm5658_vm14 = vcmp.eq.f32.partialorder %v5657_v36, 8.507059e+37  ;;  %v9565_v12 = vor.u32 %v10349_v6, %v9562_v9  ;;  %v9512_v36 = vld [vmem:[#allocation9 + $0x250] sm:$0xf]  ;;  %v9440_v6 = vld [vmem:[#allocation9 + $0x1c0] sm:$0xf] }
 0x5bd   :  { %v5667_v29 = vrot.slane %v5664_v58, 7  ;;  %v9537_v58 = vor.u32 %v10346_v51, %v9536_v18  ;;  %v10322_v9 = vld [vmem:[#allocation9 + $0x1d4] sm:$0xf0]  ;;  %v9224_v18 = vld [vmem:[#allocation9 + $0x10] sm:$0xf] }
 0x5be   :  { %v10268_v51 = vld [vmem:[#allocation9 + $0x24] sm:$0xf0] }
 0x5bf   :  { %v5617_v11 = vpop.f32.mrf.mxu2  ;;  %v5668_v19 = vsel %vm834_vm0, %v5663_v59, %v5667_v29  ;;  %v10340_v29 = vld [vmem:[#allocation9 + $0x264] sm:$0xf0]  ;;  %v9322_v59 = vld [vmem:[#allocation9 + $0xe8] sm:$0xf0] }
 0x5c0   :  { %v5630_v16 = vpop.f32.mrf.mxu3  ;;  %v10405_v43 = vpop.eup %10404  ;;  %v10298_v11 = vld [vmem:[#allocation9 + $0x114] sm:$0xf0] }
 0x5c1   :  { %v5649_v26 = vmul.f32 %v10405_v43, %v11080_v41  ;;  %vm5654_vm11 = vweird.f32 %v10405_v43  ;;  %v9584_v41 = vld [vmem:[#allocation9 + $0x2e0] sm:$0xf]  ;;  %v9373_v16 = vor.u32 %v10301_v23, %v9370_v13  ;;  %v9469_v13 = vor.u32 %v10325_v1, %v9466_v50 }
 0x5c2   :  { %vm5655_vm13 = vmor %vm5653_vm12, %vm5654_vm11  ;;  %v9585_v62 = vor.u32 %v10358_v7, %v9584_v41 }
 0x5c3   :  { %v5650_v32 = vsub.f32 1.0, %v5649_v26  ;;  %v9345_v26 = vor.u32 %v10298_v11, %v9344_v17  ;;  %v10319_v17 = vld [vmem:[#allocation9 + $0x1c4] sm:$0xf]  ;;  %v9442_v11 = vld [vmem:[#allocation9 + $0x1d8] sm:$0xf0] }
 0x5c5   :  { %v5651_v20 = vmul.f32 %v10405_v43, %v5650_v32  ;;  %v9320_v32 = vld [vmem:[#allocation9 + $0xd0] sm:$0xf] }
 0x5c7   :  { %v5652_v38 = vadd.f32 %v10405_v43, %v5651_v20  ;;  %v9541_v20 = vor.u32 %v10343_v21, %v9538_v22  ;;  %v9416_v21 = vld [vmem:[#allocation9 + $0x190] sm:$0xf]  ;;  %v10316_v22 = vld [vmem:[#allocation9 + $0x1a4] sm:$0xf0] }
 0x5c9   :  { %v5656_v33 = vsel %vm5655_vm13, %v10405_v43, %v5652_v38  ;;  %v9346_v43 = vld [vmem:[#allocation9 + $0x118] sm:$0xf0]  ;;  %v10289_v38 = vld [vmem:[#allocation9 + $0xd4] sm:$0xf] }
 0x5ca   :  { %v5661_v2 = vsel %vm5658_vm14, %v5660_v35, %v5656_v33  ;;  %v9349_v28 = vor.u32 %v10295_v24, %v9346_v43  ;;  %v10337_v35 = vld [vmem:[#allocation9 + $0x254] sm:$0xf]  ;;  %v9321_v33 = vor.u32 %v10292_v44, %v9320_v32  ;;  %v9445_v43 = vor.u32 %v10319_v17, %v9442_v11  ;;  %v9418_v44 = vld [vmem:[#allocation9 + $0x1a8] sm:$0xf0] }
 0x5cb   :  { %v5670_v37 = vmul.f32 %v5668_v19, %v5661_v2  ;;  %v5677_v14 = vrot.slane %v5661_v2, 2  ;;  %v9513_v2 = vor.u32 %v10340_v29, %v9512_v36  ;;  %v9296_v19 = vld [vmem:[#allocation9 + $0xa0] sm:$0xf]  ;;  %v10313_v32 = vld [vmem:[#allocation9 + $0x194] sm:$0xf] }
 0x5cc   :  { %v9421_v29 = vor.u32 %v10313_v32, %v9418_v44 }
 0x5cd   :  { %v5674_v46 = vadd.f32 %v5672_v30, %v5670_v37  ;;  %v5679_v39 = vsub.f32 1.0, %v5677_v14  ;;  %v5681_v55 = vmul.f32 %v5677_v14, %v11020_v15  ;;  %v9514_v30 = vld [vmem:[#allocation9 + $0x268] sm:$0xf0]  ;;  %v10286_v37 = vld [vmem:[#allocation9 + $0xb4] sm:$0xf0] }
 0x5ce   :  { %v9517_v14 = vor.u32 %v10337_v35, %v9514_v30  ;;  %v9297_v41 = vor.u32 %v10286_v37, %v9296_v19 }
 0x5cf   :  { %10406 = vtanh.f32 %v5674_v46  ;;  %v9325_v46 = vor.u32 %v10289_v38, %v9322_v59 }
 0x5d5   :  { %v10407_v53 = vpop.eup %10406 }
 0x5d6   :  { %v5680_v47 = vmul.f32 %v10407_v53, %v5679_v39  ;;  %v9488_v39 = vld [vmem:[#allocation9 + $0x220] sm:$0xf]  ;;  %v10334_v53 = vld [vmem:[#allocation9 + $0x234] sm:$0xf0] }
 0x5d7   :  { %v9489_v7 = vor.u32 %v10334_v53, %v9488_v39  ;;  %v5689_v53 = vstv %s5688_s26 }
 0x5d8   :  { %v11094_v52 = vadd.f32 %v5681_v55, %v5680_v47  ;;  %v10283_v47 = vld [vmem:[#allocation9 + $0xa4] sm:$0xf]  ;;  %v9298_v55 = vld [vmem:[#allocation9 + $0xb8] sm:$0xf0]  ;;  %vm5690_vm15 = vcmp.eq.s32.totalorder %v5689_v53, 1 }
 0x5d9   :  { %v9301_v0 = vor.u32 %v10283_v47, %v9298_v55 }
 0x5da   :  { %5684 = vst.msk [vmem:[#allocation10 + $0x6] ss:$8 sm:$0x3] %vm10658_vm8, %v11094_v52  ;;  %v5693_v40 = vperm.slane %v11094_v52, 0  ;;  %v5694_v45 = vperm.slane %v11094_v52, 1 }
 0x5dc   :  { %v11101_v61 = vpack.c.bf16 %v5693_v40, %v5693_v40  ;;  %v11103_v15 = vpack.c.bf16 %v5694_v45, %v5694_v45  ;;  %v9464_v40 = vld [vmem:[#allocation9 + $0x1f0] sm:$0xf]  ;;  %v10328_v45 = vld [vmem:[#allocation9 + $0x204] sm:$0xf0] }
 0x5de   :  { %6283 = vmatmul.bf16.vlgmr.msrb.gmra.mxu0 %v11101_v61  ;;  %6296 = vmatmul.bf16.vlgmr.msrb.gmra.mxu1 %v11103_v15 }
 0x5df   :  { %6309 = vmatmul.bf16.vlgmr.msrb.gmra.mxu2 %v11101_v61  ;;  %6322 = vmatmul.bf16.vlgmr.msrb.gmra.mxu3 %v11103_v15 }
 0x5e0   :  { %6379 = vmatpush.bf16.msrb.mxu0 %v9393_v34  ;;  %6392 = vmatpush.bf16.msrb.mxu1 %v9585_v62  ;;  %v10277_v34 = vld [vmem:[#allocation9 + $0x74] sm:$0xf]  ;;  %v9274_v62 = vld [vmem:[#allocation9 + $0x88] sm:$0xf0] }
 0x5e1   :  { %6405 = vmatpush.bf16.msrb.mxu2 %v9397_v3  ;;  %6418 = vmatpush.bf16.msrb.mxu3 %v9589_v5  ;;  %v9273_v3 = vor.u32 %v10280_v8, %v9272_v56  ;;  %v9465_v5 = vor.u32 %v10328_v45, %v9464_v40  ;;  %v9277_v23 = vor.u32 %v10277_v34, %v9274_v62 }
 0x5e4   :  { %6380 = vmatpush.bf16.msrb.mxu0 %v9369_v42  ;;  %6393 = vmatpush.bf16.msrb.mxu1 %v9561_v63  ;;  %v10271_v42 = vld [vmem:[#allocation9 + $0x44] sm:$0xf]  ;;  %v9250_v63 = vld [vmem:[#allocation9 + $0x58] sm:$0xf0] }
 0x5e5   :  { %6406 = vmatpush.bf16.msrb.mxu2 %v9373_v16  ;;  %6419 = vmatpush.bf16.msrb.mxu3 %v9565_v12  ;;  %v9249_v16 = vor.u32 %v10274_v10, %v9248_v4  ;;  %v9441_v12 = vor.u32 %v10322_v9, %v9440_v6  ;;  %v9253_v24 = vor.u32 %v10271_v42, %v9250_v63 }
 0x5e8   :  { %6381 = vmatpush.bf16.msrb.mxu0 %v9345_v26  ;;  %6394 = vmatpush.bf16.msrb.mxu1 %v9537_v58  ;;  %v10265_v26 = vld [vmem:[#allocation9 + $0x14] sm:$0xf]  ;;  %v9226_v58 = vld [vmem:[#allocation9 + $0x28] sm:$0xf0] }
 0x5e9   :  { %6407 = vmatpush.bf16.msrb.mxu2 %v9349_v28  ;;  %6420 = vmatpush.bf16.msrb.mxu3 %v9541_v20  ;;  %v9225_v28 = vor.u32 %v10268_v51, %v9224_v18  ;;  %v9417_v20 = vor.u32 %v10316_v22, %v9416_v21  ;;  %v9229_v36 = vor.u32 %v10265_v26, %v9226_v58 }
 0x5ec   :  { %6382 = vmatpush.bf16.msrb.mxu0 %v9321_v33  ;;  %6395 = vmatpush.bf16.msrb.mxu1 %v9513_v2 }
 0x5ed   :  { %6408 = vmatpush.bf16.msrb.mxu2 %v9325_v46  ;;  %6421 = vmatpush.bf16.msrb.mxu3 %v9517_v14 }
 0x5ee   :  { %6335 = vmatmul.bf16.vlgmr.msra.gmra.mxu0 %v11101_v61  ;;  %6348 = vmatmul.bf16.vlgmr.msra.gmra.mxu1 %v11103_v15 }
 0x5ef   :  { %6361 = vmatmul.bf16.vlgmr.msra.gmra.mxu2 %v11101_v61  ;;  %6374 = vmatmul.bf16.vlgmr.msra.gmra.mxu3 %v11103_v15 }
 0x5f0   :  { %6383 = vmatpush.bf16.msrb.mxu0 %v9297_v41  ;;  %6396 = vmatpush.bf16.msrb.mxu1 %v9489_v7 }
 0x5f1   :  { %6409 = vmatpush.bf16.msrb.mxu2 %v9301_v0  ;;  %6422 = vmatpush.bf16.msrb.mxu3 %v9493_v31  ;;  %v5691_v0 = vsel %vm5690_vm15, %v11064_v57, %v11062_v54 }
 0x5f2   :  { %v6471_v58 = vrot.slane %v5691_v0, 4 }
 0x5f4   :  { %6384 = vmatpush.bf16.msrb.mxu0 %v9273_v3  ;;  %6397 = vmatpush.bf16.msrb.mxu1 %v9465_v5 }
 0x5f5   :  { %6410 = vmatpush.bf16.msrb.mxu2 %v9277_v23  ;;  %6423 = vmatpush.bf16.msrb.mxu3 %v9469_v13 }
 0x5f8   :  { %6385 = vmatpush.bf16.msrb.mxu0 %v9249_v16  ;;  %6398 = vmatpush.bf16.msrb.mxu1 %v9441_v12 }
 0x5f9   :  { %6411 = vmatpush.bf16.msrb.mxu2 %v9253_v24  ;;  %6424 = vmatpush.bf16.msrb.mxu3 %v9445_v43 }
 0x5fc   :  { %6386 = vmatpush.bf16.msrb.mxu0 %v9225_v28  ;;  %6399 = vmatpush.bf16.msrb.mxu1 %v9417_v20 }
 0x5fd   :  { %6412 = vmatpush.bf16.msrb.mxu2 %v9229_v36  ;;  %6425 = vmatpush.bf16.msrb.mxu3 %v9421_v29 }
 0x5ff   :  { %6387 = vmatmul.bf16.vlgmr.msrb.gmra.mxu0 %v11101_v61  ;;  %6400 = vmatmul.bf16.vlgmr.msrb.gmra.mxu1 %v11103_v15 }
 0x600   :  { %6413 = vmatmul.bf16.vlgmr.msrb.gmra.mxu2 %v11101_v61  ;;  %6426 = vmatmul.bf16.vlgmr.msrb.gmra.mxu3 %v11103_v15 }
 0x65b   :  { %v6284_v38 = vpop.f32.mrf.mxu0  ;;  %v6297_v59 = vpop.f32.mrf.mxu1 }
 0x65c   :  { %v6298_v7 = vadd.f32 %v6297_v59, %v6284_v38 }
 0x662   :  { %v6310_v35 = vpop.f32.mrf.mxu2  ;;  %v6323_v30 = vpop.f32.mrf.mxu3 }
 0x663   :  { %v6286_v33 = vpop.f32.mrf.mxu0  ;;  %v6299_v2 = vpop.f32.mrf.mxu1  ;;  %v6324_v39 = vadd.f32 %v6323_v30, %v6310_v35 }
 0x665   :  { %v6435_v48 = vrot.slane %v6324_v39, 7 }
 0x667   :  { %v6438_v31 = vsel %vm834_vm0, %v6298_v7, %v6435_v48 }
 0x66a   :  { %v6312_v19 = vpop.f32.mrf.mxu2  ;;  %v6325_v37 = vpop.f32.mrf.mxu3 }
 0x66b   :  { %v6336_v46 = vpop.f32.mrf.mxu0  ;;  %v6349_v14 = vpop.f32.mrf.mxu1 }
 0x66c   :  { %v6350_v47 = vadd.f32 %v6349_v14, %v6336_v46 }
 0x66e   :  { %v6436_v56 = vrot.slane %v6350_v47, 6 }
 0x672   :  { %v6362_v55 = vpop.f32.mrf.mxu2  ;;  %v6375_v61 = vpop.f32.mrf.mxu3 }
 0x673   :  { %v6376_v15 = vadd.f32 %v6375_v61, %v6362_v55  ;;  %v6338_v49 = vpop.f32.mrf.mxu0  ;;  %v6351_v41 = vpop.f32.mrf.mxu1 }
 0x675   :  { %v6437_v8 = vrot.slane %v6376_v15, 5 }
 0x677   :  { %v6439_v40 = vsel %vm836_vm2, %v6436_v56, %v6437_v8 }
 0x678   :  { %v6440_v45 = vsel %vm838_vm3, %v6438_v31, %v6439_v40 }
 0x679   :  { %v6442_v34 = vadd.f32 %v6440_v45, %v5691_v0 }
 0x67a   :  { %v6364_v62 = vpop.f32.mrf.mxu2  ;;  %v6377_v1 = vpop.f32.mrf.mxu3 }
 0x67b   :  { %v9590_v50 = vmul.f32 -1.442695, %v6442_v34 }
 0x67c   :  { %v6388_v3 = vpop.f32.mrf.mxu0  ;;  %v6401_v5 = vpop.f32.mrf.mxu1 }
 0x67d   :  { %10408 = vpow2.f32 %v9590_v50  ;;  %v6402_v12 = vadd.f32 %v6401_v5, %v6388_v3 }
 0x67f   :  { %v6462_v22 = vadd.f32 %v6402_v12, %v10647_v25 }
 0x683   :  { %v10409_v4 = vpop.eup %10408  ;;  %v6414_v10 = vpop.f32.mrf.mxu2 }
 0x684   :  { %v6427_v23 = vpop.f32.mrf.mxu3  ;;  %v6446_v13 = vadd.f32 1.0, %v10409_v4  ;;  %v6390_v6 = vpop.f32.mrf.mxu0 }
 0x685   :  { %v6403_v9 = vpop.f32.mrf.mxu1  ;;  %v6428_v54 = vadd.f32 %v6427_v23, %v6414_v10 }
 0x686   :  { %10410 = vrcp.f32 %v6446_v13  ;;  %v6458_v18 = vand.u32 2147483648, %v6446_v13  ;;  %v6456_v24 = vand.u32 2147483647, %v6446_v13  ;;  %vm6452_vm3 = vweird.f32 %v6446_v13 }
 0x687   :  { %v6463_v11 = vadd.f32 %v6428_v54, %v10649_v27 }
 0x688   :  { %v6459_v26 = vor.u32 1.1754944e-38, %v6458_v18  ;;  %vm6457_vm4 = vcmp.eq.f32.partialorder %v6456_v24, 8.507059e+37 }
 0x689   :  { %v6466_v43 = vrot.slane %v6463_v11, 7 }
 0x68b   :  { %v6416_v57 = vpop.f32.mrf.mxu2  ;;  %v6467_v28 = vsel %vm834_vm0, %v6462_v22, %v6466_v43 }
 0x68c   :  { %v6429_v42 = vpop.f32.mrf.mxu3  ;;  %v10411_v63 = vpop.eup %10410 }
 0x68d   :  { %v6448_v17 = vmul.f32 %v10411_v63, %v6446_v13  ;;  %vm6453_vm2 = vweird.f32 %v10411_v63 }
 0x68e   :  { %vm6454_vm1 = vmor %vm6452_vm3, %vm6453_vm2 }
 0x68f   :  { %v6449_v16 = vsub.f32 1.0, %v6448_v17 }
 0x691   :  { %v6450_v51 = vmul.f32 %v10411_v63, %v6449_v16 }
 0x693   :  { %v6451_v21 = vadd.f32 %v10411_v63, %v6450_v51 }
 0x695   :  { %v6455_v32 = vsel %vm6454_vm1, %v10411_v63, %v6451_v21 }
 0x696   :  { %v6460_v44 = vsel %vm6457_vm4, %v6459_v26, %v6455_v32 }
 0x697   :  { %v6469_v27 = vmul.f32 %v6467_v28, %v6460_v44  ;;  %v6476_v36 = vrot.slane %v6460_v44, 2 }
 0x699   :  { %v6473_v20 = vadd.f32 %v6471_v58, %v6469_v27  ;;  %v6478_v29 = vsub.f32 1.0, %v6476_v36  ;;  %v6480_v59 = vmul.f32 %v6476_v36, %v11094_v52 }
 0x69b   :  { %10412 = vtanh.f32 %v6473_v20 }
 0x6a1   :  { %v10413_v38 = vpop.eup %10412 }
 0x6a2   :  { %v6479_v25 = vmul.f32 %v10413_v38, %v6478_v29 }
 0x6a4   :  { %v6481_v35 = vadd.f32 %v6480_v59, %v6479_v25 }
 0x6a6   :  { %6483 = vst.msk [vmem:[#allocation10 + $0x7] ss:$8 sm:$0x3] %vm10658_vm8, %v6481_v35 }
 0x6a7   :  { %6495 = dma.vmem_to_hbm [thread:$0]  %s6491_s28, 256, %s6493_s2, [#allocation4]  }
 0x6a8   :  { %10535 = dma.done.wait [#allocation4], 256  }
 0x6a9   :  { %10536 = vsyncadd [#allocation4], 4294967040 }
 0x6aa   :  { %6500 = vsyncpa [#allocation3], 1 }
 0x6ab   :  { %6501 = vsyncpa [#allocation8], 1 }
 0x6ac   :  { %6502 = vsyncpa [#allocation4], 1 }
 0x6ad   :  { %6503 = vsyncpa [#allocation5], 1 }

</bundles_post_ra>
